<compile_context>
chip_gen: v6e
topology: v6e:2x2x1
jax: 0.10.0
libtpu: 0.0.40
codegen_flags: <defaults>
</compile_context>

<pallas_src>
import jax
import jax.numpy as jnp
import numpy as np
from jax.experimental import pallas as pl
from jax.experimental.pallas import tpu as pltpu


# ----------------------------------------------------------------------------
# Fused kernel: one image per grid step.
# Layouts:
#   x_ref   (4, 8, 32)    padded 32x32 input, rows split by (row mod 4).
#   w1b_ref (5, 32, 448)  conv1 banded weights, col = (w%2)*224 + (w//2)*16 + c
#   b1_ref  (1, 448)      conv1 bias tiled over w           (col % 16 == c)
#   w2b_ref (5, 288, 448) conv2 banded weights, row = b*16+c,
#                         col = (j%2)*224 + (j//2)*32 + co
#   b2_ref  (1, 448)      conv2 bias tiled over j           (col % 32 == co)
#   wl_ref  (10, 7, 224)  linear weights in (n, y, x*32+c) layout
#   bl_ref  (1, 10)
#   o_ref   (1, 10)
#   xp2_ref VMEM (2, 9, 288) scratch: zero-padded conv2 input, split by row
#           parity; row a of the 18x18 padded map lives at [a%2, a//2, :],
#           lane = b*16 + c (b = padded column).
# ----------------------------------------------------------------------------
def _cnn_fused_kernel(x_ref, w1b_ref, b1_ref, w2b_ref, b2_ref, wl_ref, bl_ref,
                      o_ref, xp2_ref):
    f32 = jnp.float32
    x = x_ref[...]                                             # (4, 8, 32)

    # ---- conv1 (5x5, pad 2) as banded MXU matmuls, 4 output row phases ----
    # out1_ph[m] row t == conv1 output row h = 4t + m  (t = 0..6)
    phase_out = []
    for m in range(4):
        acc = jnp.zeros((7, 448), f32)
        for kh in range(5):
            g = m + kh                                         # padded input row = 4t + g
            band = x[g % 4, (g // 4):(g // 4) + 7, :]          # (7, 32)
            acc = acc + jnp.dot(band, w1b_ref[kh],
                                preferred_element_type=f32)
        phase_out.append(acc)

    bias1 = b1_ref[...]                                        # (1, 448)
    # vertical 2x1 pool (h pairs {2i, 2i+1}) + bias + ReLU
    even_i = jnp.maximum(jnp.maximum(phase_out[0], phase_out[1]) + bias1, 0.0)
    odd_i = jnp.maximum(jnp.maximum(phase_out[2], phase_out[3]) + bias1, 0.0)
    # horizontal 1x2 pool: even-w lanes [0:224), odd-w lanes [224:448)
    p1_even = jnp.maximum(even_i[:, :224], even_i[:, 224:])    # rows i = 0,2,..,12
    p1_odd = jnp.maximum(odd_i[:, :224], odd_i[:, 224:])       # rows i = 1,3,..,13

    # ---- build zero-padded, row-parity-split conv2 input in VMEM scratch ----
    xp2_ref[...] = jnp.zeros((2, 9, 288), f32)
    xp2_ref[0:1, 1:8, 32:256] = p1_even[None]                  # padded rows 2,4,..,14
    xp2_ref[1:2, 1:8, 32:256] = p1_odd[None]                   # padded rows 3,5,..,15
    xp2 = xp2_ref[...]                                         # (2, 9, 288)

    # ---- conv2 (5x5, pad 2) as banded MXU matmuls, 2 output row parities ----
    conv2_out = []
    for par in range(2):                                       # output row i2 = 2u + par
        acc = jnp.zeros((7, 448), f32)
        for kh in range(5):
            a = par + kh                                       # padded input row = 2u + a
            band = xp2[a % 2, (a // 2):(a // 2) + 7, :]        # (7, 288)
            acc = acc + jnp.dot(band, w2b_ref[kh],
                                preferred_element_type=f32)
        conv2_out.append(acc)

    v = jnp.maximum(jnp.maximum(conv2_out[0], conv2_out[1]) + b2_ref[...], 0.0)
    p2 = jnp.maximum(v[:, :224], v[:, 224:])                   # (7, 224): lane = x*32 + c

    # ---- linear: out[n] = sum_{y, lane} p2[y, lane] * WL[n, y, lane] + bl ----
    prod = p2[None, :, :] * wl_ref[...]                        # (10, 7, 224)
    logits = jnp.sum(jnp.sum(prod, axis=2), axis=1)            # (10,)
    o_ref[...] = logits[None, :] + bl_ref[...]


# ----------------------------------------------------------------------------
# One-time weight preparation (banded matrices, tiled biases, permuted linear).
# ----------------------------------------------------------------------------
def prepare_params(params):
    w1, b1, w2, b2, wl, bl = params

    # conv1: B1[kh, b, col(w,c)] = w1[kh, b-w, 0, c] if 0 <= b-w < 5 else 0
    sel1 = np.zeros((32, 28, 5), np.float32)
    for w in range(28):
        for k in range(5):
            sel1[w + k, w, k] = 1.0
    w1r = w1.reshape(5, 5, 16)
    b1w = jnp.einsum('bwk,hkc->hbwc', jnp.asarray(sel1), w1r)        # (5,32,28,16)
    b1w = b1w.reshape(5, 32, 14, 2, 16).transpose(0, 1, 3, 2, 4).reshape(5, 32, 448)
    bias1 = jnp.tile(b1, 28).reshape(1, 448)

    # conv2: BW2[kh, b*16+c, col(j,co)] = w2[kh, b-j, c, co] if 0 <= b-j < 5 else 0
    sel2 = np.zeros((18, 14, 5), np.float32)
    for j in range(14):
        for k in range(5):
            sel2[j + k, j, k] = 1.0
    b2w = jnp.einsum('bjk,hkcd->hbcjd', jnp.asarray(sel2), w2)       # (5,18,16,14,32)
    b2w = b2w.reshape(5, 18, 16, 7, 2, 32).transpose(0, 1, 2, 4, 3, 5).reshape(5, 288, 448)
    bias2 = jnp.tile(b2, 14).reshape(1, 448)

    # linear: PyTorch flatten order is c*49 + y*7 + x -> (n, y, x*32 + c)
    wlt = wl.reshape(32, 7, 7, 10).transpose(3, 1, 2, 0).reshape(10, 7, 224)
    blr = bl.reshape(1, 10)
    return (b1w, bias1, b2w, bias2, wlt, blr)


# ----------------------------------------------------------------------------
# Forward pass: pad + row-phase-split the input, then one fused pallas_call.
# ----------------------------------------------------------------------------
def cnn_forward(x_nchw, prepared):
    w1b, b1r, w2b, b2r, wlt, blr = prepared
    B = x_nchw.shape[0]
    x = x_nchw.reshape(B, 28, 28)                       # drop C=1
    xpad = jnp.pad(x, ((0, 0), (2, 2), (2, 2)))         # (B, 32, 32)
    xph = jnp.stack([xpad[:, q::4, :] for q in range(4)], axis=1)   # (B, 4, 8, 32)

    out = pl.pallas_call(
        _cnn_fused_kernel,
        out_shape=jax.ShapeDtypeStruct((B, 1, 10), jnp.float32),
        grid=(B,),
        in_specs=[
            pl.BlockSpec((None, 4, 8, 32), lambda b: (b, 0, 0, 0)),
            pl.BlockSpec((5, 32, 448), lambda b: (0, 0, 0)),
            pl.BlockSpec((1, 448), lambda b: (0, 0)),
            pl.BlockSpec((5, 288, 448), lambda b: (0, 0, 0)),
            pl.BlockSpec((1, 448), lambda b: (0, 0)),
            pl.BlockSpec((10, 7, 224), lambda b: (0, 0, 0)),
            pl.BlockSpec((1, 10), lambda b: (0, 0)),
        ],
        out_specs=pl.BlockSpec((None, 1, 10), lambda b: (b, 0, 0)),
        scratch_shapes=[pltpu.VMEM((2, 9, 288), jnp.float32)],
        compiler_params=pltpu.CompilerParams(dimension_semantics=("parallel",)),
    )(xph, w1b, b1r, w2b, b2r, wlt, blr)
    return out.reshape(B, 10)


# ----------------------------------------------------------------------------
# Parameters (HWIO conv weights, (in, out) linear) and a plain-JAX reference.
# ----------------------------------------------------------------------------
def init_params(key):
    k1, k2, k3, k4, k5, k6 = jax.random.split(key, 6)
    w1 = jax.random.normal(k1, (5, 5, 1, 16), jnp.float32) * 0.1
    b1 = jax.random.normal(k2, (16,), jnp.float32) * 0.1
    w2 = jax.random.normal(k3, (5, 5, 16, 32), jnp.float32) * 0.05
    b2 = jax.random.normal(k4, (32,), jnp.float32) * 0.05
    wl = jax.random.normal(k5, (32 * 7 * 7, 10), jnp.float32) * 0.02
    bl = jax.random.normal(k6, (10,), jnp.float32) * 0.02
    return (w1, b1, w2, b2, wl, bl)


def reference_forward(x_nchw, params):
    w1, b1, w2, b2, wl, bl = params

    def block(x, w, b):
        y = jax.lax.conv_general_dilated(
            x, w, window_strides=(1, 1), padding=((2, 2), (2, 2)),
            dimension_numbers=("NHWC", "HWIO", "NHWC"))
        y = jnp.maximum(y + b.reshape(1, 1, 1, -1), 0.0)
        B, H, W, C = y.shape
        return y.reshape(B, H // 2, 2, W // 2, 2, C).max(axis=(2, 4))

    x = jnp.transpose(x_nchw, (0, 2, 3, 1))
    x = block(x, w1, b1)
    x = block(x, w2, b2)
    feat = jnp.transpose(x, (0, 3, 1, 2)).reshape(x.shape[0], -1)   # NCHW flatten
    return feat @ wl + bl.reshape(1, -1)


if __name__ == "__main__":
    key = jax.random.PRNGKey(0)
    kx, kp = jax.random.split(key)
    # Module requires 1x28x28 input (Linear expects 32*7*7); batch = 2.
    x = jax.random.normal(kx, (2, 1, 28, 28), jnp.float32)
    params = init_params(kp)
    prepared = prepare_params(params)        # one-time weight re-layout

    out = jax.jit(cnn_forward)(x, prepared)
    out = jax.block_until_ready(out)

    ref = reference_forward(x, params)
    np.testing.assert_allclose(np.asarray(out), np.asarray(ref),
                               rtol=1e-3, atol=1e-3)
    assert out.shape == (2, 10) and out.dtype == jnp.float32
    print("KERNEL_OK")
</pallas_src>

<mosaic_0001>
module attributes {stable_mosaic.version = 11 : i64} {
  func.func @_cnn_fused_kernel(%arg0: i32, %arg1: memref<1x4x8x32xf32, #tpu.memory_space<vmem>>, %arg2: memref<5x32x448xf32, #tpu.memory_space<vmem>>, %arg3: memref<1x448xf32, #tpu.memory_space<vmem>>, %arg4: memref<5x288x448xf32, #tpu.memory_space<vmem>>, %arg5: memref<1x448xf32, #tpu.memory_space<vmem>>, %arg6: memref<10x7x224xf32, #tpu.memory_space<vmem>>, %arg7: memref<1x10xf32, #tpu.memory_space<vmem>>, %arg8: memref<1x1x10xf32, #tpu.memory_space<vmem>>, %arg9: memref<2x9x288xf32, #tpu.memory_space<vmem>>) attributes {dimension_semantics = [#tpu.dimension_semantics<parallel>], iteration_bounds = array<i64: 2>, scalar_prefetch = 0 : i64, scratch_operands = 1 : i64, tpu.core_type = #tpu.core_type<tc>, window_params = [{transform_indices = @transform_0, window_bounds = array<i64: 1, 4, 8, 32>}, {pipeline_mode = #tpu.pipeline_mode<synchronous>, transform_indices = @transform_1, window_bounds = array<i64: 5, 32, 448>}, {pipeline_mode = #tpu.pipeline_mode<synchronous>, transform_indices = @transform_2, window_bounds = array<i64: 1, 448>}, {pipeline_mode = #tpu.pipeline_mode<synchronous>, transform_indices = @transform_3, window_bounds = array<i64: 5, 288, 448>}, {pipeline_mode = #tpu.pipeline_mode<synchronous>, transform_indices = @transform_4, window_bounds = array<i64: 1, 448>}, {pipeline_mode = #tpu.pipeline_mode<synchronous>, transform_indices = @transform_5, window_bounds = array<i64: 10, 7, 224>}, {pipeline_mode = #tpu.pipeline_mode<synchronous>, transform_indices = @transform_6, window_bounds = array<i64: 1, 10>}, {transform_indices = @transform_7, window_bounds = array<i64: 1, 1, 10>}]} {
    %c0 = arith.constant 0 : index
    %c0_0 = arith.constant 0 : index
    %c0_1 = arith.constant 0 : index
    %c0_2 = arith.constant 0 : index
    %0 = vector.load %arg1[%c0, %c0_0, %c0_1, %c0_2] : memref<1x4x8x32xf32, #tpu.memory_space<vmem>>, vector<1x4x8x32xf32>
    %1 = vector.shape_cast %0 : vector<1x4x8x32xf32> to vector<4x8x32xf32>
    %cst = arith.constant 0.000000e+00 : f32
    %2 = vector.broadcast %cst : f32 to vector<7x448xf32>
    %3 = vector.extract_strided_slice %1 {offsets = [0, 0, 0], sizes = [1, 7, 32], strides = [1, 1, 1]} : vector<4x8x32xf32> to vector<1x7x32xf32>
    %4 = vector.shape_cast %3 : vector<1x7x32xf32> to vector<7x32xf32>
    %c0_3 = arith.constant 0 : index
    %c0_4 = arith.constant 0 : index
    %c0_5 = arith.constant 0 : index
    %5 = vector.load %arg2[%c0_3, %c0_4, %c0_5] : memref<5x32x448xf32, #tpu.memory_space<vmem>>, vector<1x32x448xf32>
    %6 = vector.shape_cast %5 : vector<1x32x448xf32> to vector<32x448xf32>
    %cst_6 = arith.constant dense<0.000000e+00> : vector<7x448xf32>
    %7 = tpu.matmul %4, %6, %cst_6 {dimension_numbers = #tpu.dot_dimension_numbers<[1], [0], [0], [1], [0, 0, 1, 1], [], []>} : vector<7x32xf32>, vector<32x448xf32>, vector<7x448xf32> -> vector<7x448xf32>
    %8 = arith.addf %2, %7 : vector<7x448xf32>
    %9 = vector.extract_strided_slice %1 {offsets = [1, 0, 0], sizes = [1, 7, 32], strides = [1, 1, 1]} : vector<4x8x32xf32> to vector<1x7x32xf32>
    %10 = vector.shape_cast %9 : vector<1x7x32xf32> to vector<7x32xf32>
    %c1 = arith.constant 1 : index
    %c0_7 = arith.constant 0 : index
    %c0_8 = arith.constant 0 : index
    %11 = vector.load %arg2[%c1, %c0_7, %c0_8] : memref<5x32x448xf32, #tpu.memory_space<vmem>>, vector<1x32x448xf32>
    %12 = vector.shape_cast %11 : vector<1x32x448xf32> to vector<32x448xf32>
    %cst_9 = arith.constant dense<0.000000e+00> : vector<7x448xf32>
    %13 = tpu.matmul %10, %12, %cst_9 {dimension_numbers = #tpu.dot_dimension_numbers<[1], [0], [0], [1], [0, 0, 1, 1], [], []>} : vector<7x32xf32>, vector<32x448xf32>, vector<7x448xf32> -> vector<7x448xf32>
    %14 = arith.addf %8, %13 : vector<7x448xf32>
    %15 = vector.extract_strided_slice %1 {offsets = [2, 0, 0], sizes = [1, 7, 32], strides = [1, 1, 1]} : vector<4x8x32xf32> to vector<1x7x32xf32>
    %16 = vector.shape_cast %15 : vector<1x7x32xf32> to vector<7x32xf32>
    %c2 = arith.constant 2 : index
    %c0_10 = arith.constant 0 : index
    %c0_11 = arith.constant 0 : index
    %17 = vector.load %arg2[%c2, %c0_10, %c0_11] : memref<5x32x448xf32, #tpu.memory_space<vmem>>, vector<1x32x448xf32>
    %18 = vector.shape_cast %17 : vector<1x32x448xf32> to vector<32x448xf32>
    %cst_12 = arith.constant dense<0.000000e+00> : vector<7x448xf32>
    %19 = tpu.matmul %16, %18, %cst_12 {dimension_numbers = #tpu.dot_dimension_numbers<[1], [0], [0], [1], [0, 0, 1, 1], [], []>} : vector<7x32xf32>, vector<32x448xf32>, vector<7x448xf32> -> vector<7x448xf32>
    %20 = arith.addf %14, %19 : vector<7x448xf32>
    %21 = vector.extract_strided_slice %1 {offsets = [3, 0, 0], sizes = [1, 7, 32], strides = [1, 1, 1]} : vector<4x8x32xf32> to vector<1x7x32xf32>
    %22 = vector.shape_cast %21 : vector<1x7x32xf32> to vector<7x32xf32>
    %c3 = arith.constant 3 : index
    %c0_13 = arith.constant 0 : index
    %c0_14 = arith.constant 0 : index
    %23 = vector.load %arg2[%c3, %c0_13, %c0_14] : memref<5x32x448xf32, #tpu.memory_space<vmem>>, vector<1x32x448xf32>
    %24 = vector.shape_cast %23 : vector<1x32x448xf32> to vector<32x448xf32>
    %cst_15 = arith.constant dense<0.000000e+00> : vector<7x448xf32>
    %25 = tpu.matmul %22, %24, %cst_15 {dimension_numbers = #tpu.dot_dimension_numbers<[1], [0], [0], [1], [0, 0, 1, 1], [], []>} : vector<7x32xf32>, vector<32x448xf32>, vector<7x448xf32> -> vector<7x448xf32>
    %26 = arith.addf %20, %25 : vector<7x448xf32>
    %27 = vector.extract_strided_slice %1 {offsets = [0, 1, 0], sizes = [1, 7, 32], strides = [1, 1, 1]} : vector<4x8x32xf32> to vector<1x7x32xf32>
    %28 = vector.shape_cast %27 : vector<1x7x32xf32> to vector<7x32xf32>
    %c4 = arith.constant 4 : index
    %c0_16 = arith.constant 0 : index
    %c0_17 = arith.constant 0 : index
    %29 = vector.load %arg2[%c4, %c0_16, %c0_17] : memref<5x32x448xf32, #tpu.memory_space<vmem>>, vector<1x32x448xf32>
    %30 = vector.shape_cast %29 : vector<1x32x448xf32> to vector<32x448xf32>
    %cst_18 = arith.constant dense<0.000000e+00> : vector<7x448xf32>
    %31 = tpu.matmul %28, %30, %cst_18 {dimension_numbers = #tpu.dot_dimension_numbers<[1], [0], [0], [1], [0, 0, 1, 1], [], []>} : vector<7x32xf32>, vector<32x448xf32>, vector<7x448xf32> -> vector<7x448xf32>
    %32 = arith.addf %26, %31 : vector<7x448xf32>
    %cst_19 = arith.constant 0.000000e+00 : f32
    %33 = vector.broadcast %cst_19 : f32 to vector<7x448xf32>
    %34 = vector.extract_strided_slice %1 {offsets = [1, 0, 0], sizes = [1, 7, 32], strides = [1, 1, 1]} : vector<4x8x32xf32> to vector<1x7x32xf32>
    %35 = vector.shape_cast %34 : vector<1x7x32xf32> to vector<7x32xf32>
    %c0_20 = arith.constant 0 : index
    %c0_21 = arith.constant 0 : index
    %c0_22 = arith.constant 0 : index
    %36 = vector.load %arg2[%c0_20, %c0_21, %c0_22] : memref<5x32x448xf32, #tpu.memory_space<vmem>>, vector<1x32x448xf32>
    %37 = vector.shape_cast %36 : vector<1x32x448xf32> to vector<32x448xf32>
    %cst_23 = arith.constant dense<0.000000e+00> : vector<7x448xf32>
    %38 = tpu.matmul %35, %37, %cst_23 {dimension_numbers = #tpu.dot_dimension_numbers<[1], [0], [0], [1], [0, 0, 1, 1], [], []>} : vector<7x32xf32>, vector<32x448xf32>, vector<7x448xf32> -> vector<7x448xf32>
    %39 = arith.addf %33, %38 : vector<7x448xf32>
    %40 = vector.extract_strided_slice %1 {offsets = [2, 0, 0], sizes = [1, 7, 32], strides = [1, 1, 1]} : vector<4x8x32xf32> to vector<1x7x32xf32>
    %41 = vector.shape_cast %40 : vector<1x7x32xf32> to vector<7x32xf32>
    %c1_24 = arith.constant 1 : index
    %c0_25 = arith.constant 0 : index
    %c0_26 = arith.constant 0 : index
    %42 = vector.load %arg2[%c1_24, %c0_25, %c0_26] : memref<5x32x448xf32, #tpu.memory_space<vmem>>, vector<1x32x448xf32>
    %43 = vector.shape_cast %42 : vector<1x32x448xf32> to vector<32x448xf32>
    %cst_27 = arith.constant dense<0.000000e+00> : vector<7x448xf32>
    %44 = tpu.matmul %41, %43, %cst_27 {dimension_numbers = #tpu.dot_dimension_numbers<[1], [0], [0], [1], [0, 0, 1, 1], [], []>} : vector<7x32xf32>, vector<32x448xf32>, vector<7x448xf32> -> vector<7x448xf32>
    %45 = arith.addf %39, %44 : vector<7x448xf32>
    %46 = vector.extract_strided_slice %1 {offsets = [3, 0, 0], sizes = [1, 7, 32], strides = [1, 1, 1]} : vector<4x8x32xf32> to vector<1x7x32xf32>
    %47 = vector.shape_cast %46 : vector<1x7x32xf32> to vector<7x32xf32>
    %c2_28 = arith.constant 2 : index
    %c0_29 = arith.constant 0 : index
    %c0_30 = arith.constant 0 : index
    %48 = vector.load %arg2[%c2_28, %c0_29, %c0_30] : memref<5x32x448xf32, #tpu.memory_space<vmem>>, vector<1x32x448xf32>
    %49 = vector.shape_cast %48 : vector<1x32x448xf32> to vector<32x448xf32>
    %cst_31 = arith.constant dense<0.000000e+00> : vector<7x448xf32>
    %50 = tpu.matmul %47, %49, %cst_31 {dimension_numbers = #tpu.dot_dimension_numbers<[1], [0], [0], [1], [0, 0, 1, 1], [], []>} : vector<7x32xf32>, vector<32x448xf32>, vector<7x448xf32> -> vector<7x448xf32>
    %51 = arith.addf %45, %50 : vector<7x448xf32>
    %52 = vector.extract_strided_slice %1 {offsets = [0, 1, 0], sizes = [1, 7, 32], strides = [1, 1, 1]} : vector<4x8x32xf32> to vector<1x7x32xf32>
    %53 = vector.shape_cast %52 : vector<1x7x32xf32> to vector<7x32xf32>
    %c3_32 = arith.constant 3 : index
    %c0_33 = arith.constant 0 : index
    %c0_34 = arith.constant 0 : index
    %54 = vector.load %arg2[%c3_32, %c0_33, %c0_34] : memref<5x32x448xf32, #tpu.memory_space<vmem>>, vector<1x32x448xf32>
    %55 = vector.shape_cast %54 : vector<1x32x448xf32> to vector<32x448xf32>
    %cst_35 = arith.constant dense<0.000000e+00> : vector<7x448xf32>
    %56 = tpu.matmul %53, %55, %cst_35 {dimension_numbers = #tpu.dot_dimension_numbers<[1], [0], [0], [1], [0, 0, 1, 1], [], []>} : vector<7x32xf32>, vector<32x448xf32>, vector<7x448xf32> -> vector<7x448xf32>
    %57 = arith.addf %51, %56 : vector<7x448xf32>
    %58 = vector.extract_strided_slice %1 {offsets = [1, 1, 0], sizes = [1, 7, 32], strides = [1, 1, 1]} : vector<4x8x32xf32> to vector<1x7x32xf32>
    %59 = vector.shape_cast %58 : vector<1x7x32xf32> to vector<7x32xf32>
    %c4_36 = arith.constant 4 : index
    %c0_37 = arith.constant 0 : index
    %c0_38 = arith.constant 0 : index
    %60 = vector.load %arg2[%c4_36, %c0_37, %c0_38] : memref<5x32x448xf32, #tpu.memory_space<vmem>>, vector<1x32x448xf32>
    %61 = vector.shape_cast %60 : vector<1x32x448xf32> to vector<32x448xf32>
    %cst_39 = arith.constant dense<0.000000e+00> : vector<7x448xf32>
    %62 = tpu.matmul %59, %61, %cst_39 {dimension_numbers = #tpu.dot_dimension_numbers<[1], [0], [0], [1], [0, 0, 1, 1], [], []>} : vector<7x32xf32>, vector<32x448xf32>, vector<7x448xf32> -> vector<7x448xf32>
    %63 = arith.addf %57, %62 : vector<7x448xf32>
    %cst_40 = arith.constant 0.000000e+00 : f32
    %64 = vector.broadcast %cst_40 : f32 to vector<7x448xf32>
    %65 = vector.extract_strided_slice %1 {offsets = [2, 0, 0], sizes = [1, 7, 32], strides = [1, 1, 1]} : vector<4x8x32xf32> to vector<1x7x32xf32>
    %66 = vector.shape_cast %65 : vector<1x7x32xf32> to vector<7x32xf32>
    %c0_41 = arith.constant 0 : index
    %c0_42 = arith.constant 0 : index
    %c0_43 = arith.constant 0 : index
    %67 = vector.load %arg2[%c0_41, %c0_42, %c0_43] : memref<5x32x448xf32, #tpu.memory_space<vmem>>, vector<1x32x448xf32>
    %68 = vector.shape_cast %67 : vector<1x32x448xf32> to vector<32x448xf32>
    %cst_44 = arith.constant dense<0.000000e+00> : vector<7x448xf32>
    %69 = tpu.matmul %66, %68, %cst_44 {dimension_numbers = #tpu.dot_dimension_numbers<[1], [0], [0], [1], [0, 0, 1, 1], [], []>} : vector<7x32xf32>, vector<32x448xf32>, vector<7x448xf32> -> vector<7x448xf32>
    %70 = arith.addf %64, %69 : vector<7x448xf32>
    %71 = vector.extract_strided_slice %1 {offsets = [3, 0, 0], sizes = [1, 7, 32], strides = [1, 1, 1]} : vector<4x8x32xf32> to vector<1x7x32xf32>
    %72 = vector.shape_cast %71 : vector<1x7x32xf32> to vector<7x32xf32>
    %c1_45 = arith.constant 1 : index
    %c0_46 = arith.constant 0 : index
    %c0_47 = arith.constant 0 : index
    %73 = vector.load %arg2[%c1_45, %c0_46, %c0_47] : memref<5x32x448xf32, #tpu.memory_space<vmem>>, vector<1x32x448xf32>
    %74 = vector.shape_cast %73 : vector<1x32x448xf32> to vector<32x448xf32>
    %cst_48 = arith.constant dense<0.000000e+00> : vector<7x448xf32>
    %75 = tpu.matmul %72, %74, %cst_48 {dimension_numbers = #tpu.dot_dimension_numbers<[1], [0], [0], [1], [0, 0, 1, 1], [], []>} : vector<7x32xf32>, vector<32x448xf32>, vector<7x448xf32> -> vector<7x448xf32>
    %76 = arith.addf %70, %75 : vector<7x448xf32>
    %77 = vector.extract_strided_slice %1 {offsets = [0, 1, 0], sizes = [1, 7, 32], strides = [1, 1, 1]} : vector<4x8x32xf32> to vector<1x7x32xf32>
    %78 = vector.shape_cast %77 : vector<1x7x32xf32> to vector<7x32xf32>
    %c2_49 = arith.constant 2 : index
    %c0_50 = arith.constant 0 : index
    %c0_51 = arith.constant 0 : index
    %79 = vector.load %arg2[%c2_49, %c0_50, %c0_51] : memref<5x32x448xf32, #tpu.memory_space<vmem>>, vector<1x32x448xf32>
    %80 = vector.shape_cast %79 : vector<1x32x448xf32> to vector<32x448xf32>
    %cst_52 = arith.constant dense<0.000000e+00> : vector<7x448xf32>
    %81 = tpu.matmul %78, %80, %cst_52 {dimension_numbers = #tpu.dot_dimension_numbers<[1], [0], [0], [1], [0, 0, 1, 1], [], []>} : vector<7x32xf32>, vector<32x448xf32>, vector<7x448xf32> -> vector<7x448xf32>
    %82 = arith.addf %76, %81 : vector<7x448xf32>
    %83 = vector.extract_strided_slice %1 {offsets = [1, 1, 0], sizes = [1, 7, 32], strides = [1, 1, 1]} : vector<4x8x32xf32> to vector<1x7x32xf32>
    %84 = vector.shape_cast %83 : vector<1x7x32xf32> to vector<7x32xf32>
    %c3_53 = arith.constant 3 : index
    %c0_54 = arith.constant 0 : index
    %c0_55 = arith.constant 0 : index
    %85 = vector.load %arg2[%c3_53, %c0_54, %c0_55] : memref<5x32x448xf32, #tpu.memory_space<vmem>>, vector<1x32x448xf32>
    %86 = vector.shape_cast %85 : vector<1x32x448xf32> to vector<32x448xf32>
    %cst_56 = arith.constant dense<0.000000e+00> : vector<7x448xf32>
    %87 = tpu.matmul %84, %86, %cst_56 {dimension_numbers = #tpu.dot_dimension_numbers<[1], [0], [0], [1], [0, 0, 1, 1], [], []>} : vector<7x32xf32>, vector<32x448xf32>, vector<7x448xf32> -> vector<7x448xf32>
    %88 = arith.addf %82, %87 : vector<7x448xf32>
    %89 = vector.extract_strided_slice %1 {offsets = [2, 1, 0], sizes = [1, 7, 32], strides = [1, 1, 1]} : vector<4x8x32xf32> to vector<1x7x32xf32>
    %90 = vector.shape_cast %89 : vector<1x7x32xf32> to vector<7x32xf32>
    %c4_57 = arith.constant 4 : index
    %c0_58 = arith.constant 0 : index
    %c0_59 = arith.constant 0 : index
    %91 = vector.load %arg2[%c4_57, %c0_58, %c0_59] : memref<5x32x448xf32, #tpu.memory_space<vmem>>, vector<1x32x448xf32>
    %92 = vector.shape_cast %91 : vector<1x32x448xf32> to vector<32x448xf32>
    %cst_60 = arith.constant dense<0.000000e+00> : vector<7x448xf32>
    %93 = tpu.matmul %90, %92, %cst_60 {dimension_numbers = #tpu.dot_dimension_numbers<[1], [0], [0], [1], [0, 0, 1, 1], [], []>} : vector<7x32xf32>, vector<32x448xf32>, vector<7x448xf32> -> vector<7x448xf32>
    %94 = arith.addf %88, %93 : vector<7x448xf32>
    %cst_61 = arith.constant 0.000000e+00 : f32
    %95 = vector.broadcast %cst_61 : f32 to vector<7x448xf32>
    %96 = vector.extract_strided_slice %1 {offsets = [3, 0, 0], sizes = [1, 7, 32], strides = [1, 1, 1]} : vector<4x8x32xf32> to vector<1x7x32xf32>
    %97 = vector.shape_cast %96 : vector<1x7x32xf32> to vector<7x32xf32>
    %c0_62 = arith.constant 0 : index
    %c0_63 = arith.constant 0 : index
    %c0_64 = arith.constant 0 : index
    %98 = vector.load %arg2[%c0_62, %c0_63, %c0_64] : memref<5x32x448xf32, #tpu.memory_space<vmem>>, vector<1x32x448xf32>
    %99 = vector.shape_cast %98 : vector<1x32x448xf32> to vector<32x448xf32>
    %cst_65 = arith.constant dense<0.000000e+00> : vector<7x448xf32>
    %100 = tpu.matmul %97, %99, %cst_65 {dimension_numbers = #tpu.dot_dimension_numbers<[1], [0], [0], [1], [0, 0, 1, 1], [], []>} : vector<7x32xf32>, vector<32x448xf32>, vector<7x448xf32> -> vector<7x448xf32>
    %101 = arith.addf %95, %100 : vector<7x448xf32>
    %102 = vector.extract_strided_slice %1 {offsets = [0, 1, 0], sizes = [1, 7, 32], strides = [1, 1, 1]} : vector<4x8x32xf32> to vector<1x7x32xf32>
    %103 = vector.shape_cast %102 : vector<1x7x32xf32> to vector<7x32xf32>
    %c1_66 = arith.constant 1 : index
    %c0_67 = arith.constant 0 : index
    %c0_68 = arith.constant 0 : index
    %104 = vector.load %arg2[%c1_66, %c0_67, %c0_68] : memref<5x32x448xf32, #tpu.memory_space<vmem>>, vector<1x32x448xf32>
    %105 = vector.shape_cast %104 : vector<1x32x448xf32> to vector<32x448xf32>
    %cst_69 = arith.constant dense<0.000000e+00> : vector<7x448xf32>
    %106 = tpu.matmul %103, %105, %cst_69 {dimension_numbers = #tpu.dot_dimension_numbers<[1], [0], [0], [1], [0, 0, 1, 1], [], []>} : vector<7x32xf32>, vector<32x448xf32>, vector<7x448xf32> -> vector<7x448xf32>
    %107 = arith.addf %101, %106 : vector<7x448xf32>
    %108 = vector.extract_strided_slice %1 {offsets = [1, 1, 0], sizes = [1, 7, 32], strides = [1, 1, 1]} : vector<4x8x32xf32> to vector<1x7x32xf32>
    %109 = vector.shape_cast %108 : vector<1x7x32xf32> to vector<7x32xf32>
    %c2_70 = arith.constant 2 : index
    %c0_71 = arith.constant 0 : index
    %c0_72 = arith.constant 0 : index
    %110 = vector.load %arg2[%c2_70, %c0_71, %c0_72] : memref<5x32x448xf32, #tpu.memory_space<vmem>>, vector<1x32x448xf32>
    %111 = vector.shape_cast %110 : vector<1x32x448xf32> to vector<32x448xf32>
    %cst_73 = arith.constant dense<0.000000e+00> : vector<7x448xf32>
    %112 = tpu.matmul %109, %111, %cst_73 {dimension_numbers = #tpu.dot_dimension_numbers<[1], [0], [0], [1], [0, 0, 1, 1], [], []>} : vector<7x32xf32>, vector<32x448xf32>, vector<7x448xf32> -> vector<7x448xf32>
    %113 = arith.addf %107, %112 : vector<7x448xf32>
    %114 = vector.extract_strided_slice %1 {offsets = [2, 1, 0], sizes = [1, 7, 32], strides = [1, 1, 1]} : vector<4x8x32xf32> to vector<1x7x32xf32>
    %115 = vector.shape_cast %114 : vector<1x7x32xf32> to vector<7x32xf32>
    %c3_74 = arith.constant 3 : index
    %c0_75 = arith.constant 0 : index
    %c0_76 = arith.constant 0 : index
    %116 = vector.load %arg2[%c3_74, %c0_75, %c0_76] : memref<5x32x448xf32, #tpu.memory_space<vmem>>, vector<1x32x448xf32>
    %117 = vector.shape_cast %116 : vector<1x32x448xf32> to vector<32x448xf32>
    %cst_77 = arith.constant dense<0.000000e+00> : vector<7x448xf32>
    %118 = tpu.matmul %115, %117, %cst_77 {dimension_numbers = #tpu.dot_dimension_numbers<[1], [0], [0], [1], [0, 0, 1, 1], [], []>} : vector<7x32xf32>, vector<32x448xf32>, vector<7x448xf32> -> vector<7x448xf32>
    %119 = arith.addf %113, %118 : vector<7x448xf32>
    %120 = vector.extract_strided_slice %1 {offsets = [3, 1, 0], sizes = [1, 7, 32], strides = [1, 1, 1]} : vector<4x8x32xf32> to vector<1x7x32xf32>
    %121 = vector.shape_cast %120 : vector<1x7x32xf32> to vector<7x32xf32>
    %c4_78 = arith.constant 4 : index
    %c0_79 = arith.constant 0 : index
    %c0_80 = arith.constant 0 : index
    %122 = vector.load %arg2[%c4_78, %c0_79, %c0_80] : memref<5x32x448xf32, #tpu.memory_space<vmem>>, vector<1x32x448xf32>
    %123 = vector.shape_cast %122 : vector<1x32x448xf32> to vector<32x448xf32>
    %cst_81 = arith.constant dense<0.000000e+00> : vector<7x448xf32>
    %124 = tpu.matmul %121, %123, %cst_81 {dimension_numbers = #tpu.dot_dimension_numbers<[1], [0], [0], [1], [0, 0, 1, 1], [], []>} : vector<7x32xf32>, vector<32x448xf32>, vector<7x448xf32> -> vector<7x448xf32>
    %125 = arith.addf %119, %124 : vector<7x448xf32>
    %c0_82 = arith.constant 0 : index
    %c0_83 = arith.constant 0 : index
    %126 = vector.load %arg3[%c0_82, %c0_83] : memref<1x448xf32, #tpu.memory_space<vmem>>, vector<1x448xf32>
    %127 = arith.maximumf %32, %63 : vector<7x448xf32>
    %128 = vector.broadcast %126 : vector<1x448xf32> to vector<7x448xf32>
    %129 = arith.addf %127, %128 : vector<7x448xf32>
    %cst_84 = arith.constant 0.000000e+00 : f32
    %130 = vector.broadcast %cst_84 : f32 to vector<7x448xf32>
    %131 = arith.maximumf %129, %130 : vector<7x448xf32>
    %132 = arith.maximumf %94, %125 : vector<7x448xf32>
    %133 = vector.broadcast %126 : vector<1x448xf32> to vector<7x448xf32>
    %134 = arith.addf %132, %133 : vector<7x448xf32>
    %cst_85 = arith.constant 0.000000e+00 : f32
    %135 = vector.broadcast %cst_85 : f32 to vector<7x448xf32>
    %136 = arith.maximumf %134, %135 : vector<7x448xf32>
    %137 = vector.extract_strided_slice %131 {offsets = [0, 0], sizes = [7, 224], strides = [1, 1]} : vector<7x448xf32> to vector<7x224xf32>
    %138 = vector.extract_strided_slice %131 {offsets = [0, 224], sizes = [7, 224], strides = [1, 1]} : vector<7x448xf32> to vector<7x224xf32>
    %139 = arith.maximumf %137, %138 : vector<7x224xf32>
    %140 = vector.extract_strided_slice %136 {offsets = [0, 0], sizes = [7, 224], strides = [1, 1]} : vector<7x448xf32> to vector<7x224xf32>
    %141 = vector.extract_strided_slice %136 {offsets = [0, 224], sizes = [7, 224], strides = [1, 1]} : vector<7x448xf32> to vector<7x224xf32>
    %142 = arith.maximumf %140, %141 : vector<7x224xf32>
    %cst_86 = arith.constant 0.000000e+00 : f32
    %143 = vector.broadcast %cst_86 : f32 to vector<2x9x288xf32>
    %c0_87 = arith.constant 0 : index
    %c0_88 = arith.constant 0 : index
    %c0_89 = arith.constant 0 : index
    %144 = vector.load %arg9[%c0_87, %c0_88, %c0_89] : memref<2x9x288xf32, #tpu.memory_space<vmem>>, vector<2x9x288xf32>
    tpu.vector_store %arg9[%c0_87, %c0_88, %c0_89], %143 {strides = array<i32>} : memref<2x9x288xf32, #tpu.memory_space<vmem>>, vector<2x9x288xf32>,
    %145 = vector.shape_cast %139 : vector<7x224xf32> to vector<1x7x224xf32>
    %c0_90 = arith.constant 0 : index
    %c1_91 = arith.constant 1 : index
    %c32 = arith.constant 32 : index
    %146 = vector.load %arg9[%c0_90, %c1_91, %c32] : memref<2x9x288xf32, #tpu.memory_space<vmem>>, vector<1x7x224xf32>
    tpu.vector_store %arg9[%c0_90, %c1_91, %c32], %145 {strides = array<i32>} : memref<2x9x288xf32, #tpu.memory_space<vmem>>, vector<1x7x224xf32>,
    %147 = vector.shape_cast %142 : vector<7x224xf32> to vector<1x7x224xf32>
    %c1_92 = arith.constant 1 : index
    %c1_93 = arith.constant 1 : index
    %c32_94 = arith.constant 32 : index
    %148 = vector.load %arg9[%c1_92, %c1_93, %c32_94] : memref<2x9x288xf32, #tpu.memory_space<vmem>>, vector<1x7x224xf32>
    tpu.vector_store %arg9[%c1_92, %c1_93, %c32_94], %147 {strides = array<i32>} : memref<2x9x288xf32, #tpu.memory_space<vmem>>, vector<1x7x224xf32>,
    %c0_95 = arith.constant 0 : index
    %c0_96 = arith.constant 0 : index
    %c0_97 = arith.constant 0 : index
    %149 = vector.load %arg9[%c0_95, %c0_96, %c0_97] : memref<2x9x288xf32, #tpu.memory_space<vmem>>, vector<2x9x288xf32>
    %cst_98 = arith.constant 0.000000e+00 : f32
    %150 = vector.broadcast %cst_98 : f32 to vector<7x448xf32>
    %151 = vector.extract_strided_slice %149 {offsets = [0, 0, 0], sizes = [1, 7, 288], strides = [1, 1, 1]} : vector<2x9x288xf32> to vector<1x7x288xf32>
    %152 = vector.shape_cast %151 : vector<1x7x288xf32> to vector<7x288xf32>
    %c0_99 = arith.constant 0 : index
    %c0_100 = arith.constant 0 : index
    %c0_101 = arith.constant 0 : index
    %153 = vector.load %arg4[%c0_99, %c0_100, %c0_101] : memref<5x288x448xf32, #tpu.memory_space<vmem>>, vector<1x288x448xf32>
    %154 = vector.shape_cast %153 : vector<1x288x448xf32> to vector<288x448xf32>
    %cst_102 = arith.constant dense<0.000000e+00> : vector<7x448xf32>
    %155 = tpu.matmul %152, %154, %cst_102 {dimension_numbers = #tpu.dot_dimension_numbers<[1], [0], [0], [1], [0, 0, 1, 1], [], []>} : vector<7x288xf32>, vector<288x448xf32>, vector<7x448xf32> -> vector<7x448xf32>
    %156 = arith.addf %150, %155 : vector<7x448xf32>
    %157 = vector.extract_strided_slice %149 {offsets = [1, 0, 0], sizes = [1, 7, 288], strides = [1, 1, 1]} : vector<2x9x288xf32> to vector<1x7x288xf32>
    %158 = vector.shape_cast %157 : vector<1x7x288xf32> to vector<7x288xf32>
    %c1_103 = arith.constant 1 : index
    %c0_104 = arith.constant 0 : index
    %c0_105 = arith.constant 0 : index
    %159 = vector.load %arg4[%c1_103, %c0_104, %c0_105] : memref<5x288x448xf32, #tpu.memory_space<vmem>>, vector<1x288x448xf32>
    %160 = vector.shape_cast %159 : vector<1x288x448xf32> to vector<288x448xf32>
    %cst_106 = arith.constant dense<0.000000e+00> : vector<7x448xf32>
    %161 = tpu.matmul %158, %160, %cst_106 {dimension_numbers = #tpu.dot_dimension_numbers<[1], [0], [0], [1], [0, 0, 1, 1], [], []>} : vector<7x288xf32>, vector<288x448xf32>, vector<7x448xf32> -> vector<7x448xf32>
    %162 = arith.addf %156, %161 : vector<7x448xf32>
    %163 = vector.extract_strided_slice %149 {offsets = [0, 1, 0], sizes = [1, 7, 288], strides = [1, 1, 1]} : vector<2x9x288xf32> to vector<1x7x288xf32>
    %164 = vector.shape_cast %163 : vector<1x7x288xf32> to vector<7x288xf32>
    %c2_107 = arith.constant 2 : index
    %c0_108 = arith.constant 0 : index
    %c0_109 = arith.constant 0 : index
    %165 = vector.load %arg4[%c2_107, %c0_108, %c0_109] : memref<5x288x448xf32, #tpu.memory_space<vmem>>, vector<1x288x448xf32>
    %166 = vector.shape_cast %165 : vector<1x288x448xf32> to vector<288x448xf32>
    %cst_110 = arith.constant dense<0.000000e+00> : vector<7x448xf32>
    %167 = tpu.matmul %164, %166, %cst_110 {dimension_numbers = #tpu.dot_dimension_numbers<[1], [0], [0], [1], [0, 0, 1, 1], [], []>} : vector<7x288xf32>, vector<288x448xf32>, vector<7x448xf32> -> vector<7x448xf32>
    %168 = arith.addf %162, %167 : vector<7x448xf32>
    %169 = vector.extract_strided_slice %149 {offsets = [1, 1, 0], sizes = [1, 7, 288], strides = [1, 1, 1]} : vector<2x9x288xf32> to vector<1x7x288xf32>
    %170 = vector.shape_cast %169 : vector<1x7x288xf32> to vector<7x288xf32>
    %c3_111 = arith.constant 3 : index
    %c0_112 = arith.constant 0 : index
    %c0_113 = arith.constant 0 : index
    %171 = vector.load %arg4[%c3_111, %c0_112, %c0_113] : memref<5x288x448xf32, #tpu.memory_space<vmem>>, vector<1x288x448xf32>
    %172 = vector.shape_cast %171 : vector<1x288x448xf32> to vector<288x448xf32>
    %cst_114 = arith.constant dense<0.000000e+00> : vector<7x448xf32>
    %173 = tpu.matmul %170, %172, %cst_114 {dimension_numbers = #tpu.dot_dimension_numbers<[1], [0], [0], [1], [0, 0, 1, 1], [], []>} : vector<7x288xf32>, vector<288x448xf32>, vector<7x448xf32> -> vector<7x448xf32>
    %174 = arith.addf %168, %173 : vector<7x448xf32>
    %175 = vector.extract_strided_slice %149 {offsets = [0, 2, 0], sizes = [1, 7, 288], strides = [1, 1, 1]} : vector<2x9x288xf32> to vector<1x7x288xf32>
    %176 = vector.shape_cast %175 : vector<1x7x288xf32> to vector<7x288xf32>
    %c4_115 = arith.constant 4 : index
    %c0_116 = arith.constant 0 : index
    %c0_117 = arith.constant 0 : index
    %177 = vector.load %arg4[%c4_115, %c0_116, %c0_117] : memref<5x288x448xf32, #tpu.memory_space<vmem>>, vector<1x288x448xf32>
    %178 = vector.shape_cast %177 : vector<1x288x448xf32> to vector<288x448xf32>
    %cst_118 = arith.constant dense<0.000000e+00> : vector<7x448xf32>
    %179 = tpu.matmul %176, %178, %cst_118 {dimension_numbers = #tpu.dot_dimension_numbers<[1], [0], [0], [1], [0, 0, 1, 1], [], []>} : vector<7x288xf32>, vector<288x448xf32>, vector<7x448xf32> -> vector<7x448xf32>
    %180 = arith.addf %174, %179 : vector<7x448xf32>
    %cst_119 = arith.constant 0.000000e+00 : f32
    %181 = vector.broadcast %cst_119 : f32 to vector<7x448xf32>
    %182 = vector.extract_strided_slice %149 {offsets = [1, 0, 0], sizes = [1, 7, 288], strides = [1, 1, 1]} : vector<2x9x288xf32> to vector<1x7x288xf32>
    %183 = vector.shape_cast %182 : vector<1x7x288xf32> to vector<7x288xf32>
    %c0_120 = arith.constant 0 : index
    %c0_121 = arith.constant 0 : index
    %c0_122 = arith.constant 0 : index
    %184 = vector.load %arg4[%c0_120, %c0_121, %c0_122] : memref<5x288x448xf32, #tpu.memory_space<vmem>>, vector<1x288x448xf32>
    %185 = vector.shape_cast %184 : vector<1x288x448xf32> to vector<288x448xf32>
    %cst_123 = arith.constant dense<0.000000e+00> : vector<7x448xf32>
    %186 = tpu.matmul %183, %185, %cst_123 {dimension_numbers = #tpu.dot_dimension_numbers<[1], [0], [0], [1], [0, 0, 1, 1], [], []>} : vector<7x288xf32>, vector<288x448xf32>, vector<7x448xf32> -> vector<7x448xf32>
    %187 = arith.addf %181, %186 : vector<7x448xf32>
    %188 = vector.extract_strided_slice %149 {offsets = [0, 1, 0], sizes = [1, 7, 288], strides = [1, 1, 1]} : vector<2x9x288xf32> to vector<1x7x288xf32>
    %189 = vector.shape_cast %188 : vector<1x7x288xf32> to vector<7x288xf32>
    %c1_124 = arith.constant 1 : index
    %c0_125 = arith.constant 0 : index
    %c0_126 = arith.constant 0 : index
    %190 = vector.load %arg4[%c1_124, %c0_125, %c0_126] : memref<5x288x448xf32, #tpu.memory_space<vmem>>, vector<1x288x448xf32>
    %191 = vector.shape_cast %190 : vector<1x288x448xf32> to vector<288x448xf32>
    %cst_127 = arith.constant dense<0.000000e+00> : vector<7x448xf32>
    %192 = tpu.matmul %189, %191, %cst_127 {dimension_numbers = #tpu.dot_dimension_numbers<[1], [0], [0], [1], [0, 0, 1, 1], [], []>} : vector<7x288xf32>, vector<288x448xf32>, vector<7x448xf32> -> vector<7x448xf32>
    %193 = arith.addf %187, %192 : vector<7x448xf32>
    %194 = vector.extract_strided_slice %149 {offsets = [1, 1, 0], sizes = [1, 7, 288], strides = [1, 1, 1]} : vector<2x9x288xf32> to vector<1x7x288xf32>
    %195 = vector.shape_cast %194 : vector<1x7x288xf32> to vector<7x288xf32>
    %c2_128 = arith.constant 2 : index
    %c0_129 = arith.constant 0 : index
    %c0_130 = arith.constant 0 : index
    %196 = vector.load %arg4[%c2_128, %c0_129, %c0_130] : memref<5x288x448xf32, #tpu.memory_space<vmem>>, vector<1x288x448xf32>
    %197 = vector.shape_cast %196 : vector<1x288x448xf32> to vector<288x448xf32>
    %cst_131 = arith.constant dense<0.000000e+00> : vector<7x448xf32>
    %198 = tpu.matmul %195, %197, %cst_131 {dimension_numbers = #tpu.dot_dimension_numbers<[1], [0], [0], [1], [0, 0, 1, 1], [], []>} : vector<7x288xf32>, vector<288x448xf32>, vector<7x448xf32> -> vector<7x448xf32>
    %199 = arith.addf %193, %198 : vector<7x448xf32>
    %200 = vector.extract_strided_slice %149 {offsets = [0, 2, 0], sizes = [1, 7, 288], strides = [1, 1, 1]} : vector<2x9x288xf32> to vector<1x7x288xf32>
    %201 = vector.shape_cast %200 : vector<1x7x288xf32> to vector<7x288xf32>
    %c3_132 = arith.constant 3 : index
    %c0_133 = arith.constant 0 : index
    %c0_134 = arith.constant 0 : index
    %202 = vector.load %arg4[%c3_132, %c0_133, %c0_134] : memref<5x288x448xf32, #tpu.memory_space<vmem>>, vector<1x288x448xf32>
    %203 = vector.shape_cast %202 : vector<1x288x448xf32> to vector<288x448xf32>
    %cst_135 = arith.constant dense<0.000000e+00> : vector<7x448xf32>
    %204 = tpu.matmul %201, %203, %cst_135 {dimension_numbers = #tpu.dot_dimension_numbers<[1], [0], [0], [1], [0, 0, 1, 1], [], []>} : vector<7x288xf32>, vector<288x448xf32>, vector<7x448xf32> -> vector<7x448xf32>
    %205 = arith.addf %199, %204 : vector<7x448xf32>
    %206 = vector.extract_strided_slice %149 {offsets = [1, 2, 0], sizes = [1, 7, 288], strides = [1, 1, 1]} : vector<2x9x288xf32> to vector<1x7x288xf32>
    %207 = vector.shape_cast %206 : vector<1x7x288xf32> to vector<7x288xf32>
    %c4_136 = arith.constant 4 : index
    %c0_137 = arith.constant 0 : index
    %c0_138 = arith.constant 0 : index
    %208 = vector.load %arg4[%c4_136, %c0_137, %c0_138] : memref<5x288x448xf32, #tpu.memory_space<vmem>>, vector<1x288x448xf32>
    %209 = vector.shape_cast %208 : vector<1x288x448xf32> to vector<288x448xf32>
    %cst_139 = arith.constant dense<0.000000e+00> : vector<7x448xf32>
    %210 = tpu.matmul %207, %209, %cst_139 {dimension_numbers = #tpu.dot_dimension_numbers<[1], [0], [0], [1], [0, 0, 1, 1], [], []>} : vector<7x288xf32>, vector<288x448xf32>, vector<7x448xf32> -> vector<7x448xf32>
    %211 = arith.addf %205, %210 : vector<7x448xf32>
    %212 = arith.maximumf %180, %211 : vector<7x448xf32>
    %c0_140 = arith.constant 0 : index
    %c0_141 = arith.constant 0 : index
    %213 = vector.load %arg5[%c0_140, %c0_141] : memref<1x448xf32, #tpu.memory_space<vmem>>, vector<1x448xf32>
    %214 = vector.broadcast %213 : vector<1x448xf32> to vector<7x448xf32>
    %215 = arith.addf %212, %214 : vector<7x448xf32>
    %cst_142 = arith.constant 0.000000e+00 : f32
    %216 = vector.broadcast %cst_142 : f32 to vector<7x448xf32>
    %217 = arith.maximumf %215, %216 : vector<7x448xf32>
    %218 = vector.extract_strided_slice %217 {offsets = [0, 0], sizes = [7, 224], strides = [1, 1]} : vector<7x448xf32> to vector<7x224xf32>
    %219 = vector.extract_strided_slice %217 {offsets = [0, 224], sizes = [7, 224], strides = [1, 1]} : vector<7x448xf32> to vector<7x224xf32>
    %220 = arith.maximumf %218, %219 : vector<7x224xf32>
    %221 = vector.shape_cast %220 : vector<7x224xf32> to vector<1x7x224xf32>
    %c0_143 = arith.constant 0 : index
    %c0_144 = arith.constant 0 : index
    %c0_145 = arith.constant 0 : index
    %222 = vector.load %arg6[%c0_143, %c0_144, %c0_145] : memref<10x7x224xf32, #tpu.memory_space<vmem>>, vector<10x7x224xf32>
    %223 = vector.broadcast %221 : vector<1x7x224xf32> to vector<10x7x224xf32>
    %224 = arith.mulf %223, %222 : vector<10x7x224xf32>
    %cst_146 = arith.constant dense<0.000000e+00> : vector<10x7xf32>
    %225 = vector.multi_reduction <add>, %224, %cst_146 [2] : vector<10x7x224xf32> to vector<10x7xf32>
    %cst_147 = arith.constant dense<0.000000e+00> : vector<10xf32>
    %226 = vector.multi_reduction <add>, %225, %cst_147 [1] : vector<10x7xf32> to vector<10xf32>
    %227 = vector.shape_cast %226 : vector<10xf32> to vector<1x10xf32>
    %c0_148 = arith.constant 0 : index
    %c0_149 = arith.constant 0 : index
    %228 = vector.load %arg7[%c0_148, %c0_149] : memref<1x10xf32, #tpu.memory_space<vmem>>, vector<1x10xf32>
    %229 = arith.addf %227, %228 : vector<1x10xf32>
    %c0_150 = arith.constant 0 : index
    %c0_151 = arith.constant 0 : index
    %c0_152 = arith.constant 0 : index
    %230 = vector.load %arg8[%c0_150, %c0_151, %c0_152] : memref<1x1x10xf32, #tpu.memory_space<vmem>>, vector<1x1x10xf32>
    %231 = vector.shape_cast %230 : vector<1x1x10xf32> to vector<1x10xf32>
    %232 = vector.shape_cast %229 : vector<1x10xf32> to vector<1x1x10xf32>
    tpu.vector_store %arg8[%c0_150, %c0_151, %c0_152], %232 {strides = array<i32>} : memref<1x1x10xf32, #tpu.memory_space<vmem>>, vector<1x1x10xf32>,
    return
  }
  func.func @transform_0(%arg0: i32) -> (i32, i32, i32, i32) {
    %c0_i32 = arith.constant 0 : i32
    %c0_i32_0 = arith.constant 0 : i32
    %c0_i32_1 = arith.constant 0 : i32
    %c0_i32_2 = arith.constant 0 : i32
    return %arg0, %c0_i32, %c0_i32_0, %c0_i32_1 : i32, i32, i32, i32
  }
  func.func @transform_1(%arg0: i32) -> (i32, i32, i32) {
    %c0_i32 = arith.constant 0 : i32
    %c0_i32_0 = arith.constant 0 : i32
    %c0_i32_1 = arith.constant 0 : i32
    %c0_i32_2 = arith.constant 0 : i32
    return %c0_i32, %c0_i32_0, %c0_i32_1 : i32, i32, i32
  }
  func.func @transform_2(%arg0: i32) -> (i32, i32) {
    %c0_i32 = arith.constant 0 : i32
    %c0_i32_0 = arith.constant 0 : i32
    %c0_i32_1 = arith.constant 0 : i32
    return %c0_i32, %c0_i32_0 : i32, i32
  }
  func.func @transform_3(%arg0: i32) -> (i32, i32, i32) {
    %c0_i32 = arith.constant 0 : i32
    %c0_i32_0 = arith.constant 0 : i32
    %c0_i32_1 = arith.constant 0 : i32
    %c0_i32_2 = arith.constant 0 : i32
    return %c0_i32, %c0_i32_0, %c0_i32_1 : i32, i32, i32
  }
  func.func @transform_4(%arg0: i32) -> (i32, i32) {
    %c0_i32 = arith.constant 0 : i32
    %c0_i32_0 = arith.constant 0 : i32
    %c0_i32_1 = arith.constant 0 : i32
    return %c0_i32, %c0_i32_0 : i32, i32
  }
  func.func @transform_5(%arg0: i32) -> (i32, i32, i32) {
    %c0_i32 = arith.constant 0 : i32
    %c0_i32_0 = arith.constant 0 : i32
    %c0_i32_1 = arith.constant 0 : i32
    %c0_i32_2 = arith.constant 0 : i32
    return %c0_i32, %c0_i32_0, %c0_i32_1 : i32, i32, i32
  }
  func.func @transform_6(%arg0: i32) -> (i32, i32) {
    %c0_i32 = arith.constant 0 : i32
    %c0_i32_0 = arith.constant 0 : i32
    %c0_i32_1 = arith.constant 0 : i32
    return %c0_i32, %c0_i32_0 : i32, i32
  }
  func.func @transform_7(%arg0: i32) -> (i32, i32, i32) {
    %c0_i32 = arith.constant 0 : i32
    %c0_i32_0 = arith.constant 0 : i32
    %c0_i32_1 = arith.constant 0 : i32
    return %arg0, %c0_i32, %c0_i32_0 : i32, i32, i32
  }
}

</mosaic_0001>

<bundles_post_ra>
// kernel: cnn_forward.1
= control target key start
LH: loop header
LB: loop body
LE: loop exit
PB: predicated region body
PF: predicated region fallthrough
CT: control target
= control target key end

     0   :  { %12 = vsyncpa [#allocation4], 0  ;;  %s9957_s0 = inlined_call_operand.vmem [shape: f32[2,4,8,32], index: 0, kind: input, shape index: {}]   ;;  %s9958_s1 = inlined_call_operand.hbm [shape: f32[5,32,448], index: 1, kind: input, shape index: {}]   ;;  %s9959_s2 = inlined_call_operand.hbm [shape: f32[1,448], index: 2, kind: input, shape index: {}]   ;;  %s9960_s3 = inlined_call_operand.hbm [shape: f32[5,288,448], index: 3, kind: input, shape index: {}]   ;;  %s9961_s4 = inlined_call_operand.hbm [shape: f32[1,448], index: 4, kind: input, shape index: {}]   ;;  %s9962_s5 = inlined_call_operand.hbm [shape: f32[10,7,224], index: 5, kind: input, shape index: {}]   ;;  %s9963_s6 = inlined_call_operand.hbm [shape: f32[1,10], index: 6, kind: input, shape index: {}]   ;;  %s9964_s7 = inlined_call_operand.hbm [shape: f32[2,1,10], index: 7, kind: output, shape index: {}]  }
   0x1   :  { %13 = vsyncpa [#allocation7], 0 }
   0x2   :  { %14 = vsyncpa [#allocation10], 0 }
   0x3   :  { %15 = vsyncpa [#allocation13], 0 }
   0x4   :  { %16 = vsyncpa [#allocation5], 0 }
   0x5   :  { %18 = vsyncpa [#allocation5 + $0x1], 0  ;;  %s8728_s24 = smov 0   ;;  %s8730_s25 = smov 0  }
   0x6   :  { %s8732_s26 = smov 0   ;;  %s8734_s27 = smov 0  }
   0x7 LB: > { %s8749_s28 = sadd.s32 4294967295, %s8672_s27   ;;  %s7518_s29 = sadd.s32 4294967294, %s8672_s27   ;;  %s8672_s27 = sphi %s8734_s27, %s10172_s27   ;;  %s8668_s26 = sphi %s8732_s26, %s10171_s26   ;;  %s8664_s25 = sphi %s8730_s25, %s10170_s25   ;;  %s8660_s24 = sphi %s8728_s24, %s10169_s24  }
   0x8   : > { %s8753_s30 = sadd.s32 1, %s8672_s27   ;;  %s183_s8 = sadd.s32 1, %s8668_s26 }
   0x9   : > { %s180_s9 = ssub.s32 %s8672_s27, %s8753_s30  ;;  %p193_p0 = scmp.ne.s32.totalorder %s8668_s26, %s8664_s25 }
   0xa   : > { %p181_p1 = scmp.eq.s32.totalorder %s180_s9, 0  ;;  %p194_p2 = scmp.eq.s32.totalorder %s8749_s28, 1 }
   0xb   : > { %p199_p3 = scmp.ne.s32.totalorder %s8664_s25, %s8660_s24  ;;  %p200_p4 = scmp.eq.s32.totalorder %s7518_s29, 1 }
   0xc   : > { %s8764_s10 = scalar_select %p181_p1, %s8668_s26, %s183_s8  }
   0xd   : > { %p8766_p5 = por %p194_p2, %p193_p0  ;;  %p8770_p6 = por %p200_p4, %p199_p3 }
   0xe   : > { %p7519_p7 = scmp.ge.s32.totalorder %s8672_s27, 1  ;;  %p207_p8 = scmp.lt.s32.totalorder %s8672_s27, 3 }
   0xf   : > { %s10045_s11 = scalar_select %p8766_p5, 1, 0 }
  0x10   : > { %s10046_s12 = scalar_select %p8770_p6, 1, 0 }
  0x11   : > { %p9965_p9 = scmp.eq.s32.totalorder %s8749_s28, 0  ;;  %p8777_p10 = pnand %p7519_p7, %p207_p8 }
  0x12   : > { %s8674_s14 = smov [#allocation6]   ;;  %s8675_s16 = smov [#allocation9]  }
  0x13   : > { %s10047_s13 = scalar_select %p8777_p10, 1, 0 }
  0x14   : > { %s233_s15 = sshll.u32 %s8674_s14, 4  ;;  %p7627_p11 = pneg %p8777_p10  ;;  %s234_s15 = int_to_ptr.vmem [resolvable:$true] %s233_s15 }
  0x15   : > { %s257_s17 = sshll.u32 %s8675_s16, 4  ;;  %s8676_s19 = smov [#allocation3]   ;;  %s258_s17 = int_to_ptr.vmem [resolvable:$true] %s257_s17 }
  0x16   : > { %p8785_p12 = pnand %p9965_p9, %p7627_p11  ;;  %s219_s20 = sshll.u32 %s8676_s19, 4  ;;  %s8789_s20 = int_to_ptr.vmem [resolvable:$true] %s219_s20 }
  0x17   : > { %s8451_s22 = scalar_lea.vmem %s234_s15, 64  ;;  %p8459_p3 = scmp.lt.s32.totalorder %s234_s15, %s234_s15 }
  0x18   : > { %p8793_p13 = pneg %p8785_p12  ;;  %p8452_p0 = scmp.ne.s32.totalorder %s234_s15, %s8451_s22 }
  0x19   : > { %p8460_p4 = scmp.lt.s32.totalorder %s8451_s22, %s8451_s22 }
  0x1a   : > { %p8454_p1 = pnand %p8452_p0, %p8793_p13 }
  0x1b   : > { %p8461_p7 = por %p8460_p4, %p8459_p3 }
  0x1c   : > { %p8455_p2 = pneg %p8454_p1 }
  0x1e   : > { %p8462_p8 = pnand %p8461_p7, %p8455_p2 }
  0x20   : > { %8465 = shalt.err (!%p8462_p8)
}
  0x21   : > { %7633 = dma.hbm_to_vmem [thread:$0]  (!%p8785_p12), %s9959_s2, 64, %s234_s15, [#allocation7]  }
  0x22   : > { %s8477_s8 = scalar_lea.vmem %s258_s17, 64  ;;  %p8485_p5 = scmp.lt.s32.totalorder %s258_s17, %s258_s17 }
  0x23   : > { %p8478_p11 = scmp.ne.s32.totalorder %s258_s17, %s8477_s8  ;;  %p8486_p0 = scmp.lt.s32.totalorder %s8477_s8, %s8477_s8 }
  0x25   : > { %p8480_p9 = pnand %p8478_p11, %p8793_p13  ;;  %p8487_p1 = por %p8486_p0, %p8485_p5 }
  0x27   : > { %p8481_p6 = pneg %p8480_p9 }
  0x29   : > { %p8488_p10 = pnand %p8487_p1, %p8481_p6 }
  0x2b   : > { %8491 = shalt.err (!%p8488_p10)
}
  0x2c   : > { %7639 = dma.hbm_to_vmem [thread:$0]  (!%p8785_p12), %s9961_s4, 64, %s258_s17, [#allocation10]  }
  0x2d   : > { %s8503_s15 = scalar_lea.vmem %s8789_s20, 10240  ;;  %p8511_p4 = scmp.lt.s32.totalorder %s8789_s20, %s8789_s20 }
  0x2e   : > { %p8504_p2 = scmp.ne.s32.totalorder %s8789_s20, %s8503_s15  ;;  %p8512_p5 = scmp.lt.s32.totalorder %s8503_s15, %s8503_s15 }
  0x30   : > { %p8506_p3 = pnand %p8504_p2, %p8793_p13  ;;  %p8513_p6 = por %p8512_p5, %p8511_p4 }
  0x32   : > { %p8507_p9 = pneg %p8506_p3 }
  0x34   : > { %p8514_p10 = pnand %p8513_p6, %p8507_p9 }
  0x36   : > { %8517 = shalt.err (!%p8514_p10)
}
  0x37   : > { %s8677_s16 = smov 512   ;;  %s8678_s19 = smov 32  }
  0x38   : > { %7630 = dma.hbm_to_vmem [thread:$0]  (!%p8785_p12), %s9958_s1, 10240, %s8789_s20, [#allocation4], %s8677_s16, %s8677_s16, %s8678_s19  }
  0x39   : > { %s8679_s17 = smov [#allocation8]   ;;  %s8680_s8 = smov [#allocation11]  }
  0x3a   : > { %s243_s29 = sshll.u32 %s8679_s17, 4  ;;  %s267_s9 = sshll.u32 %s8680_s8, 4  ;;  %s244_s29 = int_to_ptr.vmem [resolvable:$true] %s243_s29  ;;  %s268_s9 = int_to_ptr.vmem [resolvable:$true] %s267_s9 }
  0x3b   : > { %s8529_s14 = scalar_lea.vmem %s244_s29, 92160  ;;  %p8537_p0 = scmp.lt.s32.totalorder %s244_s29, %s244_s29 }
  0x3c   : > { %p8530_p7 = scmp.ne.s32.totalorder %s244_s29, %s8529_s14  ;;  %p8538_p1 = scmp.lt.s32.totalorder %s8529_s14, %s8529_s14 }
  0x3e   : > { %p8532_p8 = pnand %p8530_p7, %p8793_p13  ;;  %p8539_p2 = por %p8538_p1, %p8537_p0 }
  0x40   : > { %p8533_p11 = pneg %p8532_p8 }
  0x42   : > { %p8540_p3 = pnand %p8539_p2, %p8533_p11 }
  0x44   : > { %8543 = shalt.err (!%p8540_p3)
}
  0x45   : > { %7636 = dma.hbm_to_vmem [thread:$0]  (!%p8785_p12), %s9960_s3, 92160, %s244_s29, [#allocation7], %s8677_s16, %s8677_s16, %s8678_s19  }
  0x46   : > { %s8555_s20 = scalar_lea.vmem %s268_s9, 2560  ;;  %p8563_p6 = scmp.lt.s32.totalorder %s268_s9, %s268_s9 }
  0x47   : > { %p8556_p9 = scmp.ne.s32.totalorder %s268_s9, %s8555_s20  ;;  %p8564_p10 = scmp.lt.s32.totalorder %s8555_s20, %s8555_s20 }
  0x49   : > { %p8558_p4 = pnand %p8556_p9, %p8793_p13  ;;  %p8565_p7 = por %p8564_p10, %p8563_p6 }
  0x4b   : > { %p8559_p5 = pneg %p8558_p4 }
  0x4d   : > { %p8566_p8 = pnand %p8565_p7, %p8559_p5 }
  0x4f   : > { %8569 = shalt.err (!%p8566_p8)
}
  0x50   : > { %s8681_s23 = smov 256   ;;  %s8682_s17 = smov 16  }
  0x51   : > { %7642 = dma.hbm_to_vmem [thread:$0]  (!%p8785_p12), %s9962_s5, 2560, %s268_s9, [#allocation10], %s8681_s23, %s8681_s23, %s8682_s17  }
  0x52   : > { %s8683_s16 = smov [#allocation12]  }
  0x53   : > { %s281_s19 = sshll.u32 %s8683_s16, 4  ;;  %s282_s19 = int_to_ptr.vmem [resolvable:$true] %s281_s19 }
  0x54   : > { %s8581_s29 = scalar_lea.vmem %s282_s19, 16  ;;  %s8588_s15 = scalar_lea.vmem %s282_s19, 32 }
  0x55   : > { %p8582_p11 = scmp.ne.s32.totalorder %s282_s19, %s8581_s29  ;;  %p8589_p2 = scmp.lt.s32.totalorder %s282_s19, %s282_s19 }
  0x56   : > { %p8590_p3 = scmp.lt.s32.totalorder %s8588_s15, %s8581_s29 }
  0x57   : > { %p8584_p0 = pnand %p8582_p11, %p8793_p13 }
  0x58   : > { %p8591_p9 = por %p8590_p3, %p8589_p2 }
  0x59   : > { %p8585_p1 = pneg %p8584_p0 }
  0x5b   : > { %p8592_p4 = pnand %p8591_p9, %p8585_p1 }
  0x5d   : > { %8595 = shalt.err (!%p8592_p4)
}
  0x5e   : > { %7645 = dma.hbm_to_vmem [thread:$0]  (!%p8785_p12), %s9963_s6, 16, %s282_s19, [#allocation13]  }
  0x5f   : > { %p10050_p5 = scmp.ne.s32.totalorder %s10047_s13, 0 }
  0x61   : > { %302 = sbr.rel (%p10050_p5) target bundleno = 2280 (0x8e8), region = 48 }
  0x66   : > { %p10051_p6 = scmp.eq.s32.totalorder %s8749_s28, 0 }
  0x68   : > { %8639 = dma.done.wait (%p10051_p6), [#allocation4], 10240   ;;  %p10052_p13 = pmov %p10051_p6 }
  0x69   : > { %p10053_p10 = pmov %p10051_p6 }
  0x6a   : > { %8641 = vsyncadd (%p10052_p13), [#allocation4], 4294957056 }
  0x6b   : > { %8643 = dma.done.wait (%p10053_p10), [#allocation7], 92224   ;;  %p10054_p7 = pmov %p10051_p6 }
  0x6c   : > { %p10055_p8 = pmov %p10051_p6 }
  0x6d   : > { %8645 = vsyncadd (%p10054_p7), [#allocation7], 4294875072 }
  0x6e   : > { %8647 = dma.done.wait (%p10055_p8), [#allocation10], 2624   ;;  %p10056_p12 = pmov %p10051_p6 }
  0x6f   : > { %p10057_p11 = pmov %p10051_p6 }
  0x70   : > { %8649 = vsyncadd (%p10056_p12), [#allocation10], 4294964672 }
  0x71   : > { %8651 = dma.done.wait (%p10057_p11), [#allocation13], 16   ;;  %p10058_p0 = pmov %p10051_p6 }
  0x72   : > { %p353_p1 = scmp.lt.s32.totalorder %s8749_s28, 1  ;;  %vm395_vm0 = vcmask 261120   ;;  %v9968_v0 = vmov 0.0   ;;  %v8880_v1 = vld [vmem:[#allocation3 + $0xe8] sm:$0xff]  ;;  %v8882_v2 = vld [vmem:[#allocation3 + $0xf8] sm:$0xff]  ;;  %v8884_v3 = vld [vmem:[#allocation3 + $0xe0] sm:$0xff] }
  0x73   : > { %8653 = vsyncadd (%p10058_p0), [#allocation13], 4294967280  ;;  %463 = vmatprep.mubr.f32.mxu0 %v9968_v0  ;;  %3435 = vst [vmem:[#allocation2] sm:$0xff] %v9968_v0  ;;  %534 = vmatprep.mubr.f32.mxu1 %v9968_v0  ;;  %v8888_v4 = vld [vmem:[#allocation3 + $0xf0] sm:$0xff]  ;;  %v8890_v5 = vld [vmem:[#allocation3 + $0xc8] sm:$0xff]  ;;  %s8685_s17 = smov 32  }
  0x74   : > { %3436 = vst [vmem:[#allocation2 + $0x8] sm:$0xff] %v9968_v0  ;;  %3438 = vst [vmem:[#allocation2 + $0x18] sm:$0x1] %v9968_v0  ;;  %s354_s13 = scalar_select %p353_p1, %s8749_s28, 1  ;;  %423 = vmatprep.subr.mxu0 %v8880_v1  ;;  %494 = vmatprep.subr.mxu1 %v8882_v2  ;;  %v8892_v6 = vld [vmem:[#allocation3 + $0xd8] sm:$0xff]  ;;  %v8896_v7 = vld [vmem:[#allocation3 + $0xc0] sm:$0xff] }
  0x75   : > { %3439 = vst [vmem:[#allocation2 + $0x20] sm:$0x1] %v9968_v0  ;;  %3442 = vst [vmem:[#allocation2 + $0x30] sm:$0xff] %v9968_v0  ;;  %424 = vmatpush1.msra.mxu0 %v8884_v3  ;;  %495 = vmatpush1.msra.mxu1 %v8888_v4  ;;  %v8898_v8 = vld [vmem:[#allocation3 + $0xd0] sm:$0xff]  ;;  %v8900_v9 = vld [vmem:[#allocation3 + $0xa8] sm:$0xff]  ;;  %vm3459_vm1 = vcmask 1047809  }
  0x76   : > { %3443 = vst [vmem:[#allocation2 + $0x38] sm:$0xff] %v9968_v0  ;;  %3445 = vst [vmem:[#allocation2 + $0x48] sm:$0x1] %v9968_v0  ;;  %s7600_s18 = sshll.u32 %s354_s13, 5  ;;  %425 = vmatprep.subr.mxu0 %v8890_v5  ;;  %496 = vmatprep.subr.mxu1 %v8892_v6  ;;  %v8904_v10 = vld [vmem:[#allocation3 + $0xb8] sm:$0xff]  ;;  %v8906_v11 = vld [vmem:[#allocation3 + $0xa0] sm:$0xff] }
  0x77   : > { %3446 = vst [vmem:[#allocation2 + $0x50] sm:$0x1] %v9968_v0  ;;  %3437 = vst.msk [vmem:[#allocation2 + $0x10] sm:$0xff] %vm395_vm0, %v9968_v0  ;;  %v8908_v12 = vld [vmem:[#allocation3 + $0xb0] sm:$0xff]  ;;  %s8913_s23 = scalar_lea.vmem %s9957_s0, %s7600_s18  ;;  %426 = vmatpush1.msra.mxu0 %v8896_v7  ;;  %497 = vmatpush1.msra.mxu1 %v8898_v8  ;;  %v8917_v13 = vld [vmem:[#allocation3 + $0x88] sm:$0xff]  ;;  %vm3440_vm2 = vcmask 253952  }
  0x78   : > { %3444 = vst.msk [vmem:[#allocation2 + $0x40] sm:$0xff] %vm395_vm0, %v9968_v0  ;;  %v8919_v14 = vld [vmem:[#allocation3 + $0x98] sm:$0xff]  ;;  %427 = vmatprep.subr.mxu0 %v8900_v9  ;;  %498 = vmatprep.subr.mxu1 %v8904_v10  ;;  %v8923_v15 = vld [vmem:[#allocation3 + $0x80] sm:$0xff]  ;;  %v8925_v16 = vld [vmem:[#allocation3 + $0x90] sm:$0xff]  ;;  %vm5383_vm3 = vcmask 1045504   ;;  %vm7222_vm4 = vcmask 1046528  }
  0x79   : > { %428 = vmatpush1.msra.mxu0 %v8906_v11  ;;  %499 = vmatpush1.msra.mxu1 %v8908_v12  ;;  %v8930_v17 = vld [vmem:[%s8913_s23 + $0x8] sm:$0xff]  ;;  %v8936_v19 = vld [vmem:[#allocation3 + $0x78] sm:$0xff]  ;;  %v8940_v20 = vld [vmem:[#allocation3 + $0x60] sm:$0xff]  ;;  %vm7224_vm5 = vcmask 784384   ;;  %vm7326_vm6 = vcmask 1041409   ;;  %vm7328_vm7 = vcmask 1042434  }
  0x7a   : > { %v8932_v18 = vld [vmem:[#allocation3 + $0x68] sm:$0xff]  ;;  %429 = vmatprep.subr.mxu0 %v8917_v13  ;;  %500 = vmatprep.subr.mxu1 %v8919_v14  ;;  %v8942_v21 = vld [vmem:[#allocation3 + $0x70] sm:$0xff]  ;;  %v8949_v23 = vld [vmem:[#allocation3 + $0x58] sm:$0xff]  ;;  %vm7330_vm8 = vcmask 1043459   ;;  %vm7332_vm9 = vcmask 1044484   ;;  %vm7334_vm10 = vcmask 1045509  }
  0x7b   : > { %430 = vmatpush1.msra.mxu0 %v8923_v15  ;;  %501 = vmatpush1.msra.mxu1 %v8925_v16  ;;  %v8947_v22 = vld [vmem:[#allocation3 + $0x48] sm:$0xff]  ;;  %v8954_v24 = vld [vmem:[#allocation3 + $0x40] sm:$0xff]  ;;  %v8956_v25 = vld [vmem:[#allocation3 + $0x50] sm:$0xff]  ;;  %vm7336_vm11 = vcmask 1046534   ;;  %vm7338_vm12 = vcmask 1047559   ;;  %vm7343_vm13 = vcmask 56320  }
  0x7c   : > { %7536 = vmatmul.mubr.msk.f32.vlgmr.msra.gmra.mxu0 %vm395_vm0, %v8930_v17  ;;  %568 = vmatprep.subr.mxu0 %v8932_v18  ;;  %v8960_v26 = vld [vmem:[#allocation3 + $0x28] sm:$0xff]  ;;  %v8962_v27 = vld [vmem:[#allocation3 + $0x38] sm:$0xff]  ;;  %v8966_v28 = vld [vmem:[#allocation3 + $0x20] sm:$0xff]  ;;  %vm7347_vm14 = vcmask 50176   ;;  %s351_s8 = sand.u32 1, %s8664_s25   ;;  %s7597_s14 = sshll.u32 %s8749_s28, 4 }
  0x7d   : > { %639 = vmatprep.subr.mxu1 %v8936_v19  ;;  %7537 = vmatmul.mubr.msk.f32.vlgmr.msra.gmra.mxu1 %vm395_vm0, %v8930_v17  ;;  %v8968_v29 = vld [vmem:[#allocation3 + $0x30] sm:$0xff]  ;;  %v8972_v30 = vld [vmem:[#allocation3 + $0x8] sm:$0xff]  ;;  %v8974_v31 = vld [vmem:[#allocation3 + $0x18] sm:$0xff]  ;;  %s352_s16 = scalar_lea.vmem [#allocation14], %s351_s8  ;;  %vm7385_vm15 = vcmask 130112   ;;  %s9922_s22 = scalar_lea.hbm %s9964_s7, %s7597_s14 }
  0x7e   : > { %569 = vmatpush1.msra.mxu0 %v8940_v20  ;;  %640 = vmatpush1.msra.mxu1 %v8942_v21  ;;  %10059 = vst [vmem:[#allocation20_spill] sm:$0xff] %v8974_v31  ;;  %v8978_v32 = vld [vmem:[#allocation3] sm:$0xff]  ;;  %v8982_v33 = vld [vmem:[#allocation3 + $0x10] sm:$0xff]  ;;  %v8991_v35 = vld [vmem:[#allocation3 + $0x168] sm:$0xff]  ;;  %s7403_s19 = sshll.u32 %s352_s16, 4  ;;  %s7391_s20 = scalar_lea.sflag [#allocation5], %s351_s8  ;;  %s7404_s19 = int_to_ptr.vmem [resolvable:$true] %s7403_s19 }
  0x7f   : > { %570 = vmatprep.subr.mxu0 %v8947_v22  ;;  %641 = vmatprep.subr.mxu1 %v8949_v23  ;;  %10060 = vst [vmem:[#allocation21_spill] sm:$0xff] %v8978_v32  ;;  %10061 = vst [vmem:[#allocation22_spill] sm:$0xff] %v8982_v33  ;;  %v8987_v34 = vld [vmem:[%s8913_s23] sm:$0xff]  ;;  %v8993_v36 = vld [vmem:[#allocation3 + $0x178] sm:$0xff]  ;;  %s8596_s13 = scalar_lea.vmem %s7404_s19, 16  ;;  %p10167_p3 = scmp.ne.s32.totalorder %s10045_s11, 0 }
  0x80   : > { %571 = vmatpush1.msra.mxu0 %v8954_v24  ;;  %642 = vmatpush1.msra.mxu1 %v8956_v25  ;;  %10062 = vst [vmem:[#allocation23_spill] sm:$0xff] %v8991_v35  ;;  %10063 = vst [vmem:[#allocation24_spill] sm:$0xff] %v8993_v36  ;;  %v8997_v37 = vld [vmem:[#allocation3 + $0x160] sm:$0xff]  ;;  %v8999_v38 = vld [vmem:[#allocation3 + $0x170] sm:$0xff]  ;;  %p8597_p2 = scmp.ne.s32.totalorder %s7404_s19, %s8596_s13  ;;  %s8687_s28 = smov [#allocation14]  }
  0x81   : > { %572 = vmatprep.subr.mxu0 %v8960_v26  ;;  %643 = vmatprep.subr.mxu1 %v8962_v27  ;;  %10064 = vst [vmem:[#allocation25_spill] sm:$0xff] %v8997_v37  ;;  %10065 = vst [vmem:[#allocation26_spill] sm:$0xff] %v8999_v38  ;;  %v9005_v39 = vld [vmem:[#allocation3 + $0x148] sm:$0xff]  ;;  %v9007_v40 = vld [vmem:[#allocation3 + $0x158] sm:$0xff]  ;;  %s8600_s18 = sshll.u32 %s8687_s28, 4  ;;  %s8601_s18 = int_to_ptr.vmem [resolvable:$false] %s8600_s18 }
  0x82   : > { %573 = vmatpush1.msra.mxu0 %v8966_v28  ;;  %644 = vmatpush1.msra.mxu1 %v8968_v29  ;;  %10066 = vst [vmem:[#allocation27_spill] sm:$0xff] %v9007_v40  ;;  %v9011_v41 = vld [vmem:[#allocation3 + $0x140] sm:$0xff]  ;;  %v9013_v42 = vld [vmem:[#allocation3 + $0x150] sm:$0xff]  ;;  %v9017_v43 = vld [vmem:[#allocation3 + $0x128] sm:$0xff]  ;;  %p8598_p9 = pnand %p8597_p2, %p10167_p3  ;;  %s8602_s21 = scalar_lea.vmem %s8601_s18, 32 }
  0x83   : > { %574 = vmatprep.subr.mxu0 %v8972_v30  ;;  %645 = vmatprep.subr.mxu1 %v8974_v31  ;;  %10067 = vst [vmem:[#allocation28_spill] sm:$0xff] %v9011_v41  ;;  %10068 = vst [vmem:[#allocation29_spill] sm:$0xff] %v9013_v42  ;;  %v9019_v44 = vld [vmem:[#allocation3 + $0x138] sm:$0xff]  ;;  %v9023_v45 = vld [vmem:[#allocation3 + $0x120] sm:$0xff]  ;;  %p8603_p5 = scmp.lt.s32.totalorder %s7404_s19, %s8601_s18  ;;  %p8604_p6 = scmp.lt.s32.totalorder %s8602_s21, %s8596_s13 }
  0x84   : > { %575 = vmatpush1.msra.mxu0 %v8978_v32  ;;  %608 = vmatprep.mubr.f32.mxu0 %v9968_v0  ;;  %10069 = vst [vmem:[#allocation30_spill] sm:$0xff] %v9017_v43  ;;  %10070 = vst [vmem:[#allocation31_spill] sm:$0xff] %v9019_v44  ;;  %v9025_v46 = vld [vmem:[#allocation3 + $0x130] sm:$0xff]  ;;  %v9029_v47 = vld [vmem:[#allocation3 + $0x108] sm:$0xff]  ;;  %p8599_p4 = pneg %p8598_p9 }
  0x85   : > { %646 = vmatpush1.msra.mxu1 %v8982_v33  ;;  %679 = vmatprep.mubr.f32.mxu1 %v9968_v0  ;;  %10071 = vst [vmem:[#allocation32_spill] sm:$0xff] %v9023_v45  ;;  %10072 = vst [vmem:[#allocation33_spill] sm:$0xff] %v9025_v46  ;;  %v9031_v48 = vld [vmem:[#allocation3 + $0x118] sm:$0xff]  ;;  %v9035_v49 = vld [vmem:[#allocation3 + $0x100] sm:$0xff]  ;;  %p8605_p13 = por %p8604_p6, %p8603_p5 }
  0x86   : > { %7538 = vmatmul.mubr.msk.f32.vlgmr.msra.gmra.mxu0 %vm395_vm0, %v8987_v34  ;;  %7539 = vmatmul.mubr.msk.f32.vlgmr.msra.gmra.mxu1 %vm395_vm0, %v8987_v34  ;;  %10073 = vst [vmem:[#allocation34_spill] sm:$0xff] %v9029_v47  ;;  %10074 = vst [vmem:[#allocation35_spill] sm:$0xff] %v9031_v48  ;;  %v9039_v50 = vld [vmem:[#allocation3 + $0x110] sm:$0xff]  ;;  %v9048_v52 = vld [vmem:[#allocation3 + $0x1e8] sm:$0xff] }
  0x87   : > { %730 = vmatprep.subr.mxu0 %v8991_v35  ;;  %801 = vmatprep.subr.mxu1 %v8993_v36  ;;  %10075 = vst [vmem:[#allocation36_spill] sm:$0xff] %v9035_v49  ;;  %10076 = vst [vmem:[#allocation37_spill] sm:$0xff] %v9039_v50  ;;  %v9044_v51 = vld [vmem:[%s8913_s23 + $0x10] sm:$0xff]  ;;  %v9050_v53 = vld [vmem:[#allocation3 + $0x1f8] sm:$0xff]  ;;  %p8606_p10 = pnand %p8605_p13, %p8599_p4 }
  0x88   : > { %731 = vmatpush1.msra.mxu0 %v8997_v37  ;;  %802 = vmatpush1.msra.mxu1 %v8999_v38  ;;  %10077 = vst [vmem:[#allocation38_spill] sm:$0xff] %v9048_v52  ;;  %10078 = vst [vmem:[#allocation39_spill] sm:$0xff] %v9050_v53  ;;  %v9054_v54 = vld [vmem:[#allocation3 + $0x1e0] sm:$0xff]  ;;  %v9056_v55 = vld [vmem:[#allocation3 + $0x1f0] sm:$0xff] }
  0x89   : > { %732 = vmatprep.subr.mxu0 %v9005_v39  ;;  %803 = vmatprep.subr.mxu1 %v9007_v40  ;;  %10079 = vst [vmem:[#allocation40_spill] sm:$0xff] %v9054_v54  ;;  %10080 = vst [vmem:[#allocation41_spill] sm:$0xff] %v9056_v55  ;;  %v9062_v56 = vld [vmem:[#allocation3 + $0x1c8] sm:$0xff]  ;;  %v9064_v57 = vld [vmem:[#allocation3 + $0x1d8] sm:$0xff] }
  0x8a   : > { %733 = vmatpush1.msra.mxu0 %v9011_v41  ;;  %804 = vmatpush1.msra.mxu1 %v9013_v42  ;;  %10081 = vst [vmem:[#allocation42_spill] sm:$0xff] %v9062_v56  ;;  %10082 = vst [vmem:[#allocation43_spill] sm:$0xff] %v9064_v57  ;;  %v9068_v58 = vld [vmem:[#allocation3 + $0x1c0] sm:$0xff]  ;;  %v9070_v59 = vld [vmem:[#allocation3 + $0x1d0] sm:$0xff] }
  0x8b   : > { %734 = vmatprep.subr.mxu0 %v9017_v43  ;;  %805 = vmatprep.subr.mxu1 %v9019_v44  ;;  %10083 = vst [vmem:[#allocation44_spill] sm:$0xff] %v9068_v58  ;;  %10084 = vst [vmem:[#allocation45_spill] sm:$0xff] %v9070_v59  ;;  %v9074_v60 = vld [vmem:[#allocation3 + $0x1a8] sm:$0xff]  ;;  %v9076_v61 = vld [vmem:[#allocation3 + $0x1b8] sm:$0xff] }
  0x8c   : > { %735 = vmatpush1.msra.mxu0 %v9023_v45  ;;  %806 = vmatpush1.msra.mxu1 %v9025_v46  ;;  %10085 = vst [vmem:[#allocation46_spill] sm:$0xff] %v9074_v60  ;;  %10086 = vst [vmem:[#allocation47_spill] sm:$0xff] %v9076_v61  ;;  %v9080_v62 = vld [vmem:[#allocation3 + $0x1a0] sm:$0xff]  ;;  %v9082_v63 = vld [vmem:[#allocation3 + $0x1b0] sm:$0xff] }
  0x8d   : > { %736 = vmatprep.subr.mxu0 %v9029_v47  ;;  %807 = vmatprep.subr.mxu1 %v9031_v48  ;;  %10087 = vst [vmem:[#allocation48_spill] sm:$0xff] %v9080_v62  ;;  %10088 = vst [vmem:[#allocation49_spill] sm:$0xff] %v9082_v63 }
  0x8e   : > { %737 = vmatpush1.msra.mxu0 %v9035_v49  ;;  %770 = vmatprep.mubr.f32.mxu0 %v9968_v0 }
  0x8f   : > { %808 = vmatpush1.msra.mxu1 %v9039_v50  ;;  %841 = vmatprep.mubr.f32.mxu1 %v9968_v0  ;;  %v9086_v0 = vld [vmem:[#allocation3 + $0x188] sm:$0xff] }
  0x90   : > { %7540 = vmatmul.mubr.msk.f32.vlgmr.msra.gmra.mxu0 %vm395_vm0, %v9044_v51  ;;  %7541 = vmatmul.mubr.msk.f32.vlgmr.msra.gmra.mxu1 %vm395_vm0, %v9044_v51  ;;  %10089 = vst [vmem:[#allocation50_spill] sm:$0xff] %v9086_v0 }
  0x91   : > { %896 = vmatprep.subr.mxu0 %v9048_v52  ;;  %967 = vmatprep.subr.mxu1 %v9050_v53  ;;  %v9133_v53 = vld [vmem:[#allocation3 + $0x238] sm:$0xff]  ;;  %v9137_v52 = vld [vmem:[#allocation3 + $0x220] sm:$0xff] }
  0x92   : > { %897 = vmatpush1.msra.mxu0 %v9054_v54  ;;  %968 = vmatpush1.msra.mxu1 %v9056_v55  ;;  %v9088_v55 = vld [vmem:[#allocation3 + $0x198] sm:$0xff]  ;;  %v9092_v54 = vld [vmem:[#allocation3 + $0x180] sm:$0xff] }
  0x93   : > { %898 = vmatprep.subr.mxu0 %v9062_v56  ;;  %969 = vmatprep.subr.mxu1 %v9064_v57  ;;  %10090 = vst [vmem:[#allocation51_spill] sm:$0xff] %v9088_v55  ;;  %10091 = vst [vmem:[#allocation52_spill] sm:$0xff] %v9092_v54  ;;  %v9096_v57 = vld [vmem:[#allocation3 + $0x190] sm:$0xff]  ;;  %v9099_v56 = vld [vmem:[%s8913_s23 + $0x18] sm:$0xff] }
  0x94   : > { %899 = vmatpush1.msra.mxu0 %v9068_v58  ;;  %970 = vmatpush1.msra.mxu1 %v9070_v59  ;;  %10092 = vst [vmem:[#allocation53_spill] sm:$0xff] %v9096_v57  ;;  %10093 = vst [vmem:[#allocation54_spill] sm:$0xff] %v9099_v56  ;;  %v10094_v59 = vmov 0.0   ;;  %v9131_v58 = vld [vmem:[#allocation3 + $0x228] sm:$0xff] }
  0x95   : > { %900 = vmatprep.subr.mxu0 %v9074_v60  ;;  %971 = vmatprep.subr.mxu1 %v9076_v61  ;;  %v9105_v60 = vld [vmem:[#allocation3 + $0x268] sm:$0xff]  ;;  %v9107_v61 = vld [vmem:[#allocation3 + $0x278] sm:$0xff] }
  0x96   : > { %901 = vmatpush1.msra.mxu0 %v9080_v62  ;;  %972 = vmatpush1.msra.mxu1 %v9082_v63  ;;  %10095 = vst [vmem:[#allocation55_spill] sm:$0xff] %v9105_v60  ;;  %10096 = vst [vmem:[#allocation56_spill] sm:$0xff] %v9107_v61  ;;  %v9111_v63 = vld [vmem:[#allocation3 + $0x260] sm:$0xff]  ;;  %v9113_v62 = vld [vmem:[#allocation3 + $0x270] sm:$0xff] }
  0x97   : > { %902 = vmatprep.subr.mxu0 %v9086_v0  ;;  %973 = vmatprep.subr.mxu1 %v9088_v55  ;;  %10097 = vst [vmem:[#allocation57_spill] sm:$0xff] %v9111_v63  ;;  %10098 = vst [vmem:[#allocation58_spill] sm:$0xff] %v9113_v62  ;;  %v9121_v55 = vld [vmem:[#allocation3 + $0x258] sm:$0xff]  ;;  %v9127_v0 = vld [vmem:[#allocation3 + $0x250] sm:$0xff] }
  0x98   : > { %903 = vmatpush1.msra.mxu0 %v9092_v54  ;;  %936 = vmatprep.mubr.f32.mxu0 %v10094_v59  ;;  %v9119_v54 = vld [vmem:[#allocation3 + $0x248] sm:$0xff]  ;;  %10099 = vst [vmem:[#allocation59_spill] sm:$0xff] %v9121_v55 }
  0x99   : > { %974 = vmatpush1.msra.mxu1 %v9096_v57  ;;  %1007 = vmatprep.mubr.f32.mxu1 %v10094_v59  ;;  %v9125_v57 = vld [vmem:[#allocation3 + $0x240] sm:$0xff] }
  0x9a   : > { %7542 = vmatmul.mubr.msk.f32.vlgmr.msra.gmra.mxu0 %vm395_vm0, %v9099_v56  ;;  %7543 = vmatmul.mubr.msk.f32.vlgmr.msra.gmra.mxu1 %vm395_vm0, %v9099_v56  ;;  %10100 = vst [vmem:[#allocation60_spill] sm:$0xff] %v9125_v57 }
  0x9b   : > { %1062 = vmatprep.subr.mxu0 %v9105_v60  ;;  %1133 = vmatprep.subr.mxu1 %v9107_v61  ;;  %v9139_v60 = vld [vmem:[#allocation3 + $0x230] sm:$0xff]  ;;  %v9143_v61 = vld [vmem:[#allocation3 + $0x208] sm:$0xff] }
  0x9c   : > { %1063 = vmatpush1.msra.mxu0 %v9111_v63  ;;  %1134 = vmatpush1.msra.mxu1 %v9113_v62  ;;  %v9145_v63 = vld [vmem:[#allocation3 + $0x218] sm:$0xff]  ;;  %v9149_v62 = vld [vmem:[#allocation3 + $0x200] sm:$0xff] }
  0x9d   : > { %1064 = vmatprep.subr.mxu0 %v9119_v54  ;;  %1135 = vmatprep.subr.mxu1 %v9121_v55  ;;  %v9152_v55 = vrot.slane %v8987_v34, 1  ;;  %v10101_v34 = vld [vmem:[#allocation38_spill] sm:$0xff] }
  0x9e   : > { %1065 = vmatpush1.msra.mxu0 %v9125_v57  ;;  %1136 = vmatpush1.msra.mxu1 %v9127_v0  ;;  %v9156_v57 = vld [vmem:[#allocation3 + $0x210] sm:$0xff] }
  0x9f   : > { %1066 = vmatprep.subr.mxu0 %v9131_v58  ;;  %1137 = vmatprep.subr.mxu1 %v9133_v53 }
  0xa0   : > { %1067 = vmatpush1.msra.mxu0 %v9137_v52  ;;  %1138 = vmatpush1.msra.mxu1 %v9139_v60 }
  0xa1   : > { %1068 = vmatprep.subr.mxu0 %v9143_v61  ;;  %1139 = vmatprep.subr.mxu1 %v9145_v63 }
  0xa2   : > { %1069 = vmatpush1.msra.mxu0 %v9149_v62  ;;  %1102 = vmatprep.mubr.f32.mxu0 %v10094_v59 }
  0xa3   : > { %1140 = vmatpush1.msra.mxu1 %v9156_v57  ;;  %1173 = vmatprep.mubr.f32.mxu1 %v10094_v59 }
  0xa4   : > { %7544 = vmatmul.mubr.msk.f32.vlgmr.msra.gmra.mxu0 %vm395_vm0, %v9152_v55  ;;  %7545 = vmatmul.mubr.msk.f32.vlgmr.msra.gmra.mxu1 %vm395_vm0, %v9152_v55 }
  0xa5   : > { %1208 = vmatprep.subr.mxu0 %v8880_v1  ;;  %1279 = vmatprep.subr.mxu1 %v8882_v2 }
  0xa6   : > { %1209 = vmatpush1.msra.mxu0 %v8884_v3  ;;  %1280 = vmatpush1.msra.mxu1 %v8888_v4 }
  0xa7   : > { %1210 = vmatprep.subr.mxu0 %v8890_v5  ;;  %1281 = vmatprep.subr.mxu1 %v8892_v6 }
  0xa8   : > { %1211 = vmatpush1.msra.mxu0 %v8896_v7  ;;  %1282 = vmatpush1.msra.mxu1 %v8898_v8 }
  0xa9   : > { %1212 = vmatprep.subr.mxu0 %v8900_v9  ;;  %1283 = vmatprep.subr.mxu1 %v8904_v10 }
  0xaa   : > { %1213 = vmatpush1.msra.mxu0 %v8906_v11  ;;  %1284 = vmatpush1.msra.mxu1 %v8908_v12 }
  0xab   : > { %1214 = vmatprep.subr.mxu0 %v8917_v13  ;;  %1285 = vmatprep.subr.mxu1 %v8919_v14 }
  0xac   : > { %1215 = vmatpush1.msra.mxu0 %v8923_v15  ;;  %1248 = vmatprep.mubr.f32.mxu0 %v10094_v59 }
  0xad   : > { %1286 = vmatpush1.msra.mxu1 %v8925_v16  ;;  %7546 = vmatmul.mubr.msk.f32.vlgmr.msra.gmra.mxu0 %vm395_vm0, %v9044_v51 }
  0xae   : > { %1319 = vmatprep.mubr.f32.mxu1 %v10094_v59  ;;  %1350 = vmatprep.subr.mxu0 %v8932_v18 }
  0xaf   : > { %1421 = vmatprep.subr.mxu1 %v8936_v19  ;;  %7547 = vmatmul.mubr.msk.f32.vlgmr.msra.gmra.mxu1 %vm395_vm0, %v9044_v51 }
  0xb0   : > { %1351 = vmatpush1.msra.mxu0 %v8940_v20  ;;  %1422 = vmatpush1.msra.mxu1 %v8942_v21 }
  0xb1   : > { %1352 = vmatprep.subr.mxu0 %v8947_v22  ;;  %1423 = vmatprep.subr.mxu1 %v8949_v23 }
  0xb2   : > { %1353 = vmatpush1.msra.mxu0 %v8954_v24  ;;  %1424 = vmatpush1.msra.mxu1 %v8956_v25 }
  0xb3   : > { %1354 = vmatprep.subr.mxu0 %v8960_v26  ;;  %1425 = vmatprep.subr.mxu1 %v8962_v27 }
  0xb4   : > { %1355 = vmatpush1.msra.mxu0 %v8966_v28  ;;  %1426 = vmatpush1.msra.mxu1 %v8968_v29 }
  0xb5   : > { %1356 = vmatprep.subr.mxu0 %v8972_v30  ;;  %1427 = vmatprep.subr.mxu1 %v8974_v31 }
  0xb6   : > { %1357 = vmatpush1.msra.mxu0 %v8978_v32  ;;  %1390 = vmatprep.mubr.f32.mxu0 %v10094_v59 }
  0xb7   : > { %1428 = vmatpush1.msra.mxu1 %v8982_v33  ;;  %1461 = vmatprep.mubr.f32.mxu1 %v10094_v59 }
  0xb8   : > { %7548 = vmatmul.mubr.msk.f32.vlgmr.msra.gmra.mxu0 %vm395_vm0, %v8930_v17  ;;  %7549 = vmatmul.mubr.msk.f32.vlgmr.msra.gmra.mxu1 %vm395_vm0, %v8930_v17 }
  0xb9   : > { %1492 = vmatprep.subr.mxu0 %v8991_v35  ;;  %1563 = vmatprep.subr.mxu1 %v8993_v36 }
  0xba   : > { %1493 = vmatpush1.msra.mxu0 %v8997_v37  ;;  %1564 = vmatpush1.msra.mxu1 %v8999_v38 }
  0xbb   : > { %1494 = vmatprep.subr.mxu0 %v9005_v39  ;;  %1565 = vmatprep.subr.mxu1 %v9007_v40 }
  0xbc   : > { %1495 = vmatpush1.msra.mxu0 %v9011_v41  ;;  %1566 = vmatpush1.msra.mxu1 %v9013_v42  ;;  %v10110_v42 = vld [vmem:[#allocation47_spill] sm:$0xff]  ;;  %v10111_v41 = vld [vmem:[#allocation48_spill] sm:$0xff] }
  0xbd   : > { %1496 = vmatprep.subr.mxu0 %v9017_v43  ;;  %1567 = vmatprep.subr.mxu1 %v9019_v44  ;;  %v10108_v44 = vld [vmem:[#allocation45_spill] sm:$0xff]  ;;  %v10109_v43 = vld [vmem:[#allocation46_spill] sm:$0xff] }
  0xbe   : > { %1497 = vmatpush1.msra.mxu0 %v9023_v45  ;;  %1568 = vmatpush1.msra.mxu1 %v9025_v46  ;;  %v10102_v46 = vld [vmem:[#allocation39_spill] sm:$0xff] }
  0xbf   : > { %1498 = vmatprep.subr.mxu0 %v9029_v47  ;;  %1569 = vmatprep.subr.mxu1 %v9031_v48  ;;  %v10103_v47 = vld [vmem:[#allocation40_spill] sm:$0xff]  ;;  %v10104_v48 = vld [vmem:[#allocation41_spill] sm:$0xff]  ;;  %v10106_v45 = vld [vmem:[#allocation43_spill] sm:$0xff] }
  0xc0   : > { %1499 = vmatpush1.msra.mxu0 %v9035_v49  ;;  %1532 = vmatprep.mubr.f32.mxu0 %v10094_v59  ;;  %v10105_v49 = vld [vmem:[#allocation42_spill] sm:$0xff] }
  0xc1   : > { %1570 = vmatpush1.msra.mxu1 %v9039_v50  ;;  %1603 = vmatprep.mubr.f32.mxu1 %v10094_v59  ;;  %v10107_v50 = vld [vmem:[#allocation44_spill] sm:$0xff] }
  0xc2   : > { %7550 = vmatmul.mubr.msk.f32.vlgmr.msra.gmra.mxu0 %vm395_vm0, %v9099_v56  ;;  %7551 = vmatmul.mubr.msk.f32.vlgmr.msra.gmra.mxu1 %vm395_vm0, %v9099_v56 }
  0xc3   : > { %1638 = vmatprep.subr.mxu0 %v10101_v34  ;;  %1709 = vmatprep.subr.mxu1 %v10102_v46  ;;  %v10112_v34 = vld [vmem:[#allocation49_spill] sm:$0xff]  ;;  %v10113_v46 = vld [vmem:[#allocation50_spill] sm:$0xff] }
  0xc4   : > { %1639 = vmatpush1.msra.mxu0 %v10103_v47  ;;  %1710 = vmatpush1.msra.mxu1 %v10104_v48  ;;  %v10114_v47 = vld [vmem:[#allocation51_spill] sm:$0xff]  ;;  %v10115_v48 = vld [vmem:[#allocation52_spill] sm:$0xff] }
  0xc5   : > { %1640 = vmatprep.subr.mxu0 %v10105_v49  ;;  %1711 = vmatprep.subr.mxu1 %v10106_v45  ;;  %v10116_v45 = vld [vmem:[#allocation53_spill] sm:$0xff] }
  0xc6   : > { %1641 = vmatpush1.msra.mxu0 %v10107_v50  ;;  %1712 = vmatpush1.msra.mxu1 %v10108_v44 }
  0xc7   : > { %1642 = vmatprep.subr.mxu0 %v10109_v43  ;;  %1713 = vmatprep.subr.mxu1 %v10110_v42 }
  0xc8   : > { %1643 = vmatpush1.msra.mxu0 %v10111_v41  ;;  %1714 = vmatpush1.msra.mxu1 %v10112_v34  ;;  %v10117_v41 = vld [vmem:[#allocation55_spill] sm:$0xff]  ;;  %v10118_v34 = vld [vmem:[#allocation56_spill] sm:$0xff] }
  0xc9   : > { %1644 = vmatprep.subr.mxu0 %v10113_v46  ;;  %1715 = vmatprep.subr.mxu1 %v10114_v47  ;;  %v10119_v46 = vld [vmem:[#allocation57_spill] sm:$0xff]  ;;  %v10120_v47 = vld [vmem:[#allocation58_spill] sm:$0xff] }
  0xca   : > { %1645 = vmatpush1.msra.mxu0 %v10115_v48  ;;  %1678 = vmatprep.mubr.f32.mxu0 %v10094_v59  ;;  %v10121_v48 = vld [vmem:[#allocation59_spill] sm:$0xff] }
  0xcb   : > { %1716 = vmatpush1.msra.mxu1 %v10116_v45  ;;  %1749 = vmatprep.mubr.f32.mxu1 %v10094_v59  ;;  %v10122_v45 = vld [vmem:[#allocation60_spill] sm:$0xff] }
  0xcc   : > { %7552 = vmatmul.mubr.msk.f32.vlgmr.msra.gmra.mxu0 %vm395_vm0, %v9152_v55  ;;  %7553 = vmatmul.mubr.msk.f32.vlgmr.msra.gmra.mxu1 %vm395_vm0, %v9152_v55 }
  0xcd   : > { %1787 = vmatprep.subr.mxu0 %v10117_v41  ;;  %1858 = vmatprep.subr.mxu1 %v10118_v34  ;;  %v9267_v41 = vrot.slane %v8930_v17, 1  ;;  %v10123_v17 = vld [vmem:[#allocation28_spill] sm:$0xff] }
  0xce   : > { %1788 = vmatpush1.msra.mxu0 %v10119_v46  ;;  %1859 = vmatpush1.msra.mxu1 %v10120_v47 }
  0xcf   : > { %1789 = vmatprep.subr.mxu0 %v9119_v54  ;;  %1860 = vmatprep.subr.mxu1 %v10121_v48 }
  0xd0   : > { %1790 = vmatpush1.msra.mxu0 %v10122_v45  ;;  %1861 = vmatpush1.msra.mxu1 %v9127_v0 }
  0xd1   : > { %1791 = vmatprep.subr.mxu0 %v9131_v58  ;;  %1862 = vmatprep.subr.mxu1 %v9133_v53 }
  0xd2   : > { %1792 = vmatpush1.msra.mxu0 %v9137_v52  ;;  %1863 = vmatpush1.msra.mxu1 %v9139_v60 }
  0xd3   : > { %1793 = vmatprep.subr.mxu0 %v9143_v61  ;;  %1864 = vmatprep.subr.mxu1 %v9145_v63 }
  0xd4   : > { %1794 = vmatpush1.msra.mxu0 %v9149_v62  ;;  %1827 = vmatprep.mubr.f32.mxu0 %v10094_v59 }
  0xd5   : > { %1865 = vmatpush1.msra.mxu1 %v9156_v57  ;;  %1898 = vmatprep.mubr.f32.mxu1 %v10094_v59 }
  0xd6   : > { %7554 = vmatmul.mubr.msk.f32.vlgmr.msra.gmra.mxu0 %vm395_vm0, %v9267_v41  ;;  %7555 = vmatmul.mubr.msk.f32.vlgmr.msra.gmra.mxu1 %vm395_vm0, %v9267_v41 }
  0xd7   : > { %1933 = vmatprep.subr.mxu0 %v8880_v1  ;;  %2004 = vmatprep.subr.mxu1 %v8882_v2 }
  0xd8   : > { %1934 = vmatpush1.msra.mxu0 %v8884_v3  ;;  %2005 = vmatpush1.msra.mxu1 %v8888_v4 }
  0xd9   : > { %1935 = vmatprep.subr.mxu0 %v8890_v5  ;;  %2006 = vmatprep.subr.mxu1 %v8892_v6 }
  0xda   : > { %1936 = vmatpush1.msra.mxu0 %v8896_v7  ;;  %2007 = vmatpush1.msra.mxu1 %v8898_v8 }
  0xdb   : > { %1937 = vmatprep.subr.mxu0 %v8900_v9  ;;  %2008 = vmatprep.subr.mxu1 %v8904_v10 }
  0xdc   : > { %1938 = vmatpush1.msra.mxu0 %v8906_v11  ;;  %2009 = vmatpush1.msra.mxu1 %v8908_v12 }
  0xdd   : > { %1939 = vmatprep.subr.mxu0 %v8917_v13  ;;  %2010 = vmatprep.subr.mxu1 %v8919_v14 }
  0xde   : > { %1940 = vmatpush1.msra.mxu0 %v8923_v15  ;;  %1973 = vmatprep.mubr.f32.mxu0 %v10094_v59 }
  0xdf   : > { %2011 = vmatpush1.msra.mxu1 %v8925_v16  ;;  %7556 = vmatmul.mubr.msk.f32.vlgmr.msra.gmra.mxu0 %vm395_vm0, %v9099_v56 }
  0xe0   : > { %2044 = vmatprep.mubr.f32.mxu1 %v10094_v59  ;;  %2075 = vmatprep.subr.mxu0 %v8932_v18 }
  0xe1   : > { %2146 = vmatprep.subr.mxu1 %v8936_v19  ;;  %7557 = vmatmul.mubr.msk.f32.vlgmr.msra.gmra.mxu1 %vm395_vm0, %v9099_v56  ;;  %v10124_v56 = vld [vmem:[#allocation29_spill] sm:$0xff] }
  0xe2   : > { %2076 = vmatpush1.msra.mxu0 %v8940_v20  ;;  %2147 = vmatpush1.msra.mxu1 %v8942_v21 }
  0xe3   : > { %2077 = vmatprep.subr.mxu0 %v8947_v22  ;;  %2148 = vmatprep.subr.mxu1 %v8949_v23 }
  0xe4   : > { %2078 = vmatpush1.msra.mxu0 %v8954_v24  ;;  %2149 = vmatpush1.msra.mxu1 %v8956_v25 }
  0xe5   : > { %2079 = vmatprep.subr.mxu0 %v8960_v26  ;;  %2150 = vmatprep.subr.mxu1 %v8962_v27 }
  0xe6   : > { %2080 = vmatpush1.msra.mxu0 %v8966_v28  ;;  %2151 = vmatpush1.msra.mxu1 %v8968_v29 }
  0xe7   : > { %2081 = vmatprep.subr.mxu0 %v8972_v30  ;;  %2152 = vmatprep.subr.mxu1 %v8974_v31  ;;  %v10127_v31 = vld [vmem:[#allocation32_spill] sm:$0xff] }
  0xe8   : > { %2082 = vmatpush1.msra.mxu0 %v8978_v32  ;;  %2115 = vmatprep.mubr.f32.mxu0 %v10094_v59  ;;  %v10126_v32 = vld [vmem:[#allocation31_spill] sm:$0xff] }
  0xe9   : > { %2153 = vmatpush1.msra.mxu1 %v8982_v33  ;;  %2186 = vmatprep.mubr.f32.mxu1 %v10094_v59  ;;  %v10125_v33 = vld [vmem:[#allocation30_spill] sm:$0xff] }
  0xea   : > { %7558 = vmatmul.mubr.msk.f32.vlgmr.msra.gmra.mxu0 %vm395_vm0, %v9044_v51  ;;  %7559 = vmatmul.mubr.msk.f32.vlgmr.msra.gmra.mxu1 %vm395_vm0, %v9044_v51 }
  0xeb   : > { %2217 = vmatprep.subr.mxu0 %v8991_v35  ;;  %2288 = vmatprep.subr.mxu1 %v8993_v36  ;;  %v10128_v35 = vld [vmem:[#allocation33_spill] sm:$0xff]  ;;  %v10129_v36 = vld [vmem:[#allocation34_spill] sm:$0xff] }
  0xec   : > { %2218 = vmatpush1.msra.mxu0 %v8997_v37  ;;  %2289 = vmatpush1.msra.mxu1 %v8999_v38  ;;  %v10130_v37 = vld [vmem:[#allocation35_spill] sm:$0xff]  ;;  %v10131_v38 = vld [vmem:[#allocation36_spill] sm:$0xff] }
  0xed   : > { %2219 = vmatprep.subr.mxu0 %v9005_v39  ;;  %2290 = vmatprep.subr.mxu1 %v9007_v40  ;;  %v10132_v40 = vld [vmem:[#allocation37_spill] sm:$0xff] }
  0xee   : > { %2220 = vmatpush1.msra.mxu0 %v10123_v17  ;;  %2291 = vmatpush1.msra.mxu1 %v10124_v56 }
  0xef   : > { %2221 = vmatprep.subr.mxu0 %v10125_v33  ;;  %2292 = vmatprep.subr.mxu1 %v10126_v32 }
  0xf0   : > { %2222 = vmatpush1.msra.mxu0 %v10127_v31  ;;  %2293 = vmatpush1.msra.mxu1 %v10128_v35  ;;  %v10133_v31 = vld [vmem:[#allocation38_spill] sm:$0xff]  ;;  %v10134_v35 = vld [vmem:[#allocation39_spill] sm:$0xff] }
  0xf1   : > { %2223 = vmatprep.subr.mxu0 %v10129_v36  ;;  %2294 = vmatprep.subr.mxu1 %v10130_v37  ;;  %v10135_v36 = vld [vmem:[#allocation40_spill] sm:$0xff]  ;;  %v10136_v37 = vld [vmem:[#allocation41_spill] sm:$0xff] }
  0xf2   : > { %2224 = vmatpush1.msra.mxu0 %v10131_v38  ;;  %2257 = vmatprep.mubr.f32.mxu0 %v10094_v59  ;;  %v10137_v38 = vld [vmem:[#allocation43_spill] sm:$0xff] }
  0xf3   : > { %2295 = vmatpush1.msra.mxu1 %v10132_v40  ;;  %2328 = vmatprep.mubr.f32.mxu1 %v10094_v59  ;;  %v10138_v40 = vld [vmem:[#allocation48_spill] sm:$0xff] }
  0xf4   : > { %7560 = vmatmul.mubr.msk.f32.vlgmr.msra.gmra.mxu0 %vm395_vm0, %v9152_v55  ;;  %7561 = vmatmul.mubr.msk.f32.vlgmr.msra.gmra.mxu1 %vm395_vm0, %v9152_v55 }
  0xf5   : > { %2363 = vmatprep.subr.mxu0 %v10133_v31  ;;  %2434 = vmatprep.subr.mxu1 %v10134_v35  ;;  %v10139_v31 = vld [vmem:[#allocation49_spill] sm:$0xff]  ;;  %v10140_v35 = vld [vmem:[#allocation50_spill] sm:$0xff] }
  0xf6   : > { %2364 = vmatpush1.msra.mxu0 %v10135_v36  ;;  %2435 = vmatpush1.msra.mxu1 %v10136_v37  ;;  %v10141_v36 = vld [vmem:[#allocation51_spill] sm:$0xff]  ;;  %v10142_v37 = vld [vmem:[#allocation52_spill] sm:$0xff] }
  0xf7   : > { %2365 = vmatprep.subr.mxu0 %v10105_v49  ;;  %2436 = vmatprep.subr.mxu1 %v10137_v38  ;;  %v10143_v38 = vld [vmem:[#allocation53_spill] sm:$0xff] }
  0xf8   : > { %2366 = vmatpush1.msra.mxu0 %v10107_v50  ;;  %2437 = vmatpush1.msra.mxu1 %v10108_v44 }
  0xf9   : > { %2367 = vmatprep.subr.mxu0 %v10109_v43  ;;  %2438 = vmatprep.subr.mxu1 %v10110_v42 }
  0xfa   : > { %2368 = vmatpush1.msra.mxu0 %v10138_v40  ;;  %2439 = vmatpush1.msra.mxu1 %v10139_v31  ;;  %v10144_v40 = vld [vmem:[#allocation55_spill] sm:$0xff] }
  0xfb   : > { %2369 = vmatprep.subr.mxu0 %v10140_v35  ;;  %2440 = vmatprep.subr.mxu1 %v10141_v36 }
  0xfc   : > { %2370 = vmatpush1.msra.mxu0 %v10142_v37  ;;  %2403 = vmatprep.mubr.f32.mxu0 %v10094_v59 }
  0xfd   : > { %2441 = vmatpush1.msra.mxu1 %v10143_v38  ;;  %2474 = vmatprep.mubr.f32.mxu1 %v10094_v59 }
  0xfe   : > { %7562 = vmatmul.mubr.msk.f32.vlgmr.msra.gmra.mxu0 %vm395_vm0, %v9267_v41  ;;  %7563 = vmatmul.mubr.msk.f32.vlgmr.msra.gmra.mxu1 %vm395_vm0, %v9267_v41 }
  0xff   : > { %2512 = vmatprep.subr.mxu0 %v10144_v40  ;;  %2583 = vmatprep.subr.mxu1 %v10118_v34 }
 0x100   : > { %2513 = vmatpush1.msra.mxu0 %v10119_v46  ;;  %2584 = vmatpush1.msra.mxu1 %v10120_v47  ;;  %v9382_v46 = vrot.slane %v9044_v51, 1 }
 0x101   : > { %2514 = vmatprep.subr.mxu0 %v9119_v54  ;;  %2585 = vmatprep.subr.mxu1 %v10121_v48 }
 0x102   : > { %2515 = vmatpush1.msra.mxu0 %v10122_v45  ;;  %2586 = vmatpush1.msra.mxu1 %v9127_v0 }
 0x103   : > { %2516 = vmatprep.subr.mxu0 %v9131_v58  ;;  %2587 = vmatprep.subr.mxu1 %v9133_v53 }
 0x104   : > { %2517 = vmatpush1.msra.mxu0 %v9137_v52  ;;  %2588 = vmatpush1.msra.mxu1 %v9139_v60 }
 0x105   : > { %2518 = vmatprep.subr.mxu0 %v9143_v61  ;;  %2589 = vmatprep.subr.mxu1 %v9145_v63 }
 0x106   : > { %2519 = vmatpush1.msra.mxu0 %v9149_v62  ;;  %2552 = vmatprep.mubr.f32.mxu0 %v10094_v59 }
 0x107   : > { %2590 = vmatpush1.msra.mxu1 %v9156_v57  ;;  %2623 = vmatprep.mubr.f32.mxu1 %v10094_v59 }
 0x108   : > { %7564 = vmatmul.mubr.msk.f32.vlgmr.msra.gmra.mxu0 %vm395_vm0, %v9382_v46  ;;  %7565 = vmatmul.mubr.msk.f32.vlgmr.msra.gmra.mxu1 %vm395_vm0, %v9382_v46 }
 0x109   : > { %2658 = vmatprep.subr.mxu0 %v8880_v1  ;;  %2729 = vmatprep.subr.mxu1 %v8882_v2  ;;  %v10145_v1 = vld [vmem:[#allocation20_spill] sm:$0xff]  ;;  %v10146_v2 = vld [vmem:[#allocation21_spill] sm:$0xff] }
 0x10a   : > { %2659 = vmatpush1.msra.mxu0 %v8884_v3  ;;  %2730 = vmatpush1.msra.mxu1 %v8888_v4  ;;  %v10147_v3 = vld [vmem:[#allocation22_spill] sm:$0xff] }
 0x10b   : > { %2660 = vmatprep.subr.mxu0 %v8890_v5  ;;  %2731 = vmatprep.subr.mxu1 %v8892_v6  ;;  %v10148_v4 = vld [vmem:[#allocation54_spill] sm:$0xff]  ;;  %v10149_v5 = vld [vmem:[#allocation23_spill] sm:$0xff]  ;;  %v10150_v6 = vld [vmem:[#allocation24_spill] sm:$0xff] }
 0x10c   : > { %2661 = vmatpush1.msra.mxu0 %v8896_v7  ;;  %2732 = vmatpush1.msra.mxu1 %v8898_v8  ;;  %v10151_v7 = vld [vmem:[#allocation25_spill] sm:$0xff]  ;;  %v10152_v8 = vld [vmem:[#allocation26_spill] sm:$0xff] }
 0x10d   : > { %2662 = vmatprep.subr.mxu0 %v8900_v9  ;;  %2733 = vmatprep.subr.mxu1 %v8904_v10  ;;  %v10153_v9 = vld [vmem:[#allocation27_spill] sm:$0xff]  ;;  %v10154_v10 = vld [vmem:[#allocation32_spill] sm:$0xff] }
 0x10e   : > { %2663 = vmatpush1.msra.mxu0 %v8906_v11  ;;  %2734 = vmatpush1.msra.mxu1 %v8908_v12  ;;  %v10155_v11 = vld [vmem:[#allocation33_spill] sm:$0xff]  ;;  %v10156_v12 = vld [vmem:[#allocation34_spill] sm:$0xff] }
 0x10f   : > { %2664 = vmatprep.subr.mxu0 %v8917_v13  ;;  %2735 = vmatprep.subr.mxu1 %v8919_v14  ;;  %v10157_v13 = vld [vmem:[#allocation35_spill] sm:$0xff]  ;;  %v10158_v14 = vld [vmem:[#allocation36_spill] sm:$0xff] }
 0x110   : > { %2665 = vmatpush1.msra.mxu0 %v8923_v15  ;;  %2698 = vmatprep.mubr.f32.mxu0 %v10094_v59  ;;  %v10159_v15 = vld [vmem:[#allocation37_spill] sm:$0xff] }
 0x111   : > { %2736 = vmatpush1.msra.mxu1 %v8925_v16  ;;  %7566 = vmatmul.mubr.msk.f32.vlgmr.msra.gmra.mxu0 %vm395_vm0, %v9152_v55  ;;  %v10160_v16 = vld [vmem:[#allocation38_spill] sm:$0xff] }
 0x112   : > { %2769 = vmatprep.mubr.f32.mxu1 %v10094_v59  ;;  %2800 = vmatprep.subr.mxu0 %v8932_v18  ;;  %v10161_v18 = vld [vmem:[#allocation39_spill] sm:$0xff] }
 0x113   : > { %2871 = vmatprep.subr.mxu1 %v8936_v19  ;;  %7567 = vmatmul.mubr.msk.f32.vlgmr.msra.gmra.mxu1 %vm395_vm0, %v9152_v55  ;;  %v10162_v19 = vld [vmem:[#allocation40_spill] sm:$0xff] }
 0x114   : > { %2801 = vmatpush1.msra.mxu0 %v8940_v20  ;;  %2872 = vmatpush1.msra.mxu1 %v8942_v21  ;;  %v10163_v20 = vld [vmem:[#allocation41_spill] sm:$0xff]  ;;  %v10164_v21 = vld [vmem:[#allocation43_spill] sm:$0xff] }
 0x115   : > { %2802 = vmatprep.subr.mxu0 %v8947_v22  ;;  %2873 = vmatprep.subr.mxu1 %v8949_v23  ;;  %v10165_v22 = vld [vmem:[#allocation48_spill] sm:$0xff]  ;;  %v10166_v23 = vld [vmem:[#allocation57_spill] sm:$0xff] }
 0x116   : > { %2803 = vmatpush1.msra.mxu0 %v8954_v24  ;;  %2874 = vmatpush1.msra.mxu1 %v8956_v25  ;;  %v3210_v24 = vrot.slane %v10148_v4, 1 }
 0x117   : > { %2804 = vmatprep.subr.mxu0 %v8960_v26  ;;  %2875 = vmatprep.subr.mxu1 %v8962_v27 }
 0x118   : > { %2805 = vmatpush1.msra.mxu0 %v8966_v28  ;;  %2876 = vmatpush1.msra.mxu1 %v8968_v29 }
 0x119   : > { %2806 = vmatprep.subr.mxu0 %v8972_v30  ;;  %2877 = vmatprep.subr.mxu1 %v10145_v1 }
 0x11a   : > { %2807 = vmatpush1.msra.mxu0 %v10146_v2  ;;  %2840 = vmatprep.mubr.f32.mxu0 %v10094_v59 }
 0x11b   : > { %2878 = vmatpush1.msra.mxu1 %v10147_v3  ;;  %2911 = vmatprep.mubr.f32.mxu1 %v10094_v59 }
 0x11c   : > { %7568 = vmatmul.mubr.msk.f32.vlgmr.msra.gmra.mxu0 %vm395_vm0, %v10148_v4  ;;  %7569 = vmatmul.mubr.msk.f32.vlgmr.msra.gmra.mxu1 %vm395_vm0, %v10148_v4 }
 0x11d   : > { %2942 = vmatprep.subr.mxu0 %v10149_v5  ;;  %3013 = vmatprep.subr.mxu1 %v10150_v6 }
 0x11e   : > { %2943 = vmatpush1.msra.mxu0 %v10151_v7  ;;  %3014 = vmatpush1.msra.mxu1 %v10152_v8 }
 0x11f   : > { %2944 = vmatprep.subr.mxu0 %v9005_v39  ;;  %3015 = vmatprep.subr.mxu1 %v10153_v9 }
 0x120   : > { %2945 = vmatpush1.msra.mxu0 %v10123_v17  ;;  %3016 = vmatpush1.msra.mxu1 %v10124_v56 }
 0x121   : > { %2946 = vmatprep.subr.mxu0 %v10125_v33  ;;  %3017 = vmatprep.subr.mxu1 %v10126_v32 }
 0x122   : > { %2947 = vmatpush1.msra.mxu0 %v10154_v10  ;;  %3018 = vmatpush1.msra.mxu1 %v10155_v11 }
 0x123   : > { %2948 = vmatprep.subr.mxu0 %v10156_v12  ;;  %3019 = vmatprep.subr.mxu1 %v10157_v13 }
 0x124   : > { %2949 = vmatpush1.msra.mxu0 %v10158_v14  ;;  %2982 = vmatprep.mubr.f32.mxu0 %v10094_v59 }
 0x125   : > { %3020 = vmatpush1.msra.mxu1 %v10159_v15  ;;  %3053 = vmatprep.mubr.f32.mxu1 %v10094_v59 }
 0x126   : > { %7570 = vmatmul.mubr.msk.f32.vlgmr.msra.gmra.mxu0 %vm395_vm0, %v9267_v41  ;;  %7571 = vmatmul.mubr.msk.f32.vlgmr.msra.gmra.mxu1 %vm395_vm0, %v9267_v41 }
 0x127   : > { %3088 = vmatprep.subr.mxu0 %v10160_v16  ;;  %3159 = vmatprep.subr.mxu1 %v10161_v18 }
 0x128   : > { %3089 = vmatpush1.msra.mxu0 %v10162_v19  ;;  %3160 = vmatpush1.msra.mxu1 %v10163_v20 }
 0x129   : > { %3090 = vmatprep.subr.mxu0 %v10105_v49  ;;  %3161 = vmatprep.subr.mxu1 %v10164_v21 }
 0x12a   : > { %3091 = vmatpush1.msra.mxu0 %v10107_v50  ;;  %3162 = vmatpush1.msra.mxu1 %v10108_v44 }
 0x12b   : > { %3092 = vmatprep.subr.mxu0 %v10109_v43  ;;  %3163 = vmatprep.subr.mxu1 %v10110_v42 }
 0x12c   : > { %3093 = vmatpush1.msra.mxu0 %v10165_v22  ;;  %3164 = vmatpush1.msra.mxu1 %v10139_v31 }
 0x12d   : > { %3094 = vmatprep.subr.mxu0 %v10140_v35  ;;  %3165 = vmatprep.subr.mxu1 %v10141_v36 }
 0x12e   : > { %3095 = vmatpush1.msra.mxu0 %v10142_v37  ;;  %3128 = vmatprep.mubr.f32.mxu0 %v10094_v59 }
 0x12f   : > { %3166 = vmatpush1.msra.mxu1 %v10143_v38  ;;  %3199 = vmatprep.mubr.f32.mxu1 %v10094_v59 }
 0x130   : > { %7572 = vmatmul.mubr.msk.f32.vlgmr.msra.gmra.mxu0 %vm395_vm0, %v9382_v46  ;;  %7573 = vmatmul.mubr.msk.f32.vlgmr.msra.gmra.mxu1 %vm395_vm0, %v9382_v46 }
 0x131   : > { %3237 = vmatprep.subr.mxu0 %v10144_v40  ;;  %3308 = vmatprep.subr.mxu1 %v10118_v34 }
 0x132   : > { %3238 = vmatpush1.msra.mxu0 %v10166_v23  ;;  %3309 = vmatpush1.msra.mxu1 %v10120_v47 }
 0x133   : > { %3239 = vmatprep.subr.mxu0 %v9119_v54  ;;  %3310 = vmatprep.subr.mxu1 %v10121_v48 }
 0x134   : > { %3240 = vmatpush1.msra.mxu0 %v10122_v45  ;;  %3311 = vmatpush1.msra.mxu1 %v9127_v0 }
 0x135   : > { %3241 = vmatprep.subr.mxu0 %v9131_v58  ;;  %3312 = vmatprep.subr.mxu1 %v9133_v53 }
 0x136   : > { %3242 = vmatpush1.msra.mxu0 %v9137_v52  ;;  %3313 = vmatpush1.msra.mxu1 %v9139_v60 }
 0x137   : > { %3243 = vmatprep.subr.mxu0 %v9143_v61  ;;  %3314 = vmatprep.subr.mxu1 %v9145_v63 }
 0x138   : > { %3244 = vmatpush1.msra.mxu0 %v9149_v62  ;;  %3277 = vmatprep.mubr.f32.mxu0 %v10094_v59 }
 0x139   : > { %3315 = vmatpush1.msra.mxu1 %v9156_v57  ;;  %3348 = vmatprep.mubr.f32.mxu1 %v10094_v59 }
 0x13a   : > { %7574 = vmatmul.mubr.msk.f32.vlgmr.msra.gmra.mxu0 %vm395_vm0, %v3210_v24  ;;  %7575 = vmatmul.mubr.msk.f32.vlgmr.msra.gmra.mxu1 %vm395_vm0, %v3210_v24 }
 0x13b   : > { %3915 = vmatprep.mubr.f32.mxu1 %v10094_v59 }
 0x13c   : > { %v465_v25 = vpop.f32.mrf.mxu0 }
 0x13d   : > { %v536_v0 = vpop.f32.mrf.mxu1 }
 0x13e   : > { %v467_v27 = vpop.f32.mrf.mxu0 }
 0x13f   : > { %v538_v26 = vpop.f32.mrf.mxu1 }
 0x146   : > { %v610_v28 = vpop.f32.mrf.mxu0  ;;  %v681_v29 = vpop.f32.mrf.mxu1 }
 0x147   : > { %v611_v30 = vadd.f32 %v610_v28, %v465_v25  ;;  %v682_v31 = vadd.f32 %v681_v29, %v536_v0 }
 0x148   : > { %v612_v32 = vpop.f32.mrf.mxu0  ;;  %v683_v33 = vpop.f32.mrf.mxu1 }
 0x149   : > { %v613_v35 = vadd.f32 %v612_v32, %v467_v27  ;;  %v684_v36 = vadd.f32 %v683_v33, %v538_v26 }
 0x150   : > { %v772_v37 = vpop.f32.mrf.mxu0  ;;  %v843_v38 = vpop.f32.mrf.mxu1 }
 0x151   : > { %v848_v39 = vadd.f32 %v772_v37, %v611_v30  ;;  %v850_v40 = vadd.f32 %v843_v38, %v682_v31 }
 0x152   : > { %v774_v41 = vpop.f32.mrf.mxu0  ;;  %v845_v42 = vpop.f32.mrf.mxu1 }
 0x153   : > { %v849_v43 = vadd.f32 %v774_v41, %v613_v35  ;;  %v851_v44 = vadd.f32 %v845_v42, %v684_v36 }
 0x15a   : > { %v938_v45 = vpop.f32.mrf.mxu0  ;;  %v1009_v46 = vpop.f32.mrf.mxu1 }
 0x15b   : > { %v1014_v47 = vadd.f32 %v938_v45, %v848_v39  ;;  %v1016_v48 = vadd.f32 %v1009_v46, %v850_v40 }
 0x15c   : > { %v940_v49 = vpop.f32.mrf.mxu0  ;;  %v1011_v50 = vpop.f32.mrf.mxu1 }
 0x15d   : > { %v1015_v51 = vadd.f32 %v940_v49, %v849_v43  ;;  %v1017_v52 = vadd.f32 %v1011_v50, %v851_v44 }
 0x164   : > { %v1104_v53 = vpop.f32.mrf.mxu0  ;;  %v1175_v54 = vpop.f32.mrf.mxu1 }
 0x165   : > { %v9504_v55 = vadd.f32 %v1104_v53, %v1014_v47  ;;  %v9506_v56 = vadd.f32 %v1175_v54, %v1016_v48 }
 0x166   : > { %v1106_v57 = vpop.f32.mrf.mxu0  ;;  %v1177_v58 = vpop.f32.mrf.mxu1 }
 0x167   : > { %v9508_v59 = vadd.f32 %v1106_v57, %v1015_v51  ;;  %v9510_v60 = vadd.f32 %v1177_v58, %v1017_v52 }
 0x16d   : > { %v1250_v62 = vpop.f32.mrf.mxu0 }
 0x16f   : > { %v1321_v61 = vpop.f32.mrf.mxu1  ;;  %v1252_v34 = vpop.f32.mrf.mxu0 }
 0x171   : > { %v1323_v63 = vpop.f32.mrf.mxu1 }
 0x178   : > { %v1392_v17 = vpop.f32.mrf.mxu0  ;;  %v1463_v1 = vpop.f32.mrf.mxu1 }
 0x179   : > { %v1393_v2 = vadd.f32 %v1392_v17, %v1250_v62  ;;  %v1464_v3 = vadd.f32 %v1463_v1, %v1321_v61 }
 0x17a   : > { %v1394_v4 = vpop.f32.mrf.mxu0  ;;  %v1465_v5 = vpop.f32.mrf.mxu1 }
 0x17b   : > { %v1395_v6 = vadd.f32 %v1394_v4, %v1252_v34  ;;  %v1466_v7 = vadd.f32 %v1465_v5, %v1323_v63 }
 0x182   : > { %v1534_v8 = vpop.f32.mrf.mxu0  ;;  %v1605_v9 = vpop.f32.mrf.mxu1 }
 0x183   : > { %v1610_v10 = vadd.f32 %v1534_v8, %v1393_v2  ;;  %v1612_v11 = vadd.f32 %v1605_v9, %v1464_v3 }
 0x184   : > { %v1536_v12 = vpop.f32.mrf.mxu0  ;;  %v1607_v13 = vpop.f32.mrf.mxu1 }
 0x185   : > { %v1611_v14 = vadd.f32 %v1536_v12, %v1395_v6  ;;  %v1613_v15 = vadd.f32 %v1607_v13, %v1466_v7 }
 0x18c   : > { %v1680_v16 = vpop.f32.mrf.mxu0  ;;  %v1751_v18 = vpop.f32.mrf.mxu1 }
 0x18d   : > { %v1756_v19 = vadd.f32 %v1680_v16, %v1610_v10  ;;  %v1758_v20 = vadd.f32 %v1751_v18, %v1612_v11  ;;  %v3365_v16 = vlaneseq }
 0x18e   : > { %v1682_v21 = vpop.f32.mrf.mxu0  ;;  %v1753_v22 = vpop.f32.mrf.mxu1 }
 0x18f   : > { %v1757_v23 = vadd.f32 %v1682_v21, %v1611_v14  ;;  %v1759_v24 = vadd.f32 %v1753_v22, %v1613_v15 }
 0x196   : > { %v1829_v0 = vpop.f32.mrf.mxu0  ;;  %v1900_v25 = vpop.f32.mrf.mxu1 }
 0x197   : > { %v9512_v26 = vadd.f32 %v1829_v0, %v1756_v19  ;;  %v9514_v27 = vadd.f32 %v1900_v25, %v1758_v20 }
 0x198   : > { %v1831_v28 = vpop.f32.mrf.mxu0  ;;  %v1902_v29 = vpop.f32.mrf.mxu1 }
 0x199   : > { %v3360_v30 = vmax.f32 %v9504_v55, %v9512_v26  ;;  %v3362_v31 = vmax.f32 %v9506_v56, %v9514_v27  ;;  %v9520_v32 = vadd.f32 %v1831_v28, %v1757_v23  ;;  %v9522_v33 = vadd.f32 %v1902_v29, %v1759_v24  ;;  %v3629_v56 = vld [vmem:[#allocation8 + $0x468] sm:$0xff]  ;;  %v3775_v55 = vld [vmem:[#allocation8 + $0x8f0] sm:$0xff] }
 0x19a   : > { %v9531_v23 = vshrl.u32 %v3365_v16, 7 }
 0x19b   : > { %v3361_v35 = vmax.f32 %v9508_v59, %v9520_v32  ;;  %v3363_v36 = vmax.f32 %v9510_v60, %v9522_v33 }
 0x19f   : > { %v1975_v37 = vpop.f32.mrf.mxu0 }
 0x1a1   : > { %v1977_v38 = vpop.f32.mrf.mxu0  ;;  %v2046_v47 = vpop.f32.mrf.mxu1 }
 0x1a3   : > { %v2048_v48 = vpop.f32.mrf.mxu1 }
 0x1aa   : > { %v2117_v39 = vpop.f32.mrf.mxu0  ;;  %v2188_v50 = vpop.f32.mrf.mxu1 }
 0x1ab   : > { %v2118_v40 = vadd.f32 %v2117_v39, %v1975_v37  ;;  %v2189_v20 = vadd.f32 %v2188_v50, %v2046_v47  ;;  %v3371_v50 = vsub.s32 1, %v9531_v23 }
 0x1ac   : > { %v2119_v41 = vpop.f32.mrf.mxu0  ;;  %v2190_v53 = vpop.f32.mrf.mxu1 }
 0x1ad   : > { %v2120_v21 = vadd.f32 %v2119_v41, %v1977_v38  ;;  %v2191_v22 = vadd.f32 %v2190_v53, %v2048_v48 }
 0x1b4   : > { %v2259_v42 = vpop.f32.mrf.mxu0  ;;  %v2330_v54 = vpop.f32.mrf.mxu1 }
 0x1b5   : > { %v2335_v43 = vadd.f32 %v2259_v42, %v2118_v40  ;;  %v2337_v28 = vadd.f32 %v2330_v54, %v2189_v20  ;;  %v3770_v20 = vld [vmem:[#allocation8 + $0x8c8] sm:$0xff] }
 0x1b6   : > { %v2261_v44 = vpop.f32.mrf.mxu0  ;;  %v2332_v57 = vpop.f32.mrf.mxu1 }
 0x1b7   : > { %v2336_v29 = vadd.f32 %v2261_v44, %v2120_v21  ;;  %v2338_v37 = vadd.f32 %v2332_v57, %v2191_v22  ;;  %v3769_v21 = vld [vmem:[#allocation8 + $0x8c0] sm:$0xff]  ;;  %v3766_v22 = vld [vmem:[#allocation8 + $0x8a8] sm:$0xff] }
 0x1be   : > { %v2405_v45 = vpop.f32.mrf.mxu0  ;;  %v2476_v58 = vpop.f32.mrf.mxu1 }
 0x1bf   : > { %v2481_v46 = vadd.f32 %v2405_v45, %v2335_v43 }
 0x1c0   : > { %v2407_v49 = vpop.f32.mrf.mxu0  ;;  %v2478_v63 = vpop.f32.mrf.mxu1 }
 0x1c1   : > { %v2482_v47 = vadd.f32 %v2407_v49, %v2336_v29  ;;  %v2484_v38 = vadd.f32 %v2478_v63, %v2338_v37  ;;  %v3762_v29 = vld [vmem:[#allocation8 + $0x888] sm:$0xff]  ;;  %v3689_v37 = vld [vmem:[#allocation8 + $0x640] sm:$0xff] }
 0x1c8   : > { %v2554_v51 = vpop.f32.mrf.mxu0  ;;  %v2625_v34 = vpop.f32.mrf.mxu1 }
 0x1c9   : > { %v9528_v52 = vadd.f32 %v2554_v51, %v2481_v46  ;;  %v3379_v46 = vsub.s32 3, %v9531_v23  ;;  %v2483_v51 = vadd.f32 %v2476_v58, %v2337_v28  ;;  %v3690_v28 = vld [vmem:[#allocation8 + $0x648] sm:$0xff] }
 0x1ca   : > { %v2556_v61 = vpop.f32.mrf.mxu0  ;;  %v2627_v3 = vpop.f32.mrf.mxu1 }
 0x1cb   : > { %v2632_v54 = vadd.f32 %v2625_v34, %v2483_v51  ;;  %v2631_v57 = vadd.f32 %v2556_v61, %v2482_v47  ;;  %v2633_v58 = vadd.f32 %v2627_v3, %v2484_v38  ;;  %v3695_v51 = vld [vmem:[#allocation8 + $0x670] sm:$0xff]  ;;  %v3682_v47 = vld [vmem:[#allocation8 + $0x608] sm:$0xff]  ;;  %v3692_v38 = vld [vmem:[#allocation8 + $0x658] sm:$0xff] }
 0x1d1   : > { %v2700_v62 = vpop.f32.mrf.mxu0 }
 0x1d3   : > { %v2702_v17 = vpop.f32.mrf.mxu0  ;;  %v2771_v4 = vpop.f32.mrf.mxu1 }
 0x1d5   : > { %v2773_v5 = vpop.f32.mrf.mxu1 }
 0x1dc   : > { %v2842_v1 = vpop.f32.mrf.mxu0  ;;  %v2913_v9 = vpop.f32.mrf.mxu1 }
 0x1dd   : > { %v2843_v2 = vadd.f32 %v2842_v1, %v2700_v62  ;;  %v2914_v19 = vadd.f32 %v2913_v9, %v2771_v4  ;;  %v3375_v4 = vsub.s32 2, %v9531_v23 }
 0x1de   : > { %v2844_v6 = vpop.f32.mrf.mxu0  ;;  %v2915_v10 = vpop.f32.mrf.mxu1 }
 0x1df   : > { %v2845_v24 = vadd.f32 %v2844_v6, %v2702_v17  ;;  %v2916_v0 = vadd.f32 %v2915_v10, %v2773_v5  ;;  %v9538_v5 = vld [vmem:[#allocation6] sm:$0xf] }
 0x1e0   : > { %v9550_v9 = vrot.slane %v9538_v5, %v3371_v50 }
 0x1e6   : > { %v2984_v7 = vpop.f32.mrf.mxu0  ;;  %v3055_v11 = vpop.f32.mrf.mxu1 }
 0x1e7   : > { %v3060_v8 = vadd.f32 %v2984_v7, %v2843_v2  ;;  %v3062_v25 = vadd.f32 %v3055_v11, %v2914_v19  ;;  %v9545_v7 = vrot.slane %v9538_v5, %v3379_v46  ;;  %v9559_v11 = vrot.slane %v9538_v5, %v3375_v4  ;;  %v3773_v19 = vld [vmem:[#allocation8 + $0x8e0] sm:$0xff] }
 0x1e8   : > { %v2986_v12 = vpop.f32.mrf.mxu0  ;;  %v3057_v15 = vpop.f32.mrf.mxu1 }
 0x1e9   : > { %v3061_v42 = vadd.f32 %v2986_v12, %v2845_v24  ;;  %v3063_v43 = vadd.f32 %v3057_v15, %v2916_v0  ;;  %v3694_v24 = vld [vmem:[#allocation8 + $0x668] sm:$0xff]  ;;  %v3765_v0 = vld [vmem:[#allocation8 + $0x8a0] sm:$0xff] }
 0x1ea   : > { %3780 = vmatprep.subr.mxu0 %v3694_v24  ;;  %v3657_v24 = vld [vmem:[#allocation8 + $0x540] sm:$0xff] }
 0x1f0   : > { %v3130_v13 = vpop.f32.mrf.mxu0  ;;  %v3201_v18 = vpop.f32.mrf.mxu1 }
 0x1f1   : > { %v3206_v14 = vadd.f32 %v3130_v13, %v3060_v8  ;;  %v3208_v45 = vadd.f32 %v3201_v18, %v3062_v25  ;;  %v3774_v18 = vld [vmem:[#allocation8 + $0x8e8] sm:$0xff]  ;;  %v3693_v25 = vld [vmem:[#allocation8 + $0x660] sm:$0xff] }
 0x1f2   : > { %v3132_v39 = vpop.f32.mrf.mxu0  ;;  %v3203_v40 = vpop.f32.mrf.mxu1  ;;  %3875 = vmatprep.subr.mxu1 %v3774_v18  ;;  %3781 = vmatpush1.msra.mxu0 %v3693_v25  ;;  %v3672_v18 = vld [vmem:[#allocation8 + $0x5b8] sm:$0xff]  ;;  %v3654_v25 = vld [vmem:[#allocation8 + $0x528] sm:$0xff] }
 0x1f3   : > { %v3207_v53 = vadd.f32 %v3132_v39, %v3061_v42  ;;  %v3209_v62 = vadd.f32 %v3203_v40, %v3063_v43  ;;  %3876 = vmatpush1.msra.mxu1 %v3773_v19  ;;  %v3761_v39 = vld [vmem:[#allocation8 + $0x880] sm:$0xff]  ;;  %3782 = vmatprep.subr.mxu0 %v3690_v28  ;;  %v3686_v40 = vld [vmem:[#allocation8 + $0x628] sm:$0xff]  ;;  %v3696_v42 = vld [vmem:[#allocation8 + $0x678] sm:$0xff] }
 0x1f4   : > { %3877 = vmatprep.subr.mxu1 %v3770_v20  ;;  %v9568_v43 = vld [vmem:[#allocation2 + $0x40] sm:$0xff]  ;;  %3783 = vmatpush1.msra.mxu0 %v3689_v37  ;;  %v3671_v20 = vld [vmem:[#allocation8 + $0x5b0] sm:$0xff] }
 0x1f5   : > { %3878 = vmatpush1.msra.mxu1 %v3769_v21  ;;  %3784 = vmatprep.subr.mxu0 %v3686_v40  ;;  %v3661_v19 = vld [vmem:[#allocation8 + $0x560] sm:$0xff]  ;;  %v3658_v21 = vld [vmem:[#allocation8 + $0x548] sm:$0xff]  ;;  %v3664_v28 = vld [vmem:[#allocation8 + $0x578] sm:$0xff] }
 0x1f6   : > { %3879 = vmatprep.subr.mxu1 %v3766_v22  ;;  %v3668_v22 = vld [vmem:[#allocation8 + $0x598] sm:$0xff]  ;;  %v3663_v37 = vld [vmem:[#allocation8 + $0x570] sm:$0xff] }
 0x1f7   : > { %3880 = vmatpush1.msra.mxu1 %v3765_v0  ;;  %v3667_v0 = vld [vmem:[#allocation8 + $0x590] sm:$0xff]  ;;  %v3660_v40 = vld [vmem:[#allocation8 + $0x558] sm:$0xff] }
 0x1f8   : > { %3881 = vmatprep.subr.mxu1 %v3762_v29  ;;  %v3653_v29 = vld [vmem:[#allocation8 + $0x520] sm:$0xff] }
 0x1f9   : > { %3882 = vmatpush1.msra.mxu1 %v3761_v39  ;;  %v3650_v39 = vld [vmem:[#allocation8 + $0x508] sm:$0xff] }
 0x1fa   : > { %v3279_v41 = vpop.f32.mrf.mxu0  ;;  %v3350_v48 = vpop.f32.mrf.mxu1  ;;  %3922 = vmatprep.subr.mxu1 %v3696_v42  ;;  %7576 = vmatmul.mubr.msk.f32.vlgmr.msra.gmra.mxu1 %vm395_vm0, %v9568_v43  ;;  %v3649_v42 = vld [vmem:[#allocation8 + $0x500] sm:$0xff] }
 0x1fb   : > { %v9535_v17 = vadd.f32 %v3279_v41, %v3206_v14  ;;  %v3357_v44 = vadd.f32 %v3350_v48, %v3208_v45  ;;  %v3685_v45 = vld [vmem:[#allocation8 + $0x620] sm:$0xff]  ;;  %v3691_v48 = vld [vmem:[#allocation8 + $0x650] sm:$0xff]  ;;  %3923 = vmatpush1.msra.mxu1 %v3695_v51  ;;  %v3646_v51 = vld [vmem:[#allocation8 + $0x4e8] sm:$0xff] }
 0x1fc   : > { %v3281_v1 = vpop.f32.mrf.mxu0  ;;  %v3352_v2 = vpop.f32.mrf.mxu1  ;;  %3785 = vmatpush1.msra.mxu0 %v3685_v45  ;;  %v3681_v41 = vld [vmem:[#allocation8 + $0x600] sm:$0xff]  ;;  %3924 = vmatprep.subr.mxu1 %v3692_v38  ;;  %v3659_v45 = vld [vmem:[#allocation8 + $0x550] sm:$0xff] }
 0x1fd   : > { %v3393_v49 = vmax.f32 %v9528_v52, %v9535_v17  ;;  %v3356_v63 = vadd.f32 %v3281_v1, %v3207_v53  ;;  %v3358_v6 = vadd.f32 %v3352_v2, %v3209_v62  ;;  %v3395_v8 = vmax.f32 %v2632_v54, %v3357_v44  ;;  %v3678_v53 = vld [vmem:[#allocation8 + $0x5e8] sm:$0xff]  ;;  %v3688_v62 = vld [vmem:[#allocation8 + $0x638] sm:$0xff]  ;;  %3786 = vmatprep.subr.mxu0 %v3682_v47  ;;  %v3677_v44 = vld [vmem:[#allocation8 + $0x5e0] sm:$0xff] }
 0x1fe   : > { %v3687_v54 = vld [vmem:[#allocation8 + $0x630] sm:$0xff]  ;;  %3787 = vmatpush1.msra.mxu0 %v3681_v41  ;;  %3925 = vmatpush1.msra.mxu1 %v3691_v48  ;;  %v3684_v1 = vld [vmem:[#allocation8 + $0x618] sm:$0xff]  ;;  %v3673_v2 = vld [vmem:[#allocation8 + $0x5c0] sm:$0xff] }
 0x1ff   : > { %v3394_v34 = vmax.f32 %v2631_v57, %v3356_v63  ;;  %v3396_v61 = vmax.f32 %v2633_v58, %v3358_v6  ;;  %v3399_v14 = vadd.f32 %v3395_v8, %v9559_v11  ;;  %v3674_v57 = vld [vmem:[#allocation8 + $0x5c8] sm:$0xff]  ;;  %3788 = vmatprep.subr.mxu0 %v3678_v53  ;;  %3926 = vmatprep.subr.mxu1 %v3688_v62  ;;  %v3683_v58 = vld [vmem:[#allocation8 + $0x610] sm:$0xff]  ;;  %v3680_v6 = vld [vmem:[#allocation8 + $0x5f8] sm:$0xff] }
 0x200   : > { %3789 = vmatpush1.msra.mxu0 %v3677_v44  ;;  %v3670_v63 = vld [vmem:[#allocation8 + $0x5a8] sm:$0xff]  ;;  %3927 = vmatpush1.msra.mxu1 %v3687_v54  ;;  %v3669_v8 = vld [vmem:[#allocation8 + $0x5a0] sm:$0xff]  ;;  %v3656_v47 = vld [vmem:[#allocation8 + $0x538] sm:$0xff] }
 0x201   : > { %v3400_v3 = vadd.f32 %v3396_v61, %v9545_v7  ;;  %v9554_v10 = vadd.f32 %v3394_v34, %v9550_v9  ;;  %v3403_v15 = vmax.f32 %v3399_v14, 0.0  ;;  %3790 = vmatprep.subr.mxu0 %v3674_v57  ;;  %3928 = vmatprep.subr.mxu1 %v3684_v1  ;;  %v3679_v34 = vld [vmem:[#allocation8 + $0x5f0] sm:$0xff]  ;;  %v3666_v61 = vld [vmem:[#allocation8 + $0x588] sm:$0xff]  ;;  %v3645_v38 = vld [vmem:[#allocation8 + $0x4e0] sm:$0xff] }
 0x202   : > { %3791 = vmatpush1.msra.mxu0 %v3673_v2  ;;  %3929 = vmatpush1.msra.mxu1 %v3683_v58  ;;  %v3675_v14 = vld [vmem:[#allocation8 + $0x5d0] sm:$0xff]  ;;  %v3642_v48 = vld [vmem:[#allocation8 + $0x4c8] sm:$0xff]  ;;  %v3652_v53 = vld [vmem:[#allocation8 + $0x518] sm:$0xff] }
 0x203   : > { %v3404_v12 = vmax.f32 %v3400_v3, 0.0  ;;  %v3402_v13 = vmax.f32 %v9554_v10, 0.0  ;;  %v3676_v3 = vld [vmem:[#allocation8 + $0x5d8] sm:$0xff]  ;;  %3792 = vmatprep.subr.mxu0 %v3670_v63  ;;  %3930 = vmatprep.subr.mxu1 %v3680_v6  ;;  %v3655_v41 = vld [vmem:[#allocation8 + $0x530] sm:$0xff]  ;;  %v3641_v62 = vld [vmem:[#allocation8 + $0x4c0] sm:$0xff] }
 0x204   : > { %3793 = vmatpush1.msra.mxu0 %v3669_v8  ;;  %3931 = vmatpush1.msra.mxu1 %v3679_v34  ;;  %v3651_v44 = vld [vmem:[#allocation8 + $0x510] sm:$0xff]  ;;  %v3638_v54 = vld [vmem:[#allocation8 + $0x4a8] sm:$0xff]  ;;  %v3648_v57 = vld [vmem:[#allocation8 + $0x4f8] sm:$0xff] }
 0x205   : > { %3427 = vrot.lane.b32.xlu1 %v3404_v12, %s8685_s17  ;;  %3423 = vrot.lane.b32.xlu0 %v3402_v13, %s8685_s17  ;;  %v3665_v12 = vld [vmem:[#allocation8 + $0x580] sm:$0xff]  ;;  %v3647_v2 = vld [vmem:[#allocation8 + $0x4f0] sm:$0xff]  ;;  %v3634_v58 = vld [vmem:[#allocation8 + $0x488] sm:$0xff] }
 0x206   : > { %3794 = vmatprep.subr.mxu0 %v3666_v61  ;;  %3932 = vmatprep.subr.mxu1 %v3676_v3  ;;  %v3637_v1 = vld [vmem:[#allocation8 + $0x4a0] sm:$0xff]  ;;  %v3644_v63 = vld [vmem:[#allocation8 + $0x4d8] sm:$0xff]  ;;  %v3643_v8 = vld [vmem:[#allocation8 + $0x4d0] sm:$0xff] }
 0x207   : > { %3795 = vmatpush1.msra.mxu0 %v3665_v12  ;;  %3933 = vmatpush1.msra.mxu1 %v3675_v14  ;;  %v3633_v6 = vld [vmem:[#allocation8 + $0x480] sm:$0xff]  ;;  %v3758_v34 = vld [vmem:[#allocation8 + $0x868] sm:$0xff]  ;;  %v3640_v61 = vld [vmem:[#allocation8 + $0x4b8] sm:$0xff] }
 0x208   : > { %3934 = vmatprep.subr.mxu1 %v3672_v18  ;;  %v3757_v3 = vld [vmem:[#allocation8 + $0x860] sm:$0xff]  ;;  %v3639_v12 = vld [vmem:[#allocation8 + $0x4b0] sm:$0xff]  ;;  %v3754_v14 = vld [vmem:[#allocation8 + $0x848] sm:$0xff] }
 0x209   : > { %3425 = vrot.lane.b32.xlu0 %v3403_v15, %s8685_s17  ;;  %v3662_v15 = vld [vmem:[#allocation8 + $0x568] sm:$0xff]  ;;  %3935 = vmatpush1.msra.mxu1 %v3671_v20  ;;  %v3753_v18 = vld [vmem:[#allocation8 + $0x840] sm:$0xff] }
 0x20a   : > { %3796 = vmatprep.subr.mxu0 %v3662_v15  ;;  %3936 = vmatprep.subr.mxu1 %v3668_v22  ;;  %v3636_v15 = vld [vmem:[#allocation8 + $0x498] sm:$0xff]  ;;  %v3750_v20 = vld [vmem:[#allocation8 + $0x828] sm:$0xff]  ;;  %v3749_v22 = vld [vmem:[#allocation8 + $0x820] sm:$0xff] }
 0x20b   : > { %3797 = vmatpush1.msra.mxu0 %v3661_v19  ;;  %3937 = vmatpush1.msra.mxu1 %v3667_v0  ;;  %v3635_v19 = vld [vmem:[#allocation8 + $0x490] sm:$0xff]  ;;  %v3746_v0 = vld [vmem:[#allocation8 + $0x808] sm:$0xff] }
 0x20c   : > { %3798 = vmatprep.subr.mxu0 %v3658_v21  ;;  %3938 = vmatprep.subr.mxu1 %v3664_v28  ;;  %v3760_v21 = vld [vmem:[#allocation8 + $0x878] sm:$0xff]  ;;  %v3745_v28 = vld [vmem:[#allocation8 + $0x800] sm:$0xff] }
 0x20d   : > { %3799 = vmatpush1.msra.mxu0 %v3657_v24  ;;  %3939 = vmatpush1.msra.mxu1 %v3663_v37  ;;  %v3759_v24 = vld [vmem:[#allocation8 + $0x870] sm:$0xff]  ;;  %v3742_v37 = vld [vmem:[#allocation8 + $0x7e8] sm:$0xff] }
 0x20e   : > { %3800 = vmatprep.subr.mxu0 %v3654_v25  ;;  %3940 = vmatprep.subr.mxu1 %v3660_v40  ;;  %v3756_v25 = vld [vmem:[#allocation8 + $0x858] sm:$0xff]  ;;  %v3741_v40 = vld [vmem:[#allocation8 + $0x7e0] sm:$0xff] }
 0x20f   : > { %3801 = vmatpush1.msra.mxu0 %v3653_v29  ;;  %3941 = vmatpush1.msra.mxu1 %v3659_v45  ;;  %v3755_v29 = vld [vmem:[#allocation8 + $0x850] sm:$0xff]  ;;  %v3738_v45 = vld [vmem:[#allocation8 + $0x7c8] sm:$0xff] }
 0x210   : > { %3802 = vmatprep.subr.mxu0 %v3650_v39  ;;  %3942 = vmatprep.subr.mxu1 %v3656_v47  ;;  %v3752_v39 = vld [vmem:[#allocation8 + $0x838] sm:$0xff]  ;;  %v3737_v47 = vld [vmem:[#allocation8 + $0x7c0] sm:$0xff] }
 0x211   : > { %3803 = vmatpush1.msra.mxu0 %v3649_v42  ;;  %3943 = vmatpush1.msra.mxu1 %v3655_v41  ;;  %v3751_v42 = vld [vmem:[#allocation8 + $0x830] sm:$0xff]  ;;  %v3734_v41 = vld [vmem:[#allocation8 + $0x7a8] sm:$0xff] }
 0x212   : > { %3804 = vmatprep.subr.mxu0 %v3646_v51  ;;  %3944 = vmatprep.subr.mxu1 %v3652_v53  ;;  %v3748_v51 = vld [vmem:[#allocation8 + $0x818] sm:$0xff]  ;;  %v3733_v53 = vld [vmem:[#allocation8 + $0x7a0] sm:$0xff] }
 0x213   : > { %3805 = vmatpush1.msra.mxu0 %v3645_v38  ;;  %3945 = vmatpush1.msra.mxu1 %v3651_v44  ;;  %v3747_v38 = vld [vmem:[#allocation8 + $0x810] sm:$0xff]  ;;  %v3730_v44 = vld [vmem:[#allocation8 + $0x788] sm:$0xff] }
 0x214   : > { %3806 = vmatprep.subr.mxu0 %v3642_v48  ;;  %3946 = vmatprep.subr.mxu1 %v3648_v57  ;;  %v3744_v48 = vld [vmem:[#allocation8 + $0x7f8] sm:$0xff]  ;;  %v3729_v57 = vld [vmem:[#allocation8 + $0x780] sm:$0xff] }
 0x215   : > { %3807 = vmatpush1.msra.mxu0 %v3641_v62  ;;  %3947 = vmatpush1.msra.mxu1 %v3647_v2  ;;  %v3743_v62 = vld [vmem:[#allocation8 + $0x7f0] sm:$0xff]  ;;  %v3726_v2 = vld [vmem:[#allocation8 + $0x768] sm:$0xff] }
 0x216   : > { %3808 = vmatprep.subr.mxu0 %v3638_v54  ;;  %3948 = vmatprep.subr.mxu1 %v3644_v63  ;;  %v3740_v54 = vld [vmem:[#allocation8 + $0x7d8] sm:$0xff]  ;;  %v3725_v63 = vld [vmem:[#allocation8 + $0x760] sm:$0xff] }
 0x217   : > { %3809 = vmatpush1.msra.mxu0 %v3637_v1  ;;  %3949 = vmatpush1.msra.mxu1 %v3643_v8  ;;  %v3739_v1 = vld [vmem:[#allocation8 + $0x7d0] sm:$0xff]  ;;  %v3722_v8 = vld [vmem:[#allocation8 + $0x748] sm:$0xff] }
 0x218   : > { %3810 = vmatprep.subr.mxu0 %v3634_v58  ;;  %3950 = vmatprep.subr.mxu1 %v3640_v61  ;;  %v3736_v58 = vld [vmem:[#allocation8 + $0x7b8] sm:$0xff]  ;;  %v3721_v61 = vld [vmem:[#allocation8 + $0x740] sm:$0xff] }
 0x219   : > { %3811 = vmatpush1.msra.mxu0 %v3633_v6  ;;  %3951 = vmatpush1.msra.mxu1 %v3639_v12  ;;  %v3735_v6 = vld [vmem:[#allocation8 + $0x7b0] sm:$0xff]  ;;  %v3718_v12 = vld [vmem:[#allocation8 + $0x728] sm:$0xff] }
 0x21a   : > { %3812 = vmatprep.subr.mxu0 %v3758_v34  ;;  %3952 = vmatprep.subr.mxu1 %v3636_v15  ;;  %v3732_v34 = vld [vmem:[#allocation8 + $0x798] sm:$0xff]  ;;  %v3717_v15 = vld [vmem:[#allocation8 + $0x720] sm:$0xff] }
 0x21b   : > { %3813 = vmatpush2.msra.mxu0 %v3757_v3  ;;  %3953 = vmatpush1.msra.mxu1 %v3635_v19  ;;  %v3731_v3 = vld [vmem:[#allocation8 + $0x790] sm:$0xff]  ;;  %v3714_v19 = vld [vmem:[#allocation8 + $0x708] sm:$0xff] }
 0x21c   : > { %3814 = vmatprep.subr.mxu0 %v3754_v14  ;;  %3954 = vmatprep.subr.mxu1 %v3760_v21  ;;  %v3728_v14 = vld [vmem:[#allocation8 + $0x778] sm:$0xff]  ;;  %v3723_v21 = vld [vmem:[#allocation8 + $0x750] sm:$0xff] }
 0x21d   : > { %3815 = vmatpush2.msra.mxu0 %v3753_v18  ;;  %3955 = vmatpush2.msra.mxu1 %v3759_v24  ;;  %v3727_v18 = vld [vmem:[#allocation8 + $0x770] sm:$0xff] }
 0x21e   : > { %3816 = vmatprep.subr.mxu0 %v3750_v20  ;;  %3956 = vmatprep.subr.mxu1 %v3756_v25  ;;  %v3724_v20 = vld [vmem:[#allocation8 + $0x758] sm:$0xff]  ;;  %v3719_v24 = vld [vmem:[#allocation8 + $0x730] sm:$0xff]  ;;  %v3713_v25 = vld [vmem:[#allocation8 + $0x700] sm:$0xff] }
 0x21f   : > { %3817 = vmatpush2.msra.mxu0 %v3749_v22  ;;  %3957 = vmatpush2.msra.mxu1 %v3755_v29  ;;  %v3720_v22 = vld [vmem:[#allocation8 + $0x738] sm:$0xff]  ;;  %v3710_v29 = vld [vmem:[#allocation8 + $0x6e8] sm:$0xff] }
 0x220   : > { %3818 = vmatprep.subr.mxu0 %v3746_v0  ;;  %3958 = vmatprep.subr.mxu1 %v3752_v39  ;;  %v3367_v0 = vsub.s32 0, %v9531_v23 }
 0x221   : > { %3819 = vmatpush2.msra.mxu0 %v3745_v28  ;;  %3959 = vmatpush2.msra.mxu1 %v3751_v42  ;;  %v3716_v28 = vld [vmem:[#allocation8 + $0x718] sm:$0xff] }
 0x222   : > { %3820 = vmatprep.subr.mxu0 %v3742_v37  ;;  %3960 = vmatprep.subr.mxu1 %v3748_v51  ;;  %v3715_v37 = vld [vmem:[#allocation8 + $0x710] sm:$0xff]  ;;  %v3368_v39 = vrot.slane %v9538_v5, %v3367_v0  ;;  %v3712_v42 = vld [vmem:[#allocation8 + $0x6f8] sm:$0xff]  ;;  %v3702_v5 = vld [vmem:[#allocation8 + $0x6a8] sm:$0xff] }
 0x223   : > { %3821 = vmatpush2.msra.mxu0 %v3741_v40  ;;  %3961 = vmatpush2.msra.mxu1 %v3747_v38  ;;  %v3709_v40 = vld [vmem:[#allocation8 + $0x6e0] sm:$0xff]  ;;  %v3711_v51 = vld [vmem:[#allocation8 + $0x6f0] sm:$0xff] }
 0x224   : > { %3822 = vmatprep.subr.mxu0 %v3738_v45  ;;  %3962 = vmatprep.subr.mxu1 %v3744_v48  ;;  %v3706_v45 = vld [vmem:[#allocation8 + $0x6c8] sm:$0xff]  ;;  %v3708_v48 = vld [vmem:[#allocation8 + $0x6d8] sm:$0xff]  ;;  %v3385_v59 = vadd.f32 %v3368_v39, %v3360_v30 }
 0x225   : > { %3823 = vmatpush2.msra.mxu0 %v3737_v47  ;;  %3963 = vmatpush2.msra.mxu1 %v3743_v62  ;;  %v3397_v47 = vadd.f32 %v3393_v49, %v3368_v39  ;;  %v3701_v62 = vld [vmem:[#allocation8 + $0x6a0] sm:$0xff] }
 0x226   : > { %3824 = vmatprep.subr.mxu0 %v3734_v41  ;;  %3964 = vmatprep.subr.mxu1 %v3740_v54  ;;  %v3705_v41 = vld [vmem:[#allocation8 + $0x6c0] sm:$0xff]  ;;  %v3698_v54 = vld [vmem:[#allocation8 + $0x688] sm:$0xff] }
 0x227   : > { %3825 = vmatpush2.msra.mxu0 %v3733_v53  ;;  %3965 = vmatpush2.msra.mxu1 %v3739_v1  ;;  %v3707_v53 = vld [vmem:[#allocation8 + $0x6d0] sm:$0xff]  ;;  %v3401_v17 = vmax.f32 %v3397_v47, 0.0  ;;  %v3697_v49 = vld [vmem:[#allocation8 + $0x680] sm:$0xff]  ;;  %v3621_v47 = vld [vmem:[#allocation8 + $0x428] sm:$0xff] }
 0x228   : > { %3826 = vmatprep.subr.mxu0 %v3730_v44  ;;  %3966 = vmatprep.subr.mxu1 %v3736_v58  ;;  %v3704_v44 = vld [vmem:[#allocation8 + $0x6b8] sm:$0xff] }
 0x229   : > { %3827 = vmatpush2.msra.mxu0 %v3729_v57  ;;  %3967 = vmatpush2.msra.mxu1 %v3735_v6  ;;  %v3703_v57 = vld [vmem:[#allocation8 + $0x6b0] sm:$0xff]  ;;  %v9608_v39 = vld [vmem:[#allocation2] sm:$0xff] }
 0x22a   : > { %3828 = vmatprep.subr.mxu0 %v3726_v2  ;;  %3968 = vmatprep.subr.mxu1 %v3732_v34  ;;  %v3700_v2 = vld [vmem:[#allocation8 + $0x698] sm:$0xff]  ;;  %v3699_v6 = vld [vmem:[#allocation8 + $0x690] sm:$0xff]  ;;  %3441 = vst.msk [vmem:[#allocation2 + $0x28] sm:$0x1] %vm3440_vm2, %v9608_v39  ;;  %3447 = vst.msk [vmem:[#allocation2 + $0x58] sm:$0x1] %vm3440_vm2, %v9608_v39 }
 0x22b   : > { %3829 = vmatpush2.msra.mxu0 %v3725_v63  ;;  %3969 = vmatpush2.msra.mxu1 %v3731_v3 }
 0x22c   : > { %3830 = vmatprep.subr.mxu0 %v3722_v8  ;;  %3970 = vmatprep.subr.mxu1 %v3728_v14  ;;  %v3776_v8 = vld [vmem:[#allocation8 + $0x8f8] sm:$0xff]  ;;  %v3387_v14 = vadd.f32 %v9559_v11, %v3362_v31 }
 0x22d   : > { %3831 = vmatpush2.msra.mxu0 %v3721_v61  ;;  %3971 = vmatpush2.msra.mxu1 %v3727_v18  ;;  %v3388_v18 = vadd.f32 %v9545_v7, %v3363_v36  ;;  %v3389_v36 = vmax.f32 %v3385_v59, 0.0  ;;  %v3527_v59 = vld [vmem:[#allocation8 + $0x138] sm:$0xff] }
 0x22e   : > { %3832 = vmatprep.subr.mxu0 %v3718_v12  ;;  %3972 = vmatprep.subr.mxu1 %v3724_v20  ;;  %v3391_v10 = vmax.f32 %v3387_v14, 0.0  ;;  %v3529_v14 = vld [vmem:[#allocation8 + $0x148] sm:$0xff] }
 0x22f   : > { %3833 = vmatpush2.msra.mxu0 %v3717_v15  ;;  %3973 = vmatpush2.msra.mxu1 %v3723_v21  ;;  %v3386_v15 = vadd.f32 %v9550_v9, %v3361_v35  ;;  %v3392_v27 = vmax.f32 %v3388_v18, 0.0  ;;  %v3525_v18 = vld [vmem:[#allocation8 + $0x128] sm:$0xff] }
 0x230   : > { %3834 = vmatprep.subr.mxu0 %v3714_v19  ;;  %3974 = vmatprep.subr.mxu1 %v3720_v22  ;;  %v3772_v22 = vld [vmem:[#allocation8 + $0x8d8] sm:$0xff] }
 0x231   : > { %3975 = vmatpush2.msra.mxu1 %v3719_v24  ;;  %3835 = vmatpush2.msra.mxu0 %v3713_v25  ;;  %v3771_v24 = vld [vmem:[#allocation8 + $0x8d0] sm:$0xff] }
 0x232   : > { %3976 = vmatprep.subr.mxu1 %v3716_v28  ;;  %3836 = vmatprep.subr.mxu0 %v3710_v29  ;;  %v3768_v28 = vld [vmem:[#allocation8 + $0x8b8] sm:$0xff]  ;;  %v3628_v29 = vld [vmem:[#allocation8 + $0x460] sm:$0xff] }
 0x233   : > { %3977 = vmatpush2.msra.mxu1 %v3715_v37  ;;  %3837 = vmatpush2.msra.mxu0 %v3709_v40  ;;  %v3767_v37 = vld [vmem:[#allocation8 + $0x8b0] sm:$0xff]  ;;  %v3625_v40 = vld [vmem:[#allocation8 + $0x448] sm:$0xff] }
 0x234   : > { %3978 = vmatprep.subr.mxu1 %v3712_v42  ;;  %3838 = vmatprep.subr.mxu0 %v3706_v45  ;;  %v3764_v42 = vld [vmem:[#allocation8 + $0x898] sm:$0xff]  ;;  %v3624_v45 = vld [vmem:[#allocation8 + $0x440] sm:$0xff] }
 0x235   : > { %3979 = vmatpush2.msra.mxu1 %v3711_v51  ;;  %3839 = vmatpush2.msra.mxu0 %v3705_v41  ;;  %v3763_v51 = vld [vmem:[#allocation8 + $0x890] sm:$0xff]  ;;  %v3617_v41 = vld [vmem:[#allocation8 + $0x408] sm:$0xff] }
 0x236   : > { %3980 = vmatprep.subr.mxu1 %v3708_v48  ;;  %3840 = vmatprep.subr.mxu0 %v3702_v5  ;;  %v3549_v48 = vld [vmem:[#allocation8 + $0x1e8] sm:$0xff]  ;;  %v3616_v5 = vld [vmem:[#allocation8 + $0x400] sm:$0xff] }
 0x237   : > { %3981 = vmatpush2.msra.mxu1 %v3707_v53  ;;  %3841 = vmatpush2.msra.mxu0 %v3701_v62  ;;  %v3551_v53 = vld [vmem:[#allocation8 + $0x1f8] sm:$0xff]  ;;  %v3548_v62 = vld [vmem:[#allocation8 + $0x1e0] sm:$0xff] }
 0x238   : > { %3982 = vmatprep.subr.mxu1 %v3704_v44  ;;  %3842 = vmatprep.subr.mxu0 %v3698_v54  ;;  %v9614_v44 = vld [vmem:[#allocation2 + $0x10] sm:$0xff] }
 0x239   : > { %3983 = vmatpush2.msra.mxu1 %v3703_v57  ;;  %3843 = vmatpush2.msra.mxu0 %v3697_v49  ;;  %v3545_v54 = vld [vmem:[#allocation8 + $0x1c8] sm:$0xff]  ;;  %v3550_v57 = vld [vmem:[#allocation8 + $0x1f0] sm:$0xff]  ;;  %v3540_v49 = vld [vmem:[#allocation8 + $0x1a0] sm:$0xff] }
 0x23a   : > { %3984 = vmatprep.subr.mxu1 %v3700_v2  ;;  %4017 = vmatprep.subr.mxu0 %v3776_v8  ;;  %v3543_v2 = vld [vmem:[#allocation8 + $0x1b8] sm:$0xff] }
 0x23b   : > { %3985 = vmatpush2.msra.mxu1 %v3699_v6  ;;  %v3536_v6 = vld [vmem:[#allocation8 + $0x180] sm:$0xff]  ;;  %v3539_v8 = vld [vmem:[#allocation8 + $0x198] sm:$0xff] }
 0x23c   : > { %4162 = vmatprep.subr.mxu1 %v3629_v56  ;;  %v3530_v56 = vld [vmem:[#allocation8 + $0x150] sm:$0xff] }
 0x277   : > { %v3424_v38 = vpop.permute.xlu0 %3423  ;;  %v3428_v1 = vpop.permute.xlu1 %3427 }
 0x27b   : > { %v3426_v52 = vpop.permute.xlu0 %3425 }
 0x27c   : > { %v3429_v58 = vsel %vm395_vm0, %v3424_v38, %v3426_v52  ;;  %v3430_v63 = vsel %vm395_vm0, %v3426_v52, %v3428_v1  ;;  %v3620_v38 = vld [vmem:[#allocation8 + $0x420] sm:$0xff]  ;;  %v3547_v52 = vld [vmem:[#allocation8 + $0x1d8] sm:$0xff] }
 0x27d   : > { %v3433_v34 = vmax.f32 %v3401_v17, %v3429_v58  ;;  %v3434_v61 = vmax.f32 %v3402_v13, %v3430_v63  ;;  %v3390_v13 = vmax.f32 %v3386_v15, 0.0  ;;  %v3544_v1 = vld [vmem:[#allocation8 + $0x1c0] sm:$0xff]  ;;  %v3541_v17 = vld [vmem:[#allocation8 + $0x1a8] sm:$0xff]  ;;  %v3542_v63 = vld [vmem:[#allocation8 + $0x1b0] sm:$0xff] }
 0x27e   : > { %v3537_v58 = vld [vmem:[#allocation8 + $0x188] sm:$0xff]  ;;  %v3534_v15 = vld [vmem:[#allocation8 + $0x170] sm:$0xff] }
 0x27f   : > { %v3464_v3 = vrot.slane %v3433_v34, 7  ;;  %v3465_v12 = vrot.slane %v3434_v61, 7  ;;  %v3533_v34 = vld [vmem:[#allocation8 + $0x168] sm:$0xff]  ;;  %v3538_v61 = vld [vmem:[#allocation8 + $0x190] sm:$0xff] }
 0x281   : > { %3468 = vrot.lane.b32.xlu0 %v3465_v12, %s8685_s17  ;;  %3466 = vrot.lane.b32.xlu1 %v3464_v3, %s8685_s17  ;;  %v3532_v3 = vld [vmem:[#allocation8 + $0x160] sm:$0xff]  ;;  %v3535_v12 = vld [vmem:[#allocation8 + $0x178] sm:$0xff] }
 0x285   : > { %3410 = vrot.lane.b32.xlu0 %v3391_v10, %s8685_s17  ;;  %3408 = vrot.lane.b32.xlu1 %v3390_v13, %s8685_s17  ;;  %v3528_v10 = vld [vmem:[#allocation8 + $0x140] sm:$0xff] }
 0x289   : > { %3412 = vrot.lane.b32.xlu1 %v3392_v27, %s8685_s17  ;;  %v3524_v27 = vld [vmem:[#allocation8 + $0x120] sm:$0xff] }
 0x2f3   : > { %v3469_v31 = vpop.permute.xlu0 %3468  ;;  %v3467_v32 = vpop.permute.xlu1 %3466 }
 0x2f4   : > { %v3470_v60 = vsel %vm395_vm0, %v3467_v32, %v3469_v31  ;;  %3474 = vst.msk [vmem:[#allocation2 + $0x30] sm:$0xfe] %vm3459_vm1, %v3467_v32  ;;  %v3521_v31 = vld [vmem:[#allocation8 + $0x108] sm:$0xff]  ;;  %v3526_v32 = vld [vmem:[#allocation8 + $0x130] sm:$0xff] }
 0x2f5   : > { %3475 = vst [vmem:[#allocation2 + $0x38] sm:$0xfe] %v3470_v60  ;;  %v3520_v60 = vld [vmem:[#allocation8 + $0x100] sm:$0xff] }
 0x2f7   : > { %v3411_v33 = vpop.permute.xlu0 %3410  ;;  %v3409_v35 = vpop.permute.xlu1 %3408 }
 0x2f8   : > { %v3414_v7 = vsel %vm395_vm0, %v3409_v35, %v3411_v33  ;;  %v3517_v35 = vld [vmem:[#allocation8 + $0xe8] sm:$0xff] }
 0x2f9   : > { %v3418_v9 = vmax.f32 %v3389_v36, %v3414_v7  ;;  %v3522_v36 = vld [vmem:[#allocation8 + $0x110] sm:$0xff]  ;;  %v3516_v7 = vld [vmem:[#allocation8 + $0xe0] sm:$0xff] }
 0x2fb   : > { %v3450_v11 = vrot.slane %v3418_v9, 7  ;;  %v3413_v19 = vpop.permute.xlu1 %3412  ;;  %v3482_v30 = vld [vmem:[#allocation2 + $0x30] sm:$0xff]  ;;  %v3519_v9 = vld [vmem:[#allocation8 + $0xf8] sm:$0xff] }
 0x2fc   : > { %v3415_v20 = vsel %vm395_vm0, %v3411_v33, %v3413_v19  ;;  %v3483_v21 = vld [vmem:[#allocation2 + $0x38] sm:$0xff] }
 0x2fd   : > { %v3419_v26 = vmax.f32 %v3390_v13, %v3415_v20  ;;  %3844 = vmatprep.mubr.f32.mxu0 %v3483_v21  ;;  %3986 = vmatprep.mubr.f32.mxu1 %v3483_v21  ;;  %v3531_v13 = vld [vmem:[#allocation8 + $0x158] sm:$0xff]  ;;  %v3518_v19 = vld [vmem:[#allocation8 + $0xf0] sm:$0xff]  ;;  %v3512_v20 = vld [vmem:[#allocation8 + $0xc0] sm:$0xff] }
 0x2fe   : > { %3452 = vrot.lane.b32.xlu0 %v3450_v11, %s8685_s17  ;;  %3845 = vmatmul.mubr.f32.vlgmr.msra.gmra.mxu0 %v3482_v30  ;;  %v3523_v33 = vld [vmem:[#allocation8 + $0x118] sm:$0xff]  ;;  %v3513_v11 = vld [vmem:[#allocation8 + $0xc8] sm:$0xff] }
 0x2ff   : > { %v3451_v25 = vrot.slane %v3419_v26, 7  ;;  %3987 = vmatmul.mubr.f32.vlgmr.msra.gmra.mxu1 %v3482_v30  ;;  %4018 = vmatpush1.msra.mxu0 %v3775_v55  ;;  %v3515_v21 = vld [vmem:[#allocation8 + $0xd8] sm:$0xff]  ;;  %v3509_v55 = vld [vmem:[#allocation8 + $0xa8] sm:$0xff]  ;;  %v3514_v26 = vld [vmem:[#allocation8 + $0xd0] sm:$0xff] }
 0x300   : > { %4019 = vmatprep.subr.mxu0 %v3772_v22  ;;  %4057 = vmatprep.mubr.f32.mxu0 %v9608_v39  ;;  %v3508_v30 = vld [vmem:[#allocation8 + $0xa0] sm:$0xff]  ;;  %v3511_v22 = vld [vmem:[#allocation8 + $0xb8] sm:$0xff] }
 0x301   : > { %4020 = vmatpush1.msra.mxu0 %v3771_v24  ;;  %3454 = vrot.lane.b32.xlu1 %v3451_v25, %s8685_s17  ;;  %v3505_v24 = vld [vmem:[#allocation8 + $0x88] sm:$0xff]  ;;  %v3510_v25 = vld [vmem:[#allocation8 + $0xb0] sm:$0xff] }
 0x302   : > { %4021 = vmatprep.subr.mxu0 %v3768_v28  ;;  %4163 = vmatpush1.msra.mxu1 %v3628_v29  ;;  %v3504_v28 = vld [vmem:[#allocation8 + $0x80] sm:$0xff]  ;;  %v3507_v29 = vld [vmem:[#allocation8 + $0x98] sm:$0xff] }
 0x303   : > { %4022 = vmatpush1.msra.mxu0 %v3767_v37  ;;  %4164 = vmatprep.subr.mxu1 %v3625_v40  ;;  %v3501_v37 = vld [vmem:[#allocation8 + $0x68] sm:$0xff]  ;;  %v3506_v40 = vld [vmem:[#allocation8 + $0x90] sm:$0xff] }
 0x304   : > { %4023 = vmatprep.subr.mxu0 %v3764_v42  ;;  %4165 = vmatpush1.msra.mxu1 %v3624_v45  ;;  %v3500_v42 = vld [vmem:[#allocation8 + $0x60] sm:$0xff]  ;;  %v3503_v45 = vld [vmem:[#allocation8 + $0x78] sm:$0xff] }
 0x305   : > { %4024 = vmatpush1.msra.mxu0 %v3763_v51  ;;  %4166 = vmatprep.subr.mxu1 %v3621_v47  ;;  %v3497_v51 = vld [vmem:[#allocation8 + $0x48] sm:$0xff]  ;;  %v3502_v47 = vld [vmem:[#allocation8 + $0x70] sm:$0xff] }
 0x306   : > { %7577 = vmatmul.mubr.msk.f32.vlgmr.msra.gmra.mxu0 %vm395_vm0, %v9568_v43  ;;  %4167 = vmatpush1.msra.mxu1 %v3620_v38  ;;  %v3546_v43 = vld [vmem:[#allocation8 + $0x1d0] sm:$0xff]  ;;  %v3496_v38 = vld [vmem:[#allocation8 + $0x40] sm:$0xff] }
 0x307   : > { %4168 = vmatprep.subr.mxu1 %v3617_v41  ;;  %4067 = vmatprep.subr.mxu0 %v3549_v48  ;;  %v3499_v41 = vld [vmem:[#allocation8 + $0x58] sm:$0xff]  ;;  %v3493_v48 = vld [vmem:[#allocation8 + $0x28] sm:$0xff] }
 0x308   : > { %4169 = vmatpush1.msra.mxu1 %v3616_v5  ;;  %4202 = vmatprep.mubr.f32.mxu1 %v9608_v39  ;;  %v3498_v5 = vld [vmem:[#allocation8 + $0x50] sm:$0xff] }
 0x309   : > { %4209 = vmatprep.subr.mxu1 %v3551_v53  ;;  %4068 = vmatpush1.msra.mxu0 %v3548_v62  ;;  %v3492_v53 = vld [vmem:[#allocation8 + $0x20] sm:$0xff]  ;;  %v3495_v62 = vld [vmem:[#allocation8 + $0x38] sm:$0xff] }
 0x30a   : > { %7578 = vmatmul.mubr.msk.f32.vlgmr.msra.gmra.mxu1 %vm395_vm0, %v9614_v44  ;;  %4069 = vmatprep.subr.mxu0 %v3545_v54  ;;  %v3489_v54 = vld [vmem:[#allocation8 + $0x8] sm:$0xff] }
 0x30b   : > { %4210 = vmatpush1.msra.mxu1 %v3550_v57  ;;  %4070 = vmatpush1.msra.mxu0 %v3544_v1  ;;  %v3494_v57 = vld [vmem:[#allocation8 + $0x30] sm:$0xff]  ;;  %v3488_v1 = vld [vmem:[#allocation8] sm:$0xff] }
 0x30c   : > { %4211 = vmatprep.subr.mxu1 %v3547_v52  ;;  %4071 = vmatprep.subr.mxu0 %v3541_v17  ;;  %v3491_v52 = vld [vmem:[#allocation8 + $0x18] sm:$0xff]  ;;  %v3613_v17 = vld [vmem:[#allocation8 + $0x3e8] sm:$0xff] }
 0x30d   : > { %4212 = vmatpush1.msra.mxu1 %v3546_v43  ;;  %4072 = vmatpush1.msra.mxu0 %v3540_v49  ;;  %v3490_v43 = vld [vmem:[#allocation8 + $0x10] sm:$0xff]  ;;  %v3612_v49 = vld [vmem:[#allocation8 + $0x3e0] sm:$0xff] }
 0x30e   : > { %4213 = vmatprep.subr.mxu1 %v3543_v2  ;;  %4073 = vmatprep.subr.mxu0 %v3537_v58  ;;  %v3615_v2 = vld [vmem:[#allocation8 + $0x3f8] sm:$0xff]  ;;  %v3609_v58 = vld [vmem:[#allocation8 + $0x3c8] sm:$0xff] }
 0x30f   : > { %4214 = vmatpush1.msra.mxu1 %v3542_v63  ;;  %4074 = vmatpush1.msra.mxu0 %v3536_v6  ;;  %v3614_v63 = vld [vmem:[#allocation8 + $0x3f0] sm:$0xff]  ;;  %v3608_v6 = vld [vmem:[#allocation8 + $0x3c0] sm:$0xff] }
 0x310   : > { %4215 = vmatprep.subr.mxu1 %v3539_v8  ;;  %4075 = vmatprep.subr.mxu0 %v3533_v34  ;;  %v3611_v8 = vld [vmem:[#allocation8 + $0x3d8] sm:$0xff]  ;;  %v3605_v34 = vld [vmem:[#allocation8 + $0x3a8] sm:$0xff] }
 0x311   : > { %4216 = vmatpush1.msra.mxu1 %v3538_v61  ;;  %4076 = vmatpush1.msra.mxu0 %v3532_v3  ;;  %v3610_v61 = vld [vmem:[#allocation8 + $0x3d0] sm:$0xff]  ;;  %v3604_v3 = vld [vmem:[#allocation8 + $0x3a0] sm:$0xff] }
 0x312   : > { %4217 = vmatprep.subr.mxu1 %v3535_v12  ;;  %4077 = vmatprep.subr.mxu0 %v3529_v14  ;;  %v3607_v12 = vld [vmem:[#allocation8 + $0x3b8] sm:$0xff]  ;;  %v3601_v14 = vld [vmem:[#allocation8 + $0x388] sm:$0xff] }
 0x313   : > { %4218 = vmatpush1.msra.mxu1 %v3534_v15  ;;  %4078 = vmatpush1.msra.mxu0 %v3528_v10  ;;  %v3606_v15 = vld [vmem:[#allocation8 + $0x3b0] sm:$0xff]  ;;  %v3600_v10 = vld [vmem:[#allocation8 + $0x380] sm:$0xff] }
 0x314   : > { %4219 = vmatprep.subr.mxu1 %v3531_v13  ;;  %4079 = vmatprep.subr.mxu0 %v3525_v18  ;;  %v3603_v13 = vld [vmem:[#allocation8 + $0x398] sm:$0xff]  ;;  %v3597_v18 = vld [vmem:[#allocation8 + $0x368] sm:$0xff] }
 0x315   : > { %4220 = vmatpush1.msra.mxu1 %v3530_v56  ;;  %4080 = vmatpush1.msra.mxu0 %v3524_v27  ;;  %v3602_v56 = vld [vmem:[#allocation8 + $0x390] sm:$0xff]  ;;  %v3596_v27 = vld [vmem:[#allocation8 + $0x360] sm:$0xff] }
 0x316   : > { %4221 = vmatprep.subr.mxu1 %v3527_v59  ;;  %4081 = vmatprep.subr.mxu0 %v3521_v31  ;;  %v3599_v59 = vld [vmem:[#allocation8 + $0x378] sm:$0xff]  ;;  %v3593_v31 = vld [vmem:[#allocation8 + $0x348] sm:$0xff] }
 0x317   : > { %4222 = vmatpush1.msra.mxu1 %v3526_v32  ;;  %4082 = vmatpush1.msra.mxu0 %v3520_v60  ;;  %v3598_v32 = vld [vmem:[#allocation8 + $0x370] sm:$0xff]  ;;  %v3592_v60 = vld [vmem:[#allocation8 + $0x340] sm:$0xff] }
 0x318   : > { %4223 = vmatprep.subr.mxu1 %v3523_v33  ;;  %4083 = vmatprep.subr.mxu0 %v3517_v35  ;;  %v3595_v33 = vld [vmem:[#allocation8 + $0x358] sm:$0xff]  ;;  %v3589_v35 = vld [vmem:[#allocation8 + $0x328] sm:$0xff] }
 0x319   : > { %4224 = vmatpush1.msra.mxu1 %v3522_v36  ;;  %4084 = vmatpush1.msra.mxu0 %v3516_v7  ;;  %v3594_v36 = vld [vmem:[#allocation8 + $0x350] sm:$0xff]  ;;  %v3588_v7 = vld [vmem:[#allocation8 + $0x320] sm:$0xff] }
 0x31a   : > { %4225 = vmatprep.subr.mxu1 %v3519_v9  ;;  %4085 = vmatprep.subr.mxu0 %v3513_v11  ;;  %v3591_v9 = vld [vmem:[#allocation8 + $0x338] sm:$0xff]  ;;  %v3585_v11 = vld [vmem:[#allocation8 + $0x308] sm:$0xff] }
 0x31b   : > { %4226 = vmatpush1.msra.mxu1 %v3518_v19  ;;  %4086 = vmatpush1.msra.mxu0 %v3512_v20  ;;  %v3590_v19 = vld [vmem:[#allocation8 + $0x330] sm:$0xff]  ;;  %v3584_v20 = vld [vmem:[#allocation8 + $0x300] sm:$0xff] }
 0x31c   : > { %4227 = vmatprep.subr.mxu1 %v3515_v21  ;;  %4087 = vmatprep.subr.mxu0 %v3509_v55  ;;  %v3587_v21 = vld [vmem:[#allocation8 + $0x318] sm:$0xff]  ;;  %v3581_v55 = vld [vmem:[#allocation8 + $0x2e8] sm:$0xff] }
 0x31d   : > { %4228 = vmatpush1.msra.mxu1 %v3514_v26  ;;  %4088 = vmatpush1.msra.mxu0 %v3508_v30  ;;  %v3586_v26 = vld [vmem:[#allocation8 + $0x310] sm:$0xff]  ;;  %v3580_v30 = vld [vmem:[#allocation8 + $0x2e0] sm:$0xff] }
 0x31e   : > { %4229 = vmatprep.subr.mxu1 %v3511_v22  ;;  %4089 = vmatprep.subr.mxu0 %v3505_v24  ;;  %v3583_v22 = vld [vmem:[#allocation8 + $0x2f8] sm:$0xff]  ;;  %v3577_v24 = vld [vmem:[#allocation8 + $0x2c8] sm:$0xff] }
 0x31f   : > { %4230 = vmatpush1.msra.mxu1 %v3510_v25  ;;  %4090 = vmatpush1.msra.mxu0 %v3504_v28  ;;  %v3582_v25 = vld [vmem:[#allocation8 + $0x2f0] sm:$0xff]  ;;  %v3576_v28 = vld [vmem:[#allocation8 + $0x2c0] sm:$0xff] }
 0x320   : > { %4231 = vmatprep.subr.mxu1 %v3507_v29  ;;  %4091 = vmatprep.subr.mxu0 %v3501_v37  ;;  %v3579_v29 = vld [vmem:[#allocation8 + $0x2d8] sm:$0xff]  ;;  %v3573_v37 = vld [vmem:[#allocation8 + $0x2a8] sm:$0xff] }
 0x321   : > { %4232 = vmatpush1.msra.mxu1 %v3506_v40  ;;  %4092 = vmatpush1.msra.mxu0 %v3500_v42  ;;  %v3578_v40 = vld [vmem:[#allocation8 + $0x2d0] sm:$0xff]  ;;  %v3572_v42 = vld [vmem:[#allocation8 + $0x2a0] sm:$0xff] }
 0x322   : > { %4233 = vmatprep.subr.mxu1 %v3503_v45  ;;  %4093 = vmatprep.subr.mxu0 %v3497_v51  ;;  %v3575_v45 = vld [vmem:[#allocation8 + $0x2b8] sm:$0xff]  ;;  %v3569_v51 = vld [vmem:[#allocation8 + $0x288] sm:$0xff] }
 0x323   : > { %4234 = vmatpush1.msra.mxu1 %v3502_v47  ;;  %4094 = vmatpush1.msra.mxu0 %v3496_v38  ;;  %v3574_v47 = vld [vmem:[#allocation8 + $0x2b0] sm:$0xff]  ;;  %v3568_v38 = vld [vmem:[#allocation8 + $0x280] sm:$0xff] }
 0x324   : > { %4235 = vmatprep.subr.mxu1 %v3499_v41  ;;  %4095 = vmatprep.subr.mxu0 %v3493_v48  ;;  %v3571_v41 = vld [vmem:[#allocation8 + $0x298] sm:$0xff]  ;;  %v3565_v48 = vld [vmem:[#allocation8 + $0x268] sm:$0xff] }
 0x325   : > { %4236 = vmatpush1.msra.mxu1 %v3498_v5  ;;  %4096 = vmatpush1.msra.mxu0 %v3492_v53  ;;  %v3570_v5 = vld [vmem:[#allocation8 + $0x290] sm:$0xff]  ;;  %v3564_v53 = vld [vmem:[#allocation8 + $0x260] sm:$0xff] }
 0x326   : > { %4237 = vmatprep.subr.mxu1 %v3495_v62  ;;  %4097 = vmatprep.subr.mxu0 %v3489_v54  ;;  %v3567_v62 = vld [vmem:[#allocation8 + $0x278] sm:$0xff]  ;;  %v3561_v54 = vld [vmem:[#allocation8 + $0x248] sm:$0xff] }
 0x327   : > { %4238 = vmatpush1.msra.mxu1 %v3494_v57  ;;  %4098 = vmatpush1.msra.mxu0 %v3488_v1  ;;  %v3566_v57 = vld [vmem:[#allocation8 + $0x270] sm:$0xff]  ;;  %v3560_v1 = vld [vmem:[#allocation8 + $0x240] sm:$0xff] }
 0x328   : > { %4239 = vmatprep.subr.mxu1 %v3491_v52  ;;  %4099 = vmatprep.subr.mxu0 %v3613_v17  ;;  %v3563_v52 = vld [vmem:[#allocation8 + $0x258] sm:$0xff]  ;;  %v3557_v17 = vld [vmem:[#allocation8 + $0x228] sm:$0xff] }
 0x329   : > { %4240 = vmatpush1.msra.mxu1 %v3490_v43  ;;  %4100 = vmatpush2.msra.mxu0 %v3612_v49  ;;  %v3562_v43 = vld [vmem:[#allocation8 + $0x250] sm:$0xff]  ;;  %v3556_v49 = vld [vmem:[#allocation8 + $0x220] sm:$0xff] }
 0x32a   : > { %4241 = vmatprep.subr.mxu1 %v3615_v2  ;;  %4101 = vmatprep.subr.mxu0 %v3609_v58  ;;  %v3559_v2 = vld [vmem:[#allocation8 + $0x238] sm:$0xff]  ;;  %v3553_v58 = vld [vmem:[#allocation8 + $0x208] sm:$0xff] }
 0x32b   : > { %4242 = vmatpush2.msra.mxu1 %v3614_v63  ;;  %4102 = vmatpush2.msra.mxu0 %v3608_v6  ;;  %v3558_v63 = vld [vmem:[#allocation8 + $0x230] sm:$0xff]  ;;  %v3552_v6 = vld [vmem:[#allocation8 + $0x200] sm:$0xff] }
 0x32c   : > { %4243 = vmatprep.subr.mxu1 %v3611_v8  ;;  %4103 = vmatprep.subr.mxu0 %v3605_v34  ;;  %v3555_v8 = vld [vmem:[#allocation8 + $0x218] sm:$0xff] }
 0x32d   : > { %4244 = vmatpush2.msra.mxu1 %v3610_v61  ;;  %4104 = vmatpush2.msra.mxu0 %v3604_v3  ;;  %v3631_v34 = vld [vmem:[#allocation8 + $0x478] sm:$0xff]  ;;  %v3554_v61 = vld [vmem:[#allocation8 + $0x210] sm:$0xff]  ;;  %v4493_v3 = vld [vmem:[#allocation8 + $0xd68] sm:$0xff] }
 0x32e   : > { %4245 = vmatprep.subr.mxu1 %v3607_v12  ;;  %4105 = vmatprep.subr.mxu0 %v3601_v14 }
 0x32f   : > { %4246 = vmatpush2.msra.mxu1 %v3606_v15  ;;  %4106 = vmatpush2.msra.mxu0 %v3600_v10 }
 0x330   : > { %4247 = vmatprep.subr.mxu1 %v3603_v13  ;;  %4107 = vmatprep.subr.mxu0 %v3597_v18  ;;  %v3630_v13 = vld [vmem:[#allocation8 + $0x470] sm:$0xff]  ;;  %v4492_v18 = vld [vmem:[#allocation8 + $0xd60] sm:$0xff] }
 0x331   : > { %4248 = vmatpush2.msra.mxu1 %v3602_v56  ;;  %4108 = vmatpush2.msra.mxu0 %v3596_v27  ;;  %v3627_v27 = vld [vmem:[#allocation8 + $0x458] sm:$0xff] }
 0x332   : > { %4249 = vmatprep.subr.mxu1 %v3599_v59  ;;  %4109 = vmatprep.subr.mxu0 %v3593_v31  ;;  %v4489_v59 = vld [vmem:[#allocation8 + $0xd48] sm:$0xff]  ;;  %v3626_v31 = vld [vmem:[#allocation8 + $0x450] sm:$0xff] }
 0x333   : > { %4250 = vmatpush2.msra.mxu1 %v3598_v32  ;;  %4110 = vmatpush2.msra.mxu0 %v3592_v60  ;;  %v4488_v32 = vld [vmem:[#allocation8 + $0xd40] sm:$0xff]  ;;  %v3623_v60 = vld [vmem:[#allocation8 + $0x438] sm:$0xff] }
 0x334   : > { %4251 = vmatprep.subr.mxu1 %v3595_v33  ;;  %4111 = vmatprep.subr.mxu0 %v3589_v35  ;;  %v4485_v33 = vld [vmem:[#allocation8 + $0xd28] sm:$0xff]  ;;  %v3622_v35 = vld [vmem:[#allocation8 + $0x430] sm:$0xff] }
 0x335   : > { %4252 = vmatpush2.msra.mxu1 %v3594_v36  ;;  %4112 = vmatpush2.msra.mxu0 %v3588_v7  ;;  %v4484_v36 = vld [vmem:[#allocation8 + $0xd20] sm:$0xff]  ;;  %v3619_v7 = vld [vmem:[#allocation8 + $0x418] sm:$0xff] }
 0x336   : > { %4253 = vmatprep.subr.mxu1 %v3591_v9  ;;  %4113 = vmatprep.subr.mxu0 %v3585_v11  ;;  %v4481_v9 = vld [vmem:[#allocation8 + $0xd08] sm:$0xff]  ;;  %v3618_v11 = vld [vmem:[#allocation8 + $0x410] sm:$0xff] }
 0x337   : > { %4254 = vmatpush2.msra.mxu1 %v3590_v19  ;;  %4114 = vmatpush2.msra.mxu0 %v3584_v20  ;;  %v4480_v19 = vld [vmem:[#allocation8 + $0xd00] sm:$0xff]  ;;  %v9626_v20 = vrot.slane %v9614_v44, 1 }
 0x338   : > { %4255 = vmatprep.subr.mxu1 %v3587_v21  ;;  %4115 = vmatprep.subr.mxu0 %v3581_v55  ;;  %v4413_v21 = vld [vmem:[#allocation8 + $0xae8] sm:$0xff]  ;;  %v4415_v55 = vld [vmem:[#allocation8 + $0xaf8] sm:$0xff] }
 0x339   : > { %4256 = vmatpush2.msra.mxu1 %v3586_v26  ;;  %4116 = vmatpush2.msra.mxu0 %v3580_v30  ;;  %v4412_v26 = vld [vmem:[#allocation8 + $0xae0] sm:$0xff] }
 0x33a   : > { %4257 = vmatprep.subr.mxu1 %v3583_v22  ;;  %4117 = vmatprep.subr.mxu0 %v3577_v24  ;;  %v4414_v22 = vld [vmem:[#allocation8 + $0xaf0] sm:$0xff]  ;;  %v4409_v24 = vld [vmem:[#allocation8 + $0xac8] sm:$0xff] }
 0x33b   : > { %4258 = vmatpush2.msra.mxu1 %v3582_v25  ;;  %4118 = vmatpush2.msra.mxu0 %v3576_v28  ;;  %v4411_v25 = vld [vmem:[#allocation8 + $0xad8] sm:$0xff]  ;;  %v4408_v28 = vld [vmem:[#allocation8 + $0xac0] sm:$0xff] }
 0x33c   : > { %4259 = vmatprep.subr.mxu1 %v3579_v29  ;;  %4119 = vmatprep.subr.mxu0 %v3573_v37  ;;  %v4410_v29 = vld [vmem:[#allocation8 + $0xad0] sm:$0xff]  ;;  %v4405_v37 = vld [vmem:[#allocation8 + $0xaa8] sm:$0xff] }
 0x33d   : > { %4260 = vmatpush2.msra.mxu1 %v3578_v40  ;;  %4120 = vmatpush2.msra.mxu0 %v3572_v42  ;;  %v4404_v40 = vld [vmem:[#allocation8 + $0xaa0] sm:$0xff]  ;;  %v4406_v42 = vld [vmem:[#allocation8 + $0xab0] sm:$0xff] }
 0x33e   : > { %4261 = vmatprep.subr.mxu1 %v3575_v45  ;;  %4121 = vmatprep.subr.mxu0 %v3569_v51  ;;  %v4401_v45 = vld [vmem:[#allocation8 + $0xa88] sm:$0xff]  ;;  %v4403_v51 = vld [vmem:[#allocation8 + $0xa98] sm:$0xff] }
 0x33f   : > { %4262 = vmatpush2.msra.mxu1 %v3574_v47  ;;  %4122 = vmatpush2.msra.mxu0 %v3568_v38  ;;  %v4400_v47 = vld [vmem:[#allocation8 + $0xa80] sm:$0xff]  ;;  %v4402_v38 = vld [vmem:[#allocation8 + $0xa90] sm:$0xff] }
 0x340   : > { %4263 = vmatprep.subr.mxu1 %v3571_v41  ;;  %4123 = vmatprep.subr.mxu0 %v3565_v48  ;;  %v4397_v41 = vld [vmem:[#allocation8 + $0xa68] sm:$0xff]  ;;  %v4399_v48 = vld [vmem:[#allocation8 + $0xa78] sm:$0xff] }
 0x341   : > { %4264 = vmatpush2.msra.mxu1 %v3570_v5  ;;  %4124 = vmatpush2.msra.mxu0 %v3564_v53  ;;  %v4396_v5 = vld [vmem:[#allocation8 + $0xa60] sm:$0xff]  ;;  %v4398_v53 = vld [vmem:[#allocation8 + $0xa70] sm:$0xff] }
 0x342   : > { %4265 = vmatprep.subr.mxu1 %v3567_v62  ;;  %4125 = vmatprep.subr.mxu0 %v3561_v54  ;;  %v4393_v62 = vld [vmem:[#allocation8 + $0xa48] sm:$0xff]  ;;  %v4395_v54 = vld [vmem:[#allocation8 + $0xa58] sm:$0xff] }
 0x343   : > { %4266 = vmatpush2.msra.mxu1 %v3566_v57  ;;  %4126 = vmatpush2.msra.mxu0 %v3560_v1  ;;  %v4392_v57 = vld [vmem:[#allocation8 + $0xa40] sm:$0xff]  ;;  %v4394_v1 = vld [vmem:[#allocation8 + $0xa50] sm:$0xff] }
 0x344   : > { %4267 = vmatprep.subr.mxu1 %v3563_v52  ;;  %4127 = vmatprep.subr.mxu0 %v3557_v17  ;;  %v4389_v52 = vld [vmem:[#allocation8 + $0xa28] sm:$0xff]  ;;  %v4391_v17 = vld [vmem:[#allocation8 + $0xa38] sm:$0xff] }
 0x345   : > { %4268 = vmatpush2.msra.mxu1 %v3562_v43  ;;  %4128 = vmatpush2.msra.mxu0 %v3556_v49  ;;  %v4388_v43 = vld [vmem:[#allocation8 + $0xa20] sm:$0xff]  ;;  %v4390_v49 = vld [vmem:[#allocation8 + $0xa30] sm:$0xff] }
 0x346   : > { %4269 = vmatprep.subr.mxu1 %v3559_v2  ;;  %4129 = vmatprep.subr.mxu0 %v3553_v58  ;;  %v4385_v2 = vld [vmem:[#allocation8 + $0xa08] sm:$0xff]  ;;  %v4387_v58 = vld [vmem:[#allocation8 + $0xa18] sm:$0xff] }
 0x347   : > { %4270 = vmatpush2.msra.mxu1 %v3558_v63  ;;  %4130 = vmatpush2.msra.mxu0 %v3552_v6  ;;  %v4384_v63 = vld [vmem:[#allocation8 + $0xa00] sm:$0xff]  ;;  %v4386_v6 = vld [vmem:[#allocation8 + $0xa10] sm:$0xff] }
 0x348   : > { %4271 = vmatprep.subr.mxu1 %v3555_v8  ;;  %4304 = vmatprep.subr.mxu0 %v3631_v34  ;;  %v4381_v8 = vld [vmem:[#allocation8 + $0x9e8] sm:$0xff]  ;;  %v4383_v34 = vld [vmem:[#allocation8 + $0x9f8] sm:$0xff] }
 0x349   : > { %4272 = vmatpush2.msra.mxu1 %v3554_v61  ;;  %v4380_v61 = vld [vmem:[#allocation8 + $0x9e0] sm:$0xff] }
 0x34a   : > { %4600 = vmatprep.subr.mxu1 %v4493_v3  ;;  %v4382_v3 = vld [vmem:[#allocation8 + $0x9f0] sm:$0xff] }
 0x370   : > { %v3453_v12 = vpop.permute.xlu0 %3452 }
 0x371   : > { %3460 = vst.msk [vmem:[#allocation2] sm:$0xfe] %vm3459_vm1, %v3453_v12 }
 0x373   : > { %v3455_v14 = vpop.permute.xlu1 %3454 }
 0x374   : > { %v3456_v15 = vsel %vm395_vm0, %v3453_v12, %v3455_v14  ;;  %v4377_v12 = vld [vmem:[#allocation8 + $0x9c8] sm:$0xff]  ;;  %v4379_v14 = vld [vmem:[#allocation8 + $0x9d8] sm:$0xff] }
 0x375   : > { %3461 = vst [vmem:[#allocation2 + $0x8] sm:$0xfe] %v3456_v15  ;;  %v4376_v15 = vld [vmem:[#allocation8 + $0x9c0] sm:$0xff] }
 0x378   : > { %v9621_v56 = vld [vmem:[#allocation2] sm:$0xff] }
 0x37c   : > { %v3477_v10 = vld [vmem:[#allocation2 + $0x8] sm:$0xff] }
 0x37d   : > { %4131 = vmatprep.mubr.f32.mxu0 %v3477_v10  ;;  %4273 = vmatprep.mubr.f32.mxu1 %v3477_v10  ;;  %v9632_v30 = vrot.slane %v3477_v10, 1  ;;  %v4378_v10 = vld [vmem:[#allocation8 + $0x9d0] sm:$0xff] }
 0x37e   : > { %4132 = vmatmul.mubr.f32.vlgmr.msra.gmra.mxu0 %v9621_v56  ;;  %4274 = vmatmul.mubr.f32.vlgmr.msra.gmra.mxu1 %v9621_v56 }
 0x37f   : > { %4305 = vmatpush1.msra.mxu0 %v3630_v13  ;;  %4601 = vmatpush1.msra.mxu1 %v4492_v18  ;;  %v4373_v13 = vld [vmem:[#allocation8 + $0x9a8] sm:$0xff]  ;;  %v4375_v18 = vld [vmem:[#allocation8 + $0x9b8] sm:$0xff] }
 0x380   : > { %4306 = vmatprep.subr.mxu0 %v3627_v27  ;;  %4602 = vmatprep.subr.mxu1 %v4489_v59  ;;  %v4372_v27 = vld [vmem:[#allocation8 + $0x9a0] sm:$0xff]  ;;  %v4374_v59 = vld [vmem:[#allocation8 + $0x9b0] sm:$0xff] }
 0x381   : > { %4307 = vmatpush1.msra.mxu0 %v3626_v31  ;;  %4603 = vmatpush1.msra.mxu1 %v4488_v32  ;;  %v4369_v31 = vld [vmem:[#allocation8 + $0x988] sm:$0xff]  ;;  %v4371_v32 = vld [vmem:[#allocation8 + $0x998] sm:$0xff] }
 0x382   : > { %4308 = vmatprep.subr.mxu0 %v3623_v60  ;;  %4604 = vmatprep.subr.mxu1 %v4485_v33  ;;  %v4368_v60 = vld [vmem:[#allocation8 + $0x980] sm:$0xff]  ;;  %v4370_v33 = vld [vmem:[#allocation8 + $0x990] sm:$0xff] }
 0x383   : > { %4309 = vmatpush1.msra.mxu0 %v3622_v35  ;;  %4605 = vmatpush1.msra.mxu1 %v4484_v36  ;;  %v4365_v35 = vld [vmem:[#allocation8 + $0x968] sm:$0xff]  ;;  %v4367_v36 = vld [vmem:[#allocation8 + $0x978] sm:$0xff] }
 0x384   : > { %4310 = vmatprep.subr.mxu0 %v3619_v7  ;;  %4606 = vmatprep.subr.mxu1 %v4481_v9  ;;  %v4364_v7 = vld [vmem:[#allocation8 + $0x960] sm:$0xff]  ;;  %v4366_v9 = vld [vmem:[#allocation8 + $0x970] sm:$0xff] }
 0x385   : > { %4311 = vmatpush1.msra.mxu0 %v3618_v11  ;;  %4344 = vmatprep.mubr.f32.mxu0 %v9608_v39  ;;  %v4361_v11 = vld [vmem:[#allocation8 + $0x948] sm:$0xff] }
 0x386   : > { %4607 = vmatpush1.msra.mxu1 %v4480_v19  ;;  %4640 = vmatprep.mubr.f32.mxu1 %v9608_v39  ;;  %v4363_v19 = vld [vmem:[#allocation8 + $0x958] sm:$0xff] }
 0x387   : > { %7579 = vmatmul.mubr.msk.f32.vlgmr.msra.gmra.mxu0 %vm395_vm0, %v9614_v44  ;;  %4505 = vmatprep.subr.mxu0 %v4413_v21  ;;  %v4407_v44 = vld [vmem:[#allocation8 + $0xab8] sm:$0xff]  ;;  %v4360_v21 = vld [vmem:[#allocation8 + $0x940] sm:$0xff] }
 0x388   : > { %7580 = vmatmul.mubr.msk.f32.vlgmr.msra.gmra.mxu1 %vm395_vm0, %v9626_v20  ;;  %4647 = vmatprep.subr.mxu1 %v4415_v55  ;;  %v4362_v55 = vld [vmem:[#allocation8 + $0x950] sm:$0xff] }
 0x389   : > { %4506 = vmatpush1.msra.mxu0 %v4412_v26  ;;  %4569 = vmatprep.mubr.f32.mxu0 %v9632_v30  ;;  %v4357_v26 = vld [vmem:[#allocation8 + $0x928] sm:$0xff] }
 0x38a   : > { %4648 = vmatpush1.msra.mxu1 %v4414_v22  ;;  %4711 = vmatprep.mubr.f32.mxu1 %v9632_v30  ;;  %v4359_v22 = vld [vmem:[#allocation8 + $0x938] sm:$0xff] }
 0x38b   : > { %4507 = vmatprep.subr.mxu0 %v4409_v24  ;;  %4649 = vmatprep.subr.mxu1 %v4411_v25  ;;  %v4356_v24 = vld [vmem:[#allocation8 + $0x920] sm:$0xff]  ;;  %v4358_v25 = vld [vmem:[#allocation8 + $0x930] sm:$0xff] }
 0x38c   : > { %4508 = vmatpush1.msra.mxu0 %v4408_v28  ;;  %4650 = vmatpush1.msra.mxu1 %v4410_v29  ;;  %v4353_v28 = vld [vmem:[#allocation8 + $0x908] sm:$0xff]  ;;  %v4355_v29 = vld [vmem:[#allocation8 + $0x918] sm:$0xff] }
 0x38d   : > { %4509 = vmatprep.subr.mxu0 %v4405_v37  ;;  %4651 = vmatprep.subr.mxu1 %v4407_v44  ;;  %v4352_v37 = vld [vmem:[#allocation8 + $0x900] sm:$0xff]  ;;  %v4354_v44 = vld [vmem:[#allocation8 + $0x910] sm:$0xff] }
 0x38e   : > { %4510 = vmatpush1.msra.mxu0 %v4404_v40  ;;  %4652 = vmatpush1.msra.mxu1 %v4406_v42  ;;  %v4477_v40 = vld [vmem:[#allocation8 + $0xce8] sm:$0xff]  ;;  %v4479_v42 = vld [vmem:[#allocation8 + $0xcf8] sm:$0xff] }
 0x38f   : > { %4511 = vmatprep.subr.mxu0 %v4401_v45  ;;  %4653 = vmatprep.subr.mxu1 %v4403_v51  ;;  %v4476_v45 = vld [vmem:[#allocation8 + $0xce0] sm:$0xff]  ;;  %v4478_v51 = vld [vmem:[#allocation8 + $0xcf0] sm:$0xff] }
 0x390   : > { %4512 = vmatpush1.msra.mxu0 %v4400_v47  ;;  %4654 = vmatpush1.msra.mxu1 %v4402_v38  ;;  %v4473_v47 = vld [vmem:[#allocation8 + $0xcc8] sm:$0xff]  ;;  %v4475_v38 = vld [vmem:[#allocation8 + $0xcd8] sm:$0xff] }
 0x391   : > { %4513 = vmatprep.subr.mxu0 %v4397_v41  ;;  %4655 = vmatprep.subr.mxu1 %v4399_v48  ;;  %v4472_v41 = vld [vmem:[#allocation8 + $0xcc0] sm:$0xff]  ;;  %v4474_v48 = vld [vmem:[#allocation8 + $0xcd0] sm:$0xff] }
 0x392   : > { %4514 = vmatpush1.msra.mxu0 %v4396_v5  ;;  %4656 = vmatpush1.msra.mxu1 %v4398_v53  ;;  %v4469_v5 = vld [vmem:[#allocation8 + $0xca8] sm:$0xff]  ;;  %v4471_v53 = vld [vmem:[#allocation8 + $0xcb8] sm:$0xff] }
 0x393   : > { %4515 = vmatprep.subr.mxu0 %v4393_v62  ;;  %4657 = vmatprep.subr.mxu1 %v4395_v54  ;;  %v4468_v62 = vld [vmem:[#allocation8 + $0xca0] sm:$0xff]  ;;  %v4470_v54 = vld [vmem:[#allocation8 + $0xcb0] sm:$0xff] }
 0x394   : > { %4516 = vmatpush1.msra.mxu0 %v4392_v57  ;;  %4658 = vmatpush1.msra.mxu1 %v4394_v1  ;;  %v4465_v57 = vld [vmem:[#allocation8 + $0xc88] sm:$0xff]  ;;  %v4467_v1 = vld [vmem:[#allocation8 + $0xc98] sm:$0xff] }
 0x395   : > { %4517 = vmatprep.subr.mxu0 %v4389_v52  ;;  %4659 = vmatprep.subr.mxu1 %v4391_v17  ;;  %v4464_v52 = vld [vmem:[#allocation8 + $0xc80] sm:$0xff]  ;;  %v4466_v17 = vld [vmem:[#allocation8 + $0xc90] sm:$0xff] }
 0x396   : > { %4518 = vmatpush1.msra.mxu0 %v4388_v43  ;;  %4660 = vmatpush1.msra.mxu1 %v4390_v49  ;;  %v4461_v43 = vld [vmem:[#allocation8 + $0xc68] sm:$0xff]  ;;  %v4463_v49 = vld [vmem:[#allocation8 + $0xc78] sm:$0xff] }
 0x397   : > { %4519 = vmatprep.subr.mxu0 %v4385_v2  ;;  %4661 = vmatprep.subr.mxu1 %v4387_v58  ;;  %v4460_v2 = vld [vmem:[#allocation8 + $0xc60] sm:$0xff]  ;;  %v4462_v58 = vld [vmem:[#allocation8 + $0xc70] sm:$0xff] }
 0x398   : > { %4520 = vmatpush1.msra.mxu0 %v4384_v63  ;;  %4662 = vmatpush1.msra.mxu1 %v4386_v6  ;;  %v4457_v63 = vld [vmem:[#allocation8 + $0xc48] sm:$0xff]  ;;  %v4459_v6 = vld [vmem:[#allocation8 + $0xc58] sm:$0xff] }
 0x399   : > { %4521 = vmatprep.subr.mxu0 %v4381_v8  ;;  %4663 = vmatprep.subr.mxu1 %v4383_v34  ;;  %v4456_v8 = vld [vmem:[#allocation8 + $0xc40] sm:$0xff]  ;;  %v4458_v34 = vld [vmem:[#allocation8 + $0xc50] sm:$0xff] }
 0x39a   : > { %4522 = vmatpush1.msra.mxu0 %v4380_v61  ;;  %4664 = vmatpush1.msra.mxu1 %v4382_v3  ;;  %v4453_v61 = vld [vmem:[#allocation8 + $0xc28] sm:$0xff]  ;;  %v4455_v3 = vld [vmem:[#allocation8 + $0xc38] sm:$0xff] }
 0x39b   : > { %4523 = vmatprep.subr.mxu0 %v4377_v12  ;;  %4665 = vmatprep.subr.mxu1 %v4379_v14  ;;  %v4452_v12 = vld [vmem:[#allocation8 + $0xc20] sm:$0xff]  ;;  %v4454_v14 = vld [vmem:[#allocation8 + $0xc30] sm:$0xff] }
 0x39c   : > { %4524 = vmatpush1.msra.mxu0 %v4376_v15  ;;  %4666 = vmatpush1.msra.mxu1 %v4378_v10  ;;  %v4449_v15 = vld [vmem:[#allocation8 + $0xc08] sm:$0xff]  ;;  %v4451_v10 = vld [vmem:[#allocation8 + $0xc18] sm:$0xff] }
 0x39d   : > { %4525 = vmatprep.subr.mxu0 %v4373_v13  ;;  %4667 = vmatprep.subr.mxu1 %v4375_v18  ;;  %v4448_v13 = vld [vmem:[#allocation8 + $0xc00] sm:$0xff]  ;;  %v4450_v18 = vld [vmem:[#allocation8 + $0xc10] sm:$0xff] }
 0x39e   : > { %4526 = vmatpush1.msra.mxu0 %v4372_v27  ;;  %4668 = vmatpush1.msra.mxu1 %v4374_v59  ;;  %v4445_v27 = vld [vmem:[#allocation8 + $0xbe8] sm:$0xff]  ;;  %v4447_v59 = vld [vmem:[#allocation8 + $0xbf8] sm:$0xff] }
 0x39f   : > { %4527 = vmatprep.subr.mxu0 %v4369_v31  ;;  %4669 = vmatprep.subr.mxu1 %v4371_v32  ;;  %v4444_v31 = vld [vmem:[#allocation8 + $0xbe0] sm:$0xff]  ;;  %v4446_v32 = vld [vmem:[#allocation8 + $0xbf0] sm:$0xff] }
 0x3a0   : > { %4528 = vmatpush1.msra.mxu0 %v4368_v60  ;;  %4670 = vmatpush1.msra.mxu1 %v4370_v33  ;;  %v4441_v60 = vld [vmem:[#allocation8 + $0xbc8] sm:$0xff]  ;;  %v4443_v33 = vld [vmem:[#allocation8 + $0xbd8] sm:$0xff] }
 0x3a1   : > { %4529 = vmatprep.subr.mxu0 %v4365_v35  ;;  %4671 = vmatprep.subr.mxu1 %v4367_v36  ;;  %v4440_v35 = vld [vmem:[#allocation8 + $0xbc0] sm:$0xff]  ;;  %v4442_v36 = vld [vmem:[#allocation8 + $0xbd0] sm:$0xff] }
 0x3a2   : > { %4530 = vmatpush1.msra.mxu0 %v4364_v7  ;;  %4672 = vmatpush1.msra.mxu1 %v4366_v9  ;;  %v4437_v7 = vld [vmem:[#allocation8 + $0xba8] sm:$0xff]  ;;  %v4439_v9 = vld [vmem:[#allocation8 + $0xbb8] sm:$0xff] }
 0x3a3   : > { %4531 = vmatprep.subr.mxu0 %v4361_v11  ;;  %4673 = vmatprep.subr.mxu1 %v4363_v19  ;;  %v4436_v11 = vld [vmem:[#allocation8 + $0xba0] sm:$0xff]  ;;  %v4438_v19 = vld [vmem:[#allocation8 + $0xbb0] sm:$0xff] }
 0x3a4   : > { %4532 = vmatpush1.msra.mxu0 %v4360_v21  ;;  %4674 = vmatpush1.msra.mxu1 %v4362_v55  ;;  %v9640_v21 = vpop.f32.mrf.mxu1  ;;  %v4433_v55 = vld [vmem:[#allocation8 + $0xb88] sm:$0xff] }
 0x3a5   : > { %4533 = vmatprep.subr.mxu0 %v4357_v26  ;;  %4675 = vmatprep.subr.mxu1 %v4359_v22  ;;  %v4435_v26 = vld [vmem:[#allocation8 + $0xb98] sm:$0xff]  ;;  %v4432_v22 = vld [vmem:[#allocation8 + $0xb80] sm:$0xff] }
 0x3a6   : > { %4534 = vmatpush1.msra.mxu0 %v4356_v24  ;;  %4676 = vmatpush1.msra.mxu1 %v4358_v25  ;;  %v4434_v24 = vld [vmem:[#allocation8 + $0xb90] sm:$0xff]  ;;  %v4429_v25 = vld [vmem:[#allocation8 + $0xb68] sm:$0xff] }
 0x3a7   : > { %4535 = vmatprep.subr.mxu0 %v4353_v28  ;;  %4677 = vmatprep.subr.mxu1 %v4355_v29  ;;  %v4431_v28 = vld [vmem:[#allocation8 + $0xb78] sm:$0xff] }
 0x3a8   : > { %4536 = vmatpush1.msra.mxu0 %v4352_v37  ;;  %4678 = vmatpush1.msra.mxu1 %v4354_v44  ;;  %v4428_v37 = vld [vmem:[#allocation8 + $0xb60] sm:$0xff]  ;;  %v4430_v44 = vld [vmem:[#allocation8 + $0xb70] sm:$0xff] }
 0x3a9   : > { %4537 = vmatprep.subr.mxu0 %v4477_v40  ;;  %4679 = vmatprep.subr.mxu1 %v4479_v42  ;;  %v3919_v40 = vpop.f32.mrf.mxu1  ;;  %v4425_v42 = vld [vmem:[#allocation8 + $0xb48] sm:$0xff] }
 0x3aa   : > { %4538 = vmatpush2.msra.mxu0 %v4476_v45  ;;  %4680 = vmatpush2.msra.mxu1 %v4478_v51  ;;  %v4427_v45 = vld [vmem:[#allocation8 + $0xb58] sm:$0xff] }
 0x3ab   : > { %4539 = vmatprep.subr.mxu0 %v4473_v47  ;;  %4681 = vmatprep.subr.mxu1 %v4475_v38  ;;  %v4424_v38 = vld [vmem:[#allocation8 + $0xb40] sm:$0xff] }
 0x3ac   : > { %4540 = vmatpush2.msra.mxu0 %v4472_v41  ;;  %4682 = vmatpush2.msra.mxu1 %v4474_v48  ;;  %v4426_v41 = vld [vmem:[#allocation8 + $0xb50] sm:$0xff]  ;;  %v4421_v48 = vld [vmem:[#allocation8 + $0xb28] sm:$0xff] }
 0x3ad   : > { %4541 = vmatprep.subr.mxu0 %v4469_v5  ;;  %4683 = vmatprep.subr.mxu1 %v4471_v53  ;;  %v4423_v5 = vld [vmem:[#allocation8 + $0xb38] sm:$0xff]  ;;  %v4420_v53 = vld [vmem:[#allocation8 + $0xb20] sm:$0xff] }
 0x3ae   : > { %4542 = vmatpush2.msra.mxu0 %v4468_v62  ;;  %4684 = vmatpush2.msra.mxu1 %v4470_v54  ;;  %v4422_v62 = vld [vmem:[#allocation8 + $0xb30] sm:$0xff]  ;;  %v4417_v54 = vld [vmem:[#allocation8 + $0xb08] sm:$0xff] }
 0x3af   : > { %4543 = vmatprep.subr.mxu0 %v4465_v57  ;;  %4685 = vmatprep.subr.mxu1 %v4467_v1  ;;  %v4419_v57 = vld [vmem:[#allocation8 + $0xb18] sm:$0xff]  ;;  %v4416_v1 = vld [vmem:[#allocation8 + $0xb00] sm:$0xff] }
 0x3b0   : > { %4544 = vmatpush2.msra.mxu0 %v4464_v52  ;;  %4686 = vmatpush2.msra.mxu1 %v4466_v17  ;;  %v4418_v52 = vld [vmem:[#allocation8 + $0xb10] sm:$0xff] }
 0x3b1   : > { %4545 = vmatprep.subr.mxu0 %v4461_v43  ;;  %4687 = vmatprep.subr.mxu1 %v4463_v49 }
 0x3b2   : > { %4546 = vmatpush2.msra.mxu0 %v4460_v2  ;;  %4688 = vmatpush2.msra.mxu1 %v4462_v58  ;;  %v9649_v2 = vrot.slane %v9621_v56, 1  ;;  %v4495_v58 = vld [vmem:[#allocation8 + $0xd78] sm:$0xff] }
 0x3b3   : > { %4547 = vmatprep.subr.mxu0 %v4457_v63  ;;  %4689 = vmatprep.subr.mxu1 %v4459_v6  ;;  %v4935_v63 = vld [vmem:[#allocation8 + $0x11e8] sm:$0xff]  ;;  %v4494_v6 = vld [vmem:[#allocation8 + $0xd70] sm:$0xff]  ;;  %v4487_v56 = vld [vmem:[#allocation8 + $0xd38] sm:$0xff] }
 0x3b4   : > { %4548 = vmatpush2.msra.mxu0 %v4456_v8  ;;  %4690 = vmatpush2.msra.mxu1 %v4458_v34  ;;  %v4934_v8 = vld [vmem:[#allocation8 + $0x11e0] sm:$0xff]  ;;  %v4491_v34 = vld [vmem:[#allocation8 + $0xd58] sm:$0xff] }
 0x3b5   : > { %4549 = vmatprep.subr.mxu0 %v4453_v61  ;;  %4691 = vmatprep.subr.mxu1 %v4455_v3  ;;  %v4931_v61 = vld [vmem:[#allocation8 + $0x11c8] sm:$0xff]  ;;  %v4490_v3 = vld [vmem:[#allocation8 + $0xd50] sm:$0xff] }
 0x3b6   : > { %4550 = vmatpush2.msra.mxu0 %v4452_v12  ;;  %4692 = vmatpush2.msra.mxu1 %v4454_v14  ;;  %v4930_v12 = vld [vmem:[#allocation8 + $0x11c0] sm:$0xff]  ;;  %v4927_v14 = vld [vmem:[#allocation8 + $0x11a8] sm:$0xff] }
 0x3b7   : > { %4551 = vmatprep.subr.mxu0 %v4449_v15  ;;  %4693 = vmatprep.subr.mxu1 %v4451_v10  ;;  %v4486_v15 = vld [vmem:[#allocation8 + $0xd30] sm:$0xff]  ;;  %v4926_v10 = vld [vmem:[#allocation8 + $0x11a0] sm:$0xff] }
 0x3b8   : > { %4552 = vmatpush2.msra.mxu0 %v4448_v13  ;;  %4694 = vmatpush2.msra.mxu1 %v4450_v18  ;;  %v4483_v13 = vld [vmem:[#allocation8 + $0xd18] sm:$0xff]  ;;  %v4923_v18 = vld [vmem:[#allocation8 + $0x1188] sm:$0xff] }
 0x3b9   : > { %4553 = vmatprep.subr.mxu0 %v4445_v27  ;;  %4695 = vmatprep.subr.mxu1 %v4447_v59  ;;  %v4482_v27 = vld [vmem:[#allocation8 + $0xd10] sm:$0xff]  ;;  %v4922_v59 = vld [vmem:[#allocation8 + $0x1180] sm:$0xff] }
 0x3ba   : > { %4554 = vmatpush2.msra.mxu0 %v4444_v31  ;;  %4696 = vmatpush2.msra.mxu1 %v4446_v32  ;;  %v4855_v31 = vld [vmem:[#allocation8 + $0xf68] sm:$0xff]  ;;  %v7711_v32 = vld [vmem:[#allocation2 + $0x40] sm:$0xff] }
 0x3bb   : > { %4555 = vmatprep.subr.mxu0 %v4441_v60  ;;  %4697 = vmatprep.subr.mxu1 %v4443_v33  ;;  %v9653_v60 = vrot.slane %v7711_v32, 1  ;;  %v4857_v33 = vld [vmem:[#allocation8 + $0xf78] sm:$0xff]  ;;  %v4812_v32 = vld [vmem:[#allocation8 + $0xe10] sm:$0xff] }
 0x3bc   : > { %4556 = vmatpush2.msra.mxu0 %v4440_v35  ;;  %4698 = vmatpush2.msra.mxu1 %v4442_v36  ;;  %v4854_v35 = vld [vmem:[#allocation8 + $0xf60] sm:$0xff]  ;;  %v7712_v36 = vld [vmem:[#allocation2 + $0x38] sm:$0xff] }
 0x3bd   : > { %4557 = vmatprep.subr.mxu0 %v4437_v7  ;;  %4699 = vmatprep.subr.mxu1 %v4439_v9  ;;  %v9659_v7 = vrot.slane %v7712_v36, 1  ;;  %v4856_v9 = vld [vmem:[#allocation8 + $0xf70] sm:$0xff]  ;;  %v4806_v36 = vld [vmem:[#allocation8 + $0xde0] sm:$0xff] }
 0x3be   : > { %4558 = vmatpush2.msra.mxu0 %v4436_v11  ;;  %4700 = vmatpush2.msra.mxu1 %v4438_v19  ;;  %v9642_v29 = vpop.f32.mrf.mxu0  ;;  %v4851_v11 = vld [vmem:[#allocation8 + $0xf48] sm:$0xff]  ;;  %v4853_v19 = vld [vmem:[#allocation8 + $0xf58] sm:$0xff] }
 0x3bf   : > { %4559 = vmatprep.subr.mxu0 %v4433_v55  ;;  %4701 = vmatprep.subr.mxu1 %v4435_v26  ;;  %v3988_v17 = vpop.f32.mrf.mxu1  ;;  %v4850_v55 = vld [vmem:[#allocation8 + $0xf40] sm:$0xff]  ;;  %v4852_v26 = vld [vmem:[#allocation8 + $0xf50] sm:$0xff] }
 0x3c0   : > { %4560 = vmatpush2.msra.mxu0 %v4432_v22  ;;  %4702 = vmatpush2.msra.mxu1 %v4434_v24  ;;  %v3848_v51 = vpop.f32.mrf.mxu0  ;;  %v4847_v22 = vld [vmem:[#allocation8 + $0xf28] sm:$0xff]  ;;  %v4849_v24 = vld [vmem:[#allocation8 + $0xf38] sm:$0xff] }
 0x3c1   : > { %4561 = vmatprep.subr.mxu0 %v4429_v25  ;;  %4703 = vmatprep.subr.mxu1 %v4431_v28  ;;  %v9644_v47 = vadd.f32 %v3919_v40, %v3848_v51  ;;  %v4846_v25 = vld [vmem:[#allocation8 + $0xf20] sm:$0xff]  ;;  %v4848_v28 = vld [vmem:[#allocation8 + $0xf30] sm:$0xff]  ;;  %v4841_v51 = vld [vmem:[#allocation8 + $0xef8] sm:$0xff] }
 0x3c2   : > { %4562 = vmatpush2.msra.mxu0 %v4428_v37  ;;  %4704 = vmatpush2.msra.mxu1 %v4430_v44  ;;  %v4843_v37 = vld [vmem:[#allocation8 + $0xf08] sm:$0xff]  ;;  %v4845_v44 = vld [vmem:[#allocation8 + $0xf18] sm:$0xff]  ;;  %v4842_v40 = vld [vmem:[#allocation8 + $0xf00] sm:$0xff] }
 0x3c3   : > { %4563 = vmatprep.subr.mxu0 %v4425_v42  ;;  %4705 = vmatprep.subr.mxu1 %v4427_v45  ;;  %v4844_v42 = vld [vmem:[#allocation8 + $0xf10] sm:$0xff]  ;;  %v4839_v45 = vld [vmem:[#allocation8 + $0xee8] sm:$0xff] }
 0x3c4   : > { %4564 = vmatpush2.msra.mxu0 %v4424_v38  ;;  %4706 = vmatpush2.msra.mxu1 %v4426_v41  ;;  %v4838_v38 = vld [vmem:[#allocation8 + $0xee0] sm:$0xff]  ;;  %v4840_v41 = vld [vmem:[#allocation8 + $0xef0] sm:$0xff] }
 0x3c5   : > { %4565 = vmatprep.subr.mxu0 %v4421_v48  ;;  %4707 = vmatprep.subr.mxu1 %v4423_v5  ;;  %v4835_v48 = vld [vmem:[#allocation8 + $0xec8] sm:$0xff]  ;;  %v4837_v5 = vld [vmem:[#allocation8 + $0xed8] sm:$0xff] }
 0x3c6   : > { %4566 = vmatpush2.msra.mxu0 %v4420_v53  ;;  %4708 = vmatpush2.msra.mxu1 %v4422_v62  ;;  %v4059_v43 = vpop.f32.mrf.mxu0  ;;  %v4834_v53 = vld [vmem:[#allocation8 + $0xec0] sm:$0xff]  ;;  %v4836_v62 = vld [vmem:[#allocation8 + $0xed0] sm:$0xff] }
 0x3c7   : > { %4567 = vmatprep.subr.mxu0 %v4417_v54  ;;  %4709 = vmatprep.subr.mxu1 %v4419_v57  ;;  %v9646_v49 = vadd.f32 %v4059_v43, %v3988_v17  ;;  %v4831_v54 = vld [vmem:[#allocation8 + $0xea8] sm:$0xff]  ;;  %v4833_v57 = vld [vmem:[#allocation8 + $0xeb8] sm:$0xff] }
 0x3c8   : > { %4568 = vmatpush2.msra.mxu0 %v4416_v1  ;;  %4710 = vmatpush2.msra.mxu1 %v4418_v52  ;;  %v4830_v1 = vld [vmem:[#allocation8 + $0xea0] sm:$0xff]  ;;  %v4832_v52 = vld [vmem:[#allocation8 + $0xeb0] sm:$0xff]  ;;  %v4827_v17 = vld [vmem:[#allocation8 + $0xe88] sm:$0xff] }
 0x3c9   : > { %4570 = vmatmul.mubr.f32.vlgmr.msra.gmra.mxu0 %v9649_v2  ;;  %4712 = vmatmul.mubr.f32.vlgmr.msra.gmra.mxu1 %v9649_v2  ;;  %v4829_v43 = vld [vmem:[#allocation8 + $0xe98] sm:$0xff] }
 0x3ca   : > { %4742 = vmatprep.subr.mxu0 %v4495_v58  ;;  %5042 = vmatprep.subr.mxu1 %v4935_v63  ;;  %v4826_v58 = vld [vmem:[#allocation8 + $0xe80] sm:$0xff]  ;;  %v4828_v63 = vld [vmem:[#allocation8 + $0xe90] sm:$0xff] }
 0x3cb   : > { %4743 = vmatpush1.msra.mxu0 %v4494_v6  ;;  %5043 = vmatpush1.msra.mxu1 %v4934_v8  ;;  %v4823_v6 = vld [vmem:[#allocation8 + $0xe68] sm:$0xff]  ;;  %v4825_v8 = vld [vmem:[#allocation8 + $0xe78] sm:$0xff] }
 0x3cc   : > { %4744 = vmatprep.subr.mxu0 %v4491_v34  ;;  %5044 = vmatprep.subr.mxu1 %v4931_v61  ;;  %v4822_v34 = vld [vmem:[#allocation8 + $0xe60] sm:$0xff]  ;;  %v4824_v61 = vld [vmem:[#allocation8 + $0xe70] sm:$0xff] }
 0x3cd   : > { %4745 = vmatpush1.msra.mxu0 %v4490_v3  ;;  %5045 = vmatpush1.msra.mxu1 %v4930_v12  ;;  %v4819_v3 = vld [vmem:[#allocation8 + $0xe48] sm:$0xff]  ;;  %v4821_v12 = vld [vmem:[#allocation8 + $0xe58] sm:$0xff] }
 0x3ce   : > { %4746 = vmatprep.subr.mxu0 %v4487_v56  ;;  %5046 = vmatprep.subr.mxu1 %v4927_v14  ;;  %v4818_v56 = vld [vmem:[#allocation8 + $0xe40] sm:$0xff]  ;;  %v4820_v14 = vld [vmem:[#allocation8 + $0xe50] sm:$0xff] }
 0x3cf   : > { %4747 = vmatpush1.msra.mxu0 %v4486_v15  ;;  %5047 = vmatpush1.msra.mxu1 %v4926_v10  ;;  %v4815_v15 = vld [vmem:[#allocation8 + $0xe28] sm:$0xff]  ;;  %v4817_v10 = vld [vmem:[#allocation8 + $0xe38] sm:$0xff] }
 0x3d0   : > { %4748 = vmatprep.subr.mxu0 %v4483_v13  ;;  %5048 = vmatprep.subr.mxu1 %v4923_v18  ;;  %v4814_v13 = vld [vmem:[#allocation8 + $0xe20] sm:$0xff]  ;;  %v4816_v18 = vld [vmem:[#allocation8 + $0xe30] sm:$0xff] }
 0x3d1   : > { %4749 = vmatpush1.msra.mxu0 %v4482_v27  ;;  %4782 = vmatprep.mubr.f32.mxu0 %v9608_v39  ;;  %v4811_v27 = vld [vmem:[#allocation8 + $0xe08] sm:$0xff] }
 0x3d2   : > { %5049 = vmatpush1.msra.mxu1 %v4922_v59  ;;  %5082 = vmatprep.mubr.f32.mxu1 %v9608_v39  ;;  %v4813_v59 = vld [vmem:[#allocation8 + $0xe18] sm:$0xff] }
 0x3d3   : > { %7581 = vmatmul.mubr.msk.f32.vlgmr.msra.gmra.mxu0 %vm395_vm0, %v9626_v20  ;;  %4947 = vmatprep.subr.mxu0 %v4855_v31  ;;  %v4810_v31 = vld [vmem:[#allocation8 + $0xe00] sm:$0xff] }
 0x3d4   : > { %7582 = vmatmul.mubr.msk.f32.vlgmr.msra.gmra.mxu1 %vm395_vm0, %v9653_v60  ;;  %5089 = vmatprep.subr.mxu1 %v4857_v33  ;;  %v4807_v33 = vld [vmem:[#allocation8 + $0xde8] sm:$0xff] }
 0x3d5   : > { %4948 = vmatpush1.msra.mxu0 %v4854_v35  ;;  %5011 = vmatprep.mubr.f32.mxu0 %v9659_v7  ;;  %v4809_v35 = vld [vmem:[#allocation8 + $0xdf8] sm:$0xff] }
 0x3d6   : > { %5090 = vmatpush1.msra.mxu1 %v4856_v9  ;;  %5153 = vmatprep.mubr.f32.mxu1 %v9659_v7  ;;  %v4808_v9 = vld [vmem:[#allocation8 + $0xdf0] sm:$0xff] }
 0x3d7   : > { %4949 = vmatprep.subr.mxu0 %v4851_v11  ;;  %5091 = vmatprep.subr.mxu1 %v4853_v19  ;;  %v4803_v11 = vld [vmem:[#allocation8 + $0xdc8] sm:$0xff]  ;;  %v4805_v19 = vld [vmem:[#allocation8 + $0xdd8] sm:$0xff] }
 0x3d8   : > { %4950 = vmatpush1.msra.mxu0 %v4850_v55  ;;  %5092 = vmatpush1.msra.mxu1 %v4852_v26  ;;  %v4802_v55 = vld [vmem:[#allocation8 + $0xdc0] sm:$0xff]  ;;  %v4804_v26 = vld [vmem:[#allocation8 + $0xdd0] sm:$0xff] }
 0x3d9   : > { %4951 = vmatprep.subr.mxu0 %v4847_v22  ;;  %5093 = vmatprep.subr.mxu1 %v4849_v24  ;;  %v4799_v22 = vld [vmem:[#allocation8 + $0xda8] sm:$0xff]  ;;  %v4801_v24 = vld [vmem:[#allocation8 + $0xdb8] sm:$0xff] }
 0x3da   : > { %4952 = vmatpush1.msra.mxu0 %v4846_v25  ;;  %5094 = vmatpush1.msra.mxu1 %v4848_v28  ;;  %v4798_v25 = vld [vmem:[#allocation8 + $0xda0] sm:$0xff]  ;;  %v4800_v28 = vld [vmem:[#allocation8 + $0xdb0] sm:$0xff] }
 0x3db   : > { %4953 = vmatprep.subr.mxu0 %v4843_v37  ;;  %5095 = vmatprep.subr.mxu1 %v4845_v44  ;;  %v4795_v37 = vld [vmem:[#allocation8 + $0xd88] sm:$0xff]  ;;  %v4797_v44 = vld [vmem:[#allocation8 + $0xd98] sm:$0xff] }
 0x3dc   : > { %4954 = vmatpush1.msra.mxu0 %v4842_v40  ;;  %5096 = vmatpush1.msra.mxu1 %v4844_v42  ;;  %v4794_v40 = vld [vmem:[#allocation8 + $0xd80] sm:$0xff]  ;;  %v4796_v42 = vld [vmem:[#allocation8 + $0xd90] sm:$0xff] }
 0x3dd   : > { %4955 = vmatprep.subr.mxu0 %v4839_v45  ;;  %5097 = vmatprep.subr.mxu1 %v4841_v51  ;;  %v4919_v45 = vld [vmem:[#allocation8 + $0x1168] sm:$0xff]  ;;  %v4921_v51 = vld [vmem:[#allocation8 + $0x1178] sm:$0xff] }
 0x3de   : > { %4956 = vmatpush1.msra.mxu0 %v4838_v38  ;;  %5098 = vmatpush1.msra.mxu1 %v4840_v41  ;;  %v4918_v38 = vld [vmem:[#allocation8 + $0x1160] sm:$0xff]  ;;  %v4920_v41 = vld [vmem:[#allocation8 + $0x1170] sm:$0xff] }
 0x3df   : > { %4957 = vmatprep.subr.mxu0 %v4835_v48  ;;  %5099 = vmatprep.subr.mxu1 %v4837_v5  ;;  %v4915_v48 = vld [vmem:[#allocation8 + $0x1148] sm:$0xff]  ;;  %v4917_v5 = vld [vmem:[#allocation8 + $0x1158] sm:$0xff] }
 0x3e0   : > { %4958 = vmatpush1.msra.mxu0 %v4834_v53  ;;  %5100 = vmatpush1.msra.mxu1 %v4836_v62  ;;  %v4914_v53 = vld [vmem:[#allocation8 + $0x1140] sm:$0xff]  ;;  %v4916_v62 = vld [vmem:[#allocation8 + $0x1150] sm:$0xff] }
 0x3e1   : > { %4959 = vmatprep.subr.mxu0 %v4831_v54  ;;  %5101 = vmatprep.subr.mxu1 %v4833_v57  ;;  %v4911_v54 = vld [vmem:[#allocation8 + $0x1128] sm:$0xff]  ;;  %v4913_v57 = vld [vmem:[#allocation8 + $0x1138] sm:$0xff] }
 0x3e2   : > { %4960 = vmatpush1.msra.mxu0 %v4830_v1  ;;  %5102 = vmatpush1.msra.mxu1 %v4832_v52  ;;  %v4910_v1 = vld [vmem:[#allocation8 + $0x1120] sm:$0xff]  ;;  %v4912_v52 = vld [vmem:[#allocation8 + $0x1130] sm:$0xff] }
 0x3e3   : > { %4961 = vmatprep.subr.mxu0 %v4827_v17  ;;  %5103 = vmatprep.subr.mxu1 %v4829_v43  ;;  %v4907_v17 = vld [vmem:[#allocation8 + $0x1108] sm:$0xff]  ;;  %v4909_v43 = vld [vmem:[#allocation8 + $0x1118] sm:$0xff] }
 0x3e4   : > { %4962 = vmatpush1.msra.mxu0 %v4826_v58  ;;  %5104 = vmatpush1.msra.mxu1 %v4828_v63  ;;  %v4906_v58 = vld [vmem:[#allocation8 + $0x1100] sm:$0xff]  ;;  %v4908_v63 = vld [vmem:[#allocation8 + $0x1110] sm:$0xff] }
 0x3e5   : > { %4963 = vmatprep.subr.mxu0 %v4823_v6  ;;  %5105 = vmatprep.subr.mxu1 %v4825_v8  ;;  %v4903_v6 = vld [vmem:[#allocation8 + $0x10e8] sm:$0xff]  ;;  %v4905_v8 = vld [vmem:[#allocation8 + $0x10f8] sm:$0xff] }
 0x3e6   : > { %4964 = vmatpush1.msra.mxu0 %v4822_v34  ;;  %5106 = vmatpush1.msra.mxu1 %v4824_v61  ;;  %v4902_v34 = vld [vmem:[#allocation8 + $0x10e0] sm:$0xff]  ;;  %v4904_v61 = vld [vmem:[#allocation8 + $0x10f0] sm:$0xff] }
 0x3e7   : > { %4965 = vmatprep.subr.mxu0 %v4819_v3  ;;  %5107 = vmatprep.subr.mxu1 %v4821_v12  ;;  %v4899_v3 = vld [vmem:[#allocation8 + $0x10c8] sm:$0xff]  ;;  %v4901_v12 = vld [vmem:[#allocation8 + $0x10d8] sm:$0xff] }
 0x3e8   : > { %4966 = vmatpush1.msra.mxu0 %v4818_v56  ;;  %5108 = vmatpush1.msra.mxu1 %v4820_v14  ;;  %v4898_v56 = vld [vmem:[#allocation8 + $0x10c0] sm:$0xff]  ;;  %v4900_v14 = vld [vmem:[#allocation8 + $0x10d0] sm:$0xff] }
 0x3e9   : > { %4967 = vmatprep.subr.mxu0 %v4815_v15  ;;  %5109 = vmatprep.subr.mxu1 %v4817_v10  ;;  %v4895_v15 = vld [vmem:[#allocation8 + $0x10a8] sm:$0xff]  ;;  %v4897_v10 = vld [vmem:[#allocation8 + $0x10b8] sm:$0xff] }
 0x3ea   : > { %4968 = vmatpush1.msra.mxu0 %v4814_v13  ;;  %5110 = vmatpush1.msra.mxu1 %v4816_v18  ;;  %v4894_v13 = vld [vmem:[#allocation8 + $0x10a0] sm:$0xff]  ;;  %v4896_v18 = vld [vmem:[#allocation8 + $0x10b0] sm:$0xff] }
 0x3eb   : > { %4969 = vmatprep.subr.mxu0 %v4811_v27  ;;  %5111 = vmatprep.subr.mxu1 %v4813_v59  ;;  %v4891_v27 = vld [vmem:[#allocation8 + $0x1088] sm:$0xff]  ;;  %v4893_v59 = vld [vmem:[#allocation8 + $0x1098] sm:$0xff] }
 0x3ec   : > { %4970 = vmatpush1.msra.mxu0 %v4810_v31  ;;  %5112 = vmatpush1.msra.mxu1 %v4812_v32  ;;  %v4890_v31 = vld [vmem:[#allocation8 + $0x1080] sm:$0xff]  ;;  %v4892_v32 = vld [vmem:[#allocation8 + $0x1090] sm:$0xff] }
 0x3ed   : > { %4971 = vmatprep.subr.mxu0 %v4807_v33  ;;  %5113 = vmatprep.subr.mxu1 %v4809_v35  ;;  %v4887_v33 = vld [vmem:[#allocation8 + $0x1068] sm:$0xff]  ;;  %v4889_v35 = vld [vmem:[#allocation8 + $0x1078] sm:$0xff] }
 0x3ee   : > { %4972 = vmatpush1.msra.mxu0 %v4806_v36  ;;  %5114 = vmatpush1.msra.mxu1 %v4808_v9  ;;  %v4886_v36 = vld [vmem:[#allocation8 + $0x1060] sm:$0xff]  ;;  %v4888_v9 = vld [vmem:[#allocation8 + $0x1070] sm:$0xff] }
 0x3ef   : > { %4973 = vmatprep.subr.mxu0 %v4803_v11  ;;  %5115 = vmatprep.subr.mxu1 %v4805_v19  ;;  %v4883_v11 = vld [vmem:[#allocation8 + $0x1048] sm:$0xff]  ;;  %v4885_v19 = vld [vmem:[#allocation8 + $0x1058] sm:$0xff] }
 0x3f0   : > { %4974 = vmatpush1.msra.mxu0 %v4802_v55  ;;  %5116 = vmatpush1.msra.mxu1 %v4804_v26  ;;  %v4882_v55 = vld [vmem:[#allocation8 + $0x1040] sm:$0xff]  ;;  %v4884_v26 = vld [vmem:[#allocation8 + $0x1050] sm:$0xff] }
 0x3f1   : > { %4975 = vmatprep.subr.mxu0 %v4799_v22  ;;  %5117 = vmatprep.subr.mxu1 %v4801_v24  ;;  %v4879_v22 = vld [vmem:[#allocation8 + $0x1028] sm:$0xff]  ;;  %v4881_v24 = vld [vmem:[#allocation8 + $0x1038] sm:$0xff] }
 0x3f2   : > { %4976 = vmatpush1.msra.mxu0 %v4798_v25  ;;  %5118 = vmatpush1.msra.mxu1 %v4800_v28  ;;  %v4878_v25 = vld [vmem:[#allocation8 + $0x1020] sm:$0xff]  ;;  %v4880_v28 = vld [vmem:[#allocation8 + $0x1030] sm:$0xff] }
 0x3f3   : > { %4977 = vmatprep.subr.mxu0 %v4795_v37  ;;  %5119 = vmatprep.subr.mxu1 %v4797_v44  ;;  %v4875_v37 = vld [vmem:[#allocation8 + $0x1008] sm:$0xff]  ;;  %v4877_v44 = vld [vmem:[#allocation8 + $0x1018] sm:$0xff] }
 0x3f4   : > { %4978 = vmatpush1.msra.mxu0 %v4794_v40  ;;  %5120 = vmatpush1.msra.mxu1 %v4796_v42  ;;  %v4874_v40 = vld [vmem:[#allocation8 + $0x1000] sm:$0xff]  ;;  %v4876_v42 = vld [vmem:[#allocation8 + $0x1010] sm:$0xff] }
 0x3f5   : > { %4979 = vmatprep.subr.mxu0 %v4919_v45  ;;  %5121 = vmatprep.subr.mxu1 %v4921_v51  ;;  %v4871_v45 = vld [vmem:[#allocation8 + $0xfe8] sm:$0xff]  ;;  %v4873_v51 = vld [vmem:[#allocation8 + $0xff8] sm:$0xff] }
 0x3f6   : > { %4980 = vmatpush2.msra.mxu0 %v4918_v38  ;;  %5122 = vmatpush2.msra.mxu1 %v4920_v41  ;;  %v4870_v38 = vld [vmem:[#allocation8 + $0xfe0] sm:$0xff]  ;;  %v4872_v41 = vld [vmem:[#allocation8 + $0xff0] sm:$0xff] }
 0x3f7   : > { %4981 = vmatprep.subr.mxu0 %v4915_v48  ;;  %5123 = vmatprep.subr.mxu1 %v4917_v5  ;;  %v4867_v48 = vld [vmem:[#allocation8 + $0xfc8] sm:$0xff]  ;;  %v4869_v5 = vld [vmem:[#allocation8 + $0xfd8] sm:$0xff] }
 0x3f8   : > { %4982 = vmatpush2.msra.mxu0 %v4914_v53  ;;  %5124 = vmatpush2.msra.mxu1 %v4916_v62  ;;  %v4866_v53 = vld [vmem:[#allocation8 + $0xfc0] sm:$0xff]  ;;  %v4868_v62 = vld [vmem:[#allocation8 + $0xfd0] sm:$0xff] }
 0x3f9   : > { %4983 = vmatprep.subr.mxu0 %v4911_v54  ;;  %5125 = vmatprep.subr.mxu1 %v4913_v57  ;;  %v4863_v54 = vld [vmem:[#allocation8 + $0xfa8] sm:$0xff]  ;;  %v4865_v57 = vld [vmem:[#allocation8 + $0xfb8] sm:$0xff] }
 0x3fa   : > { %4984 = vmatpush2.msra.mxu0 %v4910_v1  ;;  %5126 = vmatpush2.msra.mxu1 %v4912_v52  ;;  %v4862_v1 = vld [vmem:[#allocation8 + $0xfa0] sm:$0xff]  ;;  %v4864_v52 = vld [vmem:[#allocation8 + $0xfb0] sm:$0xff] }
 0x3fb   : > { %4985 = vmatprep.subr.mxu0 %v4907_v17  ;;  %5127 = vmatprep.subr.mxu1 %v4909_v43  ;;  %v4859_v17 = vld [vmem:[#allocation8 + $0xf88] sm:$0xff]  ;;  %v4861_v43 = vld [vmem:[#allocation8 + $0xf98] sm:$0xff] }
 0x3fc   : > { %4986 = vmatpush2.msra.mxu0 %v4906_v58  ;;  %5128 = vmatpush2.msra.mxu1 %v4908_v63  ;;  %v4858_v58 = vld [vmem:[#allocation8 + $0xf80] sm:$0xff]  ;;  %v4860_v63 = vld [vmem:[#allocation8 + $0xf90] sm:$0xff] }
 0x3fd   : > { %4987 = vmatprep.subr.mxu0 %v4903_v6  ;;  %5129 = vmatprep.subr.mxu1 %v4905_v8  ;;  %v7713_v6 = vld [vmem:[#allocation2 + $0x30] sm:$0xff] }
 0x3fe   : > { %4988 = vmatpush2.msra.mxu0 %v4902_v34  ;;  %5130 = vmatpush2.msra.mxu1 %v4904_v61  ;;  %v9665_v8 = vrot.slane %v7713_v6, 1  ;;  %v4937_v34 = vld [vmem:[#allocation8 + $0x11f8] sm:$0xff]  ;;  %v5377_v61 = vld [vmem:[#allocation8 + $0x1668] sm:$0xff] }
 0x3ff   : > { %4989 = vmatprep.subr.mxu0 %v4899_v3  ;;  %5131 = vmatprep.subr.mxu1 %v4901_v12  ;;  %v4936_v3 = vld [vmem:[#allocation8 + $0x11f0] sm:$0xff]  ;;  %v5376_v12 = vld [vmem:[#allocation8 + $0x1660] sm:$0xff]  ;;  %v5277_v6 = vld [vmem:[#allocation8 + $0x1348] sm:$0xff] }
 0x400   : > { %4990 = vmatpush2.msra.mxu0 %v4898_v56  ;;  %5132 = vmatpush2.msra.mxu1 %v4900_v14  ;;  %v4933_v56 = vld [vmem:[#allocation8 + $0x11d8] sm:$0xff]  ;;  %v5373_v14 = vld [vmem:[#allocation8 + $0x1648] sm:$0xff] }
 0x401   : > { %4991 = vmatprep.subr.mxu0 %v4895_v15  ;;  %5133 = vmatprep.subr.mxu1 %v4897_v10  ;;  %v4932_v15 = vld [vmem:[#allocation8 + $0x11d0] sm:$0xff]  ;;  %v5372_v10 = vld [vmem:[#allocation8 + $0x1640] sm:$0xff] }
 0x402   : > { %4992 = vmatpush2.msra.mxu0 %v4894_v13  ;;  %5134 = vmatpush2.msra.mxu1 %v4896_v18  ;;  %v3481_v13 = vld [vmem:[#allocation2 + $0x28] sm:$0x1]  ;;  %v4929_v18 = vld [vmem:[#allocation8 + $0x11b8] sm:$0xff] }
 0x403   : > { %4993 = vmatprep.subr.mxu0 %v4891_v27  ;;  %5135 = vmatprep.subr.mxu1 %v4893_v59  ;;  %v5369_v27 = vld [vmem:[#allocation8 + $0x1628] sm:$0xff]  ;;  %v4928_v59 = vld [vmem:[#allocation8 + $0x11b0] sm:$0xff] }
 0x404   : > { %4994 = vmatpush2.msra.mxu0 %v4890_v31  ;;  %5136 = vmatpush2.msra.mxu1 %v4892_v32  ;;  %v5368_v31 = vld [vmem:[#allocation8 + $0x1620] sm:$0xff]  ;;  %v7714_v32 = vld [vmem:[#allocation2 + $0x10] sm:$0xff] }
 0x405   : > { %4995 = vmatprep.subr.mxu0 %v4887_v33  ;;  %5137 = vmatprep.subr.mxu1 %v4889_v35  ;;  %v5390_v33 = vrot.slane %v7714_v32, 2  ;;  %v4925_v35 = vld [vmem:[#allocation8 + $0x1198] sm:$0xff]  ;;  %v5264_v32 = vld [vmem:[#allocation8 + $0x12e0] sm:$0xff] }
 0x406   : > { %4996 = vmatpush2.msra.mxu0 %v4886_v36  ;;  %5138 = vmatpush2.msra.mxu1 %v4888_v9  ;;  %v5365_v36 = vld [vmem:[#allocation8 + $0x1608] sm:$0xff]  ;;  %v5391_v9 = vrot.slane %v3481_v13, 2  ;;  %v5271_v13 = vld [vmem:[#allocation8 + $0x1318] sm:$0xff] }
 0x407   : > { %4997 = vmatprep.subr.mxu0 %v4883_v11  ;;  %5139 = vmatprep.subr.mxu1 %v4885_v19  ;;  %v3480_v11 = vld [vmem:[#allocation2 + $0x20] sm:$0x1]  ;;  %v4924_v19 = vld [vmem:[#allocation8 + $0x1190] sm:$0xff] }
 0x408   : > { %4998 = vmatpush2.msra.mxu0 %v4882_v55  ;;  %5140 = vmatpush2.msra.mxu1 %v4884_v26  ;;  %v5364_v55 = vld [vmem:[#allocation8 + $0x1600] sm:$0xff] }
 0x409   : > { %4999 = vmatprep.subr.mxu0 %v4879_v22  ;;  %5141 = vmatprep.subr.mxu1 %v4881_v24  ;;  %v7715_v26 = vld [vmem:[#allocation2 + $0x8] sm:$0xff] }
 0x40a   : > { %5000 = vmatpush2.msra.mxu0 %v4878_v25  ;;  %5142 = vmatpush2.msra.mxu1 %v4880_v28  ;;  %v5387_v22 = vrot.slane %v7715_v26, 2  ;;  %v5297_v24 = vld [vmem:[#allocation8 + $0x13e8] sm:$0xff]  ;;  %v5388_v25 = vrot.slane %v3480_v11, 2  ;;  %v9671_v28 = vsel %vm5383_vm3, %v5390_v33, %v5391_v9  ;;  %v5266_v33 = vld [vmem:[#allocation8 + $0x12f0] sm:$0xff]  ;;  %v5260_v9 = vld [vmem:[#allocation8 + $0x12c0] sm:$0xff] }
 0x40b   : > { %5001 = vmatprep.subr.mxu0 %v4875_v37  ;;  %5143 = vmatprep.subr.mxu1 %v4877_v44  ;;  %v5299_v37 = vld [vmem:[#allocation8 + $0x13f8] sm:$0xff]  ;;  %v5296_v44 = vld [vmem:[#allocation8 + $0x13e0] sm:$0xff]  ;;  %v5262_v11 = vld [vmem:[#allocation8 + $0x12d0] sm:$0xff] }
 0x40c   : > { %5002 = vmatpush2.msra.mxu0 %v4874_v40  ;;  %5144 = vmatpush2.msra.mxu1 %v4876_v42  ;;  %v5298_v40 = vld [vmem:[#allocation8 + $0x13f0] sm:$0xff]  ;;  %v9679_v42 = vsel %vm5383_vm3, %v5387_v22, %v5388_v25  ;;  %v5256_v26 = vld [vmem:[#allocation8 + $0x12a0] sm:$0xff]  ;;  %v5255_v25 = vld [vmem:[#allocation8 + $0x1298] sm:$0xff] }
 0x40d   : > { %5003 = vmatprep.subr.mxu0 %v4871_v45  ;;  %5145 = vmatprep.subr.mxu1 %v4873_v51  ;;  %v5293_v45 = vld [vmem:[#allocation8 + $0x13c8] sm:$0xff]  ;;  %v5295_v51 = vld [vmem:[#allocation8 + $0x13d8] sm:$0xff]  ;;  %v5258_v22 = vld [vmem:[#allocation8 + $0x12b0] sm:$0xff] }
 0x40e   : > { %5004 = vmatpush2.msra.mxu0 %v4870_v38  ;;  %5146 = vmatpush2.msra.mxu1 %v4872_v41  ;;  %v5292_v38 = vld [vmem:[#allocation8 + $0x13c0] sm:$0xff]  ;;  %v5294_v41 = vld [vmem:[#allocation8 + $0x13d0] sm:$0xff] }
 0x40f   : > { %5005 = vmatprep.subr.mxu0 %v4867_v48  ;;  %5147 = vmatprep.subr.mxu1 %v4869_v5  ;;  %v5289_v48 = vld [vmem:[#allocation8 + $0x13a8] sm:$0xff]  ;;  %v5291_v5 = vld [vmem:[#allocation8 + $0x13b8] sm:$0xff] }
 0x410   : > { %5006 = vmatpush2.msra.mxu0 %v4866_v53  ;;  %5148 = vmatpush2.msra.mxu1 %v4868_v62  ;;  %v5288_v53 = vld [vmem:[#allocation8 + $0x13a0] sm:$0xff]  ;;  %v5290_v62 = vld [vmem:[#allocation8 + $0x13b0] sm:$0xff] }
 0x411   : > { %5007 = vmatprep.subr.mxu0 %v4863_v54  ;;  %5149 = vmatprep.subr.mxu1 %v4865_v57  ;;  %v5285_v54 = vld [vmem:[#allocation8 + $0x1388] sm:$0xff]  ;;  %v5287_v57 = vld [vmem:[#allocation8 + $0x1398] sm:$0xff] }
 0x412   : > { %5008 = vmatpush2.msra.mxu0 %v4862_v1  ;;  %5150 = vmatpush2.msra.mxu1 %v4864_v52  ;;  %v5284_v1 = vld [vmem:[#allocation8 + $0x1380] sm:$0xff]  ;;  %v5286_v52 = vld [vmem:[#allocation8 + $0x1390] sm:$0xff] }
 0x413   : > { %5009 = vmatprep.subr.mxu0 %v4859_v17  ;;  %5151 = vmatprep.subr.mxu1 %v4861_v43  ;;  %v5281_v17 = vld [vmem:[#allocation8 + $0x1368] sm:$0xff]  ;;  %v5283_v43 = vld [vmem:[#allocation8 + $0x1378] sm:$0xff] }
 0x414   : > { %5010 = vmatpush2.msra.mxu0 %v4858_v58  ;;  %5152 = vmatpush2.msra.mxu1 %v4860_v63  ;;  %v5280_v58 = vld [vmem:[#allocation8 + $0x1360] sm:$0xff]  ;;  %v5282_v63 = vld [vmem:[#allocation8 + $0x1370] sm:$0xff] }
 0x415   : > { %5012 = vmatmul.mubr.f32.vlgmr.msra.gmra.mxu0 %v9665_v8  ;;  %5154 = vmatmul.mubr.f32.vlgmr.msra.gmra.mxu1 %v9665_v8 }
 0x416   : > { %5184 = vmatprep.subr.mxu0 %v4937_v34  ;;  %5492 = vmatprep.subr.mxu1 %v5377_v61  ;;  %v5279_v34 = vld [vmem:[#allocation8 + $0x1358] sm:$0xff]  ;;  %v5276_v61 = vld [vmem:[#allocation8 + $0x1340] sm:$0xff] }
 0x417   : > { %5185 = vmatpush1.msra.mxu0 %v4936_v3  ;;  %5493 = vmatpush1.msra.mxu1 %v5376_v12  ;;  %v5278_v3 = vld [vmem:[#allocation8 + $0x1350] sm:$0xff]  ;;  %v5273_v12 = vld [vmem:[#allocation8 + $0x1328] sm:$0xff] }
 0x418   : > { %5186 = vmatprep.subr.mxu0 %v4933_v56  ;;  %5494 = vmatprep.subr.mxu1 %v5373_v14  ;;  %v5275_v56 = vld [vmem:[#allocation8 + $0x1338] sm:$0xff]  ;;  %v5272_v14 = vld [vmem:[#allocation8 + $0x1320] sm:$0xff] }
 0x419   : > { %5187 = vmatpush1.msra.mxu0 %v4932_v15  ;;  %5495 = vmatpush1.msra.mxu1 %v5372_v10  ;;  %v5274_v15 = vld [vmem:[#allocation8 + $0x1330] sm:$0xff]  ;;  %v5269_v10 = vld [vmem:[#allocation8 + $0x1308] sm:$0xff] }
 0x41a   : > { %5188 = vmatprep.subr.mxu0 %v4929_v18  ;;  %5496 = vmatprep.subr.mxu1 %v5369_v27  ;;  %v5268_v18 = vld [vmem:[#allocation8 + $0x1300] sm:$0xff]  ;;  %v5270_v27 = vld [vmem:[#allocation8 + $0x1310] sm:$0xff] }
 0x41b   : > { %5189 = vmatpush1.msra.mxu0 %v4928_v59  ;;  %5497 = vmatpush1.msra.mxu1 %v5368_v31  ;;  %v5265_v59 = vld [vmem:[#allocation8 + $0x12e8] sm:$0xff]  ;;  %v5267_v31 = vld [vmem:[#allocation8 + $0x12f8] sm:$0xff] }
 0x41c   : > { %5190 = vmatprep.subr.mxu0 %v4925_v35  ;;  %5498 = vmatprep.subr.mxu1 %v5365_v36  ;;  %v5261_v35 = vld [vmem:[#allocation8 + $0x12c8] sm:$0xff]  ;;  %v5263_v36 = vld [vmem:[#allocation8 + $0x12d8] sm:$0xff] }
 0x41d   : > { %5191 = vmatpush1.msra.mxu0 %v4924_v19  ;;  %5224 = vmatprep.mubr.f32.mxu0 %v9608_v39  ;;  %v5257_v19 = vld [vmem:[#allocation8 + $0x12a8] sm:$0xff] }
 0x41e   : > { %5499 = vmatpush1.msra.mxu1 %v5364_v55  ;;  %5532 = vmatprep.mubr.f32.mxu1 %v9608_v39  ;;  %v5259_v55 = vld [vmem:[#allocation8 + $0x12b8] sm:$0xff] }
 0x41f   : > { %7583 = vmatmul.mubr.msk.f32.vlgmr.msra.gmra.mxu0 %vm395_vm0, %v9653_v60  ;;  %5397 = vmatprep.subr.mxu0 %v5297_v24  ;;  %v5253_v24 = vld [vmem:[#allocation8 + $0x1288] sm:$0xff] }
 0x420   : > { %7584 = vmatmul.mubr.msk.f32.vlgmr.msra.gmra.mxu1 %vm395_vm0, %v9671_v28  ;;  %5539 = vmatprep.subr.mxu1 %v5299_v37  ;;  %v5252_v37 = vld [vmem:[#allocation8 + $0x1280] sm:$0xff] }
 0x421   : > { %5398 = vmatpush1.msra.mxu0 %v5296_v44  ;;  %5461 = vmatprep.mubr.f32.mxu0 %v9679_v42  ;;  %v5254_v44 = vld [vmem:[#allocation8 + $0x1290] sm:$0xff] }
 0x422   : > { %5540 = vmatpush1.msra.mxu1 %v5298_v40  ;;  %5603 = vmatprep.mubr.f32.mxu1 %v9679_v42  ;;  %v5249_v40 = vld [vmem:[#allocation8 + $0x1268] sm:$0xff] }
 0x423   : > { %5399 = vmatprep.subr.mxu0 %v5293_v45  ;;  %5541 = vmatprep.subr.mxu1 %v5295_v51  ;;  %v5251_v45 = vld [vmem:[#allocation8 + $0x1278] sm:$0xff]  ;;  %v5248_v51 = vld [vmem:[#allocation8 + $0x1260] sm:$0xff] }
 0x424   : > { %5400 = vmatpush1.msra.mxu0 %v5292_v38  ;;  %5542 = vmatpush1.msra.mxu1 %v5294_v41  ;;  %v5250_v38 = vld [vmem:[#allocation8 + $0x1270] sm:$0xff]  ;;  %v5245_v41 = vld [vmem:[#allocation8 + $0x1248] sm:$0xff] }
 0x425   : > { %5401 = vmatprep.subr.mxu0 %v5289_v48  ;;  %5543 = vmatprep.subr.mxu1 %v5291_v5  ;;  %v5247_v48 = vld [vmem:[#allocation8 + $0x1258] sm:$0xff]  ;;  %v3990_v5 = vpop.f32.mrf.mxu1 }
 0x426   : > { %5402 = vmatpush1.msra.mxu0 %v5288_v53  ;;  %5544 = vmatpush1.msra.mxu1 %v5290_v62  ;;  %v5244_v53 = vld [vmem:[#allocation8 + $0x1240] sm:$0xff]  ;;  %v5246_v62 = vld [vmem:[#allocation8 + $0x1250] sm:$0xff] }
 0x427   : > { %5403 = vmatprep.subr.mxu0 %v5285_v54  ;;  %5545 = vmatprep.subr.mxu1 %v5287_v57  ;;  %v5241_v54 = vld [vmem:[#allocation8 + $0x1228] sm:$0xff]  ;;  %v5243_v57 = vld [vmem:[#allocation8 + $0x1238] sm:$0xff] }
 0x428   : > { %5404 = vmatpush1.msra.mxu0 %v5284_v1  ;;  %5546 = vmatpush1.msra.mxu1 %v5286_v52  ;;  %v9683_v1 = vpop.f32.mrf.mxu1  ;;  %v5240_v52 = vld [vmem:[#allocation8 + $0x1220] sm:$0xff] }
 0x429   : > { %5405 = vmatprep.subr.mxu0 %v5281_v17  ;;  %5547 = vmatprep.subr.mxu1 %v5283_v43  ;;  %v5242_v17 = vld [vmem:[#allocation8 + $0x1230] sm:$0xff]  ;;  %v4061_v43 = vpop.f32.mrf.mxu0 }
 0x42a   : > { %5406 = vmatpush1.msra.mxu0 %v5280_v58  ;;  %5548 = vmatpush1.msra.mxu1 %v5282_v63  ;;  %v5237_v58 = vld [vmem:[#allocation8 + $0x1208] sm:$0xff]  ;;  %v5239_v63 = vld [vmem:[#allocation8 + $0x1218] sm:$0xff] }
 0x42b   : > { %5407 = vmatprep.subr.mxu0 %v5277_v6  ;;  %5549 = vmatprep.subr.mxu1 %v5279_v34  ;;  %v3918_v6 = vadd.f32 %v9640_v21, %v9642_v29  ;;  %v5236_v34 = vld [vmem:[#allocation8 + $0x1200] sm:$0xff]  ;;  %v5357_v21 = vld [vmem:[#allocation8 + $0x15c8] sm:$0xff]  ;;  %v5359_v29 = vld [vmem:[#allocation8 + $0x15d8] sm:$0xff] }
 0x42c   : > { %5408 = vmatpush1.msra.mxu0 %v5276_v61  ;;  %5550 = vmatpush1.msra.mxu1 %v5278_v3  ;;  %v5238_v61 = vld [vmem:[#allocation8 + $0x1210] sm:$0xff]  ;;  %v5361_v3 = vld [vmem:[#allocation8 + $0x15e8] sm:$0xff] }
 0x42d   : > { %5409 = vmatprep.subr.mxu0 %v5273_v12  ;;  %5551 = vmatprep.subr.mxu1 %v5275_v56  ;;  %v5363_v12 = vld [vmem:[#allocation8 + $0x15f8] sm:$0xff] }
 0x42e   : > { %5410 = vmatpush1.msra.mxu0 %v5272_v14  ;;  %5552 = vmatpush1.msra.mxu1 %v5274_v15  ;;  %v9687_v14 = vpop.f32.mrf.mxu1  ;;  %v5360_v15 = vld [vmem:[#allocation8 + $0x15e0] sm:$0xff] }
 0x42f   : > { %5411 = vmatprep.subr.mxu0 %v5269_v10  ;;  %5553 = vmatprep.subr.mxu1 %v5271_v13  ;;  %v5362_v10 = vld [vmem:[#allocation8 + $0x15f0] sm:$0xff] }
 0x430   : > { %5412 = vmatpush1.msra.mxu0 %v5268_v18  ;;  %5554 = vmatpush1.msra.mxu1 %v5270_v27  ;;  %v5356_v18 = vld [vmem:[#allocation8 + $0x15c0] sm:$0xff]  ;;  %v5358_v27 = vld [vmem:[#allocation8 + $0x15d0] sm:$0xff] }
 0x431   : > { %5413 = vmatprep.subr.mxu0 %v5265_v59  ;;  %5555 = vmatprep.subr.mxu1 %v5267_v31  ;;  %v5353_v31 = vld [vmem:[#allocation8 + $0x15a8] sm:$0xff] }
 0x432   : > { %5414 = vmatpush1.msra.mxu0 %v5264_v32  ;;  %5556 = vmatpush1.msra.mxu1 %v5266_v33  ;;  %v5355_v32 = vld [vmem:[#allocation8 + $0x15b8] sm:$0xff]  ;;  %v5352_v33 = vld [vmem:[#allocation8 + $0x15a0] sm:$0xff] }
 0x433   : > { %5415 = vmatprep.subr.mxu0 %v5261_v35  ;;  %5557 = vmatprep.subr.mxu1 %v5263_v36  ;;  %v5354_v35 = vld [vmem:[#allocation8 + $0x15b0] sm:$0xff]  ;;  %v5349_v36 = vld [vmem:[#allocation8 + $0x1588] sm:$0xff] }
 0x434   : > { %5416 = vmatpush1.msra.mxu0 %v5260_v9  ;;  %5558 = vmatpush1.msra.mxu1 %v5262_v11  ;;  %v5351_v9 = vld [vmem:[#allocation8 + $0x1598] sm:$0xff]  ;;  %v5348_v11 = vld [vmem:[#allocation8 + $0x1580] sm:$0xff] }
 0x435   : > { %5417 = vmatprep.subr.mxu0 %v5257_v19  ;;  %5559 = vmatprep.subr.mxu1 %v5259_v55  ;;  %v5350_v19 = vld [vmem:[#allocation8 + $0x1590] sm:$0xff] }
 0x436   : > { %5418 = vmatpush1.msra.mxu0 %v5256_v26  ;;  %5560 = vmatpush1.msra.mxu1 %v5258_v22  ;;  %v4062_v22 = vadd.f32 %v4061_v43, %v3990_v5  ;;  %v5340_v5 = vld [vmem:[#allocation8 + $0x1540] sm:$0xff]  ;;  %v5333_v43 = vld [vmem:[#allocation8 + $0x1508] sm:$0xff] }
 0x437   : > { %5419 = vmatprep.subr.mxu0 %v5253_v24  ;;  %5561 = vmatprep.subr.mxu1 %v5255_v25  ;;  %v5345_v24 = vld [vmem:[#allocation8 + $0x1568] sm:$0xff]  ;;  %v5347_v25 = vld [vmem:[#allocation8 + $0x1578] sm:$0xff] }
 0x438   : > { %5420 = vmatpush1.msra.mxu0 %v5252_v37  ;;  %5562 = vmatpush1.msra.mxu1 %v5254_v44  ;;  %v5344_v44 = vld [vmem:[#allocation8 + $0x1560] sm:$0xff] }
 0x439   : > { %5421 = vmatprep.subr.mxu0 %v5249_v40  ;;  %5563 = vmatprep.subr.mxu1 %v5251_v45  ;;  %v5346_v40 = vld [vmem:[#allocation8 + $0x1570] sm:$0xff] }
 0x43a   : > { %5422 = vmatpush1.msra.mxu0 %v5248_v51  ;;  %5564 = vmatpush1.msra.mxu1 %v5250_v38  ;;  %v5341_v51 = vld [vmem:[#allocation8 + $0x1548] sm:$0xff]  ;;  %v5343_v38 = vld [vmem:[#allocation8 + $0x1558] sm:$0xff] }
 0x43b   : > { %5423 = vmatprep.subr.mxu0 %v5245_v41  ;;  %5565 = vmatprep.subr.mxu1 %v5247_v48 }
 0x43c   : > { %5424 = vmatpush1.msra.mxu0 %v5244_v53  ;;  %5566 = vmatpush1.msra.mxu1 %v5246_v62  ;;  %v5342_v53 = vld [vmem:[#allocation8 + $0x1550] sm:$0xff] }
 0x43d   : > { %5425 = vmatprep.subr.mxu0 %v5241_v54  ;;  %5567 = vmatprep.subr.mxu1 %v5243_v57  ;;  %v5339_v54 = vld [vmem:[#allocation8 + $0x1538] sm:$0xff] }
 0x43e   : > { %5426 = vmatpush1.msra.mxu0 %v5240_v52  ;;  %5568 = vmatpush1.msra.mxu1 %v5242_v17  ;;  %v4133_v56 = vpop.f32.mrf.mxu0  ;;  %v4275_v59 = vpop.f32.mrf.mxu1  ;;  %v5336_v52 = vld [vmem:[#allocation8 + $0x1520] sm:$0xff]  ;;  %v5338_v17 = vld [vmem:[#allocation8 + $0x1530] sm:$0xff] }
 0x43f   : > { %5427 = vmatprep.subr.mxu0 %v5237_v58  ;;  %5569 = vmatprep.subr.mxu1 %v5239_v63  ;;  %v9689_v13 = vadd.f32 %v4133_v56, %v3918_v6  ;;  %v4276_v37 = vadd.f32 %v4275_v59, %v9646_v49  ;;  %v5337_v49 = vld [vmem:[#allocation8 + $0x1528] sm:$0xff]  ;;  %v5335_v58 = vld [vmem:[#allocation8 + $0x1518] sm:$0xff]  ;;  %v5332_v63 = vld [vmem:[#allocation8 + $0x1500] sm:$0xff] }
 0x440   : > { %5428 = vmatpush1.msra.mxu0 %v5236_v34  ;;  %5570 = vmatpush1.msra.mxu1 %v5238_v61  ;;  %v9691_v55 = vpop.f32.mrf.mxu0  ;;  %v4277_v26 = vpop.f32.mrf.mxu1  ;;  %v5334_v6 = vld [vmem:[#allocation8 + $0x1510] sm:$0xff]  ;;  %v5329_v34 = vld [vmem:[#allocation8 + $0x14e8] sm:$0xff]  ;;  %v5331_v61 = vld [vmem:[#allocation8 + $0x14f8] sm:$0xff] }
 0x441   : > { %5429 = vmatprep.subr.mxu0 %v5361_v3  ;;  %5571 = vmatprep.subr.mxu1 %v5363_v12  ;;  %v4278_v41 = vadd.f32 %v4277_v26, %v4062_v22  ;;  %v5328_v3 = vld [vmem:[#allocation8 + $0x14e0] sm:$0xff]  ;;  %v5330_v12 = vld [vmem:[#allocation8 + $0x14f0] sm:$0xff]  ;;  %v5325_v56 = vld [vmem:[#allocation8 + $0x14c8] sm:$0xff] }
 0x442   : > { %5430 = vmatpush2.msra.mxu0 %v5360_v15  ;;  %5572 = vmatpush2.msra.mxu1 %v5362_v10  ;;  %v5327_v15 = vld [vmem:[#allocation8 + $0x14d8] sm:$0xff]  ;;  %v5324_v10 = vld [vmem:[#allocation8 + $0x14c0] sm:$0xff]  ;;  %v5322_v59 = vld [vmem:[#allocation8 + $0x14b0] sm:$0xff] }
 0x443   : > { %5431 = vmatprep.subr.mxu0 %v5357_v21  ;;  %5573 = vmatprep.subr.mxu1 %v5359_v29  ;;  %v5326_v21 = vld [vmem:[#allocation8 + $0x14d0] sm:$0xff]  ;;  %v5321_v29 = vld [vmem:[#allocation8 + $0x14a8] sm:$0xff]  ;;  %v5311_v22 = vld [vmem:[#allocation8 + $0x1458] sm:$0xff] }
 0x444   : > { %5432 = vmatpush2.msra.mxu0 %v5356_v18  ;;  %5574 = vmatpush2.msra.mxu1 %v5358_v27  ;;  %v5323_v18 = vld [vmem:[#allocation8 + $0x14b8] sm:$0xff]  ;;  %v5320_v27 = vld [vmem:[#allocation8 + $0x14a0] sm:$0xff]  ;;  %v5309_v26 = vld [vmem:[#allocation8 + $0x1448] sm:$0xff] }
 0x445   : > { %5433 = vmatprep.subr.mxu0 %v5353_v31  ;;  %5575 = vmatprep.subr.mxu1 %v5355_v32  ;;  %v5317_v31 = vld [vmem:[#allocation8 + $0x1488] sm:$0xff]  ;;  %v5319_v32 = vld [vmem:[#allocation8 + $0x1498] sm:$0xff] }
 0x446   : > { %5434 = vmatpush2.msra.mxu0 %v5352_v33  ;;  %5576 = vmatpush2.msra.mxu1 %v5354_v35  ;;  %v5316_v33 = vld [vmem:[#allocation8 + $0x1480] sm:$0xff]  ;;  %v5318_v35 = vld [vmem:[#allocation8 + $0x1490] sm:$0xff] }
 0x447   : > { %5435 = vmatprep.subr.mxu0 %v5349_v36  ;;  %5577 = vmatprep.subr.mxu1 %v5351_v9  ;;  %v4346_v45 = vpop.f32.mrf.mxu0  ;;  %v5313_v36 = vld [vmem:[#allocation8 + $0x1468] sm:$0xff]  ;;  %v5315_v9 = vld [vmem:[#allocation8 + $0x1478] sm:$0xff] }
 0x448   : > { %5436 = vmatpush2.msra.mxu0 %v5348_v11  ;;  %5578 = vmatpush2.msra.mxu1 %v5350_v19  ;;  %v9694_v48 = vadd.f32 %v4346_v45, %v4276_v37  ;;  %v5312_v11 = vld [vmem:[#allocation8 + $0x1460] sm:$0xff]  ;;  %v5314_v19 = vld [vmem:[#allocation8 + $0x1470] sm:$0xff] }
 0x449   : > { %5437 = vmatprep.subr.mxu0 %v5345_v24  ;;  %5579 = vmatprep.subr.mxu1 %v5347_v25  ;;  %v4348_v62 = vpop.f32.mrf.mxu0  ;;  %v5308_v24 = vld [vmem:[#allocation8 + $0x1440] sm:$0xff]  ;;  %v5310_v25 = vld [vmem:[#allocation8 + $0x1450] sm:$0xff] }
 0x44a   : > { %5438 = vmatpush2.msra.mxu0 %v5344_v44  ;;  %5580 = vmatpush2.msra.mxu1 %v5346_v40  ;;  %v9696_v57 = vadd.f32 %v4348_v62, %v4278_v41  ;;  %v3479_v37 = vld [vmem:[#allocation2 + $0x18] sm:$0x1]  ;;  %v5305_v44 = vld [vmem:[#allocation8 + $0x1428] sm:$0xff]  ;;  %v5307_v40 = vld [vmem:[#allocation8 + $0x1438] sm:$0xff] }
 0x44b   : > { %5439 = vmatprep.subr.mxu0 %v5341_v51  ;;  %5581 = vmatprep.subr.mxu1 %v5343_v38  ;;  %v5304_v45 = vld [vmem:[#allocation8 + $0x1420] sm:$0xff]  ;;  %v5306_v51 = vld [vmem:[#allocation8 + $0x1430] sm:$0xff]  ;;  %v5385_v62 = vrot.slane %v3479_v37, 2  ;;  %v7738_v37 = vld [vmem:[#allocation8 + $0x618] sm:$0xff] }
 0x44c   : > { %5440 = vmatpush2.msra.mxu0 %v5340_v5  ;;  %5582 = vmatpush2.msra.mxu1 %v5342_v53  ;;  %v7716_v38 = vld [vmem:[#allocation2] sm:$0xff]  ;;  %v5301_v5 = vld [vmem:[#allocation8 + $0x1408] sm:$0xff] }
 0x44d   : > { %5441 = vmatprep.subr.mxu0 %v5337_v49  ;;  %5583 = vmatprep.subr.mxu1 %v5339_v54  ;;  %v5384_v41 = vrot.slane %v7716_v38, 2  ;;  %v5303_v53 = vld [vmem:[#allocation8 + $0x1418] sm:$0xff]  ;;  %v5300_v49 = vld [vmem:[#allocation8 + $0x1400] sm:$0xff]  ;;  %v5302_v54 = vld [vmem:[#allocation8 + $0x1410] sm:$0xff] }
 0x44e   : > { %5442 = vmatpush2.msra.mxu0 %v5336_v52  ;;  %5584 = vmatpush2.msra.mxu1 %v5338_v17  ;;  %v5379_v52 = vld [vmem:[#allocation8 + $0x1678] sm:$0xff]  ;;  %v7744_v38 = vld [vmem:[#allocation8 + $0x5f0] sm:$0xff] }
 0x44f   : > { %5443 = vmatprep.subr.mxu0 %v5333_v43  ;;  %5585 = vmatprep.subr.mxu1 %v5335_v58  ;;  %v9699_v17 = vsel %vm5383_vm3, %v5384_v41, %v5385_v62  ;;  %v5378_v43 = vld [vmem:[#allocation8 + $0x1670] sm:$0xff]  ;;  %v5375_v58 = vld [vmem:[#allocation8 + $0x1658] sm:$0xff]  ;;  %v7745_v41 = vld [vmem:[#allocation8 + $0x5c8] sm:$0xff] }
 0x450   : > { %5444 = vmatpush2.msra.mxu0 %v5332_v63  ;;  %5586 = vmatpush2.msra.mxu1 %v5334_v6  ;;  %v7717_v63 = vld [vmem:[#allocation8 + $0x8e8] sm:$0xff]  ;;  %v5374_v6 = vld [vmem:[#allocation8 + $0x1650] sm:$0xff] }
 0x451   : > { %5445 = vmatprep.subr.mxu0 %v5329_v34  ;;  %5587 = vmatprep.subr.mxu1 %v5331_v61  ;;  %v7718_v34 = vld [vmem:[#allocation8 + $0x8e0] sm:$0xff]  ;;  %v5371_v61 = vld [vmem:[#allocation8 + $0x1638] sm:$0xff]  ;;  %v7748_v62 = vld [vmem:[#allocation8 + $0x5d0] sm:$0xff] }
 0x452   : > { %5446 = vmatpush2.msra.mxu0 %v5328_v3  ;;  %5588 = vmatpush2.msra.mxu1 %v5330_v12  ;;  %v7719_v3 = vld [vmem:[#allocation8 + $0x8c8] sm:$0xff]  ;;  %v5370_v12 = vld [vmem:[#allocation8 + $0x1630] sm:$0xff] }
 0x453   : > { %5447 = vmatprep.subr.mxu0 %v5325_v56  ;;  %5589 = vmatprep.subr.mxu1 %v5327_v15  ;;  %v7720_v56 = vld [vmem:[#allocation8 + $0x8c0] sm:$0xff]  ;;  %v5367_v15 = vld [vmem:[#allocation8 + $0x1618] sm:$0xff] }
 0x454   : > { %5448 = vmatpush2.msra.mxu0 %v5324_v10  ;;  %5590 = vmatpush2.msra.mxu1 %v5326_v21  ;;  %v7721_v10 = vld [vmem:[#allocation8 + $0x8a8] sm:$0xff]  ;;  %v5366_v21 = vld [vmem:[#allocation8 + $0x1610] sm:$0xff] }
 0x455   : > { %5449 = vmatprep.subr.mxu0 %v5321_v29  ;;  %5591 = vmatprep.subr.mxu1 %v5323_v18  ;;  %v7722_v29 = vld [vmem:[#allocation8 + $0x8a0] sm:$0xff]  ;;  %v7723_v18 = vld [vmem:[#allocation8 + $0x888] sm:$0xff] }
 0x456   : > { %5450 = vmatpush2.msra.mxu0 %v5320_v27  ;;  %5592 = vmatpush2.msra.mxu1 %v5322_v59  ;;  %v7724_v27 = vld [vmem:[#allocation8 + $0x880] sm:$0xff]  ;;  %v7725_v59 = vld [vmem:[#allocation8 + $0x668] sm:$0xff] }
 0x457   : > { %5451 = vmatprep.subr.mxu0 %v5317_v31  ;;  %5593 = vmatprep.subr.mxu1 %v5319_v32  ;;  %v7726_v31 = vld [vmem:[#allocation8 + $0x678] sm:$0xff]  ;;  %v7727_v32 = vld [vmem:[#allocation8 + $0x660] sm:$0xff] }
 0x458   : > { %5452 = vmatpush2.msra.mxu0 %v5316_v33  ;;  %5594 = vmatpush2.msra.mxu1 %v5318_v35  ;;  %v7728_v33 = vld [vmem:[#allocation8 + $0x670] sm:$0xff]  ;;  %v7729_v35 = vld [vmem:[#allocation8 + $0x648] sm:$0xff] }
 0x459   : > { %5453 = vmatprep.subr.mxu0 %v5313_v36  ;;  %5595 = vmatprep.subr.mxu1 %v5315_v9  ;;  %v7730_v36 = vld [vmem:[#allocation8 + $0x658] sm:$0xff]  ;;  %v7731_v9 = vld [vmem:[#allocation8 + $0x640] sm:$0xff] }
 0x45a   : > { %5454 = vmatpush2.msra.mxu0 %v5312_v11  ;;  %5596 = vmatpush2.msra.mxu1 %v5314_v19  ;;  %v7732_v11 = vld [vmem:[#allocation8 + $0x650] sm:$0xff]  ;;  %v7733_v19 = vld [vmem:[#allocation8 + $0x628] sm:$0xff] }
 0x45b   : > { %5455 = vmatprep.subr.mxu0 %v5309_v26  ;;  %5597 = vmatprep.subr.mxu1 %v5311_v22  ;;  %v7734_v26 = vld [vmem:[#allocation8 + $0x638] sm:$0xff]  ;;  %v7735_v22 = vld [vmem:[#allocation8 + $0x620] sm:$0xff] }
 0x45c   : > { %5456 = vmatpush2.msra.mxu0 %v5308_v24  ;;  %5598 = vmatpush2.msra.mxu1 %v5310_v25  ;;  %v7736_v24 = vld [vmem:[#allocation8 + $0x630] sm:$0xff]  ;;  %v7737_v25 = vld [vmem:[#allocation8 + $0x608] sm:$0xff] }
 0x45d   : > { %5457 = vmatprep.subr.mxu0 %v5305_v44  ;;  %5599 = vmatprep.subr.mxu1 %v5307_v40  ;;  %v7740_v44 = vld [vmem:[#allocation8 + $0x610] sm:$0xff]  ;;  %v7741_v40 = vld [vmem:[#allocation8 + $0x5e8] sm:$0xff] }
 0x45e   : > { %5458 = vmatpush2.msra.mxu0 %v5304_v45  ;;  %5600 = vmatpush2.msra.mxu1 %v5306_v51  ;;  %v7742_v45 = vld [vmem:[#allocation8 + $0x5f8] sm:$0xff]  ;;  %v7743_v51 = vld [vmem:[#allocation8 + $0x5e0] sm:$0xff] }
 0x45f   : > { %5459 = vmatprep.subr.mxu0 %v5301_v5  ;;  %5601 = vmatprep.subr.mxu1 %v5303_v53  ;;  %v7746_v5 = vld [vmem:[#allocation8 + $0x5d8] sm:$0xff]  ;;  %v7747_v53 = vld [vmem:[#allocation8 + $0x5c0] sm:$0xff] }
 0x460   : > { %5460 = vmatpush2.msra.mxu0 %v5300_v49  ;;  %5602 = vmatpush2.msra.mxu1 %v5302_v54  ;;  %v7749_v49 = vld [vmem:[#allocation8 + $0x5a8] sm:$0xff]  ;;  %v7750_v54 = vld [vmem:[#allocation8 + $0x5b8] sm:$0xff] }
 0x461   : > { %5462 = vmatmul.mubr.f32.vlgmr.msra.gmra.mxu0 %v9699_v17  ;;  %5604 = vmatmul.mubr.f32.vlgmr.msra.gmra.mxu1 %v9699_v17 }
 0x462   : > { %5634 = vmatprep.subr.mxu0 %v5379_v52  ;;  %5780 = vmatprep.subr.mxu1 %v7717_v63  ;;  %v7751_v52 = vld [vmem:[#allocation8 + $0x5a0] sm:$0xff]  ;;  %v7754_v63 = vld [vmem:[#allocation8 + $0x598] sm:$0xff] }
 0x463   : > { %5635 = vmatpush1.msra.mxu0 %v5378_v43  ;;  %5781 = vmatpush1.msra.mxu1 %v7718_v34  ;;  %v7752_v43 = vld [vmem:[#allocation8 + $0x5b0] sm:$0xff] }
 0x464   : > { %5636 = vmatprep.subr.mxu0 %v5375_v58  ;;  %5782 = vmatprep.subr.mxu1 %v7719_v3  ;;  %v7753_v58 = vld [vmem:[#allocation8 + $0x588] sm:$0xff]  ;;  %v7756_v34 = vld [vmem:[#allocation8 + $0x590] sm:$0xff]  ;;  %v7758_v3 = vld [vmem:[#allocation8 + $0x578] sm:$0xff] }
 0x465   : > { %5637 = vmatpush1.msra.mxu0 %v5374_v6  ;;  %5783 = vmatpush1.msra.mxu1 %v7720_v56  ;;  %v7755_v6 = vld [vmem:[#allocation8 + $0x580] sm:$0xff]  ;;  %v7760_v56 = vld [vmem:[#allocation8 + $0x570] sm:$0xff] }
 0x466   : > { %5638 = vmatprep.subr.mxu0 %v5371_v61  ;;  %5784 = vmatprep.subr.mxu1 %v7721_v10  ;;  %v7757_v61 = vld [vmem:[#allocation8 + $0x568] sm:$0xff]  ;;  %v7762_v10 = vld [vmem:[#allocation8 + $0x558] sm:$0xff] }
 0x467   : > { %5639 = vmatpush1.msra.mxu0 %v5370_v12  ;;  %5785 = vmatpush1.msra.mxu1 %v7722_v29  ;;  %v7759_v12 = vld [vmem:[#allocation8 + $0x560] sm:$0xff]  ;;  %v7764_v29 = vld [vmem:[#allocation8 + $0x550] sm:$0xff] }
 0x468   : > { %5640 = vmatprep.subr.mxu0 %v5367_v15  ;;  %5786 = vmatprep.subr.mxu1 %v7723_v18  ;;  %v7761_v15 = vld [vmem:[#allocation8 + $0x548] sm:$0xff] }
 0x469   : > { %5641 = vmatpush1.msra.mxu0 %v5366_v21  ;;  %5674 = vmatprep.mubr.f32.mxu0 %v9608_v39  ;;  %v7763_v21 = vld [vmem:[#allocation8 + $0x540] sm:$0xff]  ;;  %v7765_v18 = vld [vmem:[#allocation8 + $0x528] sm:$0xff] }
 0x46a   : > { %5787 = vmatpush1.msra.mxu1 %v7724_v27  ;;  %5820 = vmatprep.mubr.f32.mxu1 %v9608_v39  ;;  %v7766_v27 = vld [vmem:[#allocation8 + $0x538] sm:$0xff] }
 0x46b   : > { %7585 = vmatmul.mubr.msk.f32.vlgmr.msra.gmra.mxu0 %vm395_vm0, %v9671_v28  ;;  %5685 = vmatprep.subr.mxu0 %v7725_v59  ;;  %v7767_v59 = vld [vmem:[#allocation8 + $0x520] sm:$0xff] }
 0x46c   : > { %7586 = vmatmul.mubr.msk.f32.vlgmr.msra.gmra.mxu1 %vm395_vm0, %v9626_v20  ;;  %5827 = vmatprep.subr.mxu1 %v7726_v31  ;;  %v7768_v31 = vld [vmem:[#allocation8 + $0x530] sm:$0xff] }
 0x46d   : > { %5686 = vmatpush1.msra.mxu0 %v7727_v32  ;;  %5749 = vmatprep.mubr.f32.mxu0 %v9632_v30  ;;  %v7769_v32 = vld [vmem:[#allocation8 + $0x508] sm:$0xff] }
 0x46e   : > { %5828 = vmatpush1.msra.mxu1 %v7728_v33  ;;  %5891 = vmatprep.mubr.f32.mxu1 %v9632_v30  ;;  %v7739_v30 = vld [vmem:[#allocation8 + $0x600] sm:$0xff]  ;;  %v7770_v33 = vld [vmem:[#allocation8 + $0x518] sm:$0xff] }
 0x46f   : > { %5687 = vmatprep.subr.mxu0 %v7729_v35  ;;  %5829 = vmatprep.subr.mxu1 %v7730_v36  ;;  %v7771_v35 = vld [vmem:[#allocation8 + $0x500] sm:$0xff]  ;;  %v7772_v36 = vld [vmem:[#allocation8 + $0x510] sm:$0xff] }
 0x470   : > { %5688 = vmatpush1.msra.mxu0 %v7731_v9  ;;  %5830 = vmatpush1.msra.mxu1 %v7732_v11  ;;  %v7773_v9 = vld [vmem:[#allocation8 + $0x4e8] sm:$0xff]  ;;  %v7774_v11 = vld [vmem:[#allocation8 + $0x4f8] sm:$0xff] }
 0x471   : > { %5689 = vmatprep.subr.mxu0 %v7733_v19  ;;  %5831 = vmatprep.subr.mxu1 %v7734_v26  ;;  %v7775_v19 = vld [vmem:[#allocation8 + $0x4e0] sm:$0xff]  ;;  %v7776_v26 = vld [vmem:[#allocation8 + $0x4f0] sm:$0xff] }
 0x472   : > { %5690 = vmatpush1.msra.mxu0 %v7735_v22  ;;  %5832 = vmatpush1.msra.mxu1 %v7736_v24  ;;  %v7777_v22 = vld [vmem:[#allocation8 + $0x4c8] sm:$0xff]  ;;  %v7778_v24 = vld [vmem:[#allocation8 + $0x4d8] sm:$0xff] }
 0x473   : > { %5691 = vmatprep.subr.mxu0 %v7737_v25  ;;  %5833 = vmatprep.subr.mxu1 %v7738_v37  ;;  %v7779_v25 = vld [vmem:[#allocation8 + $0x4c0] sm:$0xff]  ;;  %v7780_v37 = vld [vmem:[#allocation8 + $0x4d0] sm:$0xff] }
 0x474   : > { %5692 = vmatpush1.msra.mxu0 %v7739_v30  ;;  %5834 = vmatpush1.msra.mxu1 %v7740_v44  ;;  %v4642_v30 = vpop.f32.mrf.mxu1  ;;  %v7781_v44 = vld [vmem:[#allocation8 + $0x4a8] sm:$0xff] }
 0x475   : > { %5693 = vmatprep.subr.mxu0 %v7741_v40  ;;  %5835 = vmatprep.subr.mxu1 %v7742_v45  ;;  %v7782_v40 = vld [vmem:[#allocation8 + $0x4b8] sm:$0xff] }
 0x476   : > { %5694 = vmatpush1.msra.mxu0 %v7743_v51  ;;  %5836 = vmatpush1.msra.mxu1 %v7744_v38  ;;  %v4205_v51 = vadd.f32 %v9683_v1, %v9689_v13  ;;  %v7783_v38 = vld [vmem:[#allocation8 + $0x4a0] sm:$0xff]  ;;  %v7792_v13 = vld [vmem:[#allocation8 + $0x870] sm:$0xff] }
 0x477   : > { %5695 = vmatprep.subr.mxu0 %v7745_v41  ;;  %5837 = vmatprep.subr.mxu1 %v7746_v5  ;;  %v7784_v41 = vld [vmem:[#allocation8 + $0x4b0] sm:$0xff]  ;;  %v7791_v1 = vld [vmem:[#allocation8 + $0x860] sm:$0xff] }
 0x478   : > { %5696 = vmatpush1.msra.mxu0 %v7747_v53  ;;  %5838 = vmatpush1.msra.mxu1 %v7748_v62  ;;  %v7785_v53 = vld [vmem:[#allocation8 + $0x488] sm:$0xff]  ;;  %v7786_v62 = vld [vmem:[#allocation8 + $0x498] sm:$0xff] }
 0x479   : > { %5697 = vmatprep.subr.mxu0 %v7749_v49  ;;  %5839 = vmatprep.subr.mxu1 %v7750_v54  ;;  %v7787_v49 = vld [vmem:[#allocation8 + $0x480] sm:$0xff]  ;;  %v7788_v54 = vld [vmem:[#allocation8 + $0x490] sm:$0xff] }
 0x47a   : > { %5698 = vmatpush1.msra.mxu0 %v7751_v52  ;;  %5840 = vmatpush1.msra.mxu1 %v7752_v43  ;;  %v7789_v43 = vld [vmem:[#allocation8 + $0x868] sm:$0xff] }
 0x47b   : > { %5699 = vmatprep.subr.mxu0 %v7753_v58  ;;  %5841 = vmatprep.subr.mxu1 %v7754_v63  ;;  %v7790_v58 = vld [vmem:[#allocation8 + $0x878] sm:$0xff]  ;;  %v7793_v63 = vld [vmem:[#allocation8 + $0x848] sm:$0xff] }
 0x47c   : > { %5700 = vmatpush1.msra.mxu0 %v7755_v6  ;;  %5842 = vmatpush1.msra.mxu1 %v7756_v34  ;;  %v7794_v6 = vld [vmem:[#allocation8 + $0x858] sm:$0xff]  ;;  %v7795_v34 = vld [vmem:[#allocation8 + $0x840] sm:$0xff] }
 0x47d   : > { %5701 = vmatprep.subr.mxu0 %v7757_v61  ;;  %5843 = vmatprep.subr.mxu1 %v7758_v3  ;;  %v7796_v61 = vld [vmem:[#allocation8 + $0x850] sm:$0xff]  ;;  %v7797_v3 = vld [vmem:[#allocation8 + $0x828] sm:$0xff] }
 0x47e   : > { %5702 = vmatpush1.msra.mxu0 %v7759_v12  ;;  %5844 = vmatpush1.msra.mxu1 %v7760_v56  ;;  %v7798_v12 = vld [vmem:[#allocation8 + $0x838] sm:$0xff]  ;;  %v7799_v56 = vld [vmem:[#allocation8 + $0x820] sm:$0xff] }
 0x47f   : > { %5703 = vmatprep.subr.mxu0 %v7761_v15  ;;  %5845 = vmatprep.subr.mxu1 %v7762_v10  ;;  %v7800_v15 = vld [vmem:[#allocation8 + $0x830] sm:$0xff]  ;;  %v7801_v10 = vld [vmem:[#allocation8 + $0x808] sm:$0xff] }
 0x480   : > { %5704 = vmatpush1.msra.mxu0 %v7763_v21  ;;  %5846 = vmatpush1.msra.mxu1 %v7764_v29  ;;  %v7802_v21 = vld [vmem:[#allocation8 + $0x818] sm:$0xff]  ;;  %v7803_v29 = vld [vmem:[#allocation8 + $0x800] sm:$0xff] }
 0x481   : > { %5705 = vmatprep.subr.mxu0 %v7765_v18  ;;  %5847 = vmatprep.subr.mxu1 %v7766_v27  ;;  %v7804_v18 = vld [vmem:[#allocation8 + $0x810] sm:$0xff]  ;;  %v7805_v27 = vld [vmem:[#allocation8 + $0x7e8] sm:$0xff] }
 0x482   : > { %5706 = vmatpush1.msra.mxu0 %v7767_v59  ;;  %5848 = vmatpush1.msra.mxu1 %v7768_v31  ;;  %v7806_v59 = vld [vmem:[#allocation8 + $0x7f8] sm:$0xff]  ;;  %v7807_v31 = vld [vmem:[#allocation8 + $0x7e0] sm:$0xff] }
 0x483   : > { %5707 = vmatprep.subr.mxu0 %v7769_v32  ;;  %5849 = vmatprep.subr.mxu1 %v7770_v33  ;;  %v7808_v32 = vld [vmem:[#allocation8 + $0x7f0] sm:$0xff]  ;;  %v7809_v33 = vld [vmem:[#allocation8 + $0x7c8] sm:$0xff] }
 0x484   : > { %5708 = vmatpush1.msra.mxu0 %v7771_v35  ;;  %5850 = vmatpush1.msra.mxu1 %v7772_v36  ;;  %v7810_v35 = vld [vmem:[#allocation8 + $0x7d8] sm:$0xff]  ;;  %v7811_v36 = vld [vmem:[#allocation8 + $0x7c0] sm:$0xff] }
 0x485   : > { %5709 = vmatprep.subr.mxu0 %v7773_v9  ;;  %5851 = vmatprep.subr.mxu1 %v7774_v11  ;;  %v7812_v9 = vld [vmem:[#allocation8 + $0x7d0] sm:$0xff]  ;;  %v7813_v11 = vld [vmem:[#allocation8 + $0x7a8] sm:$0xff] }
 0x486   : > { %5710 = vmatpush1.msra.mxu0 %v7775_v19  ;;  %5852 = vmatpush1.msra.mxu1 %v7776_v26  ;;  %v7814_v19 = vld [vmem:[#allocation8 + $0x7b8] sm:$0xff]  ;;  %v7815_v26 = vld [vmem:[#allocation8 + $0x7a0] sm:$0xff] }
 0x487   : > { %5711 = vmatprep.subr.mxu0 %v7777_v22  ;;  %5853 = vmatprep.subr.mxu1 %v7778_v24  ;;  %v7816_v22 = vld [vmem:[#allocation8 + $0x7b0] sm:$0xff]  ;;  %v7817_v24 = vld [vmem:[#allocation8 + $0x788] sm:$0xff] }
 0x488   : > { %5712 = vmatpush1.msra.mxu0 %v7779_v25  ;;  %5854 = vmatpush1.msra.mxu1 %v7780_v37  ;;  %v7818_v25 = vld [vmem:[#allocation8 + $0x798] sm:$0xff]  ;;  %v7819_v37 = vld [vmem:[#allocation8 + $0x780] sm:$0xff] }
 0x489   : > { %5713 = vmatprep.subr.mxu0 %v7781_v44  ;;  %5855 = vmatprep.subr.mxu1 %v7782_v40  ;;  %v4571_v45 = vpop.f32.mrf.mxu0  ;;  %v7821_v44 = vld [vmem:[#allocation8 + $0x768] sm:$0xff]  ;;  %v7822_v40 = vld [vmem:[#allocation8 + $0x778] sm:$0xff] }
 0x48a   : > { %5714 = vmatpush1.msra.mxu0 %v7783_v38  ;;  %5856 = vmatpush1.msra.mxu1 %v7784_v41  ;;  %v4643_v5 = vadd.f32 %v4642_v30, %v4571_v45  ;;  %v7820_v30 = vld [vmem:[#allocation8 + $0x790] sm:$0xff]  ;;  %v7823_v45 = vld [vmem:[#allocation8 + $0x760] sm:$0xff]  ;;  %v7825_v38 = vld [vmem:[#allocation8 + $0x748] sm:$0xff] }
 0x48b   : > { %5715 = vmatprep.subr.mxu0 %v7785_v53  ;;  %5857 = vmatprep.subr.mxu1 %v7786_v62  ;;  %v7826_v41 = vld [vmem:[#allocation8 + $0x758] sm:$0xff]  ;;  %v7828_v53 = vld [vmem:[#allocation8 + $0x750] sm:$0xff]  ;;  %v7829_v62 = vld [vmem:[#allocation8 + $0x728] sm:$0xff] }
 0x48c   : > { %5716 = vmatpush1.msra.mxu0 %v7787_v49  ;;  %5858 = vmatpush1.msra.mxu1 %v7788_v54  ;;  %v9713_v52 = vadd.f32 %v4643_v5, %v4205_v51  ;;  %v7824_v51 = vld [vmem:[#allocation8 + $0x770] sm:$0xff]  ;;  %v7827_v5 = vld [vmem:[#allocation8 + $0x740] sm:$0xff]  ;;  %v7830_v49 = vld [vmem:[#allocation8 + $0x738] sm:$0xff] }
 0x48d   : > { %5717 = vmatprep.subr.mxu0 %v7789_v43  ;;  %5859 = vmatprep.subr.mxu1 %v7790_v58  ;;  %v7831_v54 = vld [vmem:[#allocation8 + $0x720] sm:$0xff]  ;;  %v7832_v43 = vld [vmem:[#allocation8 + $0x730] sm:$0xff]  ;;  %v7833_v58 = vld [vmem:[#allocation8 + $0x708] sm:$0xff] }
 0x48e   : > { %5718 = vmatpush2.msra.mxu0 %v7791_v1  ;;  %5860 = vmatpush2.msra.mxu1 %v7792_v13  ;;  %v7834_v1 = vld [vmem:[#allocation8 + $0x718] sm:$0xff]  ;;  %v7835_v13 = vld [vmem:[#allocation8 + $0x700] sm:$0xff] }
 0x48f   : > { %5719 = vmatprep.subr.mxu0 %v7793_v63  ;;  %5861 = vmatprep.subr.mxu1 %v7794_v6  ;;  %v7836_v63 = vld [vmem:[#allocation8 + $0x710] sm:$0xff]  ;;  %v7837_v6 = vld [vmem:[#allocation8 + $0x6e8] sm:$0xff] }
 0x490   : > { %5720 = vmatpush2.msra.mxu0 %v7795_v34  ;;  %5862 = vmatpush2.msra.mxu1 %v7796_v61  ;;  %v7838_v34 = vld [vmem:[#allocation8 + $0x6f8] sm:$0xff]  ;;  %v7839_v61 = vld [vmem:[#allocation8 + $0x6e0] sm:$0xff] }
 0x491   : > { %5721 = vmatprep.subr.mxu0 %v7797_v3  ;;  %5863 = vmatprep.subr.mxu1 %v7798_v12  ;;  %v7840_v3 = vld [vmem:[#allocation8 + $0x6f0] sm:$0xff]  ;;  %v7841_v12 = vld [vmem:[#allocation8 + $0x6c8] sm:$0xff] }
 0x492   : > { %5722 = vmatpush2.msra.mxu0 %v7799_v56  ;;  %5864 = vmatpush2.msra.mxu1 %v7800_v15  ;;  %v7842_v56 = vld [vmem:[#allocation8 + $0x6d8] sm:$0xff]  ;;  %v7843_v15 = vld [vmem:[#allocation8 + $0x6c0] sm:$0xff] }
 0x493   : > { %5723 = vmatprep.subr.mxu0 %v7801_v10  ;;  %5865 = vmatprep.subr.mxu1 %v7802_v21  ;;  %v7844_v10 = vld [vmem:[#allocation8 + $0x6d0] sm:$0xff]  ;;  %v7845_v21 = vld [vmem:[#allocation8 + $0x6a8] sm:$0xff] }
 0x494   : > { %5724 = vmatpush2.msra.mxu0 %v7803_v29  ;;  %5866 = vmatpush2.msra.mxu1 %v7804_v18  ;;  %v7846_v29 = vld [vmem:[#allocation8 + $0x6b8] sm:$0xff]  ;;  %v7847_v18 = vld [vmem:[#allocation8 + $0x6a0] sm:$0xff] }
 0x495   : > { %5725 = vmatprep.subr.mxu0 %v7805_v27  ;;  %5867 = vmatprep.subr.mxu1 %v7806_v59  ;;  %v7848_v27 = vld [vmem:[#allocation8 + $0x6b0] sm:$0xff]  ;;  %v7849_v59 = vld [vmem:[#allocation8 + $0x688] sm:$0xff] }
 0x496   : > { %5726 = vmatpush2.msra.mxu0 %v7807_v31  ;;  %5868 = vmatpush2.msra.mxu1 %v7808_v32  ;;  %v7850_v31 = vld [vmem:[#allocation8 + $0x698] sm:$0xff]  ;;  %v7851_v32 = vld [vmem:[#allocation8 + $0x680] sm:$0xff] }
 0x497   : > { %5727 = vmatprep.subr.mxu0 %v7809_v33  ;;  %5869 = vmatprep.subr.mxu1 %v7810_v35  ;;  %v7852_v33 = vld [vmem:[#allocation8 + $0x690] sm:$0xff]  ;;  %v7853_v35 = vld [vmem:[#allocation8 + $0x8f8] sm:$0xff] }
 0x498   : > { %5728 = vmatpush2.msra.mxu0 %v7811_v36  ;;  %5870 = vmatpush2.msra.mxu1 %v7812_v9  ;;  %v7854_v36 = vld [vmem:[#allocation8 + $0x468] sm:$0xff]  ;;  %v7855_v9 = vld [vmem:[#allocation8 + $0x8f0] sm:$0xff] }
 0x499   : > { %5729 = vmatprep.subr.mxu0 %v7813_v11  ;;  %5871 = vmatprep.subr.mxu1 %v7814_v19  ;;  %v7856_v11 = vld [vmem:[#allocation8 + $0x460] sm:$0xff]  ;;  %v7857_v19 = vld [vmem:[#allocation8 + $0x8d8] sm:$0xff] }
 0x49a   : > { %5730 = vmatpush2.msra.mxu0 %v7815_v26  ;;  %5872 = vmatpush2.msra.mxu1 %v7816_v22  ;;  %v7858_v26 = vld [vmem:[#allocation8 + $0x448] sm:$0xff]  ;;  %v7859_v22 = vld [vmem:[#allocation8 + $0x8d0] sm:$0xff] }
 0x49b   : > { %5731 = vmatprep.subr.mxu0 %v7817_v24  ;;  %5873 = vmatprep.subr.mxu1 %v7818_v25  ;;  %v7860_v24 = vld [vmem:[#allocation8 + $0x440] sm:$0xff]  ;;  %v7861_v25 = vld [vmem:[#allocation8 + $0x8b8] sm:$0xff] }
 0x49c   : > { %5732 = vmatpush2.msra.mxu0 %v7819_v37  ;;  %5874 = vmatpush2.msra.mxu1 %v7820_v30  ;;  %v7862_v37 = vld [vmem:[#allocation8 + $0x428] sm:$0xff]  ;;  %v7864_v30 = vld [vmem:[#allocation8 + $0x420] sm:$0xff] }
 0x49d   : > { %5733 = vmatprep.subr.mxu0 %v7821_v44  ;;  %5875 = vmatprep.subr.mxu1 %v7822_v40  ;;  %v7865_v44 = vld [vmem:[#allocation8 + $0x898] sm:$0xff]  ;;  %v7866_v40 = vld [vmem:[#allocation8 + $0x408] sm:$0xff] }
 0x49e   : > { %5734 = vmatpush2.msra.mxu0 %v7823_v45  ;;  %5876 = vmatpush2.msra.mxu1 %v7824_v51  ;;  %v7867_v45 = vld [vmem:[#allocation8 + $0x890] sm:$0xff]  ;;  %v7868_v51 = vld [vmem:[#allocation8 + $0x400] sm:$0xff] }
 0x49f   : > { %5735 = vmatprep.subr.mxu0 %v7825_v38  ;;  %5877 = vmatprep.subr.mxu1 %v7826_v41  ;;  %v7869_v38 = vld [vmem:[#allocation8 + $0x1e8] sm:$0xff]  ;;  %v9721_v41 = vld [vmem:[#allocation2 + $0x40] sm:$0xff] }
 0x4a0   : > { %5736 = vmatpush2.msra.mxu0 %v7827_v5  ;;  %5878 = vmatpush2.msra.mxu1 %v7828_v53  ;;  %v7871_v5 = vld [vmem:[#allocation8 + $0x1f8] sm:$0xff]  ;;  %v7872_v53 = vld [vmem:[#allocation8 + $0x1e0] sm:$0xff] }
 0x4a1   : > { %5737 = vmatprep.subr.mxu0 %v7829_v62  ;;  %5879 = vmatprep.subr.mxu1 %v7830_v49  ;;  %v9725_v62 = vld [vmem:[#allocation2 + $0x38] sm:$0xff] }
 0x4a2   : > { %5738 = vmatpush2.msra.mxu0 %v7831_v54  ;;  %5880 = vmatpush2.msra.mxu1 %v7832_v43  ;;  %v7874_v49 = vld [vmem:[#allocation8 + $0x1f0] sm:$0xff]  ;;  %v7876_v54 = vld [vmem:[#allocation8 + $0x1d8] sm:$0xff]  ;;  %v7877_v43 = vld [vmem:[#allocation8 + $0x1c0] sm:$0xff] }
 0x4a3   : > { %5739 = vmatprep.subr.mxu0 %v7833_v58  ;;  %5881 = vmatprep.subr.mxu1 %v7834_v1  ;;  %v7878_v58 = vld [vmem:[#allocation8 + $0x1d0] sm:$0xff]  ;;  %v7879_v1 = vld [vmem:[#allocation8 + $0x1a8] sm:$0xff] }
 0x4a4   : > { %5740 = vmatpush2.msra.mxu0 %v7835_v13  ;;  %5882 = vmatpush2.msra.mxu1 %v7836_v63  ;;  %v7880_v13 = vld [vmem:[#allocation8 + $0x1b8] sm:$0xff]  ;;  %v7881_v63 = vld [vmem:[#allocation8 + $0x1a0] sm:$0xff] }
 0x4a5   : > { %5741 = vmatprep.subr.mxu0 %v7837_v6  ;;  %5883 = vmatprep.subr.mxu1 %v7838_v34  ;;  %v7882_v6 = vld [vmem:[#allocation8 + $0x1b0] sm:$0xff]  ;;  %v7883_v34 = vld [vmem:[#allocation8 + $0x188] sm:$0xff] }
 0x4a6   : > { %5742 = vmatpush2.msra.mxu0 %v7839_v61  ;;  %5884 = vmatpush2.msra.mxu1 %v7840_v3  ;;  %v7884_v61 = vld [vmem:[#allocation8 + $0x198] sm:$0xff]  ;;  %v7885_v3 = vld [vmem:[#allocation8 + $0x180] sm:$0xff] }
 0x4a7   : > { %5743 = vmatprep.subr.mxu0 %v7841_v12  ;;  %5885 = vmatprep.subr.mxu1 %v7842_v56  ;;  %v7886_v12 = vld [vmem:[#allocation8 + $0x190] sm:$0xff]  ;;  %v7887_v56 = vld [vmem:[#allocation8 + $0x168] sm:$0xff] }
 0x4a8   : > { %5744 = vmatpush2.msra.mxu0 %v7843_v15  ;;  %5886 = vmatpush2.msra.mxu1 %v7844_v10  ;;  %v7888_v15 = vld [vmem:[#allocation8 + $0x178] sm:$0xff]  ;;  %v7889_v10 = vld [vmem:[#allocation8 + $0x160] sm:$0xff] }
 0x4a9   : > { %5745 = vmatprep.subr.mxu0 %v7845_v21  ;;  %5887 = vmatprep.subr.mxu1 %v7846_v29  ;;  %v7890_v21 = vld [vmem:[#allocation8 + $0x170] sm:$0xff]  ;;  %v7891_v29 = vld [vmem:[#allocation8 + $0x148] sm:$0xff] }
 0x4aa   : > { %5746 = vmatpush2.msra.mxu0 %v7847_v18  ;;  %5888 = vmatpush2.msra.mxu1 %v7848_v27  ;;  %v7892_v18 = vld [vmem:[#allocation8 + $0x158] sm:$0xff]  ;;  %v7893_v27 = vld [vmem:[#allocation8 + $0x140] sm:$0xff] }
 0x4ab   : > { %5747 = vmatprep.subr.mxu0 %v7849_v59  ;;  %5889 = vmatprep.subr.mxu1 %v7850_v31  ;;  %v7894_v59 = vld [vmem:[#allocation8 + $0x150] sm:$0xff]  ;;  %v7895_v31 = vld [vmem:[#allocation8 + $0x128] sm:$0xff] }
 0x4ac   : > { %5748 = vmatpush2.msra.mxu0 %v7851_v32  ;;  %5890 = vmatpush2.msra.mxu1 %v7852_v33  ;;  %v7896_v32 = vld [vmem:[#allocation8 + $0x138] sm:$0xff]  ;;  %v7897_v33 = vld [vmem:[#allocation8 + $0x120] sm:$0xff] }
 0x4ad   : > { %5750 = vmatmul.mubr.f32.vlgmr.msra.gmra.mxu0 %v9649_v2  ;;  %5892 = vmatmul.mubr.f32.vlgmr.msra.gmra.mxu1 %v9649_v2  ;;  %v7863_v2 = vld [vmem:[#allocation8 + $0x8b0] sm:$0xff] }
 0x4ae   : > { %5922 = vmatprep.subr.mxu0 %v7853_v35  ;;  %6064 = vmatprep.subr.mxu1 %v7854_v36  ;;  %v7898_v35 = vld [vmem:[#allocation8 + $0x130] sm:$0xff]  ;;  %v7899_v36 = vld [vmem:[#allocation8 + $0x108] sm:$0xff] }
 0x4af   : > { %5923 = vmatpush1.msra.mxu0 %v7855_v9  ;;  %6065 = vmatpush1.msra.mxu1 %v7856_v11  ;;  %v7900_v9 = vld [vmem:[#allocation8 + $0x118] sm:$0xff]  ;;  %v7901_v11 = vld [vmem:[#allocation8 + $0x100] sm:$0xff] }
 0x4b0   : > { %5924 = vmatprep.subr.mxu0 %v7857_v19  ;;  %6066 = vmatprep.subr.mxu1 %v7858_v26  ;;  %v7902_v19 = vld [vmem:[#allocation8 + $0x110] sm:$0xff]  ;;  %v7903_v26 = vld [vmem:[#allocation8 + $0xe8] sm:$0xff] }
 0x4b1   : > { %5925 = vmatpush1.msra.mxu0 %v7859_v22  ;;  %6067 = vmatpush1.msra.mxu1 %v7860_v24  ;;  %v7904_v22 = vld [vmem:[#allocation8 + $0xf8] sm:$0xff]  ;;  %v7905_v24 = vld [vmem:[#allocation8 + $0xe0] sm:$0xff] }
 0x4b2   : > { %5926 = vmatprep.subr.mxu0 %v7861_v25  ;;  %6068 = vmatprep.subr.mxu1 %v7862_v37  ;;  %v7906_v25 = vld [vmem:[#allocation8 + $0xf0] sm:$0xff]  ;;  %v7907_v37 = vld [vmem:[#allocation8 + $0xc8] sm:$0xff] }
 0x4b3   : > { %5927 = vmatpush1.msra.mxu0 %v7863_v2  ;;  %6069 = vmatpush1.msra.mxu1 %v7864_v30  ;;  %v7908_v2 = vld [vmem:[#allocation8 + $0xd8] sm:$0xff]  ;;  %v7909_v30 = vld [vmem:[#allocation8 + $0xc0] sm:$0xff] }
 0x4b4   : > { %5928 = vmatprep.subr.mxu0 %v7865_v44  ;;  %6070 = vmatprep.subr.mxu1 %v7866_v40  ;;  %v7910_v44 = vld [vmem:[#allocation8 + $0xd0] sm:$0xff]  ;;  %v9729_v40 = vpop.f32.mrf.mxu1 }
 0x4b5   : > { %5929 = vmatpush1.msra.mxu0 %v7867_v45  ;;  %5962 = vmatprep.mubr.f32.mxu0 %v9608_v39  ;;  %v9731_v45 = vpop.f32.mrf.mxu0 }
 0x4b6   : > { %6071 = vmatpush1.msra.mxu1 %v7868_v51  ;;  %6104 = vmatprep.mubr.f32.mxu1 %v9608_v39  ;;  %v7911_v51 = vld [vmem:[#allocation8 + $0xa8] sm:$0xff] }
 0x4b7   : > { %7587 = vmatmul.mubr.msk.f32.vlgmr.msra.gmra.mxu0 %vm395_vm0, %v9626_v20  ;;  %5969 = vmatprep.subr.mxu0 %v7869_v38  ;;  %v7875_v20 = vld [vmem:[#allocation8 + $0x1c8] sm:$0xff]  ;;  %v7912_v38 = vld [vmem:[#allocation8 + $0xb8] sm:$0xff] }
 0x4b8   : > { %7588 = vmatmul.mubr.msk.f32.vlgmr.msra.gmra.mxu1 %vm395_vm0, %v9721_v41  ;;  %6111 = vmatprep.subr.mxu1 %v7871_v5  ;;  %v7913_v5 = vld [vmem:[#allocation8 + $0xa0] sm:$0xff] }
 0x4b9   : > { %5970 = vmatpush1.msra.mxu0 %v7872_v53  ;;  %6033 = vmatprep.mubr.f32.mxu0 %v9725_v62  ;;  %v7914_v53 = vld [vmem:[#allocation8 + $0xb0] sm:$0xff] }
 0x4ba   : > { %6112 = vmatpush1.msra.mxu1 %v7874_v49  ;;  %6175 = vmatprep.mubr.f32.mxu1 %v9725_v62  ;;  %v9733_v49 = vpop.f32.mrf.mxu1 }
 0x4bb   : > { %5971 = vmatprep.subr.mxu0 %v7875_v20  ;;  %6113 = vmatprep.subr.mxu1 %v7876_v54  ;;  %v9735_v20 = vpop.f32.mrf.mxu0  ;;  %v7915_v54 = vld [vmem:[#allocation8 + $0x88] sm:$0xff] }
 0x4bc   : > { %5972 = vmatpush1.msra.mxu0 %v7877_v43  ;;  %6114 = vmatpush1.msra.mxu1 %v7878_v58  ;;  %v7916_v43 = vld [vmem:[#allocation8 + $0x98] sm:$0xff]  ;;  %v7917_v58 = vld [vmem:[#allocation8 + $0x80] sm:$0xff] }
 0x4bd   : > { %5973 = vmatprep.subr.mxu0 %v7879_v1  ;;  %6115 = vmatprep.subr.mxu1 %v7880_v13  ;;  %v7918_v1 = vld [vmem:[#allocation8 + $0x90] sm:$0xff]  ;;  %v7919_v13 = vld [vmem:[#allocation8 + $0x68] sm:$0xff] }
 0x4be   : > { %5974 = vmatpush1.msra.mxu0 %v7881_v63  ;;  %6116 = vmatpush1.msra.mxu1 %v7882_v6  ;;  %v7920_v63 = vld [vmem:[#allocation8 + $0x78] sm:$0xff]  ;;  %v7921_v6 = vld [vmem:[#allocation8 + $0x60] sm:$0xff] }
 0x4bf   : > { %5975 = vmatprep.subr.mxu0 %v7883_v34  ;;  %6117 = vmatprep.subr.mxu1 %v7884_v61  ;;  %v7922_v34 = vld [vmem:[#allocation8 + $0x70] sm:$0xff]  ;;  %v9737_v61 = vpop.f32.mrf.mxu1 }
 0x4c0   : > { %5976 = vmatpush1.msra.mxu0 %v7885_v3  ;;  %6118 = vmatpush1.msra.mxu1 %v7886_v12  ;;  %v9739_v3 = vpop.f32.mrf.mxu0  ;;  %v7923_v12 = vld [vmem:[#allocation8 + $0x48] sm:$0xff] }
 0x4c1   : > { %5977 = vmatprep.subr.mxu0 %v7887_v56  ;;  %6119 = vmatprep.subr.mxu1 %v7888_v15  ;;  %v7924_v56 = vld [vmem:[#allocation8 + $0x58] sm:$0xff]  ;;  %v7925_v15 = vld [vmem:[#allocation8 + $0x40] sm:$0xff] }
 0x4c2   : > { %5978 = vmatpush1.msra.mxu0 %v7889_v10  ;;  %6120 = vmatpush1.msra.mxu1 %v7890_v21  ;;  %v7926_v10 = vld [vmem:[#allocation8 + $0x50] sm:$0xff]  ;;  %v5084_v21 = vpop.f32.mrf.mxu1 }
 0x4c3   : > { %5979 = vmatprep.subr.mxu0 %v7891_v29  ;;  %6121 = vmatprep.subr.mxu1 %v7892_v18  ;;  %v7927_v29 = vld [vmem:[#allocation8 + $0x28] sm:$0xff]  ;;  %v7928_v18 = vld [vmem:[#allocation8 + $0x38] sm:$0xff] }
 0x4c4   : > { %5980 = vmatpush1.msra.mxu0 %v7893_v27  ;;  %6122 = vmatpush1.msra.mxu1 %v7894_v59  ;;  %v7929_v59 = vld [vmem:[#allocation8 + $0x20] sm:$0xff] }
 0x4c5   : > { %5981 = vmatprep.subr.mxu0 %v7895_v31  ;;  %6123 = vmatprep.subr.mxu1 %v7896_v32  ;;  %v7930_v31 = vld [vmem:[#allocation8 + $0x30] sm:$0xff] }
 0x4c6   : > { %5982 = vmatpush1.msra.mxu0 %v7897_v33  ;;  %6124 = vmatpush1.msra.mxu1 %v7898_v35  ;;  %v7931_v33 = vld [vmem:[#allocation8 + $0x8] sm:$0xff]  ;;  %v7932_v35 = vld [vmem:[#allocation8 + $0x18] sm:$0xff] }
 0x4c7   : > { %5983 = vmatprep.subr.mxu0 %v7899_v36  ;;  %6125 = vmatprep.subr.mxu1 %v7900_v9  ;;  %v7933_v36 = vld [vmem:[#allocation8] sm:$0xff]  ;;  %v7934_v9 = vld [vmem:[#allocation8 + $0x10] sm:$0xff] }
 0x4c8   : > { %5984 = vmatpush1.msra.mxu0 %v7901_v11  ;;  %6126 = vmatpush1.msra.mxu1 %v7902_v19  ;;  %v7935_v19 = vld [vmem:[#allocation8 + $0x3e8] sm:$0xff] }
 0x4c9   : > { %5985 = vmatprep.subr.mxu0 %v7903_v26  ;;  %6127 = vmatprep.subr.mxu1 %v7904_v22  ;;  %v7936_v26 = vld [vmem:[#allocation8 + $0x3f8] sm:$0xff]  ;;  %v7937_v22 = vld [vmem:[#allocation8 + $0x3e0] sm:$0xff] }
 0x4ca   : > { %5986 = vmatpush1.msra.mxu0 %v7905_v24  ;;  %6128 = vmatpush1.msra.mxu1 %v7906_v25  ;;  %v7938_v24 = vld [vmem:[#allocation8 + $0x3f0] sm:$0xff]  ;;  %v7939_v25 = vld [vmem:[#allocation8 + $0x3c8] sm:$0xff] }
 0x4cb   : > { %5987 = vmatprep.subr.mxu0 %v7907_v37  ;;  %6129 = vmatprep.subr.mxu1 %v7908_v2  ;;  %v7940_v37 = vld [vmem:[#allocation8 + $0x3d8] sm:$0xff]  ;;  %v7941_v2 = vld [vmem:[#allocation8 + $0x3c0] sm:$0xff] }
 0x4cc   : > { %5988 = vmatpush1.msra.mxu0 %v7909_v30  ;;  %6130 = vmatpush1.msra.mxu1 %v7910_v44  ;;  %v7942_v30 = vld [vmem:[#allocation8 + $0x3d0] sm:$0xff]  ;;  %v7943_v44 = vld [vmem:[#allocation8 + $0x3a8] sm:$0xff] }
 0x4cd   : > { %5989 = vmatprep.subr.mxu0 %v7911_v51  ;;  %6131 = vmatprep.subr.mxu1 %v7912_v38  ;;  %v7945_v51 = vld [vmem:[#allocation8 + $0x3a0] sm:$0xff]  ;;  %v7946_v38 = vld [vmem:[#allocation8 + $0x3b0] sm:$0xff] }
 0x4ce   : > { %5990 = vmatpush1.msra.mxu0 %v7913_v5  ;;  %6132 = vmatpush1.msra.mxu1 %v7914_v53  ;;  %v7947_v5 = vld [vmem:[#allocation8 + $0x388] sm:$0xff]  ;;  %v7948_v53 = vld [vmem:[#allocation8 + $0x398] sm:$0xff] }
 0x4cf   : > { %5991 = vmatprep.subr.mxu0 %v7915_v54  ;;  %6133 = vmatprep.subr.mxu1 %v7916_v43  ;;  %v7949_v54 = vld [vmem:[#allocation8 + $0x380] sm:$0xff]  ;;  %v7950_v43 = vld [vmem:[#allocation8 + $0x390] sm:$0xff] }
 0x4d0   : > { %5992 = vmatpush1.msra.mxu0 %v7917_v58  ;;  %6134 = vmatpush1.msra.mxu1 %v7918_v1  ;;  %v7951_v58 = vld [vmem:[#allocation8 + $0x368] sm:$0xff]  ;;  %v7952_v1 = vld [vmem:[#allocation8 + $0x378] sm:$0xff] }
 0x4d1   : > { %5993 = vmatprep.subr.mxu0 %v7919_v13  ;;  %6135 = vmatprep.subr.mxu1 %v7920_v63  ;;  %v7953_v13 = vld [vmem:[#allocation8 + $0x360] sm:$0xff]  ;;  %v7954_v63 = vld [vmem:[#allocation8 + $0x370] sm:$0xff] }
 0x4d2   : > { %5994 = vmatpush1.msra.mxu0 %v7921_v6  ;;  %6136 = vmatpush1.msra.mxu1 %v7922_v34  ;;  %v7955_v6 = vld [vmem:[#allocation8 + $0x348] sm:$0xff]  ;;  %v7956_v34 = vld [vmem:[#allocation8 + $0x358] sm:$0xff] }
 0x4d3   : > { %5995 = vmatprep.subr.mxu0 %v7923_v12  ;;  %6137 = vmatprep.subr.mxu1 %v7924_v56  ;;  %v7957_v12 = vld [vmem:[#allocation8 + $0x340] sm:$0xff]  ;;  %v7958_v56 = vld [vmem:[#allocation8 + $0x350] sm:$0xff] }
 0x4d4   : > { %5996 = vmatpush1.msra.mxu0 %v7925_v15  ;;  %6138 = vmatpush1.msra.mxu1 %v7926_v10  ;;  %v7959_v15 = vld [vmem:[#allocation8 + $0x328] sm:$0xff]  ;;  %v7960_v10 = vld [vmem:[#allocation8 + $0x338] sm:$0xff] }
 0x4d5   : > { %5997 = vmatprep.subr.mxu0 %v7927_v29  ;;  %6139 = vmatprep.subr.mxu1 %v7928_v18  ;;  %v5013_v27 = vpop.f32.mrf.mxu0  ;;  %v7962_v29 = vld [vmem:[#allocation8 + $0x330] sm:$0xff]  ;;  %v7963_v18 = vld [vmem:[#allocation8 + $0x308] sm:$0xff] }
 0x4d6   : > { %5998 = vmatpush1.msra.mxu0 %v7929_v59  ;;  %6140 = vmatpush1.msra.mxu1 %v7930_v31  ;;  %v5085_v32 = vadd.f32 %v5084_v21, %v5013_v27  ;;  %v7961_v21 = vld [vmem:[#allocation8 + $0x320] sm:$0xff]  ;;  %v7964_v27 = vld [vmem:[#allocation8 + $0x318] sm:$0xff]  ;;  %v7966_v31 = vld [vmem:[#allocation8 + $0x310] sm:$0xff] }
 0x4d7   : > { %5999 = vmatprep.subr.mxu0 %v7931_v33  ;;  %6141 = vmatprep.subr.mxu1 %v7932_v35  ;;  %v7965_v59 = vld [vmem:[#allocation8 + $0x300] sm:$0xff]  ;;  %v7968_v33 = vld [vmem:[#allocation8 + $0x2f8] sm:$0xff] }
 0x4d8   : > { %6000 = vmatpush1.msra.mxu0 %v7933_v36  ;;  %6142 = vmatpush1.msra.mxu1 %v7934_v9  ;;  %v9742_v11 = vadd.f32 %v5085_v32, %v9713_v52  ;;  %v7944_v52 = vld [vmem:[#allocation8 + $0x3b8] sm:$0xff]  ;;  %v7967_v32 = vld [vmem:[#allocation8 + $0x2e8] sm:$0xff]  ;;  %v7969_v35 = vld [vmem:[#allocation8 + $0x2e0] sm:$0xff] }
 0x4d9   : > { %6001 = vmatprep.subr.mxu0 %v7935_v19  ;;  %6143 = vmatprep.subr.mxu1 %v7936_v26  ;;  %v7970_v36 = vld [vmem:[#allocation8 + $0x2f0] sm:$0xff]  ;;  %v7971_v9 = vld [vmem:[#allocation8 + $0x2c8] sm:$0xff]  ;;  %v7972_v19 = vld [vmem:[#allocation8 + $0x2d8] sm:$0xff] }
 0x4da   : > { %6002 = vmatpush2.msra.mxu0 %v7937_v22  ;;  %6144 = vmatpush2.msra.mxu1 %v7938_v24  ;;  %v7973_v26 = vld [vmem:[#allocation8 + $0x2c0] sm:$0xff]  ;;  %v7974_v22 = vld [vmem:[#allocation8 + $0x2d0] sm:$0xff]  ;;  %v7975_v24 = vld [vmem:[#allocation8 + $0x2a8] sm:$0xff] }
 0x4db   : > { %6003 = vmatprep.subr.mxu0 %v7939_v25  ;;  %6145 = vmatprep.subr.mxu1 %v7940_v37  ;;  %v7976_v25 = vld [vmem:[#allocation8 + $0x2b8] sm:$0xff]  ;;  %v7977_v37 = vld [vmem:[#allocation8 + $0x2a0] sm:$0xff] }
 0x4dc   : > { %6004 = vmatpush2.msra.mxu0 %v7941_v2  ;;  %6146 = vmatpush2.msra.mxu1 %v7942_v30  ;;  %v7978_v2 = vld [vmem:[#allocation8 + $0x2b0] sm:$0xff]  ;;  %v7979_v30 = vld [vmem:[#allocation8 + $0x288] sm:$0xff] }
 0x4dd   : > { %6005 = vmatprep.subr.mxu0 %v7943_v44  ;;  %6147 = vmatprep.subr.mxu1 %v7944_v52  ;;  %v7980_v44 = vld [vmem:[#allocation8 + $0x298] sm:$0xff]  ;;  %v7981_v52 = vld [vmem:[#allocation8 + $0x280] sm:$0xff] }
 0x4de   : > { %6006 = vmatpush2.msra.mxu0 %v7945_v51  ;;  %6148 = vmatpush2.msra.mxu1 %v7946_v38  ;;  %v7982_v51 = vld [vmem:[#allocation8 + $0x290] sm:$0xff]  ;;  %v7983_v38 = vld [vmem:[#allocation8 + $0x268] sm:$0xff] }
 0x4df   : > { %6007 = vmatprep.subr.mxu0 %v7947_v5  ;;  %6149 = vmatprep.subr.mxu1 %v7948_v53  ;;  %v7984_v5 = vld [vmem:[#allocation8 + $0x278] sm:$0xff]  ;;  %v7985_v53 = vld [vmem:[#allocation8 + $0x260] sm:$0xff] }
 0x4e0   : > { %6008 = vmatpush2.msra.mxu0 %v7949_v54  ;;  %6150 = vmatpush2.msra.mxu1 %v7950_v43  ;;  %v7986_v54 = vld [vmem:[#allocation8 + $0x270] sm:$0xff]  ;;  %v7987_v43 = vld [vmem:[#allocation8 + $0x248] sm:$0xff] }
 0x4e1   : > { %6009 = vmatprep.subr.mxu0 %v7951_v58  ;;  %6151 = vmatprep.subr.mxu1 %v7952_v1  ;;  %v7988_v58 = vld [vmem:[#allocation8 + $0x258] sm:$0xff]  ;;  %v7989_v1 = vld [vmem:[#allocation8 + $0x240] sm:$0xff] }
 0x4e2   : > { %6010 = vmatpush2.msra.mxu0 %v7953_v13  ;;  %6152 = vmatpush2.msra.mxu1 %v7954_v63  ;;  %v7990_v13 = vld [vmem:[#allocation8 + $0x250] sm:$0xff]  ;;  %v7991_v63 = vld [vmem:[#allocation8 + $0x228] sm:$0xff] }
 0x4e3   : > { %6011 = vmatprep.subr.mxu0 %v7955_v6  ;;  %6153 = vmatprep.subr.mxu1 %v7956_v34  ;;  %v7992_v6 = vld [vmem:[#allocation8 + $0x238] sm:$0xff]  ;;  %v7993_v34 = vld [vmem:[#allocation8 + $0x220] sm:$0xff] }
 0x4e4   : > { %6012 = vmatpush2.msra.mxu0 %v7957_v12  ;;  %6154 = vmatpush2.msra.mxu1 %v7958_v56  ;;  %v7994_v12 = vld [vmem:[#allocation8 + $0x230] sm:$0xff]  ;;  %v7995_v56 = vld [vmem:[#allocation8 + $0x208] sm:$0xff] }
 0x4e5   : > { %6013 = vmatprep.subr.mxu0 %v7959_v15  ;;  %6155 = vmatprep.subr.mxu1 %v7960_v10  ;;  %v7996_v15 = vld [vmem:[#allocation8 + $0x218] sm:$0xff]  ;;  %v7997_v10 = vld [vmem:[#allocation8 + $0x200] sm:$0xff] }
 0x4e6   : > { %6014 = vmatpush2.msra.mxu0 %v7961_v21  ;;  %6156 = vmatpush2.msra.mxu1 %v7962_v29  ;;  %v7998_v21 = vld [vmem:[#allocation8 + $0x210] sm:$0xff] }
 0x4e7   : > { %6015 = vmatprep.subr.mxu0 %v7963_v18  ;;  %6157 = vmatprep.subr.mxu1 %v7964_v27  ;;  %v9744_v29 = vld [vmem:[#allocation2 + $0x30] sm:$0xff]  ;;  %v8000_v18 = vld [vmem:[#allocation8 + $0x478] sm:$0xff] }
 0x4e8   : > { %6016 = vmatpush2.msra.mxu0 %v7965_v59  ;;  %6158 = vmatpush2.msra.mxu1 %v7966_v31  ;;  %v8001_v27 = vld [vmem:[#allocation8 + $0xd68] sm:$0xff]  ;;  %v8002_v59 = vld [vmem:[#allocation8 + $0x470] sm:$0xff]  ;;  %v8003_v31 = vld [vmem:[#allocation8 + $0xd60] sm:$0xff] }
 0x4e9   : > { %6017 = vmatprep.subr.mxu0 %v7967_v32  ;;  %6159 = vmatprep.subr.mxu1 %v7968_v33  ;;  %v8004_v32 = vld [vmem:[#allocation8 + $0x458] sm:$0xff]  ;;  %v8005_v33 = vld [vmem:[#allocation8 + $0xd48] sm:$0xff] }
 0x4ea   : > { %6018 = vmatpush2.msra.mxu0 %v7969_v35  ;;  %6160 = vmatpush2.msra.mxu1 %v7970_v36  ;;  %v8006_v35 = vld [vmem:[#allocation8 + $0x450] sm:$0xff]  ;;  %v8007_v36 = vld [vmem:[#allocation8 + $0xd40] sm:$0xff] }
 0x4eb   : > { %6019 = vmatprep.subr.mxu0 %v7971_v9  ;;  %6161 = vmatprep.subr.mxu1 %v7972_v19  ;;  %v8008_v9 = vld [vmem:[#allocation8 + $0x438] sm:$0xff]  ;;  %v8009_v19 = vld [vmem:[#allocation8 + $0xd28] sm:$0xff] }
 0x4ec   : > { %6020 = vmatpush2.msra.mxu0 %v7973_v26  ;;  %6162 = vmatpush2.msra.mxu1 %v7974_v22  ;;  %v8010_v26 = vld [vmem:[#allocation8 + $0x430] sm:$0xff]  ;;  %v8011_v22 = vld [vmem:[#allocation8 + $0xd20] sm:$0xff] }
 0x4ed   : > { %6021 = vmatprep.subr.mxu0 %v7975_v24  ;;  %6163 = vmatprep.subr.mxu1 %v7976_v25  ;;  %v8012_v24 = vld [vmem:[#allocation8 + $0x418] sm:$0xff]  ;;  %v8013_v25 = vld [vmem:[#allocation8 + $0xd08] sm:$0xff] }
 0x4ee   : > { %6022 = vmatpush2.msra.mxu0 %v7977_v37  ;;  %6164 = vmatpush2.msra.mxu1 %v7978_v2  ;;  %v8014_v37 = vld [vmem:[#allocation8 + $0x410] sm:$0xff]  ;;  %v8015_v2 = vld [vmem:[#allocation8 + $0xd00] sm:$0xff] }
 0x4ef   : > { %6023 = vmatprep.subr.mxu0 %v7979_v30  ;;  %6165 = vmatprep.subr.mxu1 %v7980_v44  ;;  %v8016_v30 = vld [vmem:[#allocation8 + $0xae8] sm:$0xff]  ;;  %v8017_v44 = vld [vmem:[#allocation8 + $0xaf8] sm:$0xff] }
 0x4f0   : > { %6024 = vmatpush2.msra.mxu0 %v7981_v52  ;;  %6166 = vmatpush2.msra.mxu1 %v7982_v51  ;;  %v8018_v52 = vld [vmem:[#allocation8 + $0xae0] sm:$0xff]  ;;  %v8019_v51 = vld [vmem:[#allocation8 + $0xaf0] sm:$0xff] }
 0x4f1   : > { %6025 = vmatprep.subr.mxu0 %v7983_v38  ;;  %6167 = vmatprep.subr.mxu1 %v7984_v5  ;;  %v8020_v38 = vld [vmem:[#allocation8 + $0xac8] sm:$0xff]  ;;  %v8021_v5 = vld [vmem:[#allocation8 + $0xad8] sm:$0xff] }
 0x4f2   : > { %6026 = vmatpush2.msra.mxu0 %v7985_v53  ;;  %6168 = vmatpush2.msra.mxu1 %v7986_v54  ;;  %v8022_v53 = vld [vmem:[#allocation8 + $0xac0] sm:$0xff]  ;;  %v8023_v54 = vld [vmem:[#allocation8 + $0xad0] sm:$0xff] }
 0x4f3   : > { %6027 = vmatprep.subr.mxu0 %v7987_v43  ;;  %6169 = vmatprep.subr.mxu1 %v7988_v58  ;;  %v8024_v43 = vld [vmem:[#allocation8 + $0xaa8] sm:$0xff]  ;;  %v8025_v58 = vld [vmem:[#allocation8 + $0xab8] sm:$0xff] }
 0x4f4   : > { %6028 = vmatpush2.msra.mxu0 %v7989_v1  ;;  %6170 = vmatpush2.msra.mxu1 %v7990_v13  ;;  %v8026_v1 = vld [vmem:[#allocation8 + $0xaa0] sm:$0xff]  ;;  %v8027_v13 = vld [vmem:[#allocation8 + $0xab0] sm:$0xff] }
 0x4f5   : > { %6029 = vmatprep.subr.mxu0 %v7991_v63  ;;  %6171 = vmatprep.subr.mxu1 %v7992_v6  ;;  %v8028_v63 = vld [vmem:[#allocation8 + $0xa88] sm:$0xff]  ;;  %v8029_v6 = vld [vmem:[#allocation8 + $0xa98] sm:$0xff] }
 0x4f6   : > { %6030 = vmatpush2.msra.mxu0 %v7993_v34  ;;  %6172 = vmatpush2.msra.mxu1 %v7994_v12  ;;  %v8031_v34 = vld [vmem:[#allocation8 + $0xa90] sm:$0xff]  ;;  %v8032_v12 = vld [vmem:[#allocation8 + $0xa68] sm:$0xff] }
 0x4f7   : > { %6031 = vmatprep.subr.mxu0 %v7995_v56  ;;  %6173 = vmatprep.subr.mxu1 %v7996_v15  ;;  %v8033_v56 = vld [vmem:[#allocation8 + $0xa78] sm:$0xff]  ;;  %v8034_v15 = vld [vmem:[#allocation8 + $0xa60] sm:$0xff] }
 0x4f8   : > { %6032 = vmatpush2.msra.mxu0 %v7997_v10  ;;  %6174 = vmatpush2.msra.mxu1 %v7998_v21  ;;  %v8035_v10 = vld [vmem:[#allocation8 + $0xa70] sm:$0xff]  ;;  %v8036_v21 = vld [vmem:[#allocation8 + $0xa48] sm:$0xff] }
 0x4f9   : > { %6034 = vmatmul.mubr.f32.vlgmr.msra.gmra.mxu0 %v9744_v29  ;;  %6176 = vmatmul.mubr.f32.vlgmr.msra.gmra.mxu1 %v9744_v29 }
 0x4fa   : > { %6206 = vmatprep.subr.mxu0 %v8000_v18  ;;  %6348 = vmatprep.subr.mxu1 %v8001_v27  ;;  %v8037_v18 = vld [vmem:[#allocation8 + $0xa58] sm:$0xff]  ;;  %v8038_v27 = vld [vmem:[#allocation8 + $0xa40] sm:$0xff] }
 0x4fb   : > { %6207 = vmatpush1.msra.mxu0 %v8002_v59  ;;  %6349 = vmatpush1.msra.mxu1 %v8003_v31  ;;  %v8039_v59 = vld [vmem:[#allocation8 + $0xa50] sm:$0xff]  ;;  %v8040_v31 = vld [vmem:[#allocation8 + $0xa28] sm:$0xff] }
 0x4fc   : > { %6208 = vmatprep.subr.mxu0 %v8004_v32  ;;  %6350 = vmatprep.subr.mxu1 %v8005_v33  ;;  %v8041_v32 = vld [vmem:[#allocation8 + $0xa38] sm:$0xff]  ;;  %v8042_v33 = vld [vmem:[#allocation8 + $0xa20] sm:$0xff] }
 0x4fd   : > { %6209 = vmatpush1.msra.mxu0 %v8006_v35  ;;  %6351 = vmatpush1.msra.mxu1 %v8007_v36  ;;  %v8043_v35 = vld [vmem:[#allocation8 + $0xa30] sm:$0xff]  ;;  %v8044_v36 = vld [vmem:[#allocation8 + $0xa08] sm:$0xff] }
 0x4fe   : > { %6210 = vmatprep.subr.mxu0 %v8008_v9  ;;  %6352 = vmatprep.subr.mxu1 %v8009_v19  ;;  %v8045_v9 = vld [vmem:[#allocation8 + $0xa18] sm:$0xff]  ;;  %v8046_v19 = vld [vmem:[#allocation8 + $0xa00] sm:$0xff] }
 0x4ff   : > { %6211 = vmatpush1.msra.mxu0 %v8010_v26  ;;  %6353 = vmatpush1.msra.mxu1 %v8011_v22  ;;  %v8047_v26 = vld [vmem:[#allocation8 + $0xa10] sm:$0xff]  ;;  %v8048_v22 = vld [vmem:[#allocation8 + $0x9e8] sm:$0xff] }
 0x500   : > { %6212 = vmatprep.subr.mxu0 %v8012_v24  ;;  %6354 = vmatprep.subr.mxu1 %v8013_v25  ;;  %v8049_v24 = vld [vmem:[#allocation8 + $0x9f8] sm:$0xff]  ;;  %v8050_v25 = vld [vmem:[#allocation8 + $0x9e0] sm:$0xff] }
 0x501   : > { %6213 = vmatpush1.msra.mxu0 %v8014_v37  ;;  %6246 = vmatprep.mubr.f32.mxu0 %v9608_v39  ;;  %v8051_v37 = vld [vmem:[#allocation8 + $0x9f0] sm:$0xff] }
 0x502   : > { %6355 = vmatpush1.msra.mxu1 %v8015_v2  ;;  %6388 = vmatprep.mubr.f32.mxu1 %v9608_v39  ;;  %v8052_v2 = vld [vmem:[#allocation8 + $0x9c8] sm:$0xff] }
 0x503   : > { %7589 = vmatmul.mubr.msk.f32.vlgmr.msra.gmra.mxu0 %vm395_vm0, %v9721_v41  ;;  %6253 = vmatprep.subr.mxu0 %v8016_v30  ;;  %v8053_v30 = vld [vmem:[#allocation8 + $0x9d8] sm:$0xff] }
 0x504   : > { %7590 = vmatmul.mubr.msk.f32.vlgmr.msra.gmra.mxu1 %vm395_vm0, %v9653_v60  ;;  %6395 = vmatprep.subr.mxu1 %v8017_v44  ;;  %v8054_v44 = vld [vmem:[#allocation8 + $0x9c0] sm:$0xff] }
 0x505   : > { %6254 = vmatpush1.msra.mxu0 %v8018_v52  ;;  %6317 = vmatprep.mubr.f32.mxu0 %v9659_v7  ;;  %v8055_v52 = vld [vmem:[#allocation8 + $0x9d0] sm:$0xff] }
 0x506   : > { %6396 = vmatpush1.msra.mxu1 %v8019_v51  ;;  %6459 = vmatprep.mubr.f32.mxu1 %v9659_v7  ;;  %v8030_v7 = vld [vmem:[#allocation8 + $0xa80] sm:$0xff]  ;;  %v9756_v51 = vpop.f32.mrf.mxu1 }
 0x507   : > { %6255 = vmatprep.subr.mxu0 %v8020_v38  ;;  %6397 = vmatprep.subr.mxu1 %v8021_v5  ;;  %v9758_v38 = vpop.f32.mrf.mxu0  ;;  %v8056_v5 = vld [vmem:[#allocation8 + $0x9a8] sm:$0xff] }
 0x508   : > { %6256 = vmatpush1.msra.mxu0 %v8022_v53  ;;  %6398 = vmatpush1.msra.mxu1 %v8023_v54  ;;  %v8057_v53 = vld [vmem:[#allocation8 + $0x9b8] sm:$0xff]  ;;  %v8058_v54 = vld [vmem:[#allocation8 + $0x9a0] sm:$0xff] }
 0x509   : > { %6257 = vmatprep.subr.mxu0 %v8024_v43  ;;  %6399 = vmatprep.subr.mxu1 %v8025_v58  ;;  %v8059_v43 = vld [vmem:[#allocation8 + $0x9b0] sm:$0xff]  ;;  %v9760_v58 = vpop.f32.mrf.mxu1 }
 0x50a   : > { %6258 = vmatpush1.msra.mxu0 %v8026_v1  ;;  %6400 = vmatpush1.msra.mxu1 %v8027_v13  ;;  %v9762_v1 = vpop.f32.mrf.mxu0  ;;  %v8060_v13 = vld [vmem:[#allocation8 + $0x988] sm:$0xff] }
 0x50b   : > { %6259 = vmatprep.subr.mxu0 %v8028_v63  ;;  %6401 = vmatprep.subr.mxu1 %v8029_v6  ;;  %v8061_v63 = vld [vmem:[#allocation8 + $0x998] sm:$0xff]  ;;  %v8062_v6 = vld [vmem:[#allocation8 + $0x980] sm:$0xff] }
 0x50c   : > { %6260 = vmatpush1.msra.mxu0 %v8030_v7  ;;  %6402 = vmatpush1.msra.mxu1 %v8031_v34  ;;  %v8063_v7 = vld [vmem:[#allocation8 + $0x990] sm:$0xff]  ;;  %v8064_v34 = vld [vmem:[#allocation8 + $0x968] sm:$0xff] }
 0x50d   : > { %6261 = vmatprep.subr.mxu0 %v8032_v12  ;;  %6403 = vmatprep.subr.mxu1 %v8033_v56  ;;  %v8065_v12 = vld [vmem:[#allocation8 + $0x978] sm:$0xff]  ;;  %v8066_v56 = vld [vmem:[#allocation8 + $0x960] sm:$0xff] }
 0x50e   : > { %6262 = vmatpush1.msra.mxu0 %v8034_v15  ;;  %6404 = vmatpush1.msra.mxu1 %v8035_v10  ;;  %v8067_v15 = vld [vmem:[#allocation8 + $0x970] sm:$0xff]  ;;  %v9764_v10 = vpop.f32.mrf.mxu1 }
 0x50f   : > { %6263 = vmatprep.subr.mxu0 %v8036_v21  ;;  %6405 = vmatprep.subr.mxu1 %v8037_v18  ;;  %v9766_v21 = vpop.f32.mrf.mxu0  ;;  %v8068_v18 = vld [vmem:[#allocation8 + $0x948] sm:$0xff] }
 0x510   : > { %6264 = vmatpush1.msra.mxu0 %v8038_v27  ;;  %6406 = vmatpush1.msra.mxu1 %v8039_v59  ;;  %v8069_v27 = vld [vmem:[#allocation8 + $0x958] sm:$0xff]  ;;  %v8070_v59 = vld [vmem:[#allocation8 + $0x940] sm:$0xff] }
 0x511   : > { %6265 = vmatprep.subr.mxu0 %v8040_v31  ;;  %6407 = vmatprep.subr.mxu1 %v8041_v32  ;;  %v8071_v31 = vld [vmem:[#allocation8 + $0x950] sm:$0xff]  ;;  %v5534_v32 = vpop.f32.mrf.mxu1 }
 0x512   : > { %6266 = vmatpush1.msra.mxu0 %v8042_v33  ;;  %6408 = vmatpush1.msra.mxu1 %v8043_v35  ;;  %v8072_v33 = vld [vmem:[#allocation8 + $0x928] sm:$0xff]  ;;  %v8073_v35 = vld [vmem:[#allocation8 + $0x938] sm:$0xff] }
 0x513   : > { %6267 = vmatprep.subr.mxu0 %v8044_v36  ;;  %6409 = vmatprep.subr.mxu1 %v8045_v9  ;;  %v8074_v9 = vld [vmem:[#allocation8 + $0x920] sm:$0xff] }
 0x514   : > { %6268 = vmatpush1.msra.mxu0 %v8046_v19  ;;  %6410 = vmatpush1.msra.mxu1 %v8047_v26  ;;  %v8075_v19 = vld [vmem:[#allocation8 + $0x930] sm:$0xff] }
 0x515   : > { %6269 = vmatprep.subr.mxu0 %v8048_v22  ;;  %6411 = vmatprep.subr.mxu1 %v8049_v24  ;;  %v8076_v22 = vld [vmem:[#allocation8 + $0x908] sm:$0xff]  ;;  %v8077_v24 = vld [vmem:[#allocation8 + $0x918] sm:$0xff] }
 0x516   : > { %6270 = vmatpush1.msra.mxu0 %v8050_v25  ;;  %6412 = vmatpush1.msra.mxu1 %v8051_v37  ;;  %v8078_v25 = vld [vmem:[#allocation8 + $0x900] sm:$0xff]  ;;  %v8079_v37 = vld [vmem:[#allocation8 + $0x910] sm:$0xff] }
 0x517   : > { %6271 = vmatprep.subr.mxu0 %v8052_v2  ;;  %6413 = vmatprep.subr.mxu1 %v8053_v30  ;;  %v8080_v30 = vld [vmem:[#allocation8 + $0xce8] sm:$0xff] }
 0x518   : > { %6272 = vmatpush1.msra.mxu0 %v8054_v44  ;;  %6414 = vmatpush1.msra.mxu1 %v8055_v52  ;;  %v8081_v44 = vld [vmem:[#allocation8 + $0xcf8] sm:$0xff]  ;;  %v8082_v52 = vld [vmem:[#allocation8 + $0xce0] sm:$0xff] }
 0x519   : > { %6273 = vmatprep.subr.mxu0 %v8056_v5  ;;  %6415 = vmatprep.subr.mxu1 %v8057_v53  ;;  %v8083_v5 = vld [vmem:[#allocation8 + $0xcf0] sm:$0xff]  ;;  %v8084_v53 = vld [vmem:[#allocation8 + $0xcc8] sm:$0xff] }
 0x51a   : > { %6274 = vmatpush1.msra.mxu0 %v8058_v54  ;;  %6416 = vmatpush1.msra.mxu1 %v8059_v43  ;;  %v8085_v54 = vld [vmem:[#allocation8 + $0xcd8] sm:$0xff]  ;;  %v8086_v43 = vld [vmem:[#allocation8 + $0xcc0] sm:$0xff] }
 0x51b   : > { %6275 = vmatprep.subr.mxu0 %v8060_v13  ;;  %6417 = vmatprep.subr.mxu1 %v8061_v63  ;;  %v8087_v13 = vld [vmem:[#allocation8 + $0xcd0] sm:$0xff]  ;;  %v8088_v63 = vld [vmem:[#allocation8 + $0xca8] sm:$0xff] }
 0x51c   : > { %6276 = vmatpush1.msra.mxu0 %v8062_v6  ;;  %6418 = vmatpush1.msra.mxu1 %v8063_v7  ;;  %v8090_v6 = vld [vmem:[#allocation8 + $0xca0] sm:$0xff]  ;;  %v8091_v7 = vld [vmem:[#allocation8 + $0xcb0] sm:$0xff] }
 0x51d   : > { %6277 = vmatprep.subr.mxu0 %v8064_v34  ;;  %6419 = vmatprep.subr.mxu1 %v8065_v12  ;;  %v8092_v34 = vld [vmem:[#allocation8 + $0xc88] sm:$0xff]  ;;  %v8093_v12 = vld [vmem:[#allocation8 + $0xc98] sm:$0xff] }
 0x51e   : > { %6278 = vmatpush1.msra.mxu0 %v8066_v56  ;;  %6420 = vmatpush1.msra.mxu1 %v8067_v15  ;;  %v8094_v56 = vld [vmem:[#allocation8 + $0xc80] sm:$0xff]  ;;  %v8095_v15 = vld [vmem:[#allocation8 + $0xc90] sm:$0xff] }
 0x51f   : > { %6279 = vmatprep.subr.mxu0 %v8068_v18  ;;  %6421 = vmatprep.subr.mxu1 %v8069_v27  ;;  %v8096_v18 = vld [vmem:[#allocation8 + $0xc68] sm:$0xff]  ;;  %v8097_v27 = vld [vmem:[#allocation8 + $0xc78] sm:$0xff] }
 0x520   : > { %6280 = vmatpush1.msra.mxu0 %v8070_v59  ;;  %6422 = vmatpush1.msra.mxu1 %v8071_v31  ;;  %v8098_v59 = vld [vmem:[#allocation8 + $0xc60] sm:$0xff]  ;;  %v8099_v31 = vld [vmem:[#allocation8 + $0xc70] sm:$0xff] }
 0x521   : > { %6281 = vmatprep.subr.mxu0 %v8072_v33  ;;  %6423 = vmatprep.subr.mxu1 %v8073_v35  ;;  %v5463_v36 = vpop.f32.mrf.mxu0  ;;  %v8101_v33 = vld [vmem:[#allocation8 + $0xc58] sm:$0xff]  ;;  %v8102_v35 = vld [vmem:[#allocation8 + $0xc40] sm:$0xff] }
 0x522   : > { %6282 = vmatpush1.msra.mxu0 %v8074_v9  ;;  %6424 = vmatpush1.msra.mxu1 %v8075_v19  ;;  %v5535_v26 = vadd.f32 %v5534_v32, %v5463_v36  ;;  %v8100_v32 = vld [vmem:[#allocation8 + $0xc48] sm:$0xff]  ;;  %v8103_v36 = vld [vmem:[#allocation8 + $0xc50] sm:$0xff]  ;;  %v8105_v19 = vld [vmem:[#allocation8 + $0xc38] sm:$0xff] }
 0x523   : > { %6283 = vmatprep.subr.mxu0 %v8076_v22  ;;  %6425 = vmatprep.subr.mxu1 %v8077_v24  ;;  %v8104_v9 = vld [vmem:[#allocation8 + $0xc28] sm:$0xff]  ;;  %v8107_v22 = vld [vmem:[#allocation8 + $0xc30] sm:$0xff] }
 0x524   : > { %6284 = vmatpush1.msra.mxu0 %v8078_v25  ;;  %6426 = vmatpush1.msra.mxu1 %v8079_v37  ;;  %v9769_v2 = vadd.f32 %v5535_v26, %v9742_v11  ;;  %v8089_v11 = vld [vmem:[#allocation8 + $0xcb8] sm:$0xff]  ;;  %v8106_v26 = vld [vmem:[#allocation8 + $0xc20] sm:$0xff]  ;;  %v8108_v24 = vld [vmem:[#allocation8 + $0xc08] sm:$0xff] }
 0x525   : > { %6285 = vmatprep.subr.mxu0 %v8080_v30  ;;  %6427 = vmatprep.subr.mxu1 %v8081_v44  ;;  %v8109_v25 = vld [vmem:[#allocation8 + $0xc18] sm:$0xff]  ;;  %v8110_v37 = vld [vmem:[#allocation8 + $0xc00] sm:$0xff]  ;;  %v8111_v30 = vld [vmem:[#allocation8 + $0xc10] sm:$0xff] }
 0x526   : > { %6286 = vmatpush2.msra.mxu0 %v8082_v52  ;;  %6428 = vmatpush2.msra.mxu1 %v8083_v5  ;;  %v8112_v44 = vld [vmem:[#allocation8 + $0xbe8] sm:$0xff]  ;;  %v8113_v52 = vld [vmem:[#allocation8 + $0xbf8] sm:$0xff]  ;;  %v8114_v5 = vld [vmem:[#allocation8 + $0xbe0] sm:$0xff] }
 0x527   : > { %6287 = vmatprep.subr.mxu0 %v8084_v53  ;;  %6429 = vmatprep.subr.mxu1 %v8085_v54  ;;  %v8115_v53 = vld [vmem:[#allocation8 + $0xbf0] sm:$0xff]  ;;  %v8116_v54 = vld [vmem:[#allocation8 + $0xbc8] sm:$0xff] }
 0x528   : > { %6288 = vmatpush2.msra.mxu0 %v8086_v43  ;;  %6430 = vmatpush2.msra.mxu1 %v8087_v13  ;;  %v8117_v43 = vld [vmem:[#allocation8 + $0xbd8] sm:$0xff]  ;;  %v8118_v13 = vld [vmem:[#allocation8 + $0xbc0] sm:$0xff] }
 0x529   : > { %6289 = vmatprep.subr.mxu0 %v8088_v63  ;;  %6431 = vmatprep.subr.mxu1 %v8089_v11  ;;  %v8119_v63 = vld [vmem:[#allocation8 + $0xbd0] sm:$0xff]  ;;  %v8120_v11 = vld [vmem:[#allocation8 + $0xba8] sm:$0xff] }
 0x52a   : > { %6290 = vmatpush2.msra.mxu0 %v8090_v6  ;;  %6432 = vmatpush2.msra.mxu1 %v8091_v7  ;;  %v8121_v6 = vld [vmem:[#allocation8 + $0xbb8] sm:$0xff]  ;;  %v8122_v7 = vld [vmem:[#allocation8 + $0xba0] sm:$0xff] }
 0x52b   : > { %6291 = vmatprep.subr.mxu0 %v8092_v34  ;;  %6433 = vmatprep.subr.mxu1 %v8093_v12  ;;  %v8123_v34 = vld [vmem:[#allocation8 + $0xbb0] sm:$0xff]  ;;  %v8124_v12 = vld [vmem:[#allocation8 + $0xb88] sm:$0xff] }
 0x52c   : > { %6292 = vmatpush2.msra.mxu0 %v8094_v56  ;;  %6434 = vmatpush2.msra.mxu1 %v8095_v15  ;;  %v8125_v56 = vld [vmem:[#allocation8 + $0xb98] sm:$0xff]  ;;  %v8126_v15 = vld [vmem:[#allocation8 + $0xb80] sm:$0xff] }
 0x52d   : > { %6293 = vmatprep.subr.mxu0 %v8096_v18  ;;  %6435 = vmatprep.subr.mxu1 %v8097_v27  ;;  %v8127_v18 = vld [vmem:[#allocation8 + $0xb90] sm:$0xff]  ;;  %v8128_v27 = vld [vmem:[#allocation8 + $0xb68] sm:$0xff] }
 0x52e   : > { %6294 = vmatpush2.msra.mxu0 %v8098_v59  ;;  %6436 = vmatpush2.msra.mxu1 %v8099_v31  ;;  %v8129_v59 = vld [vmem:[#allocation8 + $0xb78] sm:$0xff]  ;;  %v8130_v31 = vld [vmem:[#allocation8 + $0xb60] sm:$0xff] }
 0x52f   : > { %6295 = vmatprep.subr.mxu0 %v8100_v32  ;;  %6437 = vmatprep.subr.mxu1 %v8101_v33  ;;  %v8131_v32 = vld [vmem:[#allocation8 + $0xb70] sm:$0xff]  ;;  %v8132_v33 = vld [vmem:[#allocation8 + $0xb48] sm:$0xff] }
 0x530   : > { %6296 = vmatpush2.msra.mxu0 %v8102_v35  ;;  %6438 = vmatpush2.msra.mxu1 %v8103_v36  ;;  %v8133_v35 = vld [vmem:[#allocation8 + $0xb58] sm:$0xff]  ;;  %v8134_v36 = vld [vmem:[#allocation8 + $0xb40] sm:$0xff] }
 0x531   : > { %6297 = vmatprep.subr.mxu0 %v8104_v9  ;;  %6439 = vmatprep.subr.mxu1 %v8105_v19  ;;  %v8135_v9 = vld [vmem:[#allocation8 + $0xb50] sm:$0xff]  ;;  %v8136_v19 = vld [vmem:[#allocation8 + $0xb28] sm:$0xff] }
 0x532   : > { %6298 = vmatpush2.msra.mxu0 %v8106_v26  ;;  %6440 = vmatpush2.msra.mxu1 %v8107_v22  ;;  %v8137_v26 = vld [vmem:[#allocation8 + $0xb38] sm:$0xff]  ;;  %v8138_v22 = vld [vmem:[#allocation8 + $0xb20] sm:$0xff] }
 0x533   : > { %6299 = vmatprep.subr.mxu0 %v8108_v24  ;;  %6441 = vmatprep.subr.mxu1 %v8109_v25  ;;  %v8139_v24 = vld [vmem:[#allocation8 + $0xb30] sm:$0xff]  ;;  %v8140_v25 = vld [vmem:[#allocation8 + $0xb08] sm:$0xff] }
 0x534   : > { %6300 = vmatpush2.msra.mxu0 %v8110_v37  ;;  %6442 = vmatpush2.msra.mxu1 %v8111_v30  ;;  %v8141_v37 = vld [vmem:[#allocation8 + $0xb18] sm:$0xff]  ;;  %v8142_v30 = vld [vmem:[#allocation8 + $0xb00] sm:$0xff] }
 0x535   : > { %6301 = vmatprep.subr.mxu0 %v8112_v44  ;;  %6443 = vmatprep.subr.mxu1 %v8113_v52  ;;  %v8143_v44 = vld [vmem:[#allocation8 + $0xb10] sm:$0xff]  ;;  %v8144_v52 = vld [vmem:[#allocation8 + $0xd78] sm:$0xff] }
 0x536   : > { %6302 = vmatpush2.msra.mxu0 %v8114_v5  ;;  %6444 = vmatpush2.msra.mxu1 %v8115_v53  ;;  %v8145_v5 = vld [vmem:[#allocation8 + $0x11e8] sm:$0xff]  ;;  %v8146_v53 = vld [vmem:[#allocation8 + $0xd70] sm:$0xff] }
 0x537   : > { %6303 = vmatprep.subr.mxu0 %v8116_v54  ;;  %6445 = vmatprep.subr.mxu1 %v8117_v43  ;;  %v8147_v54 = vld [vmem:[#allocation8 + $0x11e0] sm:$0xff]  ;;  %v8148_v43 = vld [vmem:[#allocation8 + $0xd58] sm:$0xff] }
 0x538   : > { %6304 = vmatpush2.msra.mxu0 %v8118_v13  ;;  %6446 = vmatpush2.msra.mxu1 %v8119_v63  ;;  %v8149_v13 = vld [vmem:[#allocation8 + $0x11c8] sm:$0xff]  ;;  %v8150_v63 = vld [vmem:[#allocation8 + $0xd50] sm:$0xff] }
 0x539   : > { %6305 = vmatprep.subr.mxu0 %v8120_v11  ;;  %6447 = vmatprep.subr.mxu1 %v8121_v6  ;;  %v8151_v11 = vld [vmem:[#allocation8 + $0x11c0] sm:$0xff]  ;;  %v8152_v6 = vld [vmem:[#allocation8 + $0xd38] sm:$0xff] }
 0x53a   : > { %6306 = vmatpush2.msra.mxu0 %v8122_v7  ;;  %6448 = vmatpush2.msra.mxu1 %v8123_v34  ;;  %v8153_v7 = vld [vmem:[#allocation8 + $0x11a8] sm:$0xff]  ;;  %v8155_v34 = vld [vmem:[#allocation8 + $0x11a0] sm:$0xff] }
 0x53b   : > { %6307 = vmatprep.subr.mxu0 %v8124_v12  ;;  %6449 = vmatprep.subr.mxu1 %v8125_v56  ;;  %v8156_v12 = vld [vmem:[#allocation8 + $0xd18] sm:$0xff]  ;;  %v8157_v56 = vld [vmem:[#allocation8 + $0x1188] sm:$0xff] }
 0x53c   : > { %6308 = vmatpush2.msra.mxu0 %v8126_v15  ;;  %6450 = vmatpush2.msra.mxu1 %v8127_v18  ;;  %v8158_v15 = vld [vmem:[#allocation8 + $0xd10] sm:$0xff]  ;;  %v8159_v18 = vld [vmem:[#allocation8 + $0x1180] sm:$0xff] }
 0x53d   : > { %6309 = vmatprep.subr.mxu0 %v8128_v27  ;;  %6451 = vmatprep.subr.mxu1 %v8129_v59  ;;  %v8160_v27 = vld [vmem:[#allocation8 + $0xf68] sm:$0xff]  ;;  %v8161_v59 = vld [vmem:[#allocation8 + $0xf78] sm:$0xff] }
 0x53e   : > { %6310 = vmatpush2.msra.mxu0 %v8130_v31  ;;  %6452 = vmatpush2.msra.mxu1 %v8131_v32  ;;  %v8162_v31 = vld [vmem:[#allocation8 + $0xf60] sm:$0xff]  ;;  %v8163_v32 = vld [vmem:[#allocation8 + $0xf70] sm:$0xff] }
 0x53f   : > { %6311 = vmatprep.subr.mxu0 %v8132_v33  ;;  %6453 = vmatprep.subr.mxu1 %v8133_v35  ;;  %v8164_v33 = vld [vmem:[#allocation8 + $0xf48] sm:$0xff]  ;;  %v8165_v35 = vld [vmem:[#allocation8 + $0xf58] sm:$0xff] }
 0x540   : > { %6312 = vmatpush2.msra.mxu0 %v8134_v36  ;;  %6454 = vmatpush2.msra.mxu1 %v8135_v9  ;;  %v8167_v36 = vld [vmem:[#allocation8 + $0xf50] sm:$0xff]  ;;  %v8168_v9 = vld [vmem:[#allocation8 + $0xf28] sm:$0xff] }
 0x541   : > { %6313 = vmatprep.subr.mxu0 %v8136_v19  ;;  %6455 = vmatprep.subr.mxu1 %v8137_v26  ;;  %v8169_v19 = vld [vmem:[#allocation8 + $0xf38] sm:$0xff]  ;;  %v8170_v26 = vld [vmem:[#allocation8 + $0xf20] sm:$0xff] }
 0x542   : > { %6314 = vmatpush2.msra.mxu0 %v8138_v22  ;;  %6456 = vmatpush2.msra.mxu1 %v8139_v24  ;;  %v8171_v22 = vld [vmem:[#allocation8 + $0xf30] sm:$0xff]  ;;  %v8172_v24 = vld [vmem:[#allocation8 + $0xf08] sm:$0xff] }
 0x543   : > { %6315 = vmatprep.subr.mxu0 %v8140_v25  ;;  %6457 = vmatprep.subr.mxu1 %v8141_v37  ;;  %v8173_v25 = vld [vmem:[#allocation8 + $0xf18] sm:$0xff]  ;;  %v8175_v37 = vld [vmem:[#allocation8 + $0xf10] sm:$0xff] }
 0x544   : > { %6316 = vmatpush2.msra.mxu0 %v8142_v30  ;;  %6458 = vmatpush2.msra.mxu1 %v8143_v44  ;;  %v8176_v30 = vld [vmem:[#allocation8 + $0xee8] sm:$0xff]  ;;  %v8177_v44 = vld [vmem:[#allocation8 + $0xef8] sm:$0xff] }
 0x545   : > { %6318 = vmatmul.mubr.f32.vlgmr.msra.gmra.mxu0 %v9665_v8  ;;  %6460 = vmatmul.mubr.f32.vlgmr.msra.gmra.mxu1 %v9665_v8  ;;  %v8154_v8 = vld [vmem:[#allocation8 + $0xd30] sm:$0xff] }
 0x546   : > { %6490 = vmatprep.subr.mxu0 %v8144_v52  ;;  %6636 = vmatprep.subr.mxu1 %v8145_v5  ;;  %v8178_v52 = vld [vmem:[#allocation8 + $0xee0] sm:$0xff]  ;;  %v8179_v5 = vld [vmem:[#allocation8 + $0xef0] sm:$0xff] }
 0x547   : > { %6491 = vmatpush1.msra.mxu0 %v8146_v53  ;;  %6637 = vmatpush1.msra.mxu1 %v8147_v54  ;;  %v8180_v53 = vld [vmem:[#allocation8 + $0xec8] sm:$0xff]  ;;  %v8181_v54 = vld [vmem:[#allocation8 + $0xed8] sm:$0xff] }
 0x548   : > { %6492 = vmatprep.subr.mxu0 %v8148_v43  ;;  %6638 = vmatprep.subr.mxu1 %v8149_v13  ;;  %v8182_v43 = vld [vmem:[#allocation8 + $0xec0] sm:$0xff]  ;;  %v8183_v13 = vld [vmem:[#allocation8 + $0xed0] sm:$0xff] }
 0x549   : > { %6493 = vmatpush1.msra.mxu0 %v8150_v63  ;;  %6639 = vmatpush1.msra.mxu1 %v8151_v11  ;;  %v8184_v63 = vld [vmem:[#allocation8 + $0xea8] sm:$0xff]  ;;  %v8185_v11 = vld [vmem:[#allocation8 + $0xeb8] sm:$0xff] }
 0x54a   : > { %6494 = vmatprep.subr.mxu0 %v8152_v6  ;;  %6640 = vmatprep.subr.mxu1 %v8153_v7  ;;  %v8186_v6 = vld [vmem:[#allocation8 + $0xea0] sm:$0xff]  ;;  %v8187_v7 = vld [vmem:[#allocation8 + $0xeb0] sm:$0xff] }
 0x54b   : > { %6495 = vmatpush1.msra.mxu0 %v8154_v8  ;;  %6641 = vmatpush1.msra.mxu1 %v8155_v34  ;;  %v8188_v8 = vld [vmem:[#allocation8 + $0xe88] sm:$0xff]  ;;  %v8189_v34 = vld [vmem:[#allocation8 + $0xe98] sm:$0xff] }
 0x54c   : > { %6496 = vmatprep.subr.mxu0 %v8156_v12  ;;  %6642 = vmatprep.subr.mxu1 %v8157_v56  ;;  %v8190_v12 = vld [vmem:[#allocation8 + $0xe80] sm:$0xff]  ;;  %v8191_v56 = vld [vmem:[#allocation8 + $0xe90] sm:$0xff] }
 0x54d   : > { %6497 = vmatpush1.msra.mxu0 %v8158_v15  ;;  %6530 = vmatprep.mubr.f32.mxu0 %v9608_v39  ;;  %v8192_v15 = vld [vmem:[#allocation8 + $0xe68] sm:$0xff] }
 0x54e   : > { %6643 = vmatpush1.msra.mxu1 %v8159_v18  ;;  %6676 = vmatprep.mubr.f32.mxu1 %v9608_v39  ;;  %v8193_v18 = vld [vmem:[#allocation8 + $0xe78] sm:$0xff] }
 0x54f   : > { %7591 = vmatmul.mubr.msk.f32.vlgmr.msra.gmra.mxu0 %vm395_vm0, %v9653_v60  ;;  %6541 = vmatprep.subr.mxu0 %v8160_v27  ;;  %v8166_v60 = vld [vmem:[#allocation8 + $0xf40] sm:$0xff] }
 0x550   : > { %7592 = vmatmul.mubr.msk.f32.vlgmr.msra.gmra.mxu1 %vm395_vm0, %v9671_v28  ;;  %6683 = vmatprep.subr.mxu1 %v8161_v59  ;;  %v8194_v27 = vld [vmem:[#allocation8 + $0xe60] sm:$0xff]  ;;  %v8195_v59 = vld [vmem:[#allocation8 + $0xe70] sm:$0xff] }
 0x551   : > { %6542 = vmatpush1.msra.mxu0 %v8162_v31  ;;  %6605 = vmatprep.mubr.f32.mxu0 %v9679_v42  ;;  %v8196_v31 = vld [vmem:[#allocation8 + $0xe48] sm:$0xff] }
 0x552   : > { %6684 = vmatpush1.msra.mxu1 %v8163_v32  ;;  %6747 = vmatprep.mubr.f32.mxu1 %v9679_v42  ;;  %v8174_v42 = vld [vmem:[#allocation8 + $0xf00] sm:$0xff]  ;;  %v8197_v32 = vld [vmem:[#allocation8 + $0xe58] sm:$0xff] }
 0x553   : > { %6543 = vmatprep.subr.mxu0 %v8164_v33  ;;  %6685 = vmatprep.subr.mxu1 %v8165_v35  ;;  %v8198_v33 = vld [vmem:[#allocation8 + $0xe40] sm:$0xff]  ;;  %v8199_v35 = vld [vmem:[#allocation8 + $0xe50] sm:$0xff] }
 0x554   : > { %6544 = vmatpush1.msra.mxu0 %v8166_v60  ;;  %6686 = vmatpush1.msra.mxu1 %v8167_v36  ;;  %v9781_v60 = vpop.f32.mrf.mxu1  ;;  %v9783_v36 = vpop.f32.mrf.mxu0 }
 0x555   : > { %6545 = vmatprep.subr.mxu0 %v8168_v9  ;;  %6687 = vmatprep.subr.mxu1 %v8169_v19  ;;  %v8200_v9 = vld [vmem:[#allocation8 + $0xe28] sm:$0xff]  ;;  %v8201_v19 = vld [vmem:[#allocation8 + $0xe38] sm:$0xff] }
 0x556   : > { %6546 = vmatpush1.msra.mxu0 %v8170_v26  ;;  %6688 = vmatpush1.msra.mxu1 %v8171_v22  ;;  %v8202_v26 = vld [vmem:[#allocation8 + $0xe20] sm:$0xff]  ;;  %v8203_v22 = vld [vmem:[#allocation8 + $0xe30] sm:$0xff] }
 0x557   : > { %6547 = vmatprep.subr.mxu0 %v8172_v24  ;;  %6689 = vmatprep.subr.mxu1 %v8173_v25  ;;  %v9785_v24 = vpop.f32.mrf.mxu1  ;;  %v9787_v25 = vpop.f32.mrf.mxu0 }
 0x558   : > { %6548 = vmatpush1.msra.mxu0 %v8174_v42  ;;  %6690 = vmatpush1.msra.mxu1 %v8175_v37  ;;  %v8204_v42 = vld [vmem:[#allocation8 + $0xe08] sm:$0xff]  ;;  %v8205_v37 = vld [vmem:[#allocation8 + $0xe18] sm:$0xff] }
 0x559   : > { %6549 = vmatprep.subr.mxu0 %v8176_v30  ;;  %6691 = vmatprep.subr.mxu1 %v8177_v44  ;;  %v8206_v30 = vld [vmem:[#allocation8 + $0xe00] sm:$0xff]  ;;  %v8207_v44 = vld [vmem:[#allocation8 + $0xe10] sm:$0xff] }
 0x55a   : > { %6550 = vmatpush1.msra.mxu0 %v8178_v52  ;;  %6692 = vmatpush1.msra.mxu1 %v8179_v5  ;;  %v8208_v52 = vld [vmem:[#allocation8 + $0xde8] sm:$0xff]  ;;  %v8209_v5 = vld [vmem:[#allocation8 + $0xdf8] sm:$0xff] }
 0x55b   : > { %6551 = vmatprep.subr.mxu0 %v8180_v53  ;;  %6693 = vmatprep.subr.mxu1 %v8181_v54  ;;  %v8210_v53 = vld [vmem:[#allocation8 + $0xde0] sm:$0xff]  ;;  %v8211_v54 = vld [vmem:[#allocation8 + $0xdf0] sm:$0xff] }
 0x55c   : > { %6552 = vmatpush1.msra.mxu0 %v8182_v43  ;;  %6694 = vmatpush1.msra.mxu1 %v8183_v13  ;;  %v9789_v43 = vpop.f32.mrf.mxu1  ;;  %v9791_v13 = vpop.f32.mrf.mxu0 }
 0x55d   : > { %6553 = vmatprep.subr.mxu0 %v8184_v63  ;;  %6695 = vmatprep.subr.mxu1 %v8185_v11  ;;  %v8212_v63 = vld [vmem:[#allocation8 + $0xdc8] sm:$0xff]  ;;  %v8213_v11 = vld [vmem:[#allocation8 + $0xdd8] sm:$0xff] }
 0x55e   : > { %6554 = vmatpush1.msra.mxu0 %v8186_v6  ;;  %6696 = vmatpush1.msra.mxu1 %v8187_v7  ;;  %v8214_v6 = vld [vmem:[#allocation8 + $0xdc0] sm:$0xff]  ;;  %v8215_v7 = vld [vmem:[#allocation8 + $0xdd0] sm:$0xff] }
 0x55f   : > { %6555 = vmatprep.subr.mxu0 %v8188_v8  ;;  %6697 = vmatprep.subr.mxu1 %v8189_v34  ;;  %v5822_v8 = vpop.f32.mrf.mxu1  ;;  %v8216_v34 = vld [vmem:[#allocation8 + $0xda8] sm:$0xff] }
 0x560   : > { %6556 = vmatpush1.msra.mxu0 %v8190_v12  ;;  %6698 = vmatpush1.msra.mxu1 %v8191_v56  ;;  %v8217_v12 = vld [vmem:[#allocation8 + $0xdb8] sm:$0xff] }
 0x561   : > { %6557 = vmatprep.subr.mxu0 %v8192_v15  ;;  %6699 = vmatprep.subr.mxu1 %v8193_v18  ;;  %v8218_v15 = vld [vmem:[#allocation8 + $0xda0] sm:$0xff]  ;;  %v8219_v18 = vld [vmem:[#allocation8 + $0xdb0] sm:$0xff] }
 0x562   : > { %6558 = vmatpush1.msra.mxu0 %v8194_v27  ;;  %6700 = vmatpush1.msra.mxu1 %v8195_v59  ;;  %v8220_v59 = vld [vmem:[#allocation8 + $0xd88] sm:$0xff] }
 0x563   : > { %6559 = vmatprep.subr.mxu0 %v8196_v31  ;;  %6701 = vmatprep.subr.mxu1 %v8197_v32  ;;  %v8221_v31 = vld [vmem:[#allocation8 + $0xd98] sm:$0xff]  ;;  %v8222_v32 = vld [vmem:[#allocation8 + $0xd80] sm:$0xff] }
 0x564   : > { %6560 = vmatpush1.msra.mxu0 %v8198_v33  ;;  %6702 = vmatpush1.msra.mxu1 %v8199_v35  ;;  %v8223_v33 = vld [vmem:[#allocation8 + $0xd90] sm:$0xff]  ;;  %v8224_v35 = vld [vmem:[#allocation8 + $0x1168] sm:$0xff] }
 0x565   : > { %6561 = vmatprep.subr.mxu0 %v8200_v9  ;;  %6703 = vmatprep.subr.mxu1 %v8201_v19  ;;  %v8225_v9 = vld [vmem:[#allocation8 + $0x1178] sm:$0xff]  ;;  %v8226_v19 = vld [vmem:[#allocation8 + $0x1160] sm:$0xff] }
 0x566   : > { %6562 = vmatpush1.msra.mxu0 %v8202_v26  ;;  %6704 = vmatpush1.msra.mxu1 %v8203_v22  ;;  %v8227_v26 = vld [vmem:[#allocation8 + $0x1170] sm:$0xff]  ;;  %v8228_v22 = vld [vmem:[#allocation8 + $0x1148] sm:$0xff] }
 0x567   : > { %6563 = vmatprep.subr.mxu0 %v8204_v42  ;;  %6705 = vmatprep.subr.mxu1 %v8205_v37  ;;  %v8229_v42 = vld [vmem:[#allocation8 + $0x1158] sm:$0xff]  ;;  %v8230_v37 = vld [vmem:[#allocation8 + $0x1140] sm:$0xff] }
 0x568   : > { %6564 = vmatpush1.msra.mxu0 %v8206_v30  ;;  %6706 = vmatpush1.msra.mxu1 %v8207_v44  ;;  %v8231_v30 = vld [vmem:[#allocation8 + $0x1150] sm:$0xff]  ;;  %v8232_v44 = vld [vmem:[#allocation8 + $0x1128] sm:$0xff] }
 0x569   : > { %6565 = vmatprep.subr.mxu0 %v8208_v52  ;;  %6707 = vmatprep.subr.mxu1 %v8209_v5  ;;  %v8233_v52 = vld [vmem:[#allocation8 + $0x1138] sm:$0xff]  ;;  %v8234_v5 = vld [vmem:[#allocation8 + $0x1120] sm:$0xff] }
 0x56a   : > { %6566 = vmatpush1.msra.mxu0 %v8210_v53  ;;  %6708 = vmatpush1.msra.mxu1 %v8211_v54  ;;  %v8235_v53 = vld [vmem:[#allocation8 + $0x1130] sm:$0xff]  ;;  %v8236_v54 = vld [vmem:[#allocation8 + $0x1108] sm:$0xff] }
 0x56b   : > { %6567 = vmatprep.subr.mxu0 %v8212_v63  ;;  %6709 = vmatprep.subr.mxu1 %v8213_v11  ;;  %v8237_v63 = vld [vmem:[#allocation8 + $0x1118] sm:$0xff]  ;;  %v8238_v11 = vld [vmem:[#allocation8 + $0x1100] sm:$0xff] }
 0x56c   : > { %6568 = vmatpush1.msra.mxu0 %v8214_v6  ;;  %6710 = vmatpush1.msra.mxu1 %v8215_v7  ;;  %v8239_v6 = vld [vmem:[#allocation8 + $0x1110] sm:$0xff]  ;;  %v8240_v7 = vld [vmem:[#allocation8 + $0x10e8] sm:$0xff] }
 0x56d   : > { %6569 = vmatprep.subr.mxu0 %v8216_v34  ;;  %6711 = vmatprep.subr.mxu1 %v8217_v12  ;;  %v5751_v56 = vpop.f32.mrf.mxu0  ;;  %v8242_v34 = vld [vmem:[#allocation8 + $0x10e0] sm:$0xff]  ;;  %v8243_v12 = vld [vmem:[#allocation8 + $0x10f0] sm:$0xff] }
 0x56e   : > { %6570 = vmatpush1.msra.mxu0 %v8218_v15  ;;  %6712 = vmatpush1.msra.mxu1 %v8219_v18  ;;  %v9793_v27 = vadd.f32 %v5822_v8, %v5751_v56  ;;  %v8241_v8 = vld [vmem:[#allocation8 + $0x10f8] sm:$0xff]  ;;  %v8244_v56 = vld [vmem:[#allocation8 + $0x10c8] sm:$0xff]  ;;  %v8246_v18 = vld [vmem:[#allocation8 + $0x10c0] sm:$0xff] }
 0x56f   : > { %6571 = vmatprep.subr.mxu0 %v8220_v59  ;;  %6713 = vmatprep.subr.mxu1 %v8221_v31  ;;  %v8245_v15 = vld [vmem:[#allocation8 + $0x10d8] sm:$0xff]  ;;  %v8247_v59 = vld [vmem:[#allocation8 + $0x10d0] sm:$0xff]  ;;  %v8248_v31 = vld [vmem:[#allocation8 + $0x10a8] sm:$0xff] }
 0x570   : > { %6572 = vmatpush1.msra.mxu0 %v8222_v32  ;;  %6714 = vmatpush1.msra.mxu1 %v8223_v33  ;;  %v8249_v32 = vld [vmem:[#allocation8 + $0x10b8] sm:$0xff]  ;;  %v8250_v33 = vld [vmem:[#allocation8 + $0x10a0] sm:$0xff] }
 0x571   : > { %6573 = vmatprep.subr.mxu0 %v8224_v35  ;;  %6715 = vmatprep.subr.mxu1 %v8225_v9  ;;  %v8251_v35 = vld [vmem:[#allocation8 + $0x10b0] sm:$0xff]  ;;  %v8252_v9 = vld [vmem:[#allocation8 + $0x1088] sm:$0xff] }
 0x572   : > { %6574 = vmatpush2.msra.mxu0 %v8226_v19  ;;  %6716 = vmatpush2.msra.mxu1 %v8227_v26  ;;  %v8253_v19 = vld [vmem:[#allocation8 + $0x1098] sm:$0xff]  ;;  %v8254_v26 = vld [vmem:[#allocation8 + $0x1080] sm:$0xff] }
 0x573   : > { %6575 = vmatprep.subr.mxu0 %v8228_v22  ;;  %6717 = vmatprep.subr.mxu1 %v8229_v42  ;;  %v8255_v22 = vld [vmem:[#allocation8 + $0x1090] sm:$0xff]  ;;  %v8256_v42 = vld [vmem:[#allocation8 + $0x1068] sm:$0xff] }
 0x574   : > { %6576 = vmatpush2.msra.mxu0 %v8230_v37  ;;  %6718 = vmatpush2.msra.mxu1 %v8231_v30  ;;  %v8257_v37 = vld [vmem:[#allocation8 + $0x1078] sm:$0xff]  ;;  %v8258_v30 = vld [vmem:[#allocation8 + $0x1060] sm:$0xff] }
 0x575   : > { %6577 = vmatprep.subr.mxu0 %v8232_v44  ;;  %6719 = vmatprep.subr.mxu1 %v8233_v52  ;;  %v8259_v44 = vld [vmem:[#allocation8 + $0x1070] sm:$0xff]  ;;  %v8260_v52 = vld [vmem:[#allocation8 + $0x1048] sm:$0xff] }
 0x576   : > { %6578 = vmatpush2.msra.mxu0 %v8234_v5  ;;  %6720 = vmatpush2.msra.mxu1 %v8235_v53  ;;  %v8261_v5 = vld [vmem:[#allocation8 + $0x1058] sm:$0xff]  ;;  %v8262_v53 = vld [vmem:[#allocation8 + $0x1040] sm:$0xff] }
 0x577   : > { %6579 = vmatprep.subr.mxu0 %v8236_v54  ;;  %6721 = vmatprep.subr.mxu1 %v8237_v63  ;;  %v8263_v54 = vld [vmem:[#allocation8 + $0x1050] sm:$0xff]  ;;  %v8264_v63 = vld [vmem:[#allocation8 + $0x1028] sm:$0xff] }
 0x578   : > { %6580 = vmatpush2.msra.mxu0 %v8238_v11  ;;  %6722 = vmatpush2.msra.mxu1 %v8239_v6  ;;  %v8265_v11 = vld [vmem:[#allocation8 + $0x1038] sm:$0xff]  ;;  %v8266_v6 = vld [vmem:[#allocation8 + $0x1020] sm:$0xff] }
 0x579   : > { %6581 = vmatprep.subr.mxu0 %v8240_v7  ;;  %6723 = vmatprep.subr.mxu1 %v8241_v8  ;;  %v8267_v7 = vld [vmem:[#allocation8 + $0x1030] sm:$0xff]  ;;  %v8268_v8 = vld [vmem:[#allocation8 + $0x1008] sm:$0xff] }
 0x57a   : > { %6582 = vmatpush2.msra.mxu0 %v8242_v34  ;;  %6724 = vmatpush2.msra.mxu1 %v8243_v12  ;;  %v8269_v34 = vld [vmem:[#allocation8 + $0x1018] sm:$0xff]  ;;  %v8270_v12 = vld [vmem:[#allocation8 + $0x1000] sm:$0xff] }
 0x57b   : > { %6583 = vmatprep.subr.mxu0 %v8244_v56  ;;  %6725 = vmatprep.subr.mxu1 %v8245_v15  ;;  %v8271_v56 = vld [vmem:[#allocation8 + $0x1010] sm:$0xff]  ;;  %v8272_v15 = vld [vmem:[#allocation8 + $0xfe8] sm:$0xff] }
 0x57c   : > { %6584 = vmatpush2.msra.mxu0 %v8246_v18  ;;  %6726 = vmatpush2.msra.mxu1 %v8247_v59  ;;  %v8273_v18 = vld [vmem:[#allocation8 + $0xff8] sm:$0xff]  ;;  %v8274_v59 = vld [vmem:[#allocation8 + $0xfe0] sm:$0xff] }
 0x57d   : > { %6585 = vmatprep.subr.mxu0 %v8248_v31  ;;  %6727 = vmatprep.subr.mxu1 %v8249_v32  ;;  %v8275_v31 = vld [vmem:[#allocation8 + $0xff0] sm:$0xff]  ;;  %v8276_v32 = vld [vmem:[#allocation8 + $0xfc8] sm:$0xff] }
 0x57e   : > { %6586 = vmatpush2.msra.mxu0 %v8250_v33  ;;  %6728 = vmatpush2.msra.mxu1 %v8251_v35  ;;  %v8277_v33 = vld [vmem:[#allocation8 + $0xfd8] sm:$0xff]  ;;  %v8278_v35 = vld [vmem:[#allocation8 + $0xfc0] sm:$0xff] }
 0x57f   : > { %6587 = vmatprep.subr.mxu0 %v8252_v9  ;;  %6729 = vmatprep.subr.mxu1 %v8253_v19  ;;  %v8279_v9 = vld [vmem:[#allocation8 + $0xfd0] sm:$0xff]  ;;  %v8280_v19 = vld [vmem:[#allocation8 + $0xfa8] sm:$0xff] }
 0x580   : > { %6588 = vmatpush2.msra.mxu0 %v8254_v26  ;;  %6730 = vmatpush2.msra.mxu1 %v8255_v22  ;;  %v8281_v26 = vld [vmem:[#allocation8 + $0xfb8] sm:$0xff]  ;;  %v8282_v22 = vld [vmem:[#allocation8 + $0xfa0] sm:$0xff] }
 0x581   : > { %6589 = vmatprep.subr.mxu0 %v8256_v42  ;;  %6731 = vmatprep.subr.mxu1 %v8257_v37  ;;  %v8283_v42 = vld [vmem:[#allocation8 + $0xfb0] sm:$0xff]  ;;  %v8284_v37 = vld [vmem:[#allocation8 + $0xf88] sm:$0xff] }
 0x582   : > { %6590 = vmatpush2.msra.mxu0 %v8258_v30  ;;  %6732 = vmatpush2.msra.mxu1 %v8259_v44  ;;  %v8285_v30 = vld [vmem:[#allocation8 + $0xf98] sm:$0xff]  ;;  %v8286_v44 = vld [vmem:[#allocation8 + $0xf80] sm:$0xff] }
 0x583   : > { %6591 = vmatprep.subr.mxu0 %v8260_v52  ;;  %6733 = vmatprep.subr.mxu1 %v8261_v5  ;;  %v8287_v52 = vld [vmem:[#allocation8 + $0xf90] sm:$0xff]  ;;  %v8288_v5 = vld [vmem:[#allocation8 + $0x11f8] sm:$0xff] }
 0x584   : > { %6592 = vmatpush2.msra.mxu0 %v8262_v53  ;;  %6734 = vmatpush2.msra.mxu1 %v8263_v54  ;;  %v8289_v53 = vld [vmem:[#allocation8 + $0x1668] sm:$0xff]  ;;  %v3487_v54 = vld [vmem:[#allocation2 + $0x58] sm:$0x1] }
 0x585   : > { %6593 = vmatprep.subr.mxu0 %v8264_v63  ;;  %6735 = vmatprep.subr.mxu1 %v8265_v11  ;;  %v8290_v63 = vld [vmem:[#allocation8 + $0x11f0] sm:$0xff]  ;;  %v8291_v11 = vld [vmem:[#allocation8 + $0x1660] sm:$0xff] }
 0x586   : > { %6594 = vmatpush2.msra.mxu0 %v8266_v6  ;;  %6736 = vmatpush2.msra.mxu1 %v8267_v7  ;;  %v8292_v6 = vld [vmem:[#allocation8 + $0x11d8] sm:$0xff]  ;;  %v8293_v7 = vld [vmem:[#allocation8 + $0x1648] sm:$0xff] }
 0x587   : > { %6595 = vmatprep.subr.mxu0 %v8268_v8  ;;  %6737 = vmatprep.subr.mxu1 %v8269_v34  ;;  %v8294_v8 = vld [vmem:[#allocation8 + $0x11d0] sm:$0xff]  ;;  %v8295_v34 = vld [vmem:[#allocation8 + $0x1640] sm:$0xff] }
 0x588   : > { %6596 = vmatpush2.msra.mxu0 %v8270_v12  ;;  %6738 = vmatpush2.msra.mxu1 %v8271_v56  ;;  %v6838_v12 = vrot.slane %v9721_v41, 2  ;;  %v3486_v56 = vld [vmem:[#allocation2 + $0x50] sm:$0x1] }
 0x589   : > { %6597 = vmatprep.subr.mxu0 %v8272_v15  ;;  %6739 = vmatprep.subr.mxu1 %v8273_v18  ;;  %v8296_v15 = vld [vmem:[#allocation8 + $0x11b8] sm:$0xff]  ;;  %v8297_v18 = vld [vmem:[#allocation8 + $0x1628] sm:$0xff] }
 0x58a   : > { %6598 = vmatpush2.msra.mxu0 %v8274_v59  ;;  %6740 = vmatpush2.msra.mxu1 %v8275_v31  ;;  %v8298_v59 = vld [vmem:[#allocation8 + $0x11b0] sm:$0xff]  ;;  %v8299_v31 = vld [vmem:[#allocation8 + $0x1620] sm:$0xff] }
 0x58b   : > { %6599 = vmatprep.subr.mxu0 %v8276_v32  ;;  %6741 = vmatprep.subr.mxu1 %v8277_v33  ;;  %v8300_v32 = vld [vmem:[#allocation8 + $0x1198] sm:$0xff]  ;;  %v8301_v33 = vld [vmem:[#allocation8 + $0x1608] sm:$0xff] }
 0x58c   : > { %6600 = vmatpush2.msra.mxu0 %v8278_v35  ;;  %6742 = vmatpush2.msra.mxu1 %v8279_v9  ;;  %v6835_v35 = vrot.slane %v9725_v62, 2  ;;  %v6836_v9 = vrot.slane %v3486_v56, 2  ;;  %v8305_v62 = vld [vmem:[#allocation8 + $0x13f8] sm:$0xff]  ;;  %v8322_v56 = vld [vmem:[#allocation8 + $0x1360] sm:$0xff] }
 0x58d   : > { %6601 = vmatprep.subr.mxu0 %v8280_v19  ;;  %6743 = vmatprep.subr.mxu1 %v8281_v26  ;;  %v8302_v19 = vld [vmem:[#allocation8 + $0x1190] sm:$0xff]  ;;  %v8303_v26 = vld [vmem:[#allocation8 + $0x1600] sm:$0xff] }
 0x58e   : > { %6602 = vmatpush2.msra.mxu0 %v8282_v22  ;;  %6744 = vmatpush2.msra.mxu1 %v8283_v42  ;;  %v8304_v22 = vld [vmem:[#allocation8 + $0x13e8] sm:$0xff]  ;;  %v6837_v42 = vsel %vm5383_vm3, %v6835_v35, %v6836_v9  ;;  %v8329_v35 = vld [vmem:[#allocation8 + $0x1338] sm:$0xff]  ;;  %v8330_v9 = vld [vmem:[#allocation8 + $0x1320] sm:$0xff] }
 0x58f   : > { %6603 = vmatprep.subr.mxu0 %v8284_v37  ;;  %6745 = vmatprep.subr.mxu1 %v8285_v30  ;;  %v8306_v37 = vld [vmem:[#allocation8 + $0x13e0] sm:$0xff]  ;;  %v8307_v30 = vld [vmem:[#allocation8 + $0x13f0] sm:$0xff] }
 0x590   : > { %6604 = vmatpush2.msra.mxu0 %v8286_v44  ;;  %6746 = vmatpush2.msra.mxu1 %v8287_v52  ;;  %v8308_v44 = vld [vmem:[#allocation8 + $0x13c8] sm:$0xff]  ;;  %v8309_v52 = vld [vmem:[#allocation8 + $0x13d8] sm:$0xff] }
 0x591   : > { %6606 = vmatmul.mubr.f32.vlgmr.msra.gmra.mxu0 %v9699_v17  ;;  %6748 = vmatmul.mubr.f32.vlgmr.msra.gmra.mxu1 %v9699_v17  ;;  %v6839_v17 = vrot.slane %v3487_v54, 2  ;;  %v8313_v54 = vld [vmem:[#allocation8 + $0x13b8] sm:$0xff] }
 0x592   : > { %6778 = vmatprep.subr.mxu0 %v8288_v5  ;;  %6940 = vmatprep.subr.mxu1 %v8289_v53  ;;  %v8311_v5 = vld [vmem:[#allocation8 + $0x13d0] sm:$0xff]  ;;  %v8312_v53 = vld [vmem:[#allocation8 + $0x13a8] sm:$0xff] }
 0x593   : > { %6779 = vmatpush1.msra.mxu0 %v8290_v63  ;;  %6941 = vmatpush1.msra.mxu1 %v8291_v11  ;;  %v9801_v41 = vsel %vm5383_vm3, %v6838_v12, %v6839_v17  ;;  %v8314_v63 = vld [vmem:[#allocation8 + $0x13a0] sm:$0xff]  ;;  %v8315_v11 = vld [vmem:[#allocation8 + $0x13b0] sm:$0xff]  ;;  %v8320_v12 = vld [vmem:[#allocation8 + $0x1368] sm:$0xff] }
 0x594   : > { %6780 = vmatprep.subr.mxu0 %v8292_v6  ;;  %6942 = vmatprep.subr.mxu1 %v8293_v7  ;;  %v8316_v6 = vld [vmem:[#allocation8 + $0x1388] sm:$0xff]  ;;  %v8317_v7 = vld [vmem:[#allocation8 + $0x1398] sm:$0xff] }
 0x595   : > { %6781 = vmatpush1.msra.mxu0 %v8294_v8  ;;  %6943 = vmatpush1.msra.mxu1 %v8295_v34  ;;  %v8318_v8 = vld [vmem:[#allocation8 + $0x1380] sm:$0xff]  ;;  %v8319_v34 = vld [vmem:[#allocation8 + $0x1390] sm:$0xff]  ;;  %v8321_v17 = vld [vmem:[#allocation8 + $0x1378] sm:$0xff] }
 0x596   : > { %6782 = vmatprep.subr.mxu0 %v8296_v15  ;;  %6944 = vmatprep.subr.mxu1 %v8297_v18  ;;  %v8323_v15 = vld [vmem:[#allocation8 + $0x1370] sm:$0xff]  ;;  %v8324_v18 = vld [vmem:[#allocation8 + $0x1348] sm:$0xff] }
 0x597   : > { %6783 = vmatpush1.msra.mxu0 %v8298_v59  ;;  %6945 = vmatpush1.msra.mxu1 %v8299_v31  ;;  %v8325_v59 = vld [vmem:[#allocation8 + $0x1358] sm:$0xff]  ;;  %v8326_v31 = vld [vmem:[#allocation8 + $0x1340] sm:$0xff] }
 0x598   : > { %6784 = vmatprep.subr.mxu0 %v8300_v32  ;;  %6946 = vmatprep.subr.mxu1 %v8301_v33  ;;  %v8327_v32 = vld [vmem:[#allocation8 + $0x1350] sm:$0xff]  ;;  %v8328_v33 = vld [vmem:[#allocation8 + $0x1328] sm:$0xff] }
 0x599   : > { %6785 = vmatpush1.msra.mxu0 %v8302_v19  ;;  %6818 = vmatprep.mubr.f32.mxu0 %v9608_v39  ;;  %v8331_v19 = vld [vmem:[#allocation8 + $0x1330] sm:$0xff] }
 0x59a   : > { %6947 = vmatpush1.msra.mxu1 %v8303_v26  ;;  %6980 = vmatprep.mubr.f32.mxu1 %v9608_v39  ;;  %v8332_v26 = vld [vmem:[#allocation8 + $0x1308] sm:$0xff] }
 0x59b   : > { %7593 = vmatmul.mubr.msk.f32.vlgmr.msra.gmra.mxu0 %vm395_vm0, %v9671_v28  ;;  %6845 = vmatprep.subr.mxu0 %v8304_v22  ;;  %v8310_v28 = vld [vmem:[#allocation8 + $0x13c0] sm:$0xff]  ;;  %v8333_v22 = vld [vmem:[#allocation8 + $0x1318] sm:$0xff] }
 0x59c   : > { %7594 = vmatmul.mubr.msk.f32.vlgmr.msra.gmra.mxu1 %vm395_vm0, %v9801_v41  ;;  %6987 = vmatprep.subr.mxu1 %v8305_v62  ;;  %v8334_v62 = vld [vmem:[#allocation8 + $0x1300] sm:$0xff] }
 0x59d   : > { %6846 = vmatpush1.msra.mxu0 %v8306_v37  ;;  %6909 = vmatprep.mubr.f32.mxu0 %v6837_v42  ;;  %v8336_v37 = vld [vmem:[#allocation8 + $0x12e8] sm:$0xff] }
 0x59e   : > { %6988 = vmatpush1.msra.mxu1 %v8307_v30  ;;  %7051 = vmatprep.mubr.f32.mxu1 %v6837_v42  ;;  %v8335_v42 = vld [vmem:[#allocation8 + $0x1310] sm:$0xff]  ;;  %v8337_v30 = vld [vmem:[#allocation8 + $0x12f8] sm:$0xff] }
 0x59f   : > { %6847 = vmatprep.subr.mxu0 %v8308_v44  ;;  %6989 = vmatprep.subr.mxu1 %v8309_v52  ;;  %v8338_v44 = vld [vmem:[#allocation8 + $0x12e0] sm:$0xff]  ;;  %v8339_v52 = vld [vmem:[#allocation8 + $0x12f0] sm:$0xff] }
 0x5a0   : > { %6848 = vmatpush1.msra.mxu0 %v8310_v28  ;;  %6990 = vmatpush1.msra.mxu1 %v8311_v5  ;;  %v8340_v28 = vld [vmem:[#allocation8 + $0x12c8] sm:$0xff]  ;;  %v8341_v5 = vld [vmem:[#allocation8 + $0x12d8] sm:$0xff] }
 0x5a1   : > { %6849 = vmatprep.subr.mxu0 %v8312_v53  ;;  %6991 = vmatprep.subr.mxu1 %v8313_v54  ;;  %v8342_v53 = vld [vmem:[#allocation8 + $0x12c0] sm:$0xff]  ;;  %v8343_v54 = vld [vmem:[#allocation8 + $0x12d0] sm:$0xff] }
 0x5a2   : > { %6850 = vmatpush1.msra.mxu0 %v8314_v63  ;;  %6992 = vmatpush1.msra.mxu1 %v8315_v11  ;;  %v9809_v63 = vpop.f32.mrf.mxu0  ;;  %v8344_v11 = vld [vmem:[#allocation8 + $0x12a8] sm:$0xff] }
 0x5a3   : > { %6851 = vmatprep.subr.mxu0 %v8316_v6  ;;  %6993 = vmatprep.subr.mxu1 %v8317_v7  ;;  %v8345_v6 = vld [vmem:[#allocation8 + $0x12b8] sm:$0xff]  ;;  %v8346_v7 = vld [vmem:[#allocation8 + $0x12a0] sm:$0xff] }
 0x5a4   : > { %6852 = vmatpush1.msra.mxu0 %v8318_v8  ;;  %6994 = vmatpush1.msra.mxu1 %v8319_v34  ;;  %v8347_v8 = vld [vmem:[#allocation8 + $0x12b0] sm:$0xff]  ;;  %v9811_v34 = vpop.f32.mrf.mxu0 }
 0x5a5   : > { %6853 = vmatprep.subr.mxu0 %v8320_v12  ;;  %6995 = vmatprep.subr.mxu1 %v8321_v17  ;;  %v8348_v12 = vld [vmem:[#allocation8 + $0x1288] sm:$0xff]  ;;  %v8349_v17 = vld [vmem:[#allocation8 + $0x1298] sm:$0xff] }
 0x5a6   : > { %6854 = vmatpush1.msra.mxu0 %v8322_v56  ;;  %6996 = vmatpush1.msra.mxu1 %v8323_v15  ;;  %v8350_v56 = vld [vmem:[#allocation8 + $0x1280] sm:$0xff]  ;;  %v8351_v15 = vld [vmem:[#allocation8 + $0x1290] sm:$0xff] }
 0x5a7   : > { %6855 = vmatprep.subr.mxu0 %v8324_v18  ;;  %6997 = vmatprep.subr.mxu1 %v8325_v59  ;;  %v8352_v18 = vld [vmem:[#allocation8 + $0x1268] sm:$0xff]  ;;  %v8353_v59 = vld [vmem:[#allocation8 + $0x1278] sm:$0xff] }
 0x5a8   : > { %6856 = vmatpush1.msra.mxu0 %v8326_v31  ;;  %6998 = vmatpush1.msra.mxu1 %v8327_v32  ;;  %v8354_v31 = vld [vmem:[#allocation8 + $0x1260] sm:$0xff]  ;;  %v8355_v32 = vld [vmem:[#allocation8 + $0x1270] sm:$0xff] }
 0x5a9   : > { %6857 = vmatprep.subr.mxu0 %v8328_v33  ;;  %6999 = vmatprep.subr.mxu1 %v8329_v35  ;;  %v9813_v33 = vpop.f32.mrf.mxu0  ;;  %v8356_v35 = vld [vmem:[#allocation8 + $0x1248] sm:$0xff] }
 0x5aa   : > { %6858 = vmatpush1.msra.mxu0 %v8330_v9  ;;  %7000 = vmatpush1.msra.mxu1 %v8331_v19  ;;  %v8357_v9 = vld [vmem:[#allocation8 + $0x1258] sm:$0xff]  ;;  %v8358_v19 = vld [vmem:[#allocation8 + $0x1240] sm:$0xff] }
 0x5ab   : > { %6859 = vmatprep.subr.mxu0 %v8332_v26  ;;  %7001 = vmatprep.subr.mxu1 %v8333_v22  ;;  %v8359_v26 = vld [vmem:[#allocation8 + $0x1250] sm:$0xff]  ;;  %v8360_v22 = vld [vmem:[#allocation8 + $0x1228] sm:$0xff] }
 0x5ac   : > { %6860 = vmatpush1.msra.mxu0 %v8334_v62  ;;  %7002 = vmatpush1.msra.mxu1 %v8335_v42  ;;  %v8361_v62 = vld [vmem:[#allocation8 + $0x1238] sm:$0xff] }
 0x5ad   : > { %6861 = vmatprep.subr.mxu0 %v8336_v37  ;;  %7003 = vmatprep.subr.mxu1 %v8337_v30  ;;  %v8362_v37 = vld [vmem:[#allocation8 + $0x1220] sm:$0xff]  ;;  %v8363_v30 = vld [vmem:[#allocation8 + $0x1230] sm:$0xff] }
 0x5ae   : > { %6862 = vmatpush1.msra.mxu0 %v8338_v44  ;;  %7004 = vmatpush1.msra.mxu1 %v8339_v52  ;;  %v8364_v52 = vld [vmem:[#allocation8 + $0x1208] sm:$0xff] }
 0x5af   : > { %6863 = vmatprep.subr.mxu0 %v8340_v28  ;;  %7005 = vmatprep.subr.mxu1 %v8341_v5  ;;  %v8365_v28 = vld [vmem:[#allocation8 + $0x1218] sm:$0xff]  ;;  %v8366_v5 = vld [vmem:[#allocation8 + $0x1200] sm:$0xff] }
 0x5b0   : > { %6864 = vmatpush1.msra.mxu0 %v8342_v53  ;;  %7006 = vmatpush1.msra.mxu1 %v8343_v54  ;;  %v8367_v53 = vld [vmem:[#allocation8 + $0x1210] sm:$0xff]  ;;  %v8368_v54 = vld [vmem:[#allocation8 + $0x15e8] sm:$0xff] }
 0x5b1   : > { %6865 = vmatprep.subr.mxu0 %v8344_v11  ;;  %7007 = vmatprep.subr.mxu1 %v8345_v6  ;;  %v8369_v11 = vld [vmem:[#allocation8 + $0x15f8] sm:$0xff]  ;;  %v8370_v6 = vld [vmem:[#allocation8 + $0x15e0] sm:$0xff] }
 0x5b2   : > { %6866 = vmatpush1.msra.mxu0 %v8346_v7  ;;  %7008 = vmatpush1.msra.mxu1 %v8347_v8  ;;  %v8371_v7 = vld [vmem:[#allocation8 + $0x15f0] sm:$0xff]  ;;  %v8372_v8 = vld [vmem:[#allocation8 + $0x15c8] sm:$0xff] }
 0x5b3   : > { %6867 = vmatprep.subr.mxu0 %v8348_v12  ;;  %7009 = vmatprep.subr.mxu1 %v8349_v17  ;;  %v8374_v12 = vld [vmem:[#allocation8 + $0x15c0] sm:$0xff]  ;;  %v8375_v17 = vld [vmem:[#allocation8 + $0x15d0] sm:$0xff] }
 0x5b4   : > { %6868 = vmatpush1.msra.mxu0 %v8350_v56  ;;  %7010 = vmatpush1.msra.mxu1 %v8351_v15  ;;  %v8376_v56 = vld [vmem:[#allocation8 + $0x15a8] sm:$0xff]  ;;  %v8377_v15 = vld [vmem:[#allocation8 + $0x15b8] sm:$0xff] }
 0x5b5   : > { %6869 = vmatprep.subr.mxu0 %v8352_v18  ;;  %7011 = vmatprep.subr.mxu1 %v8353_v59  ;;  %v8378_v18 = vld [vmem:[#allocation8 + $0x15a0] sm:$0xff]  ;;  %v8379_v59 = vld [vmem:[#allocation8 + $0x15b0] sm:$0xff] }
 0x5b6   : > { %6870 = vmatpush1.msra.mxu0 %v8354_v31  ;;  %7012 = vmatpush1.msra.mxu1 %v8355_v32  ;;  %v8380_v31 = vld [vmem:[#allocation8 + $0x1588] sm:$0xff]  ;;  %v8381_v32 = vld [vmem:[#allocation8 + $0x1598] sm:$0xff] }
 0x5b7   : > { %6871 = vmatprep.subr.mxu0 %v8356_v35  ;;  %7013 = vmatprep.subr.mxu1 %v8357_v9  ;;  %v8382_v35 = vld [vmem:[#allocation8 + $0x1580] sm:$0xff]  ;;  %v8383_v9 = vld [vmem:[#allocation8 + $0x1590] sm:$0xff] }
 0x5b8   : > { %6872 = vmatpush1.msra.mxu0 %v8358_v19  ;;  %7014 = vmatpush1.msra.mxu1 %v8359_v26  ;;  %v8384_v19 = vld [vmem:[#allocation8 + $0x1568] sm:$0xff]  ;;  %v8385_v26 = vld [vmem:[#allocation8 + $0x1578] sm:$0xff] }
 0x5b9   : > { %6873 = vmatprep.subr.mxu0 %v8360_v22  ;;  %7015 = vmatprep.subr.mxu1 %v8361_v62  ;;  %v6035_v42 = vpop.f32.mrf.mxu0  ;;  %v8386_v22 = vld [vmem:[#allocation8 + $0x1560] sm:$0xff]  ;;  %v8387_v62 = vld [vmem:[#allocation8 + $0x1570] sm:$0xff] }
 0x5ba   : > { %6874 = vmatpush1.msra.mxu0 %v8362_v37  ;;  %7016 = vmatpush1.msra.mxu1 %v8363_v30  ;;  %v9816_v44 = vadd.f32 %v6035_v42, %v9793_v27  ;;  %v8373_v27 = vld [vmem:[#allocation8 + $0x15d8] sm:$0xff]  ;;  %v8388_v42 = vld [vmem:[#allocation8 + $0x1548] sm:$0xff]  ;;  %v8390_v30 = vld [vmem:[#allocation8 + $0x1540] sm:$0xff] }
 0x5bb   : > { %6875 = vmatprep.subr.mxu0 %v8364_v52  ;;  %7017 = vmatprep.subr.mxu1 %v8365_v28  ;;  %v8389_v37 = vld [vmem:[#allocation8 + $0x1558] sm:$0xff]  ;;  %v8391_v52 = vld [vmem:[#allocation8 + $0x1550] sm:$0xff]  ;;  %v8392_v28 = vld [vmem:[#allocation8 + $0x1528] sm:$0xff] }
 0x5bc   : > { %6876 = vmatpush1.msra.mxu0 %v8366_v5  ;;  %7018 = vmatpush1.msra.mxu1 %v8367_v53  ;;  %v8393_v5 = vld [vmem:[#allocation8 + $0x1538] sm:$0xff]  ;;  %v8394_v53 = vld [vmem:[#allocation8 + $0x1520] sm:$0xff] }
 0x5bd   : > { %6877 = vmatprep.subr.mxu0 %v8368_v54  ;;  %7019 = vmatprep.subr.mxu1 %v8369_v11  ;;  %v8395_v54 = vld [vmem:[#allocation8 + $0x1530] sm:$0xff]  ;;  %v8396_v11 = vld [vmem:[#allocation8 + $0x1508] sm:$0xff] }
 0x5be   : > { %6878 = vmatpush2.msra.mxu0 %v8370_v6  ;;  %7020 = vmatpush2.msra.mxu1 %v8371_v7  ;;  %v8397_v6 = vld [vmem:[#allocation8 + $0x1518] sm:$0xff]  ;;  %v8398_v7 = vld [vmem:[#allocation8 + $0x1500] sm:$0xff] }
 0x5bf   : > { %6879 = vmatprep.subr.mxu0 %v8372_v8  ;;  %7021 = vmatprep.subr.mxu1 %v8373_v27  ;;  %v8399_v8 = vld [vmem:[#allocation8 + $0x1510] sm:$0xff]  ;;  %v8400_v27 = vld [vmem:[#allocation8 + $0x14e8] sm:$0xff] }
 0x5c0   : > { %6880 = vmatpush2.msra.mxu0 %v8374_v12  ;;  %7022 = vmatpush2.msra.mxu1 %v8375_v17  ;;  %v8401_v12 = vld [vmem:[#allocation8 + $0x14f8] sm:$0xff]  ;;  %v8402_v17 = vld [vmem:[#allocation8 + $0x14e0] sm:$0xff] }
 0x5c1   : > { %6881 = vmatprep.subr.mxu0 %v8376_v56  ;;  %7023 = vmatprep.subr.mxu1 %v8377_v15  ;;  %v8403_v56 = vld [vmem:[#allocation8 + $0x14f0] sm:$0xff]  ;;  %v8404_v15 = vld [vmem:[#allocation8 + $0x14c8] sm:$0xff] }
 0x5c2   : > { %6882 = vmatpush2.msra.mxu0 %v8378_v18  ;;  %7024 = vmatpush2.msra.mxu1 %v8379_v59  ;;  %v8405_v18 = vld [vmem:[#allocation8 + $0x14d8] sm:$0xff]  ;;  %v8406_v59 = vld [vmem:[#allocation8 + $0x14c0] sm:$0xff] }
 0x5c3   : > { %6883 = vmatprep.subr.mxu0 %v8380_v31  ;;  %7025 = vmatprep.subr.mxu1 %v8381_v32  ;;  %v8407_v31 = vld [vmem:[#allocation8 + $0x14d0] sm:$0xff]  ;;  %v8408_v32 = vld [vmem:[#allocation8 + $0x14a8] sm:$0xff] }
 0x5c4   : > { %6884 = vmatpush2.msra.mxu0 %v8382_v35  ;;  %7026 = vmatpush2.msra.mxu1 %v8383_v9  ;;  %v8409_v35 = vld [vmem:[#allocation8 + $0x14b8] sm:$0xff]  ;;  %v8410_v9 = vld [vmem:[#allocation8 + $0x14a0] sm:$0xff] }
 0x5c5   : > { %6885 = vmatprep.subr.mxu0 %v8384_v19  ;;  %7027 = vmatprep.subr.mxu1 %v8385_v26  ;;  %v8411_v19 = vld [vmem:[#allocation8 + $0x14b0] sm:$0xff]  ;;  %v8412_v26 = vld [vmem:[#allocation8 + $0x1488] sm:$0xff] }
 0x5c6   : > { %6886 = vmatpush2.msra.mxu0 %v8386_v22  ;;  %7028 = vmatpush2.msra.mxu1 %v8387_v62  ;;  %v8413_v22 = vld [vmem:[#allocation8 + $0x1498] sm:$0xff]  ;;  %v8414_v62 = vld [vmem:[#allocation8 + $0x1480] sm:$0xff] }
 0x5c7   : > { %6887 = vmatprep.subr.mxu0 %v8388_v42  ;;  %7029 = vmatprep.subr.mxu1 %v8389_v37  ;;  %v8415_v42 = vld [vmem:[#allocation8 + $0x1490] sm:$0xff]  ;;  %v8416_v37 = vld [vmem:[#allocation8 + $0x1468] sm:$0xff] }
 0x5c8   : > { %6888 = vmatpush2.msra.mxu0 %v8390_v30  ;;  %7030 = vmatpush2.msra.mxu1 %v8391_v52  ;;  %v8417_v30 = vld [vmem:[#allocation8 + $0x1478] sm:$0xff]  ;;  %v3485_v52 = vld [vmem:[#allocation2 + $0x48] sm:$0x1] }
 0x5c9   : > { %6889 = vmatprep.subr.mxu0 %v8392_v28  ;;  %7031 = vmatprep.subr.mxu1 %v8393_v5  ;;  %v8418_v28 = vld [vmem:[#allocation8 + $0x1460] sm:$0xff]  ;;  %v8419_v5 = vld [vmem:[#allocation8 + $0x1470] sm:$0xff] }
 0x5ca   : > { %6890 = vmatpush2.msra.mxu0 %v8394_v53  ;;  %7032 = vmatpush2.msra.mxu1 %v8395_v54  ;;  %v8420_v53 = vld [vmem:[#allocation8 + $0x1448] sm:$0xff]  ;;  %v8421_v54 = vld [vmem:[#allocation8 + $0x1458] sm:$0xff] }
 0x5cb   : > { %6891 = vmatprep.subr.mxu0 %v8396_v11  ;;  %7033 = vmatprep.subr.mxu1 %v8397_v6  ;;  %v8422_v11 = vld [vmem:[#allocation8 + $0x1440] sm:$0xff]  ;;  %v8423_v6 = vld [vmem:[#allocation8 + $0x1450] sm:$0xff] }
 0x5cc   : > { %6892 = vmatpush2.msra.mxu0 %v8398_v7  ;;  %7034 = vmatpush2.msra.mxu1 %v8399_v8  ;;  %v6832_v7 = vrot.slane %v9744_v29, 2  ;;  %v6833_v8 = vrot.slane %v3485_v52, 2  ;;  %v8432_v29 = vld [vmem:[#allocation8 + $0x1678] sm:$0xff] }
 0x5cd   : > { %6893 = vmatprep.subr.mxu0 %v8400_v27  ;;  %7035 = vmatprep.subr.mxu1 %v8401_v12  ;;  %v8424_v27 = vld [vmem:[#allocation8 + $0x1428] sm:$0xff]  ;;  %v8425_v12 = vld [vmem:[#allocation8 + $0x1438] sm:$0xff] }
 0x5ce   : > { %6894 = vmatpush2.msra.mxu0 %v8402_v17  ;;  %7036 = vmatpush2.msra.mxu1 %v8403_v56  ;;  %v8426_v17 = vld [vmem:[#allocation8 + $0x1420] sm:$0xff]  ;;  %v8427_v56 = vld [vmem:[#allocation8 + $0x1430] sm:$0xff] }
 0x5cf   : > { %6895 = vmatprep.subr.mxu0 %v8404_v15  ;;  %7037 = vmatprep.subr.mxu1 %v8405_v18  ;;  %v8428_v15 = vld [vmem:[#allocation8 + $0x1408] sm:$0xff]  ;;  %v8429_v18 = vld [vmem:[#allocation8 + $0x1418] sm:$0xff] }
 0x5d0   : > { %6896 = vmatpush2.msra.mxu0 %v8406_v59  ;;  %7038 = vmatpush2.msra.mxu1 %v8407_v31  ;;  %v8430_v59 = vld [vmem:[#allocation8 + $0x1400] sm:$0xff]  ;;  %v8431_v31 = vld [vmem:[#allocation8 + $0x1410] sm:$0xff] }
 0x5d1   : > { %6897 = vmatprep.subr.mxu0 %v8408_v32  ;;  %7039 = vmatprep.subr.mxu1 %v8409_v35  ;;  %v6834_v32 = vsel %vm5383_vm3, %v6832_v7, %v6833_v8  ;;  %v8433_v35 = vld [vmem:[#allocation8 + $0x1670] sm:$0xff] }
 0x5d2   : > { %6898 = vmatpush2.msra.mxu0 %v8410_v9  ;;  %7040 = vmatpush2.msra.mxu1 %v8411_v19  ;;  %v8434_v9 = vld [vmem:[#allocation8 + $0x1658] sm:$0xff]  ;;  %v8435_v19 = vld [vmem:[#allocation8 + $0x1650] sm:$0xff] }
 0x5d3   : > { %6899 = vmatprep.subr.mxu0 %v8412_v26  ;;  %7041 = vmatprep.subr.mxu1 %v8413_v22  ;;  %v8436_v26 = vld [vmem:[#allocation8 + $0x1638] sm:$0xff]  ;;  %v8437_v22 = vld [vmem:[#allocation8 + $0x1630] sm:$0xff] }
 0x5d4   : > { %6900 = vmatpush2.msra.mxu0 %v8414_v62  ;;  %7042 = vmatpush2.msra.mxu1 %v8415_v42  ;;  %v8438_v62 = vld [vmem:[#allocation8 + $0x1618] sm:$0xff]  ;;  %v8439_v42 = vld [vmem:[#allocation8 + $0x1610] sm:$0xff] }
 0x5d5   : > { %6901 = vmatprep.subr.mxu0 %v8416_v37  ;;  %7043 = vmatprep.subr.mxu1 %v8417_v30  ;;  %v5824_v37 = vpop.f32.mrf.mxu1 }
 0x5d6   : > { %6902 = vmatpush2.msra.mxu0 %v8418_v28  ;;  %7044 = vmatpush2.msra.mxu1 %v8419_v5  ;;  %v6037_v5 = vpop.f32.mrf.mxu0 }
 0x5d7   : > { %6903 = vmatprep.subr.mxu0 %v8420_v53  ;;  %7045 = vmatprep.subr.mxu1 %v8421_v54  ;;  %v5893_v30 = vpop.f32.mrf.mxu1 }
 0x5d8   : > { %6904 = vmatpush2.msra.mxu0 %v8422_v11  ;;  %7046 = vmatpush2.msra.mxu1 %v8423_v6  ;;  %v6248_v54 = vpop.f32.mrf.mxu0 }
 0x5d9   : > { %6905 = vmatprep.subr.mxu0 %v8424_v27  ;;  %7047 = vmatprep.subr.mxu1 %v8425_v12 }
 0x5da   : > { %6906 = vmatpush2.msra.mxu0 %v8426_v17  ;;  %7048 = vmatpush2.msra.mxu1 %v8427_v56  ;;  %v9823_v6 = vpop.f32.mrf.mxu0 }
 0x5db   : > { %6907 = vmatprep.subr.mxu0 %v8428_v15  ;;  %7049 = vmatprep.subr.mxu1 %v8429_v18 }
 0x5dc   : > { %6908 = vmatpush2.msra.mxu0 %v8430_v59  ;;  %7050 = vmatpush2.msra.mxu1 %v8431_v31 }
 0x5dd   : > { %6910 = vmatmul.mubr.f32.vlgmr.msra.gmra.mxu0 %v6834_v32  ;;  %7052 = vmatmul.mubr.f32.vlgmr.msra.gmra.mxu1 %v6834_v32 }
 0x5de   : > { %7082 = vmatprep.subr.mxu0 %v8432_v29  ;;  %7122 = vmatprep.mubr.f32.mxu0 %v9608_v39  ;;  %v5895_v39 = vpop.f32.mrf.mxu1 }
 0x5df   : > { %7083 = vmatpush1.msra.mxu0 %v8433_v35 }
 0x5e0   : > { %7084 = vmatprep.subr.mxu0 %v8434_v9  ;;  %v6106_v52 = vpop.f32.mrf.mxu1 }
 0x5e1   : > { %7085 = vmatpush1.msra.mxu0 %v8435_v19  ;;  %v6107_v27 = vadd.f32 %v6106_v52, %v9816_v44  ;;  %v4136_v44 = vadd.f32 %v9691_v55, %v9644_v47 }
 0x5e2   : > { %7086 = vmatprep.subr.mxu0 %v8436_v26  ;;  %v6108_v28 = vpop.f32.mrf.mxu1 }
 0x5e3   : > { %7087 = vmatpush1.msra.mxu0 %v8437_v22 }
 0x5e4   : > { %7088 = vmatprep.subr.mxu0 %v8438_v62  ;;  %v6177_v53 = vpop.f32.mrf.mxu1  ;;  %v5825_v62 = vadd.f32 %v5824_v37, %v9809_v63 }
 0x5e5   : > { %7089 = vmatpush1.msra.mxu0 %v8439_v42 }
 0x5e6   : > { %7595 = vmatmul.mubr.msk.f32.vlgmr.msra.gmra.mxu0 %vm395_vm0, %v9801_v41  ;;  %v6179_v11 = vpop.f32.mrf.mxu1  ;;  %v6038_v52 = vadd.f32 %v6037_v5, %v5825_v62  ;;  %v7137_v5 = vld [vmem:[#allocation9] sm:$0xf] }
 0x5e7   : > { %v7142_v62 = vrot.slane %v7137_v5, %v3367_v0  ;;  %v5229_v0 = vadd.f32 %v9766_v21, %v9764_v10 }
 0x5e8   : > { %v6390_v7 = vpop.f32.mrf.mxu1  ;;  %v6109_v37 = vadd.f32 %v6108_v28, %v6038_v52 }
 0x5ea   : > { %v6392_v56 = vpop.f32.mrf.mxu1 }
 0x605   : > { %v6319_v8 = vpop.f32.mrf.mxu0  ;;  %v6461_v41 = vpop.f32.mrf.mxu1 }
 0x606   : > { %v6391_v12 = vadd.f32 %v6390_v7, %v6319_v8  ;;  %v4645_v7 = vadd.f32 %v9729_v40, %v9731_v45  ;;  %v5537_v40 = vadd.f32 %v9781_v60, %v9783_v36  ;;  %v5227_v60 = vadd.f32 %v9762_v1, %v9760_v58 }
 0x607   : > { %v6321_v15 = vpop.f32.mrf.mxu0  ;;  %v6463_v59 = vpop.f32.mrf.mxu1  ;;  %v5967_v36 = vadd.f32 %v9813_v33, %v5895_v39  ;;  %v5677_v58 = vadd.f32 %v9787_v25, %v9785_v24 }
 0x608   : > { %v6537_v17 = vadd.f32 %v6391_v12, %v6107_v27  ;;  %v6393_v27 = vadd.f32 %v6392_v56, %v6321_v15  ;;  %v4207_v12 = vadd.f32 %v9687_v14, %v4136_v44 }
 0x60a   : > { %v4790_v47 = vadd.f32 %v4645_v7, %v4207_v12  ;;  %v6538_v45 = vadd.f32 %v6393_v27, %v6109_v37 }
 0x60f   : > { %v6532_v18 = vpop.f32.mrf.mxu0 }
 0x610   : > { %v6678_v32 = vpop.f32.mrf.mxu1  ;;  %v6533_v44 = vadd.f32 %v6532_v18, %v6461_v41 }
 0x611   : > { %v6534_v31 = vpop.f32.mrf.mxu0 }
 0x612   : > { %v6680_v19 = vpop.f32.mrf.mxu1  ;;  %v6535_v7 = vadd.f32 %v6534_v31, %v6463_v59  ;;  %v5679_v59 = vadd.f32 %v9791_v13, %v9789_v43  ;;  %v7154_v43 = vrot.slane %v7137_v5, %v3379_v46 }
 0x651   : > { %v6607_v29 = vpop.f32.mrf.mxu0  ;;  %v6749_v26 = vpop.f32.mrf.mxu1 }
 0x652   : > { %v6679_v35 = vadd.f32 %v6678_v32, %v6607_v29  ;;  %v5087_v32 = vadd.f32 %v9756_v51, %v9758_v38  ;;  %v5965_v51 = vadd.f32 %v9811_v34, %v5893_v30  ;;  %v7146_v34 = vrot.slane %v7137_v5, %v3371_v50 }
 0x653   : > { %v6609_v22 = vpop.f32.mrf.mxu0  ;;  %v6751_v8 = vpop.f32.mrf.mxu1  ;;  %v6180_v30 = vadd.f32 %v6179_v11, %v5967_v36  ;;  %v7189_v36 = vld [vmem:[#allocation11 + $0x38] sm:$0x7f] }
 0x654   : > { %v6825_v9 = vadd.f32 %v6679_v35, %v6537_v17  ;;  %v4785_v17 = vadd.f32 %v9735_v20, %v9733_v49  ;;  %v6681_v35 = vadd.f32 %v6680_v19, %v6609_v22  ;;  %v4787_v49 = vadd.f32 %v9739_v3, %v9737_v61 }
 0x655   : > { %v5232_v20 = vadd.f32 %v5087_v32, %v4790_v47 }
 0x656   : > { %v4791_v14 = vadd.f32 %v4785_v17, %v9694_v48  ;;  %v6826_v28 = vadd.f32 %v6681_v35, %v6538_v45  ;;  %v6178_v48 = vadd.f32 %v6177_v53, %v5965_v51  ;;  %v6251_v53 = vadd.f32 %v9823_v6, %v6180_v30  ;;  %v7191_v30 = vld [vmem:[#allocation11 + $0x48] sm:$0x7f] }
 0x657   : > { %v5682_v52 = vadd.f32 %v5537_v40, %v5232_v20  ;;  %v4792_v18 = vadd.f32 %v4787_v49, %v9696_v57  ;;  %v7150_v57 = vrot.slane %v7137_v5, %v3375_v4  ;;  %v7182_v49 = vld [vmem:[#allocation11] sm:$0x7f]  ;;  %v7185_v5 = vld [vmem:[#allocation11 + $0x18] sm:$0x7f] }
 0x658   : > { %v5233_v50 = vadd.f32 %v5227_v60, %v4791_v14  ;;  %v6540_v31 = vadd.f32 %v6535_v7, %v6251_v53  ;;  %v7184_v14 = vld [vmem:[#allocation11 + $0x10] sm:$0x7f] }
 0x659   : > { %v7188_v60 = vld [vmem:[#allocation11 + $0x30] sm:$0x7f] }
 0x65a   : > { %v5683_v24 = vadd.f32 %v5677_v58, %v5233_v50  ;;  %v7192_v53 = vld [vmem:[#allocation11 + $0x50] sm:$0x7f] }
 0x65b   : > { %v6820_v42 = vpop.f32.mrf.mxu0 }
 0x65c   : > { %v6982_v63 = vpop.f32.mrf.mxu1  ;;  %v6821_v27 = vadd.f32 %v6820_v42, %v6749_v26  ;;  %v5234_v26 = vadd.f32 %v5229_v0, %v4792_v18 }
 0x65d   : > { %v6822_v29 = vpop.f32.mrf.mxu0 }
 0x65e   : > { %v6984_v38 = vpop.f32.mrf.mxu1  ;;  %v6823_v41 = vadd.f32 %v6822_v29, %v6751_v8  ;;  %v5684_v8 = vadd.f32 %v5679_v59, %v5234_v26 }
 0x660   : > { %v6828_v17 = vadd.f32 %v6823_v41, %v6540_v31 }
 0x69d   : > { %v6911_v55 = vpop.f32.mrf.mxu0  ;;  %v7053_v1 = vpop.f32.mrf.mxu1 }
 0x69e   : > { %v6983_v56 = vadd.f32 %v6982_v63, %v6911_v55 }
 0x69f   : > { %v6913_v15 = vpop.f32.mrf.mxu0  ;;  %v7055_v25 = vpop.f32.mrf.mxu1 }
 0x6a0   : > { %v7129_v19 = vadd.f32 %v6983_v56, %v6825_v9  ;;  %v6985_v22 = vadd.f32 %v6984_v38, %v6913_v15  ;;  %v6249_v9 = vadd.f32 %v6248_v54, %v6178_v48  ;;  %v7183_v38 = vld [vmem:[#allocation11 + $0x8] sm:$0x7f]  ;;  %v7186_v15 = vld [vmem:[#allocation11 + $0x20] sm:$0x7f] }
 0x6a2   : > { %v7133_v61 = vmax.f32 %v9769_v2, %v7129_v19  ;;  %v7130_v3 = vadd.f32 %v6985_v22, %v6826_v28  ;;  %v6539_v2 = vadd.f32 %v6533_v44, %v6249_v9  ;;  %v7193_v9 = vld [vmem:[#allocation11 + $0x58] sm:$0x7f] }
 0x6a4   : > { %v7134_v33 = vmax.f32 %v5682_v52, %v7130_v3  ;;  %v7159_v39 = vadd.f32 %v7142_v62, %v7133_v61  ;;  %v6827_v10 = vadd.f32 %v6821_v27, %v6539_v2  ;;  %v7187_v62 = vld [vmem:[#allocation11 + $0x28] sm:$0x7f] }
 0x6a6   : > { %v7124_v11 = vpop.f32.mrf.mxu0  ;;  %v7160_v54 = vadd.f32 %v7146_v34, %v7134_v33  ;;  %v7163_v4 = vmax.f32 %v7159_v39, 0.0  ;;  %v7190_v39 = vld [vmem:[#allocation11 + $0x40] sm:$0x7f] }
 0x6a7   : > { %v7125_v21 = vadd.f32 %v7124_v11, %v7053_v1  ;;  %v7195_v11 = vld [vmem:[#allocation11 + $0x68] sm:$0x7f] }
 0x6a8   : > { %v7126_v42 = vpop.f32.mrf.mxu0  ;;  %v7164_v12 = vmax.f32 %v7160_v54, 0.0  ;;  %v7197_v54 = vld [vmem:[#allocation11 + $0x78] sm:$0x7f] }
 0x6a9   : > { %v7131_v6 = vadd.f32 %v7125_v21, %v6827_v10  ;;  %v7127_v32 = vadd.f32 %v7126_v42, %v7055_v25  ;;  %v7194_v25 = vld [vmem:[#allocation11 + $0x60] sm:$0x7f]  ;;  %v7196_v42 = vld [vmem:[#allocation11 + $0x70] sm:$0x7f] }
 0x6aa   : > { %7170 = vrot.lane.b32.xlu0 %v7164_v12, %s8685_s17 }
 0x6ab   : > { %v7135_v29 = vmax.f32 %v5683_v24, %v7131_v6  ;;  %v7132_v63 = vadd.f32 %v7127_v32, %v6828_v17 }
 0x6ad   : > { %v7136_v13 = vmax.f32 %v5684_v8, %v7132_v63  ;;  %v7161_v37 = vadd.f32 %v7150_v57, %v7135_v29  ;;  %v7199_v57 = vld [vmem:[#allocation11 + $0x88] sm:$0x7f]  ;;  %v7201_v8 = vld [vmem:[#allocation11 + $0x98] sm:$0x7f] }
 0x6af   : > { %v7165_v35 = vmax.f32 %v7161_v37, 0.0  ;;  %v7162_v47 = vadd.f32 %v7154_v43, %v7136_v13 }
 0x6b1   : > { %7172 = vrot.lane.b32.xlu1 %v7165_v35, %s8685_s17  ;;  %v7166_v55 = vmax.f32 %v7162_v47, 0.0  ;;  %v7198_v47 = vld [vmem:[#allocation11 + $0x80] sm:$0x7f] }
 0x6b3   : > { %7174 = vrot.lane.b32.xlu0 %v7166_v55, %s8685_s17  ;;  %v7200_v55 = vld [vmem:[#allocation11 + $0x90] sm:$0x7f] }
 0x71c   : > { %v7171_v40 = vpop.permute.xlu0 %7170 }
 0x723   : > { %v7173_v45 = vpop.permute.xlu1 %7172 }
 0x724   : > { %v7176_v56 = vsel %vm395_vm0, %v7171_v40, %v7173_v45 }
 0x725   : > { %v9866_v20 = vmax.f32 %v7163_v4, %v7176_v56  ;;  %v7175_v51 = vpop.permute.xlu0 %7174 }
 0x726   : > { %v7177_v46 = vsel %vm395_vm0, %v7173_v45, %v7175_v51  ;;  %vm7388_vm0 = vcmask 73728  }
 0x727   : > { %v7181_v28 = vmax.f32 %v7164_v12, %v7177_v46  ;;  %v7204_v19 = vmul.f32 %v7184_v14, %v9866_v20  ;;  %v7202_v22 = vmul.f32 %v7182_v49, %v9866_v20  ;;  %v7206_v52 = vmul.f32 %v7186_v15, %v9866_v20 }
 0x728   : > { %v7208_v3 = vmul.f32 %v7188_v60, %v9866_v20  ;;  %v7210_v10 = vmul.f32 %v7190_v39, %v9866_v20  ;;  %v7212_v21 = vmul.f32 %v7192_v53, %v9866_v20  ;;  %v7214_v43 = vmul.f32 %v7194_v25, %v9866_v20 }
 0x729   : > { %v7205_v48 = vmul.f32 %v7185_v5, %v7181_v28  ;;  %v7203_v44 = vmul.f32 %v7183_v38, %v7181_v28  ;;  %v7207_v61 = vmul.f32 %v7187_v62, %v7181_v28  ;;  %v7209_v34 = vmul.f32 %v7189_v36, %v7181_v28 }
 0x72a   : > { %v7229_v7 = vsel %vm7222_vm4, %v7204_v19, 0.0  ;;  %v7223_v0 = vsel %vm7222_vm4, %v7202_v22, 0.0  ;;  %v7211_v18 = vmul.f32 %v7191_v30, %v7181_v28  ;;  %v7213_v50 = vmul.f32 %v7193_v9, %v7181_v28 }
 0x72b   : > { %v7230_v27 = vsel %vm7224_vm5, %v7205_v48, 0.0  ;;  %v7225_v58 = vsel %vm7224_vm5, %v7203_v44, 0.0  ;;  %v7235_v2 = vsel %vm7224_vm5, %v7207_v61, 0.0  ;;  %v7240_v41 = vsel %vm7224_vm5, %v7209_v34, 0.0 }
 0x72c   : > { %v7231_v1 = vadd.f32 %v7230_v27, %v7229_v7  ;;  %v7226_v33 = vadd.f32 %v7225_v58, %v7223_v0  ;;  %v7234_v59 = vsel %vm7222_vm4, %v7206_v52, 0.0  ;;  %v7239_v31 = vsel %vm7222_vm4, %v7208_v3, 0.0 }
 0x72d   : > { %v7236_v26 = vadd.f32 %v7235_v2, %v7234_v59  ;;  %v7241_v24 = vadd.f32 %v7240_v41, %v7239_v31  ;;  %v7245_v12 = vsel %vm7224_vm5, %v7211_v18, 0.0  ;;  %v7250_v17 = vsel %vm7224_vm5, %v7213_v50, 0.0 }
 0x72e   : > { %7232 = vadd.xlane.f32.xlu0 %v7231_v1  ;;  %7227 = vadd.xlane.f32.xlu1 %v7226_v33  ;;  %v7215_v6 = vmul.f32 %v7195_v11, %v7181_v28  ;;  %v7217_v32 = vmul.f32 %v7197_v54, %v7181_v28  ;;  %v7244_v29 = vsel %vm7222_vm4, %v7210_v10, 0.0  ;;  %v7249_v63 = vsel %vm7222_vm4, %v7212_v21, 0.0 }
 0x72f   : > { %v7216_v13 = vmul.f32 %v7196_v42, %v9866_v20  ;;  %v7246_v37 = vadd.f32 %v7245_v12, %v7244_v29  ;;  %v7251_v35 = vadd.f32 %v7250_v17, %v7249_v63  ;;  %v7219_v4 = vmul.f32 %v7199_v57, %v7181_v28  ;;  %v7596_v12 = vld [vmem:[#allocation12] ss:$0 sm:$0xff] }
 0x730   : > { %v7255_v40 = vsel %vm7224_vm5, %v7215_v6, 0.0  ;;  %v7260_v45 = vsel %vm7224_vm5, %v7217_v32, 0.0  ;;  %v7221_v56 = vmul.f32 %v7201_v8, %v7181_v28  ;;  %v7254_v14 = vsel %vm7222_vm4, %v7214_v43, 0.0 }
 0x731   : > { %v7259_v49 = vsel %vm7222_vm4, %v7216_v13, 0.0  ;;  %v7218_v51 = vmul.f32 %v7198_v47, %v9866_v20  ;;  %v7220_v46 = vmul.f32 %v7200_v55, %v9866_v20  ;;  %v7256_v5 = vadd.f32 %v7255_v40, %v7254_v14 }
 0x732   : > { %7237 = vadd.xlane.f32.xlu0 %v7236_v26  ;;  %7242 = vadd.xlane.f32.xlu1 %v7241_v24  ;;  %v7261_v38 = vadd.f32 %v7260_v45, %v7259_v49  ;;  %v7265_v15 = vsel %vm7224_vm5, %v7219_v4, 0.0  ;;  %v7270_v19 = vsel %vm7224_vm5, %v7221_v56, 0.0  ;;  %v7285_v36 = vand.u32 127, %v3365_v16 }
 0x733   : > { %v7264_v28 = vsel %vm7222_vm4, %v7218_v51, 0.0  ;;  %v7269_v22 = vsel %vm7222_vm4, %v7220_v46, 0.0  ;;  %v8686_v42 = vmov 0  }
 0x734   : > { %v7266_v62 = vadd.f32 %v7265_v15, %v7264_v28  ;;  %v7271_v60 = vadd.f32 %v7270_v19, %v7269_v22  ;;  %v9901_v20 = vsub.s32 %v7285_v36, %v9531_v23  ;;  %7708 = vset.pattern.permute.xlu1 %v8686_v42  ;;  %7709 = vset.pattern.permute.xlu0 %v8686_v42  ;;  %v7380_v63 = vadd.s32 4294967288, %v7285_v36 }
 0x736   : > { %7247 = vadd.xlane.f32.xlu0 %v7246_v37  ;;  %7252 = vadd.xlane.f32.xlu1 %v7251_v35  ;;  %v7383_v43 = vsub.s32 %v7380_v63, %v9531_v23 }
 0x73a   : > { %7257 = vadd.xlane.f32.xlu0 %v7256_v5  ;;  %7262 = vadd.xlane.f32.xlu1 %v7261_v38 }
 0x73e   : > { %7267 = vadd.xlane.f32.xlu0 %v7266_v62  ;;  %7272 = vadd.xlane.f32.xlu1 %v7271_v60 }
 0x7b7   : > { %v7233_v48 = vpop.xlane.xlu0 %7232  ;;  %v7228_v44 = vpop.xlane.xlu1 %7227 }
 0x7b8   : > { %v7293_v52 = vrot.slane %v7233_v48, %v9901_v20  ;;  %v7289_v61 = vrot.slane %v7228_v44, %v9901_v20 }
 0x7ba   : > { %v7327_v9 = vsel %vm7326_vm6, %v7293_v52, %v7289_v61 }
 0x7bb   : > { %v7238_v3 = vpop.xlane.xlu0 %7237  ;;  %v7243_v34 = vpop.xlane.xlu1 %7242 }
 0x7bc   : > { %v7297_v30 = vrot.slane %v7238_v3, %v9901_v20  ;;  %v7301_v7 = vrot.slane %v7243_v34, %v9901_v20 }
 0x7be   : > { %v7329_v16 = vsel %vm7328_vm7, %v7297_v30, %v7327_v9 }
 0x7bf   : > { %v7248_v27 = vpop.xlane.xlu0 %7247  ;;  %v7253_v0 = vpop.xlane.xlu1 %7252  ;;  %v7331_v1 = vsel %vm7330_vm8, %v7301_v7, %v7329_v16 }
 0x7c0   : > { %v7305_v58 = vrot.slane %v7248_v27, %v9901_v20  ;;  %v7309_v33 = vrot.slane %v7253_v0, %v9901_v20 }
 0x7c2   : > { %v7333_v39 = vsel %vm7332_vm9, %v7305_v58, %v7331_v1 }
 0x7c3   : > { %v7258_v53 = vpop.xlane.xlu0 %7257  ;;  %v7263_v2 = vpop.xlane.xlu1 %7262  ;;  %v7335_v50 = vsel %vm7334_vm10, %v7309_v33, %v7333_v39 }
 0x7c4   : > { %v7313_v41 = vrot.slane %v7258_v53, %v9901_v20  ;;  %v7317_v18 = vrot.slane %v7263_v2, %v9901_v20 }
 0x7c6   : > { %v7337_v11 = vsel %vm7336_vm11, %v7313_v41, %v7335_v50 }
 0x7c7   : > { %v7268_v54 = vpop.xlane.xlu0 %7267  ;;  %v7273_v59 = vpop.xlane.xlu1 %7272  ;;  %v7339_v31 = vsel %vm7338_vm12, %v7317_v18, %v7337_v11 }
 0x7c8   : > { %v7321_v10 = vrot.slane %v7268_v54, %v9901_v20  ;;  %v7325_v21 = vrot.slane %v7273_v59, %v9901_v20  ;;  %v7344_v26 = vsel %vm7343_vm13, %v7339_v31, 0.0 }
 0x7c9   : > { %7345 = vadd.xlane.f32.xlu0 %v7344_v26 }
 0x7ca   : > { %v7340_v24 = vsel %vm7326_vm6, %v7325_v21, %v7321_v10 }
 0x7cb   : > { %v7348_v25 = vsel %vm7347_vm14, %v7340_v24, 0.0 }
 0x7cc   : > { %7349 = vadd.xlane.f32.xlu1 %v7348_v25 }
 0x7dd   : > { %7362 = vbcast.lane.b32.xlu1 %v7596_v12, 264 }
 0x7df   : > { %7358 = vbcast.lane.b32.xlu0 %v7596_v12, 256 }
 0x852   : > { %v7346_v17 = vpop.xlane.xlu0 %7345 }
 0x855   : > { %v7350_v6 = vpop.xlane.xlu1 %7349 }
 0x856   : > { %v7359_v32 = vpop.permute.xlu0 %7358 }
 0x857   : > { %v7366_v57 = vadd.f32 %v7359_v32, %v7346_v17 }
 0x859   : > { %7371 = vperm.xlu1 %7708, %v7366_v57   ;;  %v7363_v8 = vpop.permute.xlu1 %7362 }
 0x85a   : > { %v7367_v29 = vadd.f32 %v7363_v8, %v7350_v6 }
 0x85c   : > { %7374 = vperm.xlu0 %7709, %v7367_v29  }
 0x8d4   : > { %v7372_v13 = vpop.permute.xlu1 %7371 }
 0x8d5   : > { %v7379_v35 = vrot.slane %v7372_v13, %v9901_v20 }
 0x8d7   : > { %v7375_v37 = vpop.permute.xlu0 %7374 }
 0x8d8   : > { %v7384_v47 = vrot.slane %v7375_v37, %v7383_v43 }
 0x8da   : > { %v7386_v55 = vsel %vm7385_vm15, %v7384_v47, %v7379_v35 }
 0x8db   : > { %7389 = vst.msk [vmem:[%s352_s16] sm:$0x1] %vm7388_vm0, %v7386_v55 }
 0x8dc   : > { %8609 = shalt.err (!%p8606_p10)
}
 0x8dd   : > { %s8610_s9 = scalar_lea.hbm %s9922_s22, 16  ;;  %s8614_s8 = scalar_lea.hbm %s9964_s7, 32 }
 0x8de   : > { %p8611_p7 = scmp.ne.s32.totalorder %s9922_s22, %s8610_s9  ;;  %p8615_p11 = scmp.lt.s32.totalorder %s9922_s22, %s9964_s7 }
 0x8df   : > { %p8616_p0 = scmp.lt.s32.totalorder %s8614_s8, %s8610_s9 }
 0x8e0   : > { %p8612_p8 = pnand %p8611_p7, %p10167_p3 }
 0x8e1   : > { %p8617_p1 = por %p8616_p0, %p8615_p11 }
 0x8e2   : > { %p8613_p12 = pneg %p8612_p8 }
 0x8e4   : > { %p8618_p2 = pnand %p8617_p1, %p8613_p12 }
 0x8e6   : > { %8621 = shalt.err (!%p8618_p2)
}
 0x8e7   : > { %7625 = dma.vmem_to_hbm [thread:$0]  (%p10167_p3), %s7404_s19, 16, %s9922_s22, %s7391_s20  }
 0x8e8 PF: > { %p7662_p9 = scmp.ge.s32.totalorder %s8672_s27, 2  ;;  %s7415_s29 = sand.u32 1, %s8660_s24  }
 0x8e9   : > { %p10168_p4 = scmp.ne.s32.totalorder %s10046_s12, 0  ;;  %s7416_s15 = scalar_lea.sflag [#allocation5], %s7415_s29 }
 0x8eb   : > { %p7647_p5 = pnand %p7662_p9, %p10168_p4 }
 0x8ed   : > { %p7648_p6 = pneg %p7647_p5 }
 0x8ef   : > { %8655 = dma.done.wait (%p7648_p6), %s7416_s15, 16  }
 0x8f0   : > { %8657 = vsyncadd (%p7648_p6), %s7416_s15, 4294967280  ;;  %p21_p13 = scmp.ge.s32.totalorder %s8753_s30, 4   ;;  %s10169_s24 = smov %s8664_s25 }
 0x8f1   : > { %s10170_s25 = smov %s8668_s26  ;;  %s10171_s26 = smov %s8764_s10 }
 0x8f2   : > { %s10172_s27 = smov %s8753_s30  ;;  %23 = sbr.rel (!%p21_p13) target bundleno = 7 (0x7), region = 117 }
 0x8f7   :  { %7420 = vsyncpa [#allocation4], 1 }
 0x8f8   :  { %7422 = vsyncpa [#allocation4 + $0x1], 1 }
 0x8f9   :  { %7423 = vsyncpa [#allocation7], 1 }
 0x8fa   :  { %7424 = vsyncpa [#allocation10], 1 }
 0x8fb   :  { %7425 = vsyncpa [#allocation13], 1 }
 0x8fc   :  { %7426 = vsyncpa [#allocation5], 1 }
 0x8fd   :  { %7428 = vsyncpa [#allocation5 + $0x1], 1 }

</bundles_post_ra>
